<compile_context>
chip_gen: v7x
topology: tpu7x:2x2x1
jax: 0.10.0
libtpu: 0.0.40
codegen_flags: <defaults>
</compile_context>

<pallas_src>
import functools

import jax
import jax.numpy as jnp
from jax.experimental import pallas as pl
from jax.experimental.pallas import tpu as pltpu

INPUT_SIZE = 10
HIDDEN_SIZE = 20
OUTPUT_SIZE = 1

HPAD = 128            # per-gate lane padding (one full vreg lane tile)
SUBLANE = 8           # sublane tile (batch padded to a multiple of this)


def _lstm_kernel(T, x_ref, wih_ref, whh_ref, b_ref, wfc_ref, bfc_ref,
                 out_ref, xproj_ref):
    """Fused-gate, lane/sublane-padded LSTM forward + last-step Linear.

    x_ref     : (T*Bp, I)        time-major, batch padded to Bp rows per step
    wih_ref   : (I, 4*HPAD)      fused input weights, gate blocks [i|f|g|o],
                                 lanes H..HPAD-1 of each block are zero
    whh_ref   : (HPAD, 4*HPAD)   fused recurrent weights, rows H..HPAD-1 zero
    b_ref     : (1, 4*HPAD)      folded bias (b_ih + b_hh), zero padded
    wfc_ref   : (O, HPAD)        fc weight, lanes H..HPAD-1 zero
    bfc_ref   : (1, O)           fc bias
    out_ref   : (Bp, O)
    xproj_ref : VMEM scratch (T, Bp, 4*HPAD)
    """
    HP = HPAD
    Bp = x_ref.shape[0] // T

    # --- Prologue: hoisted input projection for ALL timesteps in ONE matmul,
    # folded bias added once (off the recurrence critical path).  Stored to a
    # VMEM scratch so per-step access is a plain aligned load.
    xproj = jnp.dot(x_ref[...], wih_ref[...],
                    preferred_element_type=jnp.float32,
                    precision=jax.lax.Precision.HIGHEST) + b_ref[...]
    xproj_ref[...] = xproj.reshape(T, Bp, 4 * HP)

    whh = whh_ref[...]                                   # hoisted load

    h = jnp.zeros((Bp, HP), jnp.float32)
    c = jnp.zeros((Bp, HP), jnp.float32)

    # --- Recurrence: statically unrolled (T is a trace-time constant), one
    # fused (Bp, HPAD) x (HPAD, 4*HPAD) matmul per step.
    for t in range(T):
        gates = xproj_ref[t] + jnp.dot(
            h, whh, preferred_element_type=jnp.float32,
            precision=jax.lax.Precision.HIGHEST)          # (Bp, 4*HPAD)

        # Two full-width EUP passes (instead of 4 per-gate calls); each gate
        # slice below is a whole 128-lane-aligned block -> no lane rotates.
        sig = jax.nn.sigmoid(gates)
        tnh = jnp.tanh(gates)
        i_g = sig[:, 0 * HP:1 * HP]
        f_g = sig[:, 1 * HP:2 * HP]
        g_g = tnh[:, 2 * HP:3 * HP]
        o_g = sig[:, 3 * HP:4 * HP]

        c = f_g * c + i_g * g_g
        h = o_g * jnp.tanh(c)

    # --- FC on the last hidden state. O == 1: VPU multiply + lane reduce
    # (avoids an MXU push that would use a single output lane).  Padded lanes
    # of h are exactly zero and wfc pad lanes are zero, so the sum is exact.
    wfc = wfc_ref[...]                                    # (O, HPAD)
    if wfc.shape[0] == 1:
        out = jnp.sum(h * wfc, axis=-1, keepdims=True)    # (Bp, 1)
    else:
        out = jax.lax.dot_general(h, wfc, (((1,), (1,)), ((), ())),
                                  preferred_element_type=jnp.float32)
    out_ref[...] = out + bfc_ref[...]


def pack_lstm_params(w_ih_pt, w_hh_pt, b_ih, b_hh, w_fc_pt, b_fc):
    """One-time weight packing (PyTorch layout -> fused, lane-padded layout).

    Call once outside the per-step path; the packed tuple is what the jitted
    forward consumes.  Gate order i|f|g|o is preserved; each gate block is
    padded from H to HPAD=128 lanes with zeros, W_hh rows padded to HPAD.
    """
    H = w_hh_pt.shape[1]
    I = w_ih_pt.shape[1]
    O = w_fc_pt.shape[0]
    assert w_ih_pt.shape == (4 * H, I) and w_hh_pt.shape == (4 * H, H)

    def pad_gate_cols(w_t):                                # (rows, 4H) -> (rows, 4*HPAD)
        rows = w_t.shape[0]
        out = jnp.zeros((rows, 4 * HPAD), jnp.float32)
        for g in range(4):
            out = out.at[:, g * HPAD:g * HPAD + H].set(w_t[:, g * H:(g + 1) * H])
        return out

    w_ih_t = jnp.transpose(w_ih_pt).astype(jnp.float32)   # (I, 4H)
    w_hh_t = jnp.transpose(w_hh_pt).astype(jnp.float32)   # (H, 4H)

    w_ih_p = pad_gate_cols(w_ih_t)                         # (I, 4*HPAD)
    w_hh_p = jnp.zeros((HPAD, 4 * HPAD), jnp.float32)
    w_hh_p = w_hh_p.at[:H, :].set(pad_gate_cols(w_hh_t))   # (HPAD, 4*HPAD)

    b = (b_ih + b_hh).astype(jnp.float32).reshape(1, 4 * H)
    b_p = pad_gate_cols(b)                                  # (1, 4*HPAD)

    w_fc_p = jnp.zeros((O, HPAD), jnp.float32)
    w_fc_p = w_fc_p.at[:, :H].set(w_fc_pt.astype(jnp.float32))  # (O, HPAD)
    b_fc_p = b_fc.astype(jnp.float32).reshape(1, O)             # (1, O)

    return (w_ih_p, w_hh_p, b_p, w_fc_p, b_fc_p)


@jax.jit
def lstm_model_forward(x, packed):
    """x: (batch, seq, input_size) -> (batch, output_size).

    `packed` is the tuple returned by pack_lstm_params (built once, outside
    the per-call path).
    """
    w_ih_p, w_hh_p, b_p, w_fc_p, b_fc_p = packed
    B, T, I = x.shape
    O = w_fc_p.shape[0]
    Bp = ((B + SUBLANE - 1) // SUBLANE) * SUBLANE           # batch -> sublane tile

    # Per-call x prep only: time-major + batch pad. Row t*Bp + b == x[b, t, :].
    x_tm = jnp.transpose(x, (1, 0, 2)).astype(jnp.float32)  # (T, B, I)
    x_pad = jnp.pad(x_tm, ((0, 0), (0, Bp - B), (0, 0)))    # (T, Bp, I)
    x_flat = x_pad.reshape(T * Bp, I)

    H4 = 4 * HPAD
    flops = (2 * (T * Bp) * I * H4          # hoisted input projection
             + T * 2 * Bp * HPAD * H4       # recurrent matmuls
             + T * 12 * Bp * HPAD           # gate elementwise
             + 2 * Bp * HPAD * O)           # fc
    transcendentals = T * (2 * Bp * H4 + Bp * HPAD)   # sigmoid+tanh(gates), tanh(c)
    bytes_accessed = 4 * (x_flat.size + w_ih_p.size + w_hh_p.size + b_p.size
                          + w_fc_p.size + b_fc_p.size + Bp * O)

    vmem_spec = pl.BlockSpec(memory_space=pltpu.MemorySpace.VMEM)
    out = pl.pallas_call(
        functools.partial(_lstm_kernel, T),
        out_shape=jax.ShapeDtypeStruct((Bp, O), jnp.float32),
        in_specs=[vmem_spec] * 6,
        out_specs=vmem_spec,
        scratch_shapes=[pltpu.VMEM((T, Bp, H4), jnp.float32)],
        cost_estimate=pl.CostEstimate(flops=flops,
                                      transcendentals=transcendentals,
                                      bytes_accessed=bytes_accessed),
    )(x_flat, w_ih_p, w_hh_p, b_p, w_fc_p, b_fc_p)
    return out[:B]


def _reference_forward(x, w_ih_pt, w_hh_pt, b_ih, b_hh, w_fc_pt, b_fc):
    """Pure-JAX reference with exact PyTorch LSTM semantics (for verification)."""
    B, T, I = x.shape
    H = w_hh_pt.shape[1]
    h = jnp.zeros((B, H), jnp.float32)
    c = jnp.zeros((B, H), jnp.float32)
    for t in range(T):
        x_t = x[:, t, :]
        z = x_t @ w_ih_pt.T + b_ih + h @ w_hh_pt.T + b_hh       # (B, 4H)
        i_g = jax.nn.sigmoid(z[:, 0:H])
        f_g = jax.nn.sigmoid(z[:, H:2 * H])
        g_g = jnp.tanh(z[:, 2 * H:3 * H])
        o_g = jax.nn.sigmoid(z[:, 3 * H:4 * H])
        c = f_g * c + i_g * g_g
        h = o_g * jnp.tanh(c)
    return h @ w_fc_pt.T + b_fc


if __name__ == "__main__":
    key = jax.random.PRNGKey(0)
    kx, k1, k2, k3, k4, k5, k6 = jax.random.split(key, 7)

    batch, seq = 2, 8
    bound = 1.0 / (HIDDEN_SIZE ** 0.5)

    # Deterministic synthetic params, PyTorch native layout (gate order i,f,g,o).
    w_ih_pt = jax.random.uniform(k1, (4 * HIDDEN_SIZE, INPUT_SIZE), jnp.float32, -bound, bound)
    w_hh_pt = jax.random.uniform(k2, (4 * HIDDEN_SIZE, HIDDEN_SIZE), jnp.float32, -bound, bound)
    b_ih = jax.random.uniform(k3, (4 * HIDDEN_SIZE,), jnp.float32, -bound, bound)
    b_hh = jax.random.uniform(k4, (4 * HIDDEN_SIZE,), jnp.float32, -bound, bound)
    w_fc_pt = jax.random.uniform(k5, (OUTPUT_SIZE, HIDDEN_SIZE), jnp.float32, -bound, bound)
    b_fc = jax.random.uniform(k6, (OUTPUT_SIZE,), jnp.float32, -bound, bound)

    x = jax.random.normal(kx, (batch, seq, INPUT_SIZE), jnp.float32)

    # One-time weight packing (hoisted out of the per-call path).
    packed = jax.tree_util.tree_map(jax.block_until_ready,
                                    pack_lstm_params(w_ih_pt, w_hh_pt, b_ih,
                                                     b_hh, w_fc_pt, b_fc))

    out = jax.block_until_ready(lstm_model_forward(x, packed))
    ref = jax.block_until_ready(
        _reference_forward(x, w_ih_pt, w_hh_pt, b_ih, b_hh, w_fc_pt, b_fc))

    assert out.shape == (batch, OUTPUT_SIZE), out.shape
    assert jnp.allclose(out, ref, atol=1e-5, rtol=1e-5), (out, ref)
    print("KERNEL_OK")
</pallas_src>

<mosaic_0001>
module attributes {stable_mosaic.version = 11 : i64} {
  func.func @_lstm_kernel(%arg0: memref<64x10xf32, #tpu.memory_space<vmem>>, %arg1: memref<10x512xf32, #tpu.memory_space<vmem>>, %arg2: memref<128x512xf32, #tpu.memory_space<vmem>>, %arg3: memref<1x512xf32, #tpu.memory_space<vmem>>, %arg4: memref<1x128xf32, #tpu.memory_space<vmem>>, %arg5: memref<1x1xf32, #tpu.memory_space<vmem>>, %arg6: memref<8x1xf32, #tpu.memory_space<vmem>>, %arg7: memref<8x8x512xf32, #tpu.memory_space<vmem>>) attributes {dimension_semantics = [], scalar_prefetch = 0 : i64, scratch_operands = 1 : i64, tpu.core_type = #tpu.core_type<tc>} {
    %c0 = arith.constant 0 : index
    %c0_0 = arith.constant 0 : index
    %0 = vector.load %arg0[%c0, %c0_0] : memref<64x10xf32, #tpu.memory_space<vmem>>, vector<64x10xf32>
    %c0_1 = arith.constant 0 : index
    %c0_2 = arith.constant 0 : index
    %1 = vector.load %arg1[%c0_1, %c0_2] : memref<10x512xf32, #tpu.memory_space<vmem>>, vector<10x512xf32>
    %cst = arith.constant dense<0.000000e+00> : vector<64x512xf32>
    %2 = tpu.matmul %0, %1, %cst {dimension_numbers = #tpu.dot_dimension_numbers<[1], [0], [0], [1], [0, 0, 1, 1], [], []>, precision = #tpu.contract_precision<fp32>} : vector<64x10xf32>, vector<10x512xf32>, vector<64x512xf32> -> vector<64x512xf32>
    %c0_3 = arith.constant 0 : index
    %c0_4 = arith.constant 0 : index
    %3 = vector.load %arg3[%c0_3, %c0_4] : memref<1x512xf32, #tpu.memory_space<vmem>>, vector<1x512xf32>
    %4 = vector.broadcast %3 : vector<1x512xf32> to vector<64x512xf32>
    %5 = arith.addf %2, %4 : vector<64x512xf32>
    %6 = vector.shape_cast %5 : vector<64x512xf32> to vector<8x8x512xf32>
    %c0_5 = arith.constant 0 : index
    %c0_6 = arith.constant 0 : index
    %c0_7 = arith.constant 0 : index
    %7 = vector.load %arg7[%c0_5, %c0_6, %c0_7] : memref<8x8x512xf32, #tpu.memory_space<vmem>>, vector<8x8x512xf32>
    tpu.vector_store %arg7[%c0_5, %c0_6, %c0_7], %6 {strides = array<i32>} : memref<8x8x512xf32, #tpu.memory_space<vmem>>, vector<8x8x512xf32>,
    %c0_8 = arith.constant 0 : index
    %c0_9 = arith.constant 0 : index
    %8 = vector.load %arg2[%c0_8, %c0_9] : memref<128x512xf32, #tpu.memory_space<vmem>>, vector<128x512xf32>
    %cst_10 = arith.constant 0.000000e+00 : f32
    %9 = vector.broadcast %cst_10 : f32 to vector<8x128xf32>
    %cst_11 = arith.constant 0.000000e+00 : f32
    %10 = vector.broadcast %cst_11 : f32 to vector<8x128xf32>
    %c0_12 = arith.constant 0 : index
    %c0_13 = arith.constant 0 : index
    %c0_14 = arith.constant 0 : index
    %11 = vector.load %arg7[%c0_12, %c0_13, %c0_14] : memref<8x8x512xf32, #tpu.memory_space<vmem>>, vector<1x8x512xf32>
    %12 = vector.shape_cast %11 : vector<1x8x512xf32> to vector<8x512xf32>
    %cst_15 = arith.constant dense<0.000000e+00> : vector<8x512xf32>
    %13 = tpu.matmul %9, %8, %cst_15 {dimension_numbers = #tpu.dot_dimension_numbers<[1], [0], [0], [1], [0, 0, 1, 1], [], []>, precision = #tpu.contract_precision<fp32>} : vector<8x128xf32>, vector<128x512xf32>, vector<8x512xf32> -> vector<8x512xf32>
    %14 = arith.addf %12, %13 : vector<8x512xf32>
    %15 = arith.negf %14 : vector<8x512xf32>
    %16 = math.exp %15 : vector<8x512xf32>
    %cst_16 = arith.constant 1.000000e+00 : f32
    %17 = vector.broadcast %cst_16 : f32 to vector<8x512xf32>
    %18 = arith.addf %17, %16 : vector<8x512xf32>
    %19 = arith.divf %17, %18 : vector<8x512xf32>
    %20 = math.tanh %14 : vector<8x512xf32>
    %21 = vector.extract_strided_slice %19 {offsets = [0, 0], sizes = [8, 128], strides = [1, 1]} : vector<8x512xf32> to vector<8x128xf32>
    %22 = vector.extract_strided_slice %19 {offsets = [0, 128], sizes = [8, 128], strides = [1, 1]} : vector<8x512xf32> to vector<8x128xf32>
    %23 = vector.extract_strided_slice %20 {offsets = [0, 256], sizes = [8, 128], strides = [1, 1]} : vector<8x512xf32> to vector<8x128xf32>
    %24 = vector.extract_strided_slice %19 {offsets = [0, 384], sizes = [8, 128], strides = [1, 1]} : vector<8x512xf32> to vector<8x128xf32>
    %25 = arith.mulf %22, %10 : vector<8x128xf32>
    %26 = arith.mulf %21, %23 : vector<8x128xf32>
    %27 = arith.addf %25, %26 : vector<8x128xf32>
    %28 = math.tanh %27 : vector<8x128xf32>
    %29 = arith.mulf %24, %28 : vector<8x128xf32>
    %c1 = arith.constant 1 : index
    %c0_17 = arith.constant 0 : index
    %c0_18 = arith.constant 0 : index
    %30 = vector.load %arg7[%c1, %c0_17, %c0_18] : memref<8x8x512xf32, #tpu.memory_space<vmem>>, vector<1x8x512xf32>
    %31 = vector.shape_cast %30 : vector<1x8x512xf32> to vector<8x512xf32>
    %cst_19 = arith.constant dense<0.000000e+00> : vector<8x512xf32>
    %32 = tpu.matmul %29, %8, %cst_19 {dimension_numbers = #tpu.dot_dimension_numbers<[1], [0], [0], [1], [0, 0, 1, 1], [], []>, precision = #tpu.contract_precision<fp32>} : vector<8x128xf32>, vector<128x512xf32>, vector<8x512xf32> -> vector<8x512xf32>
    %33 = arith.addf %31, %32 : vector<8x512xf32>
    %34 = arith.negf %33 : vector<8x512xf32>
    %35 = math.exp %34 : vector<8x512xf32>
    %cst_20 = arith.constant 1.000000e+00 : f32
    %36 = vector.broadcast %cst_20 : f32 to vector<8x512xf32>
    %37 = arith.addf %36, %35 : vector<8x512xf32>
    %38 = arith.divf %36, %37 : vector<8x512xf32>
    %39 = math.tanh %33 : vector<8x512xf32>
    %40 = vector.extract_strided_slice %38 {offsets = [0, 0], sizes = [8, 128], strides = [1, 1]} : vector<8x512xf32> to vector<8x128xf32>
    %41 = vector.extract_strided_slice %38 {offsets = [0, 128], sizes = [8, 128], strides = [1, 1]} : vector<8x512xf32> to vector<8x128xf32>
    %42 = vector.extract_strided_slice %39 {offsets = [0, 256], sizes = [8, 128], strides = [1, 1]} : vector<8x512xf32> to vector<8x128xf32>
    %43 = vector.extract_strided_slice %38 {offsets = [0, 384], sizes = [8, 128], strides = [1, 1]} : vector<8x512xf32> to vector<8x128xf32>
    %44 = arith.mulf %41, %27 : vector<8x128xf32>
    %45 = arith.mulf %40, %42 : vector<8x128xf32>
    %46 = arith.addf %44, %45 : vector<8x128xf32>
    %47 = math.tanh %46 : vector<8x128xf32>
    %48 = arith.mulf %43, %47 : vector<8x128xf32>
    %c2 = arith.constant 2 : index
    %c0_21 = arith.constant 0 : index
    %c0_22 = arith.constant 0 : index
    %49 = vector.load %arg7[%c2, %c0_21, %c0_22] : memref<8x8x512xf32, #tpu.memory_space<vmem>>, vector<1x8x512xf32>
    %50 = vector.shape_cast %49 : vector<1x8x512xf32> to vector<8x512xf32>
    %cst_23 = arith.constant dense<0.000000e+00> : vector<8x512xf32>
    %51 = tpu.matmul %48, %8, %cst_23 {dimension_numbers = #tpu.dot_dimension_numbers<[1], [0], [0], [1], [0, 0, 1, 1], [], []>, precision = #tpu.contract_precision<fp32>} : vector<8x128xf32>, vector<128x512xf32>, vector<8x512xf32> -> vector<8x512xf32>
    %52 = arith.addf %50, %51 : vector<8x512xf32>
    %53 = arith.negf %52 : vector<8x512xf32>
    %54 = math.exp %53 : vector<8x512xf32>
    %cst_24 = arith.constant 1.000000e+00 : f32
    %55 = vector.broadcast %cst_24 : f32 to vector<8x512xf32>
    %56 = arith.addf %55, %54 : vector<8x512xf32>
    %57 = arith.divf %55, %56 : vector<8x512xf32>
    %58 = math.tanh %52 : vector<8x512xf32>
    %59 = vector.extract_strided_slice %57 {offsets = [0, 0], sizes = [8, 128], strides = [1, 1]} : vector<8x512xf32> to vector<8x128xf32>
    %60 = vector.extract_strided_slice %57 {offsets = [0, 128], sizes = [8, 128], strides = [1, 1]} : vector<8x512xf32> to vector<8x128xf32>
    %61 = vector.extract_strided_slice %58 {offsets = [0, 256], sizes = [8, 128], strides = [1, 1]} : vector<8x512xf32> to vector<8x128xf32>
    %62 = vector.extract_strided_slice %57 {offsets = [0, 384], sizes = [8, 128], strides = [1, 1]} : vector<8x512xf32> to vector<8x128xf32>
    %63 = arith.mulf %60, %46 : vector<8x128xf32>
    %64 = arith.mulf %59, %61 : vector<8x128xf32>
    %65 = arith.addf %63, %64 : vector<8x128xf32>
    %66 = math.tanh %65 : vector<8x128xf32>
    %67 = arith.mulf %62, %66 : vector<8x128xf32>
    %c3 = arith.constant 3 : index
    %c0_25 = arith.constant 0 : index
    %c0_26 = arith.constant 0 : index
    %68 = vector.load %arg7[%c3, %c0_25, %c0_26] : memref<8x8x512xf32, #tpu.memory_space<vmem>>, vector<1x8x512xf32>
    %69 = vector.shape_cast %68 : vector<1x8x512xf32> to vector<8x512xf32>
    %cst_27 = arith.constant dense<0.000000e+00> : vector<8x512xf32>
    %70 = tpu.matmul %67, %8, %cst_27 {dimension_numbers = #tpu.dot_dimension_numbers<[1], [0], [0], [1], [0, 0, 1, 1], [], []>, precision = #tpu.contract_precision<fp32>} : vector<8x128xf32>, vector<128x512xf32>, vector<8x512xf32> -> vector<8x512xf32>
    %71 = arith.addf %69, %70 : vector<8x512xf32>
    %72 = arith.negf %71 : vector<8x512xf32>
    %73 = math.exp %72 : vector<8x512xf32>
    %cst_28 = arith.constant 1.000000e+00 : f32
    %74 = vector.broadcast %cst_28 : f32 to vector<8x512xf32>
    %75 = arith.addf %74, %73 : vector<8x512xf32>
    %76 = arith.divf %74, %75 : vector<8x512xf32>
    %77 = math.tanh %71 : vector<8x512xf32>
    %78 = vector.extract_strided_slice %76 {offsets = [0, 0], sizes = [8, 128], strides = [1, 1]} : vector<8x512xf32> to vector<8x128xf32>
    %79 = vector.extract_strided_slice %76 {offsets = [0, 128], sizes = [8, 128], strides = [1, 1]} : vector<8x512xf32> to vector<8x128xf32>
    %80 = vector.extract_strided_slice %77 {offsets = [0, 256], sizes = [8, 128], strides = [1, 1]} : vector<8x512xf32> to vector<8x128xf32>
    %81 = vector.extract_strided_slice %76 {offsets = [0, 384], sizes = [8, 128], strides = [1, 1]} : vector<8x512xf32> to vector<8x128xf32>
    %82 = arith.mulf %79, %65 : vector<8x128xf32>
    %83 = arith.mulf %78, %80 : vector<8x128xf32>
    %84 = arith.addf %82, %83 : vector<8x128xf32>
    %85 = math.tanh %84 : vector<8x128xf32>
    %86 = arith.mulf %81, %85 : vector<8x128xf32>
    %c4 = arith.constant 4 : index
    %c0_29 = arith.constant 0 : index
    %c0_30 = arith.constant 0 : index
    %87 = vector.load %arg7[%c4, %c0_29, %c0_30] : memref<8x8x512xf32, #tpu.memory_space<vmem>>, vector<1x8x512xf32>
    %88 = vector.shape_cast %87 : vector<1x8x512xf32> to vector<8x512xf32>
    %cst_31 = arith.constant dense<0.000000e+00> : vector<8x512xf32>
    %89 = tpu.matmul %86, %8, %cst_31 {dimension_numbers = #tpu.dot_dimension_numbers<[1], [0], [0], [1], [0, 0, 1, 1], [], []>, precision = #tpu.contract_precision<fp32>} : vector<8x128xf32>, vector<128x512xf32>, vector<8x512xf32> -> vector<8x512xf32>
    %90 = arith.addf %88, %89 : vector<8x512xf32>
    %91 = arith.negf %90 : vector<8x512xf32>
    %92 = math.exp %91 : vector<8x512xf32>
    %cst_32 = arith.constant 1.000000e+00 : f32
    %93 = vector.broadcast %cst_32 : f32 to vector<8x512xf32>
    %94 = arith.addf %93, %92 : vector<8x512xf32>
    %95 = arith.divf %93, %94 : vector<8x512xf32>
    %96 = math.tanh %90 : vector<8x512xf32>
    %97 = vector.extract_strided_slice %95 {offsets = [0, 0], sizes = [8, 128], strides = [1, 1]} : vector<8x512xf32> to vector<8x128xf32>
    %98 = vector.extract_strided_slice %95 {offsets = [0, 128], sizes = [8, 128], strides = [1, 1]} : vector<8x512xf32> to vector<8x128xf32>
    %99 = vector.extract_strided_slice %96 {offsets = [0, 256], sizes = [8, 128], strides = [1, 1]} : vector<8x512xf32> to vector<8x128xf32>
    %100 = vector.extract_strided_slice %95 {offsets = [0, 384], sizes = [8, 128], strides = [1, 1]} : vector<8x512xf32> to vector<8x128xf32>
    %101 = arith.mulf %98, %84 : vector<8x128xf32>
    %102 = arith.mulf %97, %99 : vector<8x128xf32>
    %103 = arith.addf %101, %102 : vector<8x128xf32>
    %104 = math.tanh %103 : vector<8x128xf32>
    %105 = arith.mulf %100, %104 : vector<8x128xf32>
    %c5 = arith.constant 5 : index
    %c0_33 = arith.constant 0 : index
    %c0_34 = arith.constant 0 : index
    %106 = vector.load %arg7[%c5, %c0_33, %c0_34] : memref<8x8x512xf32, #tpu.memory_space<vmem>>, vector<1x8x512xf32>
    %107 = vector.shape_cast %106 : vector<1x8x512xf32> to vector<8x512xf32>
    %cst_35 = arith.constant dense<0.000000e+00> : vector<8x512xf32>
    %108 = tpu.matmul %105, %8, %cst_35 {dimension_numbers = #tpu.dot_dimension_numbers<[1], [0], [0], [1], [0, 0, 1, 1], [], []>, precision = #tpu.contract_precision<fp32>} : vector<8x128xf32>, vector<128x512xf32>, vector<8x512xf32> -> vector<8x512xf32>
    %109 = arith.addf %107, %108 : vector<8x512xf32>
    %110 = arith.negf %109 : vector<8x512xf32>
    %111 = math.exp %110 : vector<8x512xf32>
    %cst_36 = arith.constant 1.000000e+00 : f32
    %112 = vector.broadcast %cst_36 : f32 to vector<8x512xf32>
    %113 = arith.addf %112, %111 : vector<8x512xf32>
    %114 = arith.divf %112, %113 : vector<8x512xf32>
    %115 = math.tanh %109 : vector<8x512xf32>
    %116 = vector.extract_strided_slice %114 {offsets = [0, 0], sizes = [8, 128], strides = [1, 1]} : vector<8x512xf32> to vector<8x128xf32>
    %117 = vector.extract_strided_slice %114 {offsets = [0, 128], sizes = [8, 128], strides = [1, 1]} : vector<8x512xf32> to vector<8x128xf32>
    %118 = vector.extract_strided_slice %115 {offsets = [0, 256], sizes = [8, 128], strides = [1, 1]} : vector<8x512xf32> to vector<8x128xf32>
    %119 = vector.extract_strided_slice %114 {offsets = [0, 384], sizes = [8, 128], strides = [1, 1]} : vector<8x512xf32> to vector<8x128xf32>
    %120 = arith.mulf %117, %103 : vector<8x128xf32>
    %121 = arith.mulf %116, %118 : vector<8x128xf32>
    %122 = arith.addf %120, %121 : vector<8x128xf32>
    %123 = math.tanh %122 : vector<8x128xf32>
    %124 = arith.mulf %119, %123 : vector<8x128xf32>
    %c6 = arith.constant 6 : index
    %c0_37 = arith.constant 0 : index
    %c0_38 = arith.constant 0 : index
    %125 = vector.load %arg7[%c6, %c0_37, %c0_38] : memref<8x8x512xf32, #tpu.memory_space<vmem>>, vector<1x8x512xf32>
    %126 = vector.shape_cast %125 : vector<1x8x512xf32> to vector<8x512xf32>
    %cst_39 = arith.constant dense<0.000000e+00> : vector<8x512xf32>
    %127 = tpu.matmul %124, %8, %cst_39 {dimension_numbers = #tpu.dot_dimension_numbers<[1], [0], [0], [1], [0, 0, 1, 1], [], []>, precision = #tpu.contract_precision<fp32>} : vector<8x128xf32>, vector<128x512xf32>, vector<8x512xf32> -> vector<8x512xf32>
    %128 = arith.addf %126, %127 : vector<8x512xf32>
    %129 = arith.negf %128 : vector<8x512xf32>
    %130 = math.exp %129 : vector<8x512xf32>
    %cst_40 = arith.constant 1.000000e+00 : f32
    %131 = vector.broadcast %cst_40 : f32 to vector<8x512xf32>
    %132 = arith.addf %131, %130 : vector<8x512xf32>
    %133 = arith.divf %131, %132 : vector<8x512xf32>
    %134 = math.tanh %128 : vector<8x512xf32>
    %135 = vector.extract_strided_slice %133 {offsets = [0, 0], sizes = [8, 128], strides = [1, 1]} : vector<8x512xf32> to vector<8x128xf32>
    %136 = vector.extract_strided_slice %133 {offsets = [0, 128], sizes = [8, 128], strides = [1, 1]} : vector<8x512xf32> to vector<8x128xf32>
    %137 = vector.extract_strided_slice %134 {offsets = [0, 256], sizes = [8, 128], strides = [1, 1]} : vector<8x512xf32> to vector<8x128xf32>
    %138 = vector.extract_strided_slice %133 {offsets = [0, 384], sizes = [8, 128], strides = [1, 1]} : vector<8x512xf32> to vector<8x128xf32>
    %139 = arith.mulf %136, %122 : vector<8x128xf32>
    %140 = arith.mulf %135, %137 : vector<8x128xf32>
    %141 = arith.addf %139, %140 : vector<8x128xf32>
    %142 = math.tanh %141 : vector<8x128xf32>
    %143 = arith.mulf %138, %142 : vector<8x128xf32>
    %c7 = arith.constant 7 : index
    %c0_41 = arith.constant 0 : index
    %c0_42 = arith.constant 0 : index
    %144 = vector.load %arg7[%c7, %c0_41, %c0_42] : memref<8x8x512xf32, #tpu.memory_space<vmem>>, vector<1x8x512xf32>
    %145 = vector.shape_cast %144 : vector<1x8x512xf32> to vector<8x512xf32>
    %cst_43 = arith.constant dense<0.000000e+00> : vector<8x512xf32>
    %146 = tpu.matmul %143, %8, %cst_43 {dimension_numbers = #tpu.dot_dimension_numbers<[1], [0], [0], [1], [0, 0, 1, 1], [], []>, precision = #tpu.contract_precision<fp32>} : vector<8x128xf32>, vector<128x512xf32>, vector<8x512xf32> -> vector<8x512xf32>
    %147 = arith.addf %145, %146 : vector<8x512xf32>
    %148 = arith.negf %147 : vector<8x512xf32>
    %149 = math.exp %148 : vector<8x512xf32>
    %cst_44 = arith.constant 1.000000e+00 : f32
    %150 = vector.broadcast %cst_44 : f32 to vector<8x512xf32>
    %151 = arith.addf %150, %149 : vector<8x512xf32>
    %152 = arith.divf %150, %151 : vector<8x512xf32>
    %153 = math.tanh %147 : vector<8x512xf32>
    %154 = vector.extract_strided_slice %152 {offsets = [0, 0], sizes = [8, 128], strides = [1, 1]} : vector<8x512xf32> to vector<8x128xf32>
    %155 = vector.extract_strided_slice %152 {offsets = [0, 128], sizes = [8, 128], strides = [1, 1]} : vector<8x512xf32> to vector<8x128xf32>
    %156 = vector.extract_strided_slice %153 {offsets = [0, 256], sizes = [8, 128], strides = [1, 1]} : vector<8x512xf32> to vector<8x128xf32>
    %157 = vector.extract_strided_slice %152 {offsets = [0, 384], sizes = [8, 128], strides = [1, 1]} : vector<8x512xf32> to vector<8x128xf32>
    %158 = arith.mulf %155, %141 : vector<8x128xf32>
    %159 = arith.mulf %154, %156 : vector<8x128xf32>
    %160 = arith.addf %158, %159 : vector<8x128xf32>
    %161 = math.tanh %160 : vector<8x128xf32>
    %162 = arith.mulf %157, %161 : vector<8x128xf32>
    %c0_45 = arith.constant 0 : index
    %c0_46 = arith.constant 0 : index
    %163 = vector.load %arg4[%c0_45, %c0_46] : memref<1x128xf32, #tpu.memory_space<vmem>>, vector<1x128xf32>
    %164 = vector.broadcast %163 : vector<1x128xf32> to vector<8x128xf32>
    %165 = arith.mulf %162, %164 : vector<8x128xf32>
    %cst_47 = arith.constant dense<0.000000e+00> : vector<8xf32>
    %166 = vector.multi_reduction <add>, %165, %cst_47 [1] : vector<8x128xf32> to vector<8xf32>
    %167 = vector.shape_cast %166 : vector<8xf32> to vector<8x1xf32>
    %c0_48 = arith.constant 0 : index
    %c0_49 = arith.constant 0 : index
    %168 = vector.load %arg5[%c0_48, %c0_49] : memref<1x1xf32, #tpu.memory_space<vmem>>, vector<1x1xf32>
    %169 = vector.broadcast %168 : vector<1x1xf32> to vector<8x1xf32>
    %170 = arith.addf %167, %169 : vector<8x1xf32>
    %c0_50 = arith.constant 0 : index
    %c0_51 = arith.constant 0 : index
    %171 = vector.load %arg6[%c0_50, %c0_51] : memref<8x1xf32, #tpu.memory_space<vmem>>, vector<8x1xf32>
    tpu.vector_store %arg6[%c0_50, %c0_51], %170 {strides = array<i32>} : memref<8x1xf32, #tpu.memory_space<vmem>>, vector<8x1xf32>,
    return
  }
}

</mosaic_0001>

<bundles_post_ra>
// kernel: lstm_model_forward.1
= control target key start
LH: loop header
LB: loop body
LE: loop exit
PB: predicated region body
PF: predicated region fallthrough
CT: control target
= control target key end

     0   :  { %s23194_s0 = inlined_call_operand.vmem [shape: f32[64,10], index: 0, kind: input, shape index: {}]   ;;  %s23195_s1 = inlined_call_operand.vmem [shape: f32[10,512], index: 1, kind: input, shape index: {}]   ;;  %s23196_s2 = inlined_call_operand.hbm [shape: f32[128,512], index: 2, kind: input, shape index: {}]   ;;  %s23197_s3 = inlined_call_operand.vmem [shape: f32[1,512], index: 3, kind: input, shape index: {}]   ;;  %s23198_s4 = inlined_call_operand.vmem [shape: f32[1,128], index: 4, kind: input, shape index: {}]   ;;  %s23199_s5 = inlined_call_operand.<no memory space> [shape: f32[1,1], index: 5, kind: input, shape index: {}]   ;;  %s23200_s6 = inlined_call_operand.vmem [shape: f32[8,1], index: 6, kind: output, shape index: {}]  }
   0x1   :  { %v11_v0 = vstv %s23199_s5 }
   0x2   :  { %12 = vst [vmem:[#allocation3] sm:$0x1] %v11_v0 }
   0x3   :  { %13 = vsyncpa [#allocation5], 0  ;;  %s19507_s23 = smov [#allocation4]   ;;  %s19483_s27 = scalar_lea.hbm %s23196_s2, 8192 }
   0x4   :  { %s23_s24 = sshll.u32 %s19507_s23, 4  ;;  %p19484_p0 = scmp.ne.s32.totalorder %s23196_s2, %s19483_s27  ;;  %s24_s24 = int_to_ptr.vmem [resolvable:$true] %s23_s24 }
   0x5   :  { %p19487_p1 = scmp.lt.u32.totalorder %s19483_s27, %s23196_s2 }
   0x7   :  { %p19489_p2 = pnand %p19487_p1, %p19484_p0 }
   0x9   :  { %19492 = shalt.err (!%p19489_p2)
}
   0xa   :  { %s19493_s5 = scalar_lea.vmem %s24_s24, 8192  ;;  %p19498_p4 = scmp.lt.s32.totalorder %s24_s24, %s24_s24 }
   0xb   :  { %p19494_p3 = scmp.ne.s32.totalorder %s24_s24, %s19493_s5  ;;  %p19499_p5 = scmp.lt.s32.totalorder %s19493_s5, %s19493_s5 }
   0xd   :  { %p19500_p6 = por %p19499_p5, %p19498_p4 }
   0xf   :  { %p19501_p7 = pnand %p19500_p6, %p19494_p3 }
  0x11   :  { %19504 = shalt.err (!%p19501_p7)
}
  0x12   :  { %s19508_s8 = smov 512   ;;  %s19509_s9 = smov 32  }
  0x13   :  { %29 = dma.hbm_to_vmem [thread:$0]  %s23196_s2, 8192, %s24_s24, [#allocation5], %s19508_s8, %s19508_s8, %s19509_s9  }
  0x14   :  { %19505 = dma.done.wait [#allocation5], 8192  }
  0x15   :  { %19506 = vsyncadd [#allocation5], 4294959104  ;;  %v23207_v1 = vmov 0.0   ;;  %vm102_vm0 = vcmask 1041408   ;;  %v48_v2 = vld [vmem:[%s23195_s1 + $0x8] sm:$0xff]  ;;  %v50_v4 = vld [vmem:[%s23195_s1 + $0x18] sm:$0xff] }
  0x16   :  { %183 = vmatprep.mubr.f32.mxu0 %v23207_v1  ;;  %1017 = vmatprep.mubr.f32.mxu1 %v23207_v1  ;;  %v52_v3 = vld [vmem:[%s23195_s1 + $0x28] sm:$0x3]  ;;  %vm77_vm1 = vcmask 80896   ;;  %v115_v6 = vand.u32 4294901760, %v48_v2  ;;  %v54_v7 = vld [vmem:[%s23195_s1 + $0x38] sm:$0x3] }
  0x17   :  { %v107_v5 = vsel %vm102_vm0, %v52_v3, 0  ;;  %v949_v8 = vand.u32 4294901760, %v50_v4  ;;  %v47_v9 = vld [vmem:[%s23195_s1] sm:$0xff]  ;;  %v113_v11 = vsel %vm102_vm0, %v54_v7, 0  ;;  %v49_v14 = vld [vmem:[%s23195_s1 + $0x10] sm:$0xff]  ;;  %v40_v33 = vld [vmem:[%s23194_s0 + $0x8] sm:$0xff] }
  0x18   :  { %v119_v10 = vand.u32 4294901760, %v107_v5  ;;  %v51_v12 = vld [vmem:[%s23195_s1 + $0x20] sm:$0x3]  ;;  %v117_v13 = vand.u32 4294901760, %v47_v9  ;;  %v19586_v15 = vsub.f32 %v48_v2, %v115_v6  ;;  %v953_v16 = vand.u32 4294901760, %v113_v11  ;;  %v41_v38 = vld [vmem:[%s23194_s0 + $0x10] sm:$0xff] }
  0x19   :  { %v19588_v17 = vsub.f32 %v50_v4, %v949_v8  ;;  %v104_v18 = vsel %vm102_vm0, %v51_v12, 0  ;;  %v53_v19 = vld [vmem:[%s23195_s1 + $0x30] sm:$0x3]  ;;  %v39_v20 = vld [vmem:[%s23194_s0] sm:$0xff]  ;;  %v951_v28 = vand.u32 4294901760, %v49_v14  ;;  %v82_v46 = vsel %vm77_vm1, %v40_v33, 0 }
  0x1a   :  { %v19597_v21 = vpack.c.bf16 %v119_v10, %v115_v6  ;;  %v19599_v22 = vsub.f32 %v107_v5, %v119_v10  ;;  %v121_v23 = vand.u32 4294901760, %v104_v18  ;;  %v19601_v24 = vsub.f32 %v47_v9, %v117_v13  ;;  %v42_v47 = vld [vmem:[%s23194_s0 + $0x18] sm:$0xff]  ;;  %v43_v56 = vld [vmem:[%s23194_s0 + $0x20] sm:$0xff] }
  0x1b   :  { %v19603_v25 = vpack.c.bf16 %v953_v16, %v949_v8  ;;  %v19605_v26 = vsub.f32 %v113_v11, %v953_v16  ;;  %v110_v27 = vsel %vm102_vm0, %v53_v19, 0  ;;  %v79_v32 = vsel %vm77_vm1, %v39_v20, 0  ;;  %v44_v20 = vld [vmem:[%s23194_s0 + $0x28] sm:$0xff] }
  0x1c   :  { %15848 = vmatprep.subr.bf16.mxu0 %v19597_v21  ;;  %v19609_v29 = vpack.c.bf16 %v121_v23, %v117_v13  ;;  %v19611_v30 = vsub.f32 %v104_v18, %v121_v23  ;;  %v955_v31 = vand.u32 4294901760, %v110_v27  ;;  %v19618_v34 = vsub.f32 %v49_v14, %v951_v28  ;;  %v45_v23 = vld [vmem:[%s23194_s0 + $0x30] sm:$0xff] }
  0x1d   :  { %15872 = vmatprep.subr.bf16.mxu1 %v19603_v25  ;;  %v19620_v35 = vand.u32 4294901760, %v79_v32  ;;  %v274_v36 = vand.u32 4294901760, %v19586_v15  ;;  %v286_v37 = vand.u32 4294901760, %v19599_v22  ;;  %v280_v41 = vand.u32 4294901760, %v19601_v24 }
  0x1e   :  { %15850 = vmatpush1.bf16.msra.mxu0 %v19609_v29  ;;  %v19628_v39 = vpack.c.bf16 %v955_v31, %v951_v28  ;;  %v19630_v40 = vsub.f32 %v110_v27, %v955_v31  ;;  %v292_v42 = vand.u32 4294901760, %v19611_v30  ;;  %v19654_v50 = vand.u32 4294901760, %v82_v46 }
  0x1f   :  { %23633 = vst [vmem:[#allocation7_spill] sm:$0xff] %v19620_v35  ;;  %v19635_v43 = vsub.f32 %v79_v32, %v19620_v35  ;;  %v275_v44 = vsub.f32 %v19586_v15, %v274_v36  ;;  %v287_v45 = vsub.f32 %v19599_v22, %v286_v37  ;;  %v281_v48 = vsub.f32 %v19601_v24, %v280_v41 }
  0x20   :  { %15874 = vmatpush1.bf16.msra.mxu1 %v19628_v39  ;;  %v293_v49 = vsub.f32 %v19611_v30, %v292_v42  ;;  %v85_v51 = vsel %vm77_vm1, %v41_v38, 0  ;;  %v19666_v59 = vsub.f32 %v82_v46, %v19654_v50  ;;  %v88_v60 = vsel %vm77_vm1, %v42_v47, 0 }
  0x21   :  { %v19658_v52 = vand.u32 4294901760, %v19635_v43  ;;  %v276_v53 = vand.u32 4294901760, %v275_v44  ;;  %v288_v54 = vand.u32 4294901760, %v287_v45  ;;  %v19660_v55 = vand.u32 4294901760, %v85_v51  ;;  %v46_v45 = vld [vmem:[%s23194_s0 + $0x38] sm:$0xff] }
  0x22   :  { %v282_v57 = vand.u32 4294901760, %v281_v48  ;;  %v294_v58 = vand.u32 4294901760, %v293_v49  ;;  %v19674_v0 = vand.u32 4294901760, %v88_v60  ;;  %v19677_v3 = vand.u32 4294901760, %v19666_v59 }
  0x23   :  { %v187_v61 = vsub.f32 %v19635_v43, %v19658_v52  ;;  %v15851_v62 = vpack.c.bf16 %v288_v54, %v276_v53  ;;  %v19672_v63 = vsub.f32 %v85_v51, %v19660_v55  ;;  %v91_v4 = vsel %vm77_vm1, %v43_v56, 0 }
  0x24   :  { %v15853_v2 = vpack.c.bf16 %v294_v58, %v282_v57  ;;  %v1108_v5 = vand.u32 4294901760, %v19588_v17  ;;  %v19685_v8 = vsub.f32 %v88_v60, %v19674_v0  ;;  %v19687_v9 = vand.u32 4294901760, %v91_v4 }
  0x25   :  { %v188_v6 = vand.u32 4294901760, %v187_v61  ;;  %15852 = vmatprep.subr.bf16.mxu0 %v15851_v62  ;;  %v19682_v7 = vand.u32 4294901760, %v19672_v63  ;;  %v198_v10 = vsub.f32 %v19666_v59, %v19677_v3  ;;  %v1120_v12 = vand.u32 4294901760, %v19605_v26 }
  0x26   :  { %v1109_v11 = vsub.f32 %v19588_v17, %v1108_v5  ;;  %v1114_v13 = vand.u32 4294901760, %v19618_v34  ;;  %v19697_v16 = vand.u32 4294901760, %v19685_v8  ;;  %v19700_v18 = vsub.f32 %v91_v4, %v19687_v9 }
  0x27   :  { %189 = vmatmul.mubr.f32.vlgmr.msra.gmra.mrb[0].mxu0 %v188_v6  ;;  %1023 = vmatmul.mubr.f32.vlgmr.msra.gmra.mrb[0].mxu1 %v188_v6  ;;  %v209_v14 = vsub.f32 %v19672_v63, %v19682_v7  ;;  %v1126_v19 = vand.u32 4294901760, %v19630_v40  ;;  %v199_v27 = vand.u32 4294901760, %v198_v10  ;;  %v1121_v31 = vsub.f32 %v19605_v26, %v1120_v12 }
  0x28   :  { %194 = vmatprep.mubr.f32.mxu0 %v23207_v1  ;;  %15854 = vmatpush1.bf16.msra.mxu0 %v15853_v2  ;;  %v1110_v28 = vand.u32 4294901760, %v1109_v11  ;;  %v1115_v32 = vsub.f32 %v19618_v34, %v1114_v13  ;;  %v220_v33 = vsub.f32 %v19685_v8, %v19697_v16  ;;  %v19716_v38 = vand.u32 4294901760, %v19700_v18 }
  0x29   :  { %1028 = vmatprep.mubr.f32.mxu1 %v23207_v1  ;;  %v1127_v44 = vsub.f32 %v19630_v40, %v1126_v19  ;;  %v1122_v46 = vand.u32 4294901760, %v1121_v31  ;;  %v94_v48 = vsel %vm77_vm1, %v44_v20, 0  ;;  %v97_v49 = vsel %vm77_vm1, %v45_v23, 0  ;;  %v19915_v31 = vld [vmem:[#allocation4 + $0x60] sm:$0xff] }
  0x2a   :  { %v1116_v47 = vand.u32 4294901760, %v1115_v32  ;;  %v210_v51 = vand.u32 4294901760, %v209_v14  ;;  %v19724_v54 = vand.u32 4294901760, %v94_v48  ;;  %v19728_v57 = vand.u32 4294901760, %v97_v49 }
  0x2b   :  { %200 = vmatmul.mubr.f32.gmra.mrb[2].mxu0 %v199_v27  ;;  %1034 = vmatmul.mubr.f32.gmra.mrb[2].mxu1 %v199_v27  ;;  %v1128_v53 = vand.u32 4294901760, %v1127_v44  ;;  %v15875_v56 = vpack.c.bf16 %v1122_v46, %v1110_v28  ;;  %v100_v58 = vsel %vm77_vm1, %v46_v45, 0  ;;  %v15855_v60 = vpack.c.bf16 %v19599_v22, %v19586_v15  ;;  %v19922_v44 = vld [vmem:[#allocation4 + $0x50] sm:$0xff]  ;;  %v19926_v46 = vld [vmem:[#allocation4 + $0x88] sm:$0xff] }
  0x2c   :  { %205 = vmatprep.mubr.f32.mxu0 %v23207_v1  ;;  %1039 = vmatprep.mubr.f32.mxu1 %v23207_v1  ;;  %v19734_v62 = vsub.f32 %v94_v48, %v19724_v54  ;;  %v221_v2 = vand.u32 4294901760, %v220_v33  ;;  %v231_v4 = vsub.f32 %v19700_v18, %v19716_v38  ;;  %v15879_v6 = vpack.c.bf16 %v19605_v26, %v19588_v17  ;;  %v19924_v45 = vld [vmem:[#allocation4 + $0x70] sm:$0xff] }
  0x2d   :  { %v15877_v61 = vpack.c.bf16 %v1128_v53, %v1116_v47  ;;  %15876 = vmatprep.subr.bf16.mxu1 %v15875_v56  ;;  %15856 = vmatprep.subr.bf16.mxu0 %v15855_v60  ;;  %v19744_v11 = vsub.f32 %v97_v49, %v19728_v57  ;;  %v19746_v14 = vand.u32 4294901760, %v100_v58  ;;  %v19752_v20 = vpack.c.bf16 %v286_v37, %v274_v36  ;;  %v19933_v53 = vld [vmem:[#allocation4 + $0x98] sm:$0xff] }
  0x2e   :  { %v19741_v10 = vand.u32 4294901760, %v19734_v62  ;;  %v19760_v17 = vpack.c.bf16 %v292_v42, %v280_v41  ;;  %v19762_v26 = vpack.c.bf16 %v1120_v12, %v1108_v5  ;;  %v19764_v23 = vpack.c.bf16 %v1126_v19, %v1114_v13  ;;  %v19935_v56 = vld [vmem:[#allocation4 + $0xb8] sm:$0xff] }
  0x2f   :  { %211 = vmatmul.mubr.f32.gmra.mrb[4].mxu0 %v210_v51  ;;  %1045 = vmatmul.mubr.f32.gmra.mrb[4].mxu1 %v210_v51  ;;  %v232_v15 = vand.u32 4294901760, %v231_v4  ;;  %v19769_v36 = vand.u32 4294901760, %v19744_v11  ;;  %v19772_v37 = vsub.f32 %v100_v58, %v19746_v14  ;;  %v15857_v27 = vpack.c.bf16 %v19611_v30, %v19601_v24  ;;  %v19885_v24 = vld [vmem:[#allocation4 + $0x28] sm:$0xff]  ;;  %v19891_v30 = vld [vmem:[#allocation4 + $0x38] sm:$0xff]  ;;  %v19944_v4 = vld [vmem:[#allocation4 + $0x90] sm:$0xff] }
  0x30   :  { %216 = vmatprep.mubr.f32.mxu0 %v23207_v1  ;;  %1050 = vmatprep.mubr.f32.mxu1 %v23207_v1  ;;  %v242_v22 = vsub.f32 %v19734_v62, %v19741_v10  ;;  %v15881_v28 = vpack.c.bf16 %v19630_v40, %v19618_v34  ;;  %v19893_v34 = vld [vmem:[#allocation4] sm:$0xff]  ;;  %v23205_v33 = vand.u32 4294901760, %v19891_v30  ;;  %v19931_v51 = vld [vmem:[#allocation4 + $0xa8] sm:$0xff]  ;;  %23634 = vst [vmem:[#allocation8_spill] sm:$0xff] %v19944_v4  ;;  %vm15814_vm2 = vcmask 7168  }
  0x31   :  { %15878 = vmatpush1.bf16.msra.mxu1 %v15877_v61  ;;  %v253_v42 = vsub.f32 %v19744_v11, %v19769_v36  ;;  %v19779_v5 = vand.u32 4294901760, %v19772_v37  ;;  %v19895_v40 = vld [vmem:[#allocation4 + $0x20] sm:$0xff] }
  0x32   :  { %15880 = vmatprep.subr.bf16.mxu1 %v15879_v6  ;;  %v243_v41 = vand.u32 4294901760, %v242_v22  ;;  %v23203_v47 = vand.u32 4294901760, %v19895_v40  ;;  %v20025_v22 = vld [vmem:[#allocation4 + $0x118] sm:$0xff] }
  0x33   :  { %222 = vmatmul.mubr.f32.gmra.mrb[6].mxu0 %v221_v2  ;;  %1056 = vmatmul.mubr.f32.gmra.mrb[6].mxu1 %v221_v2  ;;  %v254_v12 = vand.u32 4294901760, %v253_v42  ;;  %v264_v13 = vsub.f32 %v19772_v37, %v19779_v5  ;;  %v19942_v2 = vld [vmem:[#allocation4 + $0xa0] sm:$0xff]  ;;  %v19969_v42 = vld [vmem:[#allocation4 + $0xd8] sm:$0xff] }
  0x34   :  { %227 = vmatprep.mubr.f32.mxu0 %v23207_v1  ;;  %1061 = vmatprep.mubr.f32.mxu1 %v23207_v1  ;;  %23639 = vst [vmem:[#allocation13_spill] sm:$0xff] %v19969_v42 }
  0x35   :  { %v265_v19 = vand.u32 4294901760, %v264_v13 }
  0x37   :  { %233 = vmatmul.mubr.f32.gmra.mrb[8].mxu0 %v232_v15  ;;  %1067 = vmatmul.mubr.f32.gmra.mrb[8].mxu1 %v232_v15  ;;  %v19961_v15 = vld [vmem:[#allocation4 + $0xe8] sm:$0xff] }
  0x38   :  { %238 = vmatprep.mubr.f32.mxu0 %v23207_v1  ;;  %1072 = vmatprep.mubr.f32.mxu1 %v23207_v1  ;;  %23638 = vst [vmem:[#allocation12_spill] sm:$0xff] %v19961_v15 }
  0x3b   :  { %244 = vmatmul.mubr.f32.gmra.mrb[10].mxu0 %v243_v41  ;;  %1078 = vmatmul.mubr.f32.gmra.mrb[10].mxu1 %v243_v41  ;;  %v20001_v41 = vld [vmem:[#allocation4 + $0xd0] sm:$0xff] }
  0x3c   :  { %249 = vmatprep.mubr.f32.mxu0 %v23207_v1  ;;  %1083 = vmatprep.mubr.f32.mxu1 %v23207_v1 }
  0x3f   :  { %255 = vmatmul.mubr.f32.gmra.mrb[12].mxu0 %v254_v12  ;;  %1089 = vmatmul.mubr.f32.gmra.mrb[12].mxu1 %v254_v12  ;;  %v19971_v12 = vld [vmem:[#allocation4 + $0xf8] sm:$0xff] }
  0x40   :  { %260 = vmatprep.mubr.f32.mxu0 %v23207_v1  ;;  %1094 = vmatprep.mubr.f32.mxu1 %v23207_v1  ;;  %23640 = vst [vmem:[#allocation14_spill] sm:$0xff] %v19971_v12 }
  0x43   :  { %266 = vmatmul.mubr.f32.gmra.mrb[14].mxu0 %v265_v19  ;;  %1100 = vmatmul.mubr.f32.gmra.mrb[14].mxu1 %v265_v19  ;;  %v23654_v19 = vand.u32 4294901760, %v19931_v51 }
  0x44   :  { %356 = vmatprep.mubr.f32.mxu0 %v23207_v1  ;;  %1190 = vmatprep.mubr.f32.mxu1 %v23207_v1 }
  0x47   :  { %358 = vmatmul.mubr.f32.vlgmr.msra.gmra.mrb[0].mxu0 %v19620_v35  ;;  %1192 = vmatmul.mubr.f32.vlgmr.msra.gmra.mrb[0].mxu1 %v19620_v35 }
  0x48   :  { %363 = vmatprep.mubr.f32.mxu0 %v23207_v1  ;;  %15858 = vmatpush1.bf16.msra.mxu0 %v15857_v27  ;;  %v20003_v27 = vld [vmem:[#allocation4 + $0xf0] sm:$0xff] }
  0x49   :  { %1197 = vmatprep.mubr.f32.mxu1 %v23207_v1  ;;  %15882 = vmatpush1.bf16.msra.mxu1 %v15881_v28 }
  0x4a   :  { %15860 = vmatprep.subr.bf16.mxu0 %v19597_v21  ;;  %15884 = vmatprep.subr.bf16.mxu1 %v19603_v25 }
  0x4b   :  { %365 = vmatmul.mubr.f32.gmra.mrb[2].mxu0 %v19654_v50  ;;  %1199 = vmatmul.mubr.f32.gmra.mrb[2].mxu1 %v19654_v50 }
  0x4c   :  { %370 = vmatprep.mubr.f32.mxu0 %v23207_v1  ;;  %1204 = vmatprep.mubr.f32.mxu1 %v23207_v1 }
  0x4f   :  { %372 = vmatmul.mubr.f32.gmra.mrb[4].mxu0 %v19660_v55  ;;  %1206 = vmatmul.mubr.f32.gmra.mrb[4].mxu1 %v19660_v55 }
  0x50   :  { %377 = vmatprep.mubr.f32.mxu0 %v23207_v1  ;;  %1211 = vmatprep.mubr.f32.mxu1 %v23207_v1 }
  0x53   :  { %379 = vmatmul.mubr.f32.gmra.mrb[6].mxu0 %v19674_v0  ;;  %1213 = vmatmul.mubr.f32.gmra.mrb[6].mxu1 %v19674_v0 }
  0x54   :  { %384 = vmatprep.mubr.f32.mxu0 %v23207_v1  ;;  %1218 = vmatprep.mubr.f32.mxu1 %v23207_v1 }
  0x57   :  { %386 = vmatmul.mubr.f32.gmra.mrb[8].mxu0 %v19687_v9  ;;  %1220 = vmatmul.mubr.f32.gmra.mrb[8].mxu1 %v19687_v9 }
  0x58   :  { %391 = vmatprep.mubr.f32.mxu0 %v23207_v1  ;;  %1225 = vmatprep.mubr.f32.mxu1 %v23207_v1 }
  0x5b   :  { %393 = vmatmul.mubr.f32.gmra.mrb[10].mxu0 %v19724_v54  ;;  %1227 = vmatmul.mubr.f32.gmra.mrb[10].mxu1 %v19724_v54 }
  0x5c   :  { %398 = vmatprep.mubr.f32.mxu0 %v23207_v1  ;;  %1232 = vmatprep.mubr.f32.mxu1 %v23207_v1 }
  0x5f   :  { %400 = vmatmul.mubr.f32.gmra.mrb[12].mxu0 %v19728_v57  ;;  %1234 = vmatmul.mubr.f32.gmra.mrb[12].mxu1 %v19728_v57 }
  0x60   :  { %405 = vmatprep.mubr.f32.mxu0 %v23207_v1  ;;  %1239 = vmatprep.mubr.f32.mxu1 %v23207_v1 }
  0x63   :  { %407 = vmatmul.mubr.f32.gmra.mrb[14].mxu0 %v19746_v14  ;;  %1241 = vmatmul.mubr.f32.gmra.mrb[14].mxu1 %v19746_v14 }
  0x64   :  { %485 = vmatprep.mubr.f32.mxu0 %v23207_v1  ;;  %1319 = vmatprep.mubr.f32.mxu1 %v23207_v1 }
  0x67   :  { %488 = vmatmul.mubr.f32.vlgmr.msra.gmra.mrb[0].mxu0 %v19635_v43  ;;  %1322 = vmatmul.mubr.f32.vlgmr.msra.gmra.mrb[0].mxu1 %v19635_v43  ;;  %v19897_v43 = vld [vmem:[#allocation4 + $0x10] sm:$0xff] }
  0x68   :  { %493 = vmatprep.mubr.f32.mxu0 %v23207_v1  ;;  %15862 = vmatpush1.bf16.msra.mxu0 %v19609_v29  ;;  %v23212_v48 = vand.u32 4294901760, %v19897_v43 }
  0x69   :  { %1327 = vmatprep.mubr.f32.mxu1 %v23207_v1  ;;  %15886 = vmatpush1.bf16.msra.mxu1 %v19628_v39 }
  0x6a   :  { %15864 = vmatprep.subr.bf16.mxu0 %v19752_v20  ;;  %15888 = vmatprep.subr.bf16.mxu1 %v19762_v26  ;;  %v19957_v26 = vld [vmem:[#allocation4 + $0xb0] sm:$0xff] }
  0x6b   :  { %496 = vmatmul.mubr.f32.gmra.mrb[2].mxu0 %v19666_v59  ;;  %1330 = vmatmul.mubr.f32.gmra.mrb[2].mxu1 %v19666_v59  ;;  %v19901_v59 = vld [vmem:[#allocation4 + $0x48] sm:$0xff]  ;;  %23636 = vst [vmem:[#allocation10_spill] sm:$0xff] %v19957_v26 }
  0x6c   :  { %501 = vmatprep.mubr.f32.mxu0 %v23207_v1  ;;  %1335 = vmatprep.mubr.f32.mxu1 %v23207_v1  ;;  %v23211_v58 = vand.u32 4294901760, %v19901_v59 }
  0x6f   :  { %504 = vmatmul.mubr.f32.gmra.mrb[4].mxu0 %v19672_v63  ;;  %1338 = vmatmul.mubr.f32.gmra.mrb[4].mxu1 %v19672_v63  ;;  %v19903_v63 = vld [vmem:[#allocation4 + $0x68] sm:$0xff] }
  0x70   :  { %509 = vmatprep.mubr.f32.mxu0 %v23207_v1  ;;  %1343 = vmatprep.mubr.f32.mxu1 %v23207_v1  ;;  %v23210_v60 = vand.u32 4294901760, %v19903_v63 }
  0x73   :  { %512 = vmatmul.mubr.f32.gmra.mrb[6].mxu0 %v19685_v8  ;;  %1346 = vmatmul.mubr.f32.gmra.mrb[6].mxu1 %v19685_v8  ;;  %v23201_v8 = vand.u32 4294901760, %v19885_v24 }
  0x74   :  { %517 = vmatprep.mubr.f32.mxu0 %v23207_v1  ;;  %1351 = vmatprep.mubr.f32.mxu1 %v23207_v1 }
  0x77   :  { %520 = vmatmul.mubr.f32.gmra.mrb[8].mxu0 %v19700_v18  ;;  %1354 = vmatmul.mubr.f32.gmra.mrb[8].mxu1 %v19700_v18  ;;  %v19913_v18 = vld [vmem:[#allocation4 + $0x40] sm:$0xff] }
  0x78   :  { %525 = vmatprep.mubr.f32.mxu0 %v23207_v1  ;;  %1359 = vmatprep.mubr.f32.mxu1 %v23207_v1  ;;  %v23217_v20 = vand.u32 4294901760, %v19913_v18 }
  0x7b   :  { %528 = vmatmul.mubr.f32.gmra.mrb[10].mxu0 %v19734_v62  ;;  %1362 = vmatmul.mubr.f32.gmra.mrb[10].mxu1 %v19734_v62  ;;  %v19940_v62 = vld [vmem:[#allocation4 + $0x80] sm:$0xff] }
  0x7c   :  { %533 = vmatprep.mubr.f32.mxu0 %v23207_v1  ;;  %1367 = vmatprep.mubr.f32.mxu1 %v23207_v1 }
  0x7f   :  { %536 = vmatmul.mubr.f32.gmra.mrb[12].mxu0 %v19744_v11  ;;  %1370 = vmatmul.mubr.f32.gmra.mrb[12].mxu1 %v19744_v11 }
  0x80   :  { %541 = vmatprep.mubr.f32.mxu0 %v23207_v1  ;;  %1375 = vmatprep.mubr.f32.mxu1 %v23207_v1 }
  0x83   :  { %544 = vmatmul.mubr.f32.gmra.mrb[14].mxu0 %v19772_v37  ;;  %1378 = vmatmul.mubr.f32.gmra.mrb[14].mxu1 %v19772_v37 }
  0x84   :  { %618 = vmatprep.mubr.f32.mxu0 %v23207_v1  ;;  %1452 = vmatprep.mubr.f32.mxu1 %v23207_v1 }
  0x87   :  { %622 = vmatmul.mubr.f32.vlgmr.msra.gmra.mrb[0].mxu0 %v19658_v52  ;;  %1456 = vmatmul.mubr.f32.vlgmr.msra.gmra.mrb[0].mxu1 %v19658_v52  ;;  %v19899_v52 = vld [vmem:[#allocation4 + $0x30] sm:$0xff] }
  0x88   :  { %627 = vmatprep.mubr.f32.mxu0 %v23207_v1  ;;  %15866 = vmatpush1.bf16.msra.mxu0 %v19760_v17  ;;  %v23209_v49 = vand.u32 4294901760, %v19899_v52  ;;  %v23216_v17 = vand.u32 4294901760, %v19915_v31 }
  0x89   :  { %1461 = vmatprep.mubr.f32.mxu1 %v23207_v1  ;;  %15890 = vmatpush1.bf16.msra.mxu1 %v19764_v23  ;;  %v19959_v23 = vld [vmem:[#allocation4 + $0xc8] sm:$0xff] }
  0x8a   :  { %15868 = vmatprep.subr.bf16.mxu0 %v19597_v21  ;;  %15892 = vmatprep.subr.bf16.mxu1 %v19603_v25  ;;  %v19883_v21 = vld [vmem:[#allocation4 + $0x8] sm:$0xff]  ;;  %v19889_v25 = vld [vmem:[#allocation4 + $0x18] sm:$0xff]  ;;  %23637 = vst [vmem:[#allocation11_spill] sm:$0xff] %v19959_v23 }
  0x8b   :  { %631 = vmatmul.mubr.f32.gmra.mrb[2].mxu0 %v19677_v3  ;;  %1465 = vmatmul.mubr.f32.gmra.mrb[2].mxu1 %v19677_v3  ;;  %v19905_v3 = vld [vmem:[#allocation4 + $0x58] sm:$0xff]  ;;  %v23206_v32 = vand.u32 4294901760, %v19889_v25 }
  0x8c   :  { %636 = vmatprep.mubr.f32.mxu0 %v23207_v1  ;;  %1470 = vmatprep.mubr.f32.mxu1 %v23207_v1  ;;  %v23214_v61 = vand.u32 4294901760, %v19905_v3 }
  0x8d   :  { %v19991_v28 = vpack.c.bf16 %v23205_v33, %v23206_v32  ;;  %v23653_v33 = vand.u32 4294901760, %v19926_v46 }
  0x8f   :  { %640 = vmatmul.mubr.f32.gmra.mrb[4].mxu0 %v19682_v7  ;;  %1474 = vmatmul.mubr.f32.gmra.mrb[4].mxu1 %v19682_v7  ;;  %v23202_v7 = vand.u32 4294901760, %v19883_v21  ;;  %23643 = vst [vmem:[#allocation17_spill] sm:$0xff] %v19991_v28  ;;  %v20051_v13 = vpack.c.bf16 %v23654_v19, %v23653_v33  ;;  %v23665_v33 = vand.u32 4294901760, %v19944_v4  ;;  %v23666_v19 = vand.u32 4294901760, %v19957_v26  ;;  %v20133_v26 = vld [vmem:[#allocation4 + $0x1a8] sm:$0xff]  ;;  %v20161_v4 = vld [vmem:[#allocation4 + $0x198] sm:$0xff] }
  0x90   :  { %645 = vmatprep.mubr.f32.mxu0 %v23207_v1  ;;  %1479 = vmatprep.mubr.f32.mxu1 %v23207_v1  ;;  %23688 = vst [vmem:[#allocation45_spill] sm:$0xff] %v20133_v26  ;;  %23698 = vst [vmem:[#allocation49_spill] sm:$0xff] %v20161_v4 }
  0x91   :  { %v19952_v6 = vpack.c.bf16 %v23201_v8, %v23202_v7  ;;  %v19977_v8 = vld [vmem:[#allocation4 + $0xc0] sm:$0xff]  ;;  %23655 = vst [vmem:[#allocation25_spill] sm:$0xff] %v20051_v13  ;;  %v20075_v13 = vpack.c.bf16 %v23666_v19, %v23665_v33  ;;  %v23690_v19 = vand.u32 4294901760, %v20003_v27 }
  0x92   :  { %23641 = vst [vmem:[#allocation15_spill] sm:$0xff] %v19977_v8  ;;  %v19979_v7 = vld [vmem:[#allocation4 + $0xe0] sm:$0xff] }
  0x93   :  { %649 = vmatmul.mubr.f32.gmra.mrb[6].mxu0 %v19697_v16  ;;  %1483 = vmatmul.mubr.f32.gmra.mrb[6].mxu1 %v19697_v16  ;;  %v19911_v16 = vld [vmem:[#allocation4 + $0x78] sm:$0xff]  ;;  %23635 = vst [vmem:[#allocation9_spill] sm:$0xff] %v19952_v6  ;;  %23642 = vst [vmem:[#allocation16_spill] sm:$0xff] %v19979_v7 }
  0x94   :  { %654 = vmatprep.mubr.f32.mxu0 %v23207_v1  ;;  %1488 = vmatprep.mubr.f32.mxu1 %v23207_v1  ;;  %v23213_v11 = vand.u32 4294901760, %v19911_v16  ;;  %23667 = vst [vmem:[#allocation31_spill] sm:$0xff] %v20075_v13  ;;  %v20102_v13 = vld [vmem:[#allocation4 + $0x178] sm:$0xff] }
  0x95   :  { %23678 = vst [vmem:[#allocation38_spill] sm:$0xff] %v20102_v13 }
  0x97   :  { %658 = vmatmul.mubr.f32.gmra.mrb[8].mxu0 %v19716_v38  ;;  %1492 = vmatmul.mubr.f32.gmra.mrb[8].mxu1 %v19716_v38  ;;  %v23204_v38 = vand.u32 4294901760, %v19893_v34 }
  0x98   :  { %663 = vmatprep.mubr.f32.mxu0 %v23207_v1  ;;  %1497 = vmatprep.mubr.f32.mxu1 %v23207_v1 }
  0x99   :  { %v19997_v37 = vpack.c.bf16 %v23203_v47, %v23204_v38  ;;  %v20013_v47 = vpack.c.bf16 %v23209_v49, %v23212_v48  ;;  %v20019_v38 = vpack.c.bf16 %v23210_v60, %v23211_v58  ;;  %v20033_v49 = vpack.c.bf16 %v23213_v11, %v23214_v61  ;;  %v20053_v11 = vld [vmem:[#allocation4 + $0x100] sm:$0xff] }
  0x9a   :  { %v20039_v60 = vpack.c.bf16 %v23216_v17, %v23217_v20  ;;  %v23650_v58 = vand.u32 4294901760, %v19922_v44  ;;  %v23651_v48 = vand.u32 4294901760, %v19924_v45  ;;  %23656 = vst [vmem:[#allocation26_spill] sm:$0xff] %v20053_v11  ;;  %v20055_v61 = vld [vmem:[#allocation4 + $0x120] sm:$0xff]  ;;  %v23659_v17 = vand.u32 4294901760, %v19933_v53 }
  0x9b   :  { %667 = vmatmul.mubr.f32.gmra.mrb[10].mxu0 %v19741_v10  ;;  %1501 = vmatmul.mubr.f32.gmra.mrb[10].mxu1 %v19741_v10  ;;  %23644 = vst [vmem:[#allocation18_spill] sm:$0xff] %v19997_v37  ;;  %23645 = vst [vmem:[#allocation19_spill] sm:$0xff] %v20013_v47  ;;  %v20023_v10 = vld [vmem:[#allocation4 + $0x128] sm:$0xff]  ;;  %v23660_v20 = vand.u32 4294901760, %v19935_v56  ;;  %v23669_v47 = vand.u32 4294901760, %v19961_v15  ;;  %v23680_v15 = vmov 0.0  }
  0x9c   :  { %672 = vmatprep.mubr.f32.mxu0 %v23207_v1  ;;  %1506 = vmatprep.mubr.f32.mxu1 %v23207_v1  ;;  %23646 = vst [vmem:[#allocation20_spill] sm:$0xff] %v20019_v38  ;;  %23648 = vst [vmem:[#allocation22_spill] sm:$0xff] %v20033_v49  ;;  %v20045_v32 = vpack.c.bf16 %v23651_v48, %v23650_v58  ;;  %v20057_v49 = vld [vmem:[#allocation4 + $0x110] sm:$0xff]  ;;  %v23662_v48 = vand.u32 4294901760, %v19940_v62  ;;  %v23663_v58 = vand.u32 4294901760, %v19942_v2  ;;  %v23668_v38 = vand.u32 4294901760, %v19959_v23 }
  0x9d   :  { %23649 = vst [vmem:[#allocation23_spill] sm:$0xff] %v20039_v60  ;;  %23657 = vst [vmem:[#allocation27_spill] sm:$0xff] %v20055_v61  ;;  %v20063_v60 = vpack.c.bf16 %v23660_v20, %v23659_v17  ;;  %v20083_v20 = vld [vmem:[#allocation4 + $0x130] sm:$0xff]  ;;  %v20085_v17 = vld [vmem:[#allocation4 + $0x148] sm:$0xff] }
  0x9e   :  { %23652 = vst [vmem:[#allocation24_spill] sm:$0xff] %v20045_v32  ;;  %23658 = vst [vmem:[#allocation28_spill] sm:$0xff] %v20057_v49  ;;  %v20069_v32 = vpack.c.bf16 %v23663_v58, %v23662_v48  ;;  %v20081_v37 = vpack.c.bf16 %v23669_v47, %v23668_v38  ;;  %v23674_v48 = vand.u32 4294901760, %v19969_v42  ;;  %v23675_v58 = vand.u32 4294901760, %v19971_v12  ;;  %v20119_v12 = vld [vmem:[#allocation4 + $0x150] sm:$0xff] }
  0x9f   :  { %676 = vmatmul.mubr.f32.gmra.mrb[12].mxu0 %v19769_v36  ;;  %1510 = vmatmul.mubr.f32.gmra.mrb[12].mxu1 %v19769_v36  ;;  %v20005_v36 = vld [vmem:[#allocation4 + $0x108] sm:$0xff]  ;;  %23661 = vst [vmem:[#allocation29_spill] sm:$0xff] %v20063_v60  ;;  %23671 = vst [vmem:[#allocation33_spill] sm:$0xff] %v20083_v20  ;;  %v20121_v42 = vld [vmem:[#allocation4 + $0x170] sm:$0xff]  ;;  %v23689_v38 = vand.u32 4294901760, %v20001_v41 }
  0xa0   :  { %681 = vmatprep.mubr.f32.mxu0 %v23207_v1  ;;  %1515 = vmatprep.mubr.f32.mxu1 %v23207_v1  ;;  %v20027_v1 = vld [vmem:[#allocation4 + $0x138] sm:$0xff]  ;;  %23664 = vst [vmem:[#allocation30_spill] sm:$0xff] %v20069_v32  ;;  %23670 = vst [vmem:[#allocation32_spill] sm:$0xff] %v20081_v37  ;;  %v20087_v60 = vld [vmem:[#allocation4 + $0x168] sm:$0xff]  ;;  %v20095_v33 = vpack.c.bf16 %v23675_v58, %v23674_v48  ;;  %v23682_v48 = vand.u32 4294901760, %v19979_v7  ;;  %v23692_v23 = vand.u32 4294901760, %v20005_v36 }
  0xa1   :  { %23647 = vst [vmem:[#allocation21_spill] sm:$0xff] %v20027_v1  ;;  %23672 = vst [vmem:[#allocation34_spill] sm:$0xff] %v20085_v17  ;;  %v20100_v37 = vld [vmem:[#allocation4 + $0x158] sm:$0xff]  ;;  %v20104_v32 = vld [vmem:[#allocation4 + $0x140] sm:$0xff]  ;;  %v23693_v7 = vand.u32 4294901760, %v20023_v10  ;;  %v23696_v47 = vand.u32 4294901760, %v20027_v1 }
  0xa2   :  { %23673 = vst [vmem:[#allocation35_spill] sm:$0xff] %v20087_v60  ;;  %23676 = vst [vmem:[#allocation36_spill] sm:$0xff] %v20095_v33  ;;  %v20117_v33 = vld [vmem:[#allocation4 + $0x160] sm:$0xff]  ;;  %v23703_v1 = vand.u32 4294901760, %v19883_v21 }
  0xa3   :  { %685 = vmatmul.mubr.f32.gmra.mrb[14].mxu0 %v19779_v5  ;;  %1519 = vmatmul.mubr.f32.gmra.mrb[14].mxu1 %v19779_v5  ;;  %23677 = vst [vmem:[#allocation37_spill] sm:$0xff] %v20100_v37  ;;  %23679 = vst [vmem:[#allocation39_spill] sm:$0xff] %v20104_v32  ;;  %v23681_v5 = vand.u32 4294901760, %v19977_v8  ;;  %v20147_v8 = vpack.c.bf16 %v23690_v19, %v23689_v38  ;;  %v23700_v19 = vand.u32 4294901760, %v20055_v61  ;;  %v23709_v61 = vand.u32 4294901760, %v20087_v60  ;;  %v20225_v60 = vld [vmem:[#allocation4 + $0x1e8] sm:$0xff] }
  0xa4   :  { %767 = vmatprep.mubr.f32.mxu0 %v23680_v15  ;;  %1601 = vmatprep.mubr.f32.mxu1 %v23680_v15  ;;  %23684 = vst [vmem:[#allocation41_spill] sm:$0xff] %v20117_v33  ;;  %23685 = vst [vmem:[#allocation42_spill] sm:$0xff] %v20119_v12 }
  0xa5   :  { %v20112_v58 = vpack.c.bf16 %v23682_v48, %v23681_v5  ;;  %23686 = vst [vmem:[#allocation43_spill] sm:$0xff] %v20121_v42  ;;  %23691 = vst [vmem:[#allocation46_spill] sm:$0xff] %v20147_v8  ;;  %v23695_v48 = vand.u32 4294901760, %v20025_v22 }
  0xa7   :  { %23683 = vst [vmem:[#allocation40_spill] sm:$0xff] %v20112_v58  ;;  %v20131_v58 = vld [vmem:[#allocation4 + $0x188] sm:$0xff]  ;;  %769 = vmatmul.mubr.f32.vlgmr.msra.gmra.mrb[0].mxu0 %v19620_v35  ;;  %1603 = vmatmul.mubr.f32.vlgmr.msra.gmra.mrb[0].mxu1 %v19620_v35  ;;  %v20153_v35 = vpack.c.bf16 %v23693_v7, %v23692_v23  ;;  %v20159_v5 = vpack.c.bf16 %v23696_v47, %v23695_v48  ;;  %v20175_v47 = vld [vmem:[#allocation4 + $0x180] sm:$0xff]  ;;  %v23708_v7 = vand.u32 4294901760, %v20085_v17  ;;  %v20227_v17 = vld [vmem:[#allocation4 + $0x1d8] sm:$0xff] }
  0xa8   :  { %23687 = vst [vmem:[#allocation44_spill] sm:$0xff] %v20131_v58  ;;  %774 = vmatprep.mubr.f32.mxu0 %v23680_v15  ;;  %15870 = vmatpush1.bf16.msra.mxu0 %v19609_v29  ;;  %v23699_v29 = vand.u32 4294901760, %v20053_v11  ;;  %v20177_v48 = vld [vmem:[#allocation4 + $0x1a0] sm:$0xff] }
  0xa9   :  { %23694 = vst [vmem:[#allocation47_spill] sm:$0xff] %v20153_v35  ;;  %23697 = vst [vmem:[#allocation48_spill] sm:$0xff] %v20159_v5  ;;  %1608 = vmatprep.mubr.f32.mxu1 %v23680_v15  ;;  %15894 = vmatpush1.bf16.msra.mxu1 %v19628_v39  ;;  %v20173_v35 = vld [vmem:[#allocation4 + $0x1b8] sm:$0xff]  ;;  %v20182_v39 = vsub.f32 %v19883_v21, %v23703_v1  ;;  %v20196_v11 = vpack.c.bf16 %v23709_v61, %v23708_v7  ;;  %v23712_v1 = vand.u32 4294901760, %v20102_v13 }
  0xaa   :  { %v20169_v38 = vpack.c.bf16 %v23700_v19, %v23699_v29  ;;  %23702 = vst [vmem:[#allocation51_spill] sm:$0xff] %v20173_v35  ;;  %15896 = vmatprep.subr.bf16.mxu0 %v19952_v6  ;;  %16088 = vmatprep.subr.bf16.mxu1 %v19991_v28  ;;  %v23705_v29 = vand.u32 4294901760, %v20057_v49  ;;  %v23706_v19 = vand.u32 4294901760, %v20083_v20  ;;  %v20204_v6 = vld [vmem:[#allocation4 + $0x190] sm:$0xff]  ;;  %v23717_v7 = vand.u32 4294901760, %v20119_v12 }
  0xab   :  { %23704 = vst [vmem:[#allocation52_spill] sm:$0xff] %v20182_v39  ;;  %23710 = vst [vmem:[#allocation54_spill] sm:$0xff] %v20196_v11  ;;  %v20206_v28 = vld [vmem:[#allocation4 + $0x1b0] sm:$0xff]  ;;  %776 = vmatmul.mubr.f32.gmra.mrb[2].mxu0 %v19654_v50  ;;  %1610 = vmatmul.mubr.f32.gmra.mrb[2].mxu1 %v19654_v50  ;;  %v23718_v13 = vand.u32 4294901760, %v20121_v42  ;;  %v20243_v42 = vld [vmem:[#allocation4 + $0x1e0] sm:$0xff]  ;;  %v23722_v12 = vand.u32 4294901760, %v19889_v25 }
  0xac   :  { %23701 = vst [vmem:[#allocation50_spill] sm:$0xff] %v20169_v38  ;;  %v20190_v23 = vpack.c.bf16 %v23706_v19, %v23705_v29  ;;  %v23711_v38 = vand.u32 4294901760, %v20100_v37  ;;  %v23714_v29 = vand.u32 4294901760, %v20104_v32  ;;  %v23715_v19 = vand.u32 4294901760, %v20117_v33  ;;  %v20223_v37 = vld [vmem:[#allocation4 + $0x1c8] sm:$0xff]  ;;  %781 = vmatprep.mubr.f32.mxu0 %v23680_v15  ;;  %1615 = vmatprep.mubr.f32.mxu1 %v23680_v15  ;;  %v20258_v49 = vld [vmem:[#allocation4 + $0x1d0] sm:$0xff] }
  0xad   :  { %v23720_v32 = vand.u32 4294901760, %v19885_v24  ;;  %v23725_v20 = vand.u32 4294901760, %v20133_v26  ;;  %v23727_v26 = vand.u32 4294901760, %v19891_v30 }
  0xae   :  { %23707 = vst [vmem:[#allocation53_spill] sm:$0xff] %v20190_v23  ;;  %v20202_v21 = vpack.c.bf16 %v23712_v1, %v23711_v38  ;;  %v20214_v61 = vpack.c.bf16 %v23715_v19, %v23714_v29  ;;  %v20220_v38 = vpack.c.bf16 %v23718_v13, %v23717_v7  ;;  %v20239_v7 = vld [vmem:[#allocation4 + $0x1f8] sm:$0xff]  ;;  %v20241_v1 = vld [vmem:[#allocation4 + $0x1c0] sm:$0xff]  ;;  %v23731_v19 = vand.u32 4294901760, %v20161_v4 }
  0xaf   :  { %v20232_v33 = vsub.f32 %v19885_v24, %v23720_v32  ;;  %v20248_v24 = vsub.f32 %v19889_v25, %v23722_v12  ;;  %v23724_v32 = vand.u32 4294901760, %v20131_v58  ;;  %783 = vmatmul.mubr.f32.gmra.mrb[4].mxu0 %v19660_v55  ;;  %1617 = vmatmul.mubr.f32.gmra.mrb[4].mxu1 %v19660_v55  ;;  %v23729_v25 = vand.u32 4294901760, %v19893_v34 }
  0xb0   :  { %23713 = vst [vmem:[#allocation55_spill] sm:$0xff] %v20202_v21  ;;  %23716 = vst [vmem:[#allocation56_spill] sm:$0xff] %v20214_v61  ;;  %788 = vmatprep.mubr.f32.mxu0 %v23680_v15  ;;  %1622 = vmatprep.mubr.f32.mxu1 %v23680_v15  ;;  %v23732_v29 = vand.u32 4294901760, %v20173_v35  ;;  %v23734_v61 = vand.u32 4294901760, %v20175_v47  ;;  %v23735_v58 = vand.u32 4294901760, %v20177_v48  ;;  %v23755_v4 = vand.u32 4294901760, %v20243_v42 }
  0xb1   :  { %23719 = vst [vmem:[#allocation57_spill] sm:$0xff] %v20220_v38  ;;  %23721 = vst [vmem:[#allocation58_spill] sm:$0xff] %v20232_v33  ;;  %v20254_v13 = vpack.c.bf16 %v23725_v20, %v23724_v32  ;;  %v20260_v38 = vld [vmem:[#allocation4 + $0x1f0] sm:$0xff]  ;;  %v20269_v20 = vsub.f32 %v19891_v30, %v23727_v26  ;;  %v20285_v32 = vsub.f32 %v19893_v34, %v23729_v25  ;;  %v23737_v30 = vand.u32 4294901760, %v20182_v39 }
  0xb2   :  { %23723 = vst [vmem:[#allocation59_spill] sm:$0xff] %v20248_v24  ;;  %v20291_v21 = vpack.c.bf16 %v23732_v29, %v23731_v19  ;;  %v20297_v12 = vpack.c.bf16 %v23735_v58, %v23734_v61  ;;  %v23740_v25 = vand.u32 4294901760, %v20204_v6  ;;  %v23741_v29 = vand.u32 4294901760, %v20206_v28 }
  0xb3   :  { %23726 = vst [vmem:[#allocation60_spill] sm:$0xff] %v20254_v13  ;;  %23728 = vst [vmem:[#allocation61_spill] sm:$0xff] %v20269_v20  ;;  %v1989_v26 = vsub.f32 %v20182_v39, %v23737_v30  ;;  %v23738_v13 = vand.u32 4294901760, %v19895_v40  ;;  %v23743_v58 = vand.u32 4294901760, %v19897_v43  ;;  %v23745_v30 = vand.u32 4294901760, %v19899_v52  ;;  %790 = vmatmul.mubr.f32.gmra.mrb[6].mxu0 %v19674_v0  ;;  %1624 = vmatmul.mubr.f32.gmra.mrb[6].mxu1 %v19674_v0 }
  0xb4   :  { %23730 = vst [vmem:[#allocation62_spill] sm:$0xff] %v20285_v32  ;;  %23733 = vst [vmem:[#allocation63_spill] sm:$0xff] %v20291_v21  ;;  %v20311_v19 = vpack.c.bf16 %v23741_v29, %v23740_v25  ;;  %v23750_v29 = vand.u32 4294901760, %v20227_v17  ;;  %v23753_v35 = vand.u32 4294901760, %v20232_v33  ;;  %795 = vmatprep.mubr.f32.mxu0 %v23680_v15  ;;  %1629 = vmatprep.mubr.f32.mxu1 %v23680_v15 }
  0xb5   :  { %23736 = vst [vmem:[#allocation64_spill] sm:$0xff] %v20297_v12  ;;  %v20305_v34 = vsub.f32 %v19895_v40, %v23738_v13  ;;  %v20317_v61 = vsub.f32 %v19897_v43, %v23743_v58  ;;  %v20322_v39 = vsub.f32 %v19899_v52, %v23745_v30  ;;  %v23747_v40 = vand.u32 4294901760, %v20223_v37 }
  0xb6   :  { %23742 = vst [vmem:[#allocation66_spill] sm:$0xff] %v20311_v19  ;;  %v23748_v13 = vand.u32 4294901760, %v20225_v60  ;;  %v23751_v43 = vand.u32 4294901760, %v20239_v7  ;;  %v2001_v52 = vsub.f32 %v20232_v33, %v23753_v35  ;;  %v23754_v30 = vand.u32 4294901760, %v20241_v1 }
  0xb7   :  { %23739 = vst [vmem:[#allocation65_spill] sm:$0xff] %v20305_v34  ;;  %23744 = vst [vmem:[#allocation67_spill] sm:$0xff] %v20317_v61  ;;  %v23761_v12 = vand.u32 4294901760, %v19901_v59  ;;  %v23766_v19 = vand.u32 4294901760, %v19905_v3  ;;  %797 = vmatmul.mubr.f32.gmra.mrb[8].mxu0 %v19687_v9  ;;  %1631 = vmatmul.mubr.f32.gmra.mrb[8].mxu1 %v19687_v9 }
  0xb8   :  { %23746 = vst [vmem:[#allocation68_spill] sm:$0xff] %v20322_v39  ;;  %v20330_v25 = vpack.c.bf16 %v23748_v13, %v23747_v40  ;;  %v20336_v58 = vpack.c.bf16 %v23751_v43, %v23750_v29  ;;  %v20347_v40 = vpack.c.bf16 %v23755_v4, %v23754_v30  ;;  %v23757_v13 = vand.u32 4294901760, %v20258_v49  ;;  %802 = vmatprep.mubr.f32.mxu0 %v23680_v15 }
  0xb9   :  { %v23760_v43 = vand.u32 4294901760, %v20248_v24  ;;  %v20363_v4 = vsub.f32 %v19901_v59, %v23761_v12  ;;  %v23763_v30 = vand.u32 4294901760, %v19903_v63  ;;  %v20378_v33 = vsub.f32 %v19905_v3, %v23766_v19  ;;  %1636 = vmatprep.mubr.f32.mxu1 %v23680_v15 }
  0xba   :  { %23749 = vst [vmem:[#allocation69_spill] sm:$0xff] %v20330_v25  ;;  %23752 = vst [vmem:[#allocation70_spill] sm:$0xff] %v20336_v58  ;;  %v23758_v25 = vand.u32 4294901760, %v20260_v38  ;;  %v1990_v58 = vand.u32 4294901760, %v1989_v26  ;;  %v2002_v59 = vand.u32 4294901760, %v2001_v52  ;;  %v23772_v26 = vand.u32 4294901760, %v19915_v31 }
  0xbb   :  { %23756 = vst [vmem:[#allocation71_spill] sm:$0xff] %v20347_v40  ;;  %v2831_v35 = vsub.f32 %v20248_v24, %v23760_v43  ;;  %23762 = vst [vmem:[#allocation73_spill] sm:$0xff] %v20363_v4  ;;  %v20368_v40 = vsub.f32 %v19903_v63, %v23763_v30  ;;  %v23768_v63 = vand.u32 4294901760, %v19911_v16  ;;  %v23770_v30 = vand.u32 4294901760, %v19913_v18  ;;  %804 = vmatmul.mubr.f32.gmra.mrb[10].mxu0 %v19724_v54 }
  0xbc   :  { %v20353_v29 = vpack.c.bf16 %v23758_v25, %v23757_v13  ;;  %v23765_v25 = vand.u32 4294901760, %v20269_v20  ;;  %23767 = vst [vmem:[#allocation75_spill] sm:$0xff] %v20378_v33  ;;  %v20395_v3 = vsub.f32 %v19915_v31, %v23772_v26  ;;  %v23774_v52 = vand.u32 4294901760, %v20285_v32  ;;  %1638 = vmatmul.mubr.f32.gmra.mrb[10].mxu1 %v19724_v54  ;;  %809 = vmatprep.mubr.f32.mxu0 %v23680_v15 }
  0xbd   :  { %23764 = vst [vmem:[#allocation74_spill] sm:$0xff] %v20368_v40  ;;  %v20385_v12 = vsub.f32 %v19911_v16, %v23768_v63  ;;  %v2832_v19 = vand.u32 4294901760, %v2831_v35  ;;  %v23775_v63 = vand.u32 4294901760, %v19922_v44  ;;  %v23779_v31 = vand.u32 4294901760, %v20305_v34  ;;  %1643 = vmatprep.mubr.f32.mxu1 %v23680_v15 }
  0xbe   :  { %23759 = vst [vmem:[#allocation72_spill] sm:$0xff] %v20353_v29  ;;  %v2843_v13 = vsub.f32 %v20269_v20, %v23765_v25  ;;  %v20390_v25 = vsub.f32 %v19913_v18, %v23770_v30  ;;  %23773 = vst [vmem:[#allocation78_spill] sm:$0xff] %v20395_v3  ;;  %v1995_v16 = vsub.f32 %v20285_v32, %v23774_v52  ;;  %v23777_v18 = vand.u32 4294901760, %v19924_v45 }
  0xbf   :  { %23769 = vst [vmem:[#allocation76_spill] sm:$0xff] %v20385_v12  ;;  %v20405_v43 = vsub.f32 %v19922_v44, %v23775_v63  ;;  %v2007_v26 = vsub.f32 %v20305_v34, %v23779_v31  ;;  %v23780_v52 = vand.u32 4294901760, %v19926_v46  ;;  %v23782_v44 = vand.u32 4294901760, %v20317_v61  ;;  %811 = vmatmul.mubr.f32.gmra.mrb[12].mxu0 %v19728_v57 }
  0xc0   :  { %23771 = vst [vmem:[#allocation77_spill] sm:$0xff] %v20390_v25  ;;  %v20410_v30 = vsub.f32 %v19924_v45, %v23777_v18  ;;  %v23783_v45 = vand.u32 4294901760, %v20322_v39  ;;  %v23784_v31 = vand.u32 4294901760, %v19931_v51  ;;  %v1996_v24 = vand.u32 4294901760, %v1995_v16  ;;  %1645 = vmatmul.mubr.f32.gmra.mrb[12].mxu1 %v19728_v57  ;;  %816 = vmatprep.mubr.f32.mxu0 %v23680_v15 }
  0xc1   :  { %23776 = vst [vmem:[#allocation79_spill] sm:$0xff] %v20405_v43  ;;  %v20420_v32 = vsub.f32 %v19926_v46, %v23780_v52  ;;  %v2837_v63 = vsub.f32 %v20317_v61, %v23782_v44  ;;  %v20436_v46 = vpack.c.bf16 %v2002_v59, %v1990_v58  ;;  %v23787_v58 = vand.u32 4294901760, %v20363_v4  ;;  %1650 = vmatprep.mubr.f32.mxu1 %v23680_v15 }
  0xc2   :  { %23778 = vst [vmem:[#allocation80_spill] sm:$0xff] %v20410_v30  ;;  %v2849_v18 = vsub.f32 %v20322_v39, %v23783_v45  ;;  %v20432_v35 = vsub.f32 %v19931_v51, %v23784_v31  ;;  %v2844_v45 = vand.u32 4294901760, %v2843_v13  ;;  %v2008_v39 = vand.u32 4294901760, %v2007_v26 }
  0xc3   :  { %23781 = vst [vmem:[#allocation81_spill] sm:$0xff] %v20420_v32  ;;  %23786 = vst [vmem:[#allocation83_spill] sm:$0xff] %v20436_v46  ;;  %v2013_v59 = vsub.f32 %v20363_v4, %v23787_v58  ;;  %v23788_v52 = vand.u32 4294901760, %v20368_v40  ;;  %v2838_v61 = vand.u32 4294901760, %v2837_v63  ;;  %v23789_v13 = vand.u32 4294901760, %v20378_v33  ;;  %818 = vmatmul.mubr.f32.gmra.mrb[14].mxu0 %v19746_v14 }
  0xc4   :  { %23785 = vst [vmem:[#allocation82_spill] sm:$0xff] %v20432_v35  ;;  %v2850_v34 = vand.u32 4294901760, %v2849_v18  ;;  %v23790_v26 = vand.u32 4294901760, %v20385_v12  ;;  %v23792_v63 = vand.u32 4294901760, %v20395_v3  ;;  %v23794_v51 = vand.u32 4294901760, %v20405_v43  ;;  %1652 = vmatmul.mubr.f32.gmra.mrb[14].mxu1 %v19746_v14  ;;  %892 = vmatprep.mubr.f32.mxu0 %v23680_v15 }
  0xc5   :  { %v2025_v44 = vsub.f32 %v20368_v40, %v23788_v52  ;;  %v2855_v16 = vsub.f32 %v20378_v33, %v23789_v13  ;;  %v23791_v52 = vand.u32 4294901760, %v20390_v25  ;;  %v20469_v13 = vpack.c.bf16 %v2844_v45, %v2832_v19  ;;  %1726 = vmatprep.mubr.f32.mxu1 %v23680_v15 }
  0xc6   :  { %v2867_v58 = vsub.f32 %v20385_v12, %v23790_v26  ;;  %v2031_v18 = vsub.f32 %v20395_v3, %v23792_v63  ;;  %v2861_v31 = vsub.f32 %v20405_v43, %v23794_v51  ;;  %v23795_v26 = vand.u32 4294901760, %v20410_v30 }
  0xc7   :  { %v2019_v20 = vsub.f32 %v20390_v25, %v23791_v52  ;;  %23793 = vst [vmem:[#allocation84_spill] sm:$0xff] %v20469_v13  ;;  %v2014_v33 = vand.u32 4294901760, %v2013_v59  ;;  %v2026_v52 = vand.u32 4294901760, %v2025_v44  ;;  %v23796_v25 = vand.u32 4294901760, %v20420_v32 }
  0xc8   :  { %v2873_v12 = vsub.f32 %v20410_v30, %v23795_v26  ;;  %v23797_v3 = vand.u32 4294901760, %v19933_v53  ;;  %v20485_v19 = vpack.c.bf16 %v2008_v39, %v1996_v24  ;;  %v20487_v45 = vpack.c.bf16 %v2850_v34, %v2838_v61 }
  0xc9   :  { %v2037_v63 = vsub.f32 %v20420_v32, %v23796_v25  ;;  %v2856_v51 = vand.u32 4294901760, %v2855_v16  ;;  %v23800_v43 = vand.u32 4294901760, %v20432_v35  ;;  %v2868_v44 = vand.u32 4294901760, %v2867_v58  ;;  %v23808_v16 = vld [vmem:[#allocation8_spill] sm:$0xff] }
  0xca   :  { %v20483_v40 = vsub.f32 %v19933_v53, %v23797_v3  ;;  %23798 = vst [vmem:[#allocation85_spill] sm:$0xff] %v20485_v19  ;;  %23799 = vst [vmem:[#allocation86_spill] sm:$0xff] %v20487_v45  ;;  %v2020_v25 = vand.u32 4294901760, %v2019_v20  ;;  %v2032_v59 = vand.u32 4294901760, %v2031_v18  ;;  %v23801_v32 = vand.u32 4294901760, %v19935_v56  ;;  %v23811_v18 = vld [vmem:[#allocation10_spill] sm:$0xff] }
  0xcb   :  { %v2049_v26 = vsub.f32 %v20432_v35, %v23800_v43  ;;  %v2862_v39 = vand.u32 4294901760, %v2861_v31  ;;  %v2874_v24 = vand.u32 4294901760, %v2873_v12  ;;  %v23803_v34 = vand.u32 4294901760, %v19940_v62 }
  0xcc   :  { %v20497_v53 = vsub.f32 %v19935_v56, %v23801_v32  ;;  %v23805_v43 = vand.u32 4294901760, %v19942_v2  ;;  %v20511_v3 = vpack.c.bf16 %v2026_v52, %v2014_v33  ;;  %v2038_v56 = vand.u32 4294901760, %v2037_v63  ;;  %v23817_v33 = vld [vmem:[#allocation12_spill] sm:$0xff] }
  0xcd   :  { %v20504_v61 = vsub.f32 %v19940_v62, %v23803_v34  ;;  %v23809_v58 = vand.u32 4294901760, %v23808_v16  ;;  %v2050_v12 = vand.u32 4294901760, %v2049_v26  ;;  %v23812_v35 = vand.u32 4294901760, %v23811_v18  ;;  %v23814_v34 = vld [vmem:[#allocation11_spill] sm:$0xff] }
  0xce   :  { %23802 = vst [vmem:[#allocation87_spill] sm:$0xff] %v20497_v53  ;;  %v20509_v20 = vsub.f32 %v19942_v2, %v23805_v43  ;;  %23807 = vst [vmem:[#allocation90_spill] sm:$0xff] %v20511_v3  ;;  %v23815_v30 = vand.u32 4294901760, %v23814_v34  ;;  %v23818_v52 = vand.u32 4294901760, %v23817_v33  ;;  %v23820_v43 = vld [vmem:[#allocation7_spill] sm:$0xff]  ;;  %v20536_v26 = vpack.c.bf16 %v2868_v44, %v2856_v51  ;;  %v23838_v44 = vld [vmem:[#allocation20_spill] sm:$0xff] }
  0xcf   :  { %23804 = vst [vmem:[#allocation88_spill] sm:$0xff] %v20504_v61  ;;  %v20517_v31 = vsub.f32 %v23808_v16, %v23809_v58  ;;  %v20522_v62 = vsub.f32 %v23811_v18, %v23812_v35  ;;  %894 = vmatmul.mubr.f32.vlgmr.msra.gmra.mrb[0].mxu0 %v23820_v43  ;;  %1728 = vmatmul.mubr.f32.vlgmr.msra.gmra.mrb[0].mxu1 %v23820_v43  ;;  %v23822_v35 = vld [vmem:[#allocation13_spill] sm:$0xff]  ;;  %v23839_v16 = vld [vmem:[#allocation22_spill] sm:$0xff] }
  0xd0   :  { %23806 = vst [vmem:[#allocation89_spill] sm:$0xff] %v20509_v20  ;;  %v20527_v2 = vsub.f32 %v23814_v34, %v23815_v30  ;;  %v20532_v63 = vsub.f32 %v23817_v33, %v23818_v52  ;;  %23821 = vst [vmem:[#allocation7_spill] sm:$0xff] %v20536_v26  ;;  %v23823_v58 = vand.u32 4294901760, %v23822_v35  ;;  %v23825_v30 = vld [vmem:[#allocation14_spill] sm:$0xff]  ;;  %v23829_v52 = vld [vmem:[#allocation19_spill] sm:$0xff]  ;;  %v20551_v4 = vpack.c.bf16 %v2032_v59, %v2020_v25 }
  0xd1   :  { %23810 = vst [vmem:[#allocation8_spill] sm:$0xff] %v20517_v31  ;;  %23813 = vst [vmem:[#allocation10_spill] sm:$0xff] %v20522_v62  ;;  %v23826_v34 = vand.u32 4294901760, %v23825_v30  ;;  %v23828_v33 = vld [vmem:[#allocation18_spill] sm:$0xff]  ;;  %16090 = vmatpush1.bf16.msra.mxu1 %v23829_v52  ;;  %v20553_v51 = vpack.c.bf16 %v2874_v24, %v2862_v39  ;;  %899 = vmatprep.mubr.f32.mxu0 %v23680_v15  ;;  %v23835_v39 = vld [vmem:[#allocation16_spill] sm:$0xff]  ;;  %v20577_v52 = vpack.c.bf16 %v2050_v12, %v2038_v56 }
  0xd2   :  { %23816 = vst [vmem:[#allocation11_spill] sm:$0xff] %v20527_v2  ;;  %23819 = vst [vmem:[#allocation12_spill] sm:$0xff] %v20532_v63  ;;  %v20542_v18 = vsub.f32 %v23822_v35, %v23823_v58  ;;  %15898 = vmatpush1.bf16.msra.mxu0 %v23828_v33  ;;  %1733 = vmatprep.mubr.f32.mxu1 %v23680_v15  ;;  %v23832_v35 = vand.u32 4294901760, %v20483_v40  ;;  %v23836_v24 = vand.u32 4294901760, %v23835_v39  ;;  %v23842_v56 = vand.u32 4294901760, %v20001_v41  ;;  %v23844_v33 = vld [vmem:[#allocation24_spill] sm:$0xff] }
  0xd3   :  { %v20547_v32 = vsub.f32 %v23825_v30, %v23826_v34  ;;  %23830 = vst [vmem:[#allocation91_spill] sm:$0xff] %v20551_v4  ;;  %23831 = vst [vmem:[#allocation92_spill] sm:$0xff] %v20553_v51  ;;  %v23833_v34 = vld [vmem:[#allocation15_spill] sm:$0xff]  ;;  %15900 = vmatprep.subr.bf16.mxu0 %v23838_v44  ;;  %16092 = vmatprep.subr.bf16.mxu1 %v23839_v16  ;;  %v23846_v16 = vand.u32 4294901760, %v20509_v20  ;;  %v23851_v44 = vld [vmem:[#allocation25_spill] sm:$0xff] }
  0xd4   :  { %23824 = vst [vmem:[#allocation13_spill] sm:$0xff] %v20542_v18  ;;  %v20562_v58 = vsub.f32 %v20483_v40, %v23832_v35  ;;  %v23834_v25 = vand.u32 4294901760, %v23833_v34  ;;  %v20573_v43 = vsub.f32 %v23835_v39, %v23836_v24  ;;  %23840 = vst [vmem:[#allocation16_spill] sm:$0xff] %v20577_v52  ;;  %901 = vmatmul.mubr.f32.gmra.mrb[2].mxu0 %v19654_v50  ;;  %1735 = vmatmul.mubr.f32.gmra.mrb[2].mxu1 %v19654_v50  ;;  %v23843_v30 = vld [vmem:[#allocation23_spill] sm:$0xff] }
  0xd5   :  { %23827 = vst [vmem:[#allocation14_spill] sm:$0xff] %v20547_v32  ;;  %v20592_v12 = vsub.f32 %v20001_v41, %v23842_v56  ;;  %16094 = vmatpush1.bf16.msra.mxu1 %v23844_v33  ;;  %v23845_v35 = vand.u32 4294901760, %v20504_v61  ;;  %v23847_v39 = vand.u32 4294901760, %v20003_v27  ;;  %906 = vmatprep.mubr.f32.mxu0 %v23680_v15  ;;  %v23849_v41 = vand.u32 4294901760, %v20517_v31 }
  0xd6   :  { %v20568_v59 = vsub.f32 %v23833_v34, %v23834_v25  ;;  %23837 = vst [vmem:[#allocation15_spill] sm:$0xff] %v20573_v43  ;;  %v23841_v34 = vand.u32 4294901760, %v20497_v53  ;;  %15902 = vmatpush1.bf16.msra.mxu0 %v23843_v30  ;;  %1740 = vmatprep.mubr.f32.mxu1 %v23680_v15  ;;  %v23850_v30 = vand.u32 4294901760, %v20005_v36 }
  0xd7   :  { %v2043_v50 = vsub.f32 %v20504_v61, %v23845_v35  ;;  %v20605_v24 = vsub.f32 %v20003_v27, %v23847_v39  ;;  %v2885_v56 = vsub.f32 %v20517_v31, %v23849_v41  ;;  %15904 = vmatprep.subr.bf16.mxu0 %v23851_v44  ;;  %v23852_v27 = vld [vmem:[#allocation29_spill] sm:$0xff]  ;;  %v2880_v39 = vand.u32 4294901760, %v20562_v58 }
  0xd8   :  { %v2891_v25 = vsub.f32 %v20497_v53, %v23841_v34  ;;  %v2055_v34 = vsub.f32 %v20509_v20, %v23846_v16  ;;  %v20617_v16 = vsub.f32 %v20005_v36, %v23850_v30  ;;  %16096 = vmatprep.subr.bf16.mxu1 %v23852_v27  ;;  %v23853_v20 = vand.u32 4294901760, %v20522_v62  ;;  %908 = vmatmul.mubr.f32.gmra.mrb[4].mxu0 %v19660_v55 }
  0xd9   :  { %23848 = vst [vmem:[#allocation93_spill] sm:$0xff] %v20605_v24  ;;  %v23854_v41 = vand.u32 4294901760, %v20527_v2  ;;  %v23855_v35 = vand.u32 4294901760, %v20532_v63  ;;  %1742 = vmatmul.mubr.f32.gmra.mrb[4].mxu1 %v19660_v55  ;;  %v23856_v36 = vand.u32 4294901760, %v20542_v18  ;;  %v23857_v30 = vand.u32 4294901760, %v20547_v32  ;;  %913 = vmatprep.mubr.f32.mxu0 %v23680_v15 }
  0xda   :  { %v2897_v61 = vsub.f32 %v20522_v62, %v23853_v20  ;;  %v2892_v55 = vand.u32 4294901760, %v2891_v25  ;;  %v2056_v62 = vand.u32 4294901760, %v2055_v34  ;;  %1747 = vmatprep.mubr.f32.mxu1 %v23680_v15  ;;  %v23863_v25 = vand.u32 4294901760, %v20025_v22  ;;  %v23865_v34 = vld [vmem:[#allocation32_spill] sm:$0xff] }
  0xdb   :  { %v2061_v33 = vsub.f32 %v20527_v2, %v23854_v41  ;;  %v2073_v31 = vsub.f32 %v20532_v63, %v23855_v35  ;;  %v2903_v58 = vsub.f32 %v20542_v18, %v23856_v36  ;;  %v2915_v20 = vsub.f32 %v20547_v32, %v23857_v30  ;;  %v23859_v35 = vld [vmem:[#allocation30_spill] sm:$0xff]  ;;  %v23860_v63 = vld [vmem:[#allocation31_spill] sm:$0xff]  ;;  %v23866_v36 = vld [vmem:[#allocation36_spill] sm:$0xff] }
  0xdc   :  { %v23858_v41 = vand.u32 4294901760, %v20023_v10  ;;  %15906 = vmatpush1.bf16.msra.mxu0 %v23859_v35  ;;  %16098 = vmatpush1.bf16.msra.mxu1 %v23860_v63  ;;  %v2044_v2 = vand.u32 4294901760, %v2043_v50  ;;  %v23861_v30 = vand.u32 4294901760, %v20568_v59  ;;  %v20660_v50 = vsub.f32 %v20025_v22, %v23863_v25  ;;  %v23868_v25 = vld [vmem:[#allocation40_spill] sm:$0xff] }
  0xdd   :  { %15908 = vmatprep.subr.bf16.mxu0 %v23865_v34  ;;  %16100 = vmatprep.subr.bf16.mxu1 %v23866_v36  ;;  %v2886_v63 = vand.u32 4294901760, %v2885_v56  ;;  %v2898_v32 = vand.u32 4294901760, %v2897_v61  ;;  %v2062_v18 = vand.u32 4294901760, %v2061_v33  ;;  %v2074_v53 = vand.u32 4294901760, %v2073_v31 }
  0xde   :  { %v20643_v44 = vsub.f32 %v20023_v10, %v23858_v41  ;;  %v2067_v27 = vsub.f32 %v20568_v59, %v23861_v30  ;;  %v23862_v10 = vand.u32 4294901760, %v20573_v43  ;;  %23864 = vst [vmem:[#allocation94_spill] sm:$0xff] %v20660_v50  ;;  %915 = vmatmul.mubr.f32.gmra.mrb[6].mxu0 %v19674_v0  ;;  %1749 = vmatmul.mubr.f32.gmra.mrb[6].mxu1 %v19674_v0  ;;  %v2904_v30 = vand.u32 4294901760, %v2903_v58 }
  0xdf   :  { %v23867_v35 = vand.u32 4294901760, %v20592_v12  ;;  %v20672_v56 = vpack.c.bf16 %v2892_v55, %v2880_v39  ;;  %v20674_v61 = vpack.c.bf16 %v2056_v62, %v2044_v2  ;;  %v23871_v31 = vand.u32 4294901760, %v20605_v24  ;;  %920 = vmatprep.mubr.f32.mxu0 %v23680_v15  ;;  %1754 = vmatprep.mubr.f32.mxu1 %v23680_v15  ;;  %v23873_v55 = vld [vmem:[#allocation47_spill] sm:$0xff] }
  0xe0   :  { %v2079_v41 = vsub.f32 %v20573_v43, %v23862_v10  ;;  %v2916_v10 = vand.u32 4294901760, %v2915_v20  ;;  %v23353_v22 = vand.u32 4294901760, %v20643_v44  ;;  %15910 = vmatpush1.bf16.msra.mxu0 %v23868_v25  ;;  %16102 = vmatpush1.bf16.msra.mxu1 %v20147_v8  ;;  %v2068_v33 = vand.u32 4294901760, %v2067_v27 }
  0xe1   :  { %v2909_v43 = vsub.f32 %v20592_v12, %v23867_v35  ;;  %23869 = vst [vmem:[#allocation95_spill] sm:$0xff] %v20672_v56  ;;  %23870 = vst [vmem:[#allocation96_spill] sm:$0xff] %v20674_v61  ;;  %v2921_v0 = vsub.f32 %v20605_v24, %v23871_v31  ;;  %v23872_v20 = vand.u32 4294901760, %v20617_v16  ;;  %15912 = vmatprep.subr.bf16.mxu0 %v23873_v55  ;;  %16104 = vmatprep.subr.bf16.mxu1 %v20159_v5  ;;  %v23948_v55 = vld [vmem:[#allocation39_spill] sm:$0xff] }
  0xe2   :  { %v2080_v58 = vand.u32 4294901760, %v2079_v41  ;;  %v20689_v62 = vpack.c.bf16 %v2898_v32, %v2886_v63  ;;  %v20691_v2 = vpack.c.bf16 %v2074_v53, %v2062_v18  ;;  %v23876_v31 = vand.u32 4294901760, %v20175_v47  ;;  %922 = vmatmul.mubr.f32.gmra.mrb[8].mxu0 %v19687_v9  ;;  %1756 = vmatmul.mubr.f32.gmra.mrb[8].mxu1 %v19687_v9  ;;  %v23879_v63 = vld [vmem:[#allocation50_spill] sm:$0xff]  ;;  %v23880_v18 = vld [vmem:[#allocation21_spill] sm:$0xff] }
  0xe3   :  { %v20684_v35 = vsub.f32 %v20617_v16, %v23872_v20  ;;  %v20700_v41 = vpack.c.bf16 %v2916_v10, %v2904_v30  ;;  %v2910_v20 = vand.u32 4294901760, %v2909_v43  ;;  %v20705_v39 = vsub.f32 %v20643_v44, %v23353_v22  ;;  %927 = vmatprep.mubr.f32.mxu0 %v23680_v15  ;;  %1761 = vmatprep.mubr.f32.mxu1 %v23680_v15 }
  0xe4   :  { %23874 = vst [vmem:[#allocation97_spill] sm:$0xff] %v20689_v62  ;;  %23875 = vst [vmem:[#allocation98_spill] sm:$0xff] %v20691_v2  ;;  %v20696_v27 = vsub.f32 %v20175_v47, %v23876_v31  ;;  %v23878_v53 = vand.u32 4294901760, %v20177_v48  ;;  %15914 = vmatpush1.bf16.msra.mxu0 %v23879_v63  ;;  %16106 = vmatpush1.bf16.msra.mxu1 %v20190_v23  ;;  %v2922_v47 = vand.u32 4294901760, %v2921_v0  ;;  %v23881_v9 = vand.u32 4294901760, %v23880_v18  ;;  %v23932_v63 = vld [vmem:[#allocation34_spill] sm:$0xff] }
  0xe5   :  { %23877 = vst [vmem:[#allocation99_spill] sm:$0xff] %v20700_v41  ;;  %v23883_v43 = vand.u32 4294901760, %v20204_v6  ;;  %v23884_v31 = vand.u32 4294901760, %v20206_v28  ;;  %v20731_v0 = vpack.c.bf16 %v2080_v58, %v2068_v33  ;;  %15916 = vmatprep.subr.bf16.mxu0 %v20196_v11  ;;  %v23891_v33 = vand.u32 4294901760, %v20223_v37 }
  0xe6   :  { %v20710_v32 = vsub.f32 %v20177_v48, %v23878_v53  ;;  %v20717_v30 = vsub.f32 %v23880_v18, %v23881_v9  ;;  %v23886_v18 = vand.u32 4294901760, %v20660_v50  ;;  %v23892_v53 = vand.u32 4294901760, %v20225_v60  ;;  %929 = vmatmul.mubr.f32.gmra.mrb[10].mxu0 %v19724_v54  ;;  %1763 = vmatmul.mubr.f32.gmra.mrb[10].mxu1 %v19724_v54  ;;  %v23898_v54 = vld [vmem:[#allocation57_spill] sm:$0xff] }
  0xe7   :  { %v20722_v10 = vsub.f32 %v20204_v6, %v23883_v43  ;;  %v20727_v48 = vsub.f32 %v20206_v28, %v23884_v31  ;;  %23885 = vst [vmem:[#allocation100_spill] sm:$0xff] %v20731_v0  ;;  %v23887_v6 = vld [vmem:[#allocation26_spill] sm:$0xff]  ;;  %v23890_v28 = vld [vmem:[#allocation55_spill] sm:$0xff]  ;;  %v20750_v58 = vsub.f32 %v20223_v37, %v23891_v33  ;;  %v23893_v23 = vand.u32 4294901760, %v20227_v17  ;;  %934 = vmatprep.mubr.f32.mxu0 %v23680_v15 }
  0xe8   :  { %23882 = vst [vmem:[#allocation21_spill] sm:$0xff] %v20717_v30  ;;  %v20737_v9 = vsub.f32 %v20660_v50, %v23886_v18  ;;  %v23888_v43 = vand.u32 4294901760, %v23887_v6  ;;  %16108 = vmatprep.subr.bf16.mxu1 %v23890_v28  ;;  %v20755_v18 = vsub.f32 %v20225_v60, %v23892_v53  ;;  %v23894_v31 = vand.u32 4294901760, %v20239_v7  ;;  %1768 = vmatprep.mubr.f32.mxu1 %v23680_v15 }
  0xe9   :  { %v23895_v33 = vand.u32 4294901760, %v20241_v1  ;;  %v23896_v53 = vand.u32 4294901760, %v20243_v42  ;;  %16110 = vmatpush1.bf16.msra.mxu1 %v23898_v54  ;;  %v23949_v8 = vand.u32 4294901760, %v23948_v55 }
  0xea   :  { %v20742_v22 = vsub.f32 %v23887_v6, %v23888_v43  ;;  %v20760_v6 = vsub.f32 %v20227_v17, %v23893_v23  ;;  %v20768_v37 = vsub.f32 %v20239_v7, %v23894_v31  ;;  %v23897_v23 = vld [vmem:[#allocation56_spill] sm:$0xff]  ;;  %v23899_v7 = vand.u32 4294901760, %v20258_v49  ;;  %v23902_v43 = vld [vmem:[#allocation27_spill] sm:$0xff]  ;;  %16112 = vmatprep.subr.bf16.mxu1 %v20291_v21  ;;  %936 = vmatmul.mubr.f32.gmra.mrb[12].mxu0 %v19728_v57 }
  0xeb   :  { %v20773_v60 = vsub.f32 %v20241_v1, %v23895_v33  ;;  %v20778_v17 = vsub.f32 %v20243_v42, %v23896_v53  ;;  %15918 = vmatpush1.bf16.msra.mxu0 %v23897_v23  ;;  %v23900_v1 = vand.u32 4294901760, %v20260_v38  ;;  %v20796_v42 = vpack.c.bf16 %v2922_v47, %v2910_v20  ;;  %1770 = vmatmul.mubr.f32.gmra.mrb[12].mxu1 %v19728_v57  ;;  %v23914_v21 = vld [vmem:[#allocation28_spill] sm:$0xff]  ;;  %v23930_v47 = vld [vmem:[#allocation70_spill] sm:$0xff] }
  0xec   :  { %23889 = vst [vmem:[#allocation26_spill] sm:$0xff] %v20742_v22  ;;  %v20787_v31 = vsub.f32 %v20258_v49, %v23899_v7  ;;  %v23903_v28 = vand.u32 4294901760, %v23902_v43  ;;  %v23905_v49 = vand.u32 4294901760, %v20696_v27  ;;  %v23906_v7 = vand.u32 4294901760, %v20710_v32  ;;  %941 = vmatprep.mubr.f32.mxu0 %v23680_v15  ;;  %1775 = vmatprep.mubr.f32.mxu1 %v23680_v15 }
  0xed   :  { %v20792_v33 = vsub.f32 %v20260_v38, %v23900_v1  ;;  %23901 = vst [vmem:[#allocation101_spill] sm:$0xff] %v20796_v42  ;;  %v23908_v38 = vld [vmem:[#allocation60_spill] sm:$0xff]  ;;  %v23909_v53 = vand.u32 4294901760, %v20722_v10  ;;  %v23913_v1 = vld [vmem:[#allocation66_spill] sm:$0xff]  ;;  %v23924_v57 = vand.u32 4294901760, %v20768_v37  ;;  %v23938_v11 = vand.u32 4294901760, %v20742_v22 }
  0xee   :  { %v20802_v54 = vsub.f32 %v23902_v43, %v23903_v28  ;;  %v20808_v23 = vpack.c.bf16 %v23906_v7, %v23905_v49  ;;  %15920 = vmatprep.subr.bf16.mxu0 %v23908_v38  ;;  %v23910_v28 = vand.u32 4294901760, %v20727_v48  ;;  %16114 = vmatpush1.bf16.msra.mxu1 %v23913_v1  ;;  %v23915_v38 = vand.u32 4294901760, %v23914_v21 }
  0xef   :  { %v23917_v49 = vand.u32 4294901760, %v20750_v58  ;;  %v23918_v7 = vand.u32 4294901760, %v20755_v18  ;;  %16116 = vmatprep.subr.bf16.mxu1 %v23930_v47  ;;  %943 = vmatmul.mubr.f32.gmra.mrb[14].mxu0 %v19746_v14  ;;  %v23939_v47 = vld [vmem:[#allocation35_spill] sm:$0xff] }
  0xf0   :  { %23904 = vst [vmem:[#allocation27_spill] sm:$0xff] %v20802_v54  ;;  %23907 = vst [vmem:[#allocation102_spill] sm:$0xff] %v20808_v23  ;;  %v20819_v43 = vpack.c.bf16 %v23910_v28, %v23909_v53  ;;  %v23912_v23 = vld [vmem:[#allocation64_spill] sm:$0xff]  ;;  %v20832_v53 = vsub.f32 %v23914_v21, %v23915_v38  ;;  %v23923_v38 = vand.u32 4294901760, %v20760_v6  ;;  %1777 = vmatmul.mubr.f32.gmra.mrb[14].mxu1 %v19746_v14  ;;  %1979 = vmatprep.mubr.f32.mxu0 %v23680_v15  ;;  %v23953_v14 = vld [vmem:[#allocation42_spill] sm:$0xff] }
  0xf1   :  { %15922 = vmatpush1.bf16.msra.mxu0 %v23912_v23  ;;  %v20840_v20 = vpack.c.bf16 %v23918_v7, %v23917_v49  ;;  %v23926_v49 = vand.u32 4294901760, %v20773_v60  ;;  %v23927_v7 = vand.u32 4294901760, %v20778_v17  ;;  %v23929_v23 = vld [vmem:[#allocation69_spill] sm:$0xff]  ;;  %2821 = vmatprep.mubr.f32.mxu1 %v23680_v15 }
  0xf2   :  { %23911 = vst [vmem:[#allocation103_spill] sm:$0xff] %v20819_v43  ;;  %23916 = vst [vmem:[#allocation28_spill] sm:$0xff] %v20832_v53  ;;  %v23920_v43 = vld [vmem:[#allocation33_spill] sm:$0xff]  ;;  %v20854_v28 = vpack.c.bf16 %v23924_v57, %v23923_v38  ;;  %15924 = vmatprep.subr.bf16.mxu0 %v23929_v23  ;;  %v23933_v57 = vand.u32 4294901760, %v23932_v63  ;;  %16118 = vmatpush1.bf16.msra.mxu1 %v20353_v29  ;;  %v23954_v29 = vand.u32 4294901760, %v23953_v14 }
  0xf3   :  { %23919 = vst [vmem:[#allocation104_spill] sm:$0xff] %v20840_v20  ;;  %v23921_v1 = vand.u32 4294901760, %v23920_v43  ;;  %v20860_v20 = vpack.c.bf16 %v23927_v7, %v23926_v49  ;;  %v23936_v49 = vand.u32 4294901760, %v20792_v33  ;;  %v23942_v23 = vld [vmem:[#allocation37_spill] sm:$0xff]  ;;  %16120 = vmatprep.subr.bf16.mxu1 %v20469_v13 }
  0xf4   :  { %23925 = vst [vmem:[#allocation105_spill] sm:$0xff] %v20854_v28  ;;  %v20873_v38 = vsub.f32 %v23932_v63, %v23933_v57  ;;  %v23935_v28 = vand.u32 4294901760, %v20787_v31  ;;  %v23940_v63 = vand.u32 4294901760, %v23939_v47  ;;  %v23943_v5 = vand.u32 4294901760, %v23942_v23 }
  0xf5   :  { %v20848_v21 = vsub.f32 %v23920_v43, %v23921_v1  ;;  %23928 = vst [vmem:[#allocation106_spill] sm:$0xff] %v20860_v20  ;;  %v23931_v1 = vand.u32 4294901760, %v20717_v30  ;;  %2822 = vmatmul.mubr.f32.vlgmr.msra.gmra.mrb[0].mxu1 %v23680_v15 }
  0xf6   :  { %23934 = vst [vmem:[#allocation34_spill] sm:$0xff] %v20873_v38  ;;  %v20879_v7 = vpack.c.bf16 %v23936_v49, %v23935_v28  ;;  %v20892_v57 = vsub.f32 %v23939_v47, %v23940_v63  ;;  %v20897_v28 = vsub.f32 %v23942_v23, %v23943_v5  ;;  %v23944_v49 = vld [vmem:[#allocation71_spill] sm:$0xff]  ;;  %v20910_v47 = vsub.f32 %v23948_v55, %v23949_v8  ;;  %v23951_v63 = vld [vmem:[#allocation41_spill] sm:$0xff]  ;;  %v23959_v55 = vld [vmem:[#allocation44_spill] sm:$0xff] }
  0xf7   :  { %23922 = vst [vmem:[#allocation33_spill] sm:$0xff] %v20848_v21  ;;  %v20868_v43 = vsub.f32 %v20717_v30, %v23931_v1  ;;  %v20886_v1 = vsub.f32 %v20742_v22, %v23938_v11  ;;  %15926 = vmatpush1.bf16.msra.mxu0 %v23944_v49  ;;  %v23945_v11 = vld [vmem:[#allocation38_spill] sm:$0xff]  ;;  %v23952_v25 = vand.u32 4294901760, %v23951_v63  ;;  %v23960_v36 = vand.u32 4294901760, %v23959_v55  ;;  %v23962_v23 = vld [vmem:[#allocation45_spill] sm:$0xff]  ;;  %16122 = vmatpush1.bf16.msra.mxu1 %v20487_v45 }
  0xf8   :  { %23937 = vst [vmem:[#allocation107_spill] sm:$0xff] %v20879_v7  ;;  %23941 = vst [vmem:[#allocation35_spill] sm:$0xff] %v20892_v57  ;;  %v23946_v7 = vand.u32 4294901760, %v23945_v11  ;;  %15928 = vmatprep.subr.bf16.mxu0 %v20436_v46  ;;  %v23963_v46 = vand.u32 4294901760, %v23962_v23  ;;  %16124 = vmatprep.subr.bf16.mxu1 %v20536_v26  ;;  %v23973_v45 = vand.u32 4294901760, %v20892_v57 }
  0xf9   :  { %23950 = vst [vmem:[#allocation38_spill] sm:$0xff] %v20910_v47  ;;  %v20915_v5 = vsub.f32 %v23951_v63, %v23952_v25  ;;  %v20933_v25 = vsub.f32 %v23959_v55, %v23960_v36  ;;  %v2940_v63 = vand.u32 4294901760, %v20868_v43  ;;  %v23969_v43 = vand.u32 4294901760, %v20802_v54  ;;  %3052 = vmatprep.mubr.f32.mxu1 %v23680_v15 }
  0xfa   :  { %v20905_v20 = vsub.f32 %v23945_v11, %v23946_v7  ;;  %v20923_v7 = vsub.f32 %v23953_v14, %v23954_v29  ;;  %v23956_v11 = vld [vmem:[#allocation43_spill] sm:$0xff]  ;;  %v20941_v29 = vsub.f32 %v23962_v23, %v23963_v46  ;;  %v23965_v14 = vld [vmem:[#allocation49_spill] sm:$0xff]  ;;  %1980 = vmatmul.mubr.f32.vlgmr.msra.gmra.mrb[0].mxu0 %v23680_v15 }
  0xfb   :  { %v23957_v49 = vand.u32 4294901760, %v23956_v11  ;;  %23961 = vst [vmem:[#allocation42_spill] sm:$0xff] %v20933_v25  ;;  %v23966_v34 = vand.u32 4294901760, %v23965_v14  ;;  %v2103_v55 = vsub.f32 %v20802_v54, %v23969_v43  ;;  %15930 = vmatpush1.bf16.msra.mxu0 %v20485_v19  ;;  %2210 = vmatprep.mubr.f32.mxu0 %v23680_v15  ;;  %v23976_v19 = vand.u32 4294901760, %v20910_v47 }
  0xfc   :  { %23947 = vst [vmem:[#allocation37_spill] sm:$0xff] %v20905_v20  ;;  %23955 = vst [vmem:[#allocation39_spill] sm:$0xff] %v20923_v7  ;;  %15932 = vmatprep.subr.bf16.mxu0 %v20511_v3  ;;  %16126 = vmatpush1.bf16.msra.mxu1 %v20553_v51  ;;  %v23975_v43 = vand.u32 4294901760, %v20905_v20  ;;  %v23978_v51 = vand.u32 4294901760, %v20923_v7 }
  0xfd   :  { %v20928_v8 = vsub.f32 %v23956_v11, %v23957_v49  ;;  %23964 = vst [vmem:[#allocation43_spill] sm:$0xff] %v20941_v29  ;;  %v20946_v49 = vsub.f32 %v23965_v14, %v23966_v34  ;;  %v23967_v11 = vld [vmem:[#allocation51_spill] sm:$0xff]  ;;  %v23971_v34 = vand.u32 4294901760, %v20848_v21  ;;  %v2104_v26 = vand.u32 4294901760, %v2103_v55  ;;  %16128 = vmatprep.subr.bf16.mxu1 %v20672_v56 }
  0xfe   :  { %v23968_v22 = vand.u32 4294901760, %v23967_v11  ;;  %v2963_v55 = vsub.f32 %v20905_v20, %v23975_v43  ;;  %v23980_v20 = vand.u32 4294901760, %v20933_v25 }
  0xff   :  { %23958 = vst [vmem:[#allocation41_spill] sm:$0xff] %v20928_v8  ;;  %v2945_v23 = vsub.f32 %v20848_v21, %v23971_v34  ;;  %v23972_v34 = vand.u32 4294901760, %v20873_v38  ;;  %15934 = vmatpush1.bf16.msra.mxu0 %v20551_v4  ;;  %v23979_v4 = vand.u32 4294901760, %v20928_v8 }
 0x100   :  { %v20951_v36 = vsub.f32 %v23967_v11, %v23968_v22  ;;  %v23970_v22 = vand.u32 4294901760, %v20832_v53  ;;  %v2092_v11 = vand.u32 4294901760, %v20886_v1  ;;  %v23974_v1 = vand.u32 4294901760, %v20897_v28  ;;  %15936 = vmatprep.subr.bf16.mxu0 %v20577_v52  ;;  %16130 = vmatpush1.bf16.msra.mxu1 %v20689_v62 }
 0x101   :  { %v2109_v46 = vsub.f32 %v20873_v38, %v23972_v34  ;;  %v2115_v34 = vsub.f32 %v20910_v47, %v23976_v19  ;;  %v23977_v38 = vand.u32 4294901760, %v20915_v5  ;;  %v2969_v43 = vsub.f32 %v20928_v8, %v23979_v4  ;;  %16132 = vmatprep.subr.bf16.mxu1 %v20700_v41  ;;  %v24053_v41 = vld [vmem:[#allocation13_spill] sm:$0xff] }
 0x102   :  { %v2933_v14 = vsub.f32 %v20832_v53, %v23970_v22  ;;  %v2121_v22 = vsub.f32 %v20892_v57, %v23973_v45  ;;  %v2951_v13 = vsub.f32 %v20897_v28, %v23974_v1  ;;  %v2946_v1 = vand.u32 4294901760, %v2945_v23 }
 0x103   :  { %v2127_v45 = vsub.f32 %v20915_v5, %v23977_v38  ;;  %v2133_v19 = vsub.f32 %v20933_v25, %v23980_v20  ;;  %v23981_v47 = vand.u32 4294901760, %v20684_v35  ;;  %v23982_v38 = vand.u32 4294901760, %v20705_v39  ;;  %15938 = vmatpush1.bf16.msra.mxu0 %v20674_v61 }
 0x104   :  { %v2934_v3 = vand.u32 4294901760, %v2933_v14  ;;  %v2957_v14 = vsub.f32 %v20923_v7, %v23978_v51  ;;  %v23984_v23 = vand.u32 4294901760, %v20941_v29  ;;  %v23985_v51 = vand.u32 4294901760, %v20946_v49  ;;  %15940 = vmatprep.subr.bf16.mxu0 %v20691_v2  ;;  %16134 = vmatpush1.bf16.msra.mxu1 %v20796_v42  ;;  %v24051_v42 = vld [vmem:[#allocation12_spill] sm:$0xff] }
 0x105   :  { %v21018_v52 = vpack.c.bf16 %v23982_v38, %v23981_v47  ;;  %v23986_v4 = vand.u32 4294901760, %v20951_v36  ;;  %v23987_v20 = vand.u32 4294901760, %v20737_v9  ;;  %v21033_v35 = vpack.c.bf16 %v2104_v26, %v2092_v11 }
 0x106   :  { %v2145_v56 = vsub.f32 %v20941_v29, %v23984_v23  ;;  %v2975_v7 = vsub.f32 %v20946_v49, %v23985_v51  ;;  %v2110_v39 = vand.u32 4294901760, %v2109_v46  ;;  %v2122_v47 = vand.u32 4294901760, %v2121_v22 }
 0x107   :  { %23983 = vst [vmem:[#allocation44_spill] sm:$0xff] %v21018_v52  ;;  %v2987_v8 = vsub.f32 %v20951_v36, %v23986_v4  ;;  %v21031_v25 = vpack.c.bf16 %v2940_v63, %v23987_v20  ;;  %23989 = vst [vmem:[#allocation49_spill] sm:$0xff] %v21033_v35  ;;  %v2952_v38 = vand.u32 4294901760, %v2951_v13  ;;  %v2964_v23 = vand.u32 4294901760, %v2963_v55  ;;  %15942 = vmatpush1.bf16.msra.mxu0 %v20731_v0 }
 0x108   :  { %v2116_v29 = vand.u32 4294901760, %v2115_v34  ;;  %v2128_v51 = vand.u32 4294901760, %v2127_v45  ;;  %v21039_v4 = vpack.c.bf16 %v2946_v1, %v2934_v3  ;;  %v2958_v9 = vand.u32 4294901760, %v2957_v14  ;;  %15944 = vmatprep.subr.bf16.mxu0 %v21018_v52 }
 0x109   :  { %23988 = vst [vmem:[#allocation45_spill] sm:$0xff] %v21031_v25  ;;  %v2970_v63 = vand.u32 4294901760, %v2969_v43  ;;  %v2134_v26 = vand.u32 4294901760, %v2133_v19  ;;  %v2146_v11 = vand.u32 4294901760, %v2145_v56  ;;  %v2976_v46 = vand.u32 4294901760, %v2975_v7  ;;  %16136 = vmatprep.subr.bf16.mxu1 %v21031_v25 }
 0x10a   :  { %23990 = vst [vmem:[#allocation51_spill] sm:$0xff] %v21039_v4  ;;  %v2988_v22 = vand.u32 4294901760, %v2987_v8  ;;  %v23991_v20 = vand.u32 4294901760, %v20696_v27  ;;  %v21044_v13 = vpack.c.bf16 %v2122_v47, %v2110_v39  ;;  %v23993_v55 = vand.u32 4294901760, %v20710_v32  ;;  %16138 = vmatpush1.bf16.msra.mxu1 %v21039_v4 }
 0x10b   :  { %v23994_v45 = vand.u32 4294901760, %v20722_v10  ;;  %v23995_v1 = vand.u32 4294901760, %v20727_v48  ;;  %v21057_v7 = vpack.c.bf16 %v2964_v23, %v2952_v38  ;;  %v21059_v8 = vpack.c.bf16 %v2128_v51, %v2116_v29  ;;  %15946 = vmatpush1.bf16.msra.mxu0 %v21033_v35  ;;  %v24050_v35 = vld [vmem:[#allocation11_spill] sm:$0xff] }
 0x10c   :  { %v2139_v62 = vsub.f32 %v20696_v27, %v23991_v20  ;;  %23992 = vst [vmem:[#allocation108_spill] sm:$0xff] %v21044_v13  ;;  %v2151_v34 = vsub.f32 %v20710_v32, %v23993_v55  ;;  %v23998_v14 = vand.u32 4294901760, %v20750_v58  ;;  %v23999_v19 = vand.u32 4294901760, %v20755_v18  ;;  %15948 = vmatprep.subr.bf16.mxu0 %v21044_v13  ;;  %v24048_v13 = vld [vmem:[#allocation10_spill] sm:$0xff] }
 0x10d   :  { %v2981_v3 = vsub.f32 %v20722_v10, %v23994_v45  ;;  %v2993_v56 = vsub.f32 %v20727_v48, %v23995_v1  ;;  %23996 = vst [vmem:[#allocation109_spill] sm:$0xff] %v21057_v7  ;;  %23997 = vst [vmem:[#allocation110_spill] sm:$0xff] %v21059_v8  ;;  %v24000_v47 = vand.u32 4294901760, %v20760_v6  ;;  %v24001_v38 = vand.u32 4294901760, %v20768_v37  ;;  %16140 = vmatprep.subr.bf16.mxu1 %v21057_v7 }
 0x10e   :  { %v2157_v43 = vsub.f32 %v20750_v58, %v23998_v14  ;;  %v2169_v39 = vsub.f32 %v20755_v18, %v23999_v19  ;;  %v21075_v23 = vpack.c.bf16 %v2970_v63, %v2958_v9  ;;  %v21077_v51 = vpack.c.bf16 %v2146_v11, %v2134_v26 }
 0x10f   :  { %v2999_v20 = vsub.f32 %v20760_v6, %v24000_v47  ;;  %v3011_v29 = vsub.f32 %v20768_v37, %v24001_v38  ;;  %v21079_v55 = vpack.c.bf16 %v2988_v22, %v2976_v46  ;;  %v2140_v45 = vand.u32 4294901760, %v2139_v62  ;;  %15950 = vmatpush1.bf16.msra.mxu0 %v21059_v8 }
 0x110   :  { %24002 = vst [vmem:[#allocation111_spill] sm:$0xff] %v21075_v23  ;;  %24003 = vst [vmem:[#allocation112_spill] sm:$0xff] %v21077_v51  ;;  %v2152_v1 = vand.u32 4294901760, %v2151_v34  ;;  %v2982_v14 = vand.u32 4294901760, %v2981_v3  ;;  %v2994_v25 = vand.u32 4294901760, %v2993_v56  ;;  %v24005_v19 = vand.u32 4294901760, %v20773_v60  ;;  %16142 = vmatpush1.bf16.msra.mxu1 %v21075_v23  ;;  %15952 = vmatprep.subr.bf16.mxu0 %v21077_v51 }
 0x111   :  { %24004 = vst [vmem:[#allocation113_spill] sm:$0xff] %v21079_v55  ;;  %v24006_v47 = vand.u32 4294901760, %v20778_v17  ;;  %v24007_v63 = vand.u32 4294901760, %v20787_v31  ;;  %v24008_v62 = vand.u32 4294901760, %v20792_v33  ;;  %v2158_v46 = vand.u32 4294901760, %v2157_v43  ;;  %16144 = vmatprep.subr.bf16.mxu1 %v21079_v55  ;;  %v24039_v55 = vld [vmem:[#allocation81_spill] sm:$0xff] }
 0x112   :  { %v2163_v52 = vsub.f32 %v20773_v60, %v24005_v19  ;;  %v2170_v22 = vand.u32 4294901760, %v2169_v39  ;;  %v3000_v34 = vand.u32 4294901760, %v2999_v20  ;;  %v3012_v3 = vand.u32 4294901760, %v3011_v29  ;;  %v24016_v29 = vld [vmem:[#allocation58_spill] sm:$0xff] }
 0x113   :  { %v2175_v9 = vsub.f32 %v20778_v17, %v24006_v47  ;;  %v3005_v26 = vsub.f32 %v20787_v31, %v24007_v63  ;;  %v3017_v11 = vsub.f32 %v20792_v33, %v24008_v62  ;;  %v21097_v56 = vpack.c.bf16 %v2152_v1, %v2140_v45  ;;  %v24018_v1 = vld [vmem:[#allocation59_spill] sm:$0xff]  ;;  %v24040_v51 = vld [vmem:[#allocation82_spill] sm:$0xff] }
 0x114   :  { %v21099_v38 = vpack.c.bf16 %v2994_v25, %v2982_v14  ;;  %v2164_v19 = vand.u32 4294901760, %v2163_v52  ;;  %v21105_v43 = vpack.c.bf16 %v2170_v22, %v2158_v46  ;;  %v21107_v39 = vpack.c.bf16 %v3012_v3, %v3000_v34  ;;  %v24015_v52 = vld [vmem:[#allocation52_spill] sm:$0xff]  ;;  %v24019_v14 = vld [vmem:[#allocation61_spill] sm:$0xff]  ;;  %v24024_v22 = vld [vmem:[#allocation67_spill] sm:$0xff] }
 0x115   :  { %24009 = vst [vmem:[#allocation114_spill] sm:$0xff] %v21097_v56  ;;  %v2176_v47 = vand.u32 4294901760, %v2175_v9  ;;  %v3006_v63 = vand.u32 4294901760, %v3005_v26  ;;  %v3018_v62 = vand.u32 4294901760, %v3017_v11  ;;  %15954 = vmatpush1.bf16.msra.mxu0 %v21097_v56  ;;  %v21119_v45 = vpack.c.bf16 %v24016_v29, %v24015_v52  ;;  %v24021_v26 = vld [vmem:[#allocation62_spill] sm:$0xff]  ;;  %v24022_v11 = vld [vmem:[#allocation65_spill] sm:$0xff] }
 0x116   :  { %24010 = vst [vmem:[#allocation115_spill] sm:$0xff] %v21099_v38  ;;  %24011 = vst [vmem:[#allocation116_spill] sm:$0xff] %v21105_v43  ;;  %16146 = vmatpush1.bf16.msra.mxu1 %v21099_v38  ;;  %15956 = vmatprep.subr.bf16.mxu0 %v21105_v43  ;;  %v21123_v9 = vpack.c.bf16 %v24019_v14, %v24018_v1  ;;  %v21129_v46 = vpack.c.bf16 %v24022_v11, %v24021_v26  ;;  %v24025_v34 = vld [vmem:[#allocation68_spill] sm:$0xff] }
 0x117   :  { %24012 = vst [vmem:[#allocation117_spill] sm:$0xff] %v21107_v39  ;;  %v21111_v25 = vpack.c.bf16 %v2176_v47, %v2164_v19  ;;  %v21113_v20 = vpack.c.bf16 %v3018_v62, %v3006_v63  ;;  %16148 = vmatprep.subr.bf16.mxu1 %v21107_v39  ;;  %24017 = vst [vmem:[#allocation52_spill] sm:$0xff] %v21119_v45  ;;  %v21133_v3 = vpack.c.bf16 %v24025_v34, %v24024_v22  ;;  %v24027_v19 = vld [vmem:[#allocation73_spill] sm:$0xff]  ;;  %v24028_v47 = vld [vmem:[#allocation74_spill] sm:$0xff] }
 0x118   :  { %24020 = vst [vmem:[#allocation58_spill] sm:$0xff] %v21123_v9  ;;  %24023 = vst [vmem:[#allocation59_spill] sm:$0xff] %v21129_v46  ;;  %v21139_v63 = vpack.c.bf16 %v24028_v47, %v24027_v19  ;;  %v24030_v62 = vld [vmem:[#allocation75_spill] sm:$0xff]  ;;  %v24037_v38 = vld [vmem:[#allocation80_spill] sm:$0xff]  ;;  %v21161_v23 = vpack.c.bf16 %v24040_v51, %v24039_v55  ;;  %v21183_v0 = vpack.c.bf16 %v24051_v42, %v24050_v35 }
 0x119   :  { %24013 = vst [vmem:[#allocation118_spill] sm:$0xff] %v21111_v25  ;;  %24014 = vst [vmem:[#allocation119_spill] sm:$0xff] %v21113_v20  ;;  %15958 = vmatpush1.bf16.msra.mxu0 %v21111_v25  ;;  %v24031_v25 = vld [vmem:[#allocation76_spill] sm:$0xff] }
 0x11a   :  { %16150 = vmatpush1.bf16.msra.mxu1 %v21113_v20  ;;  %24026 = vst [vmem:[#allocation61_spill] sm:$0xff] %v21133_v3  ;;  %15960 = vmatprep.subr.bf16.mxu0 %v21119_v45  ;;  %24029 = vst [vmem:[#allocation62_spill] sm:$0xff] %v21139_v63  ;;  %v21143_v39 = vpack.c.bf16 %v24031_v25, %v24030_v62  ;;  %v24033_v20 = vld [vmem:[#allocation77_spill] sm:$0xff]  ;;  %v24034_v45 = vld [vmem:[#allocation78_spill] sm:$0xff] }
 0x11b   :  { %16152 = vmatprep.subr.bf16.mxu1 %v21123_v9  ;;  %v21151_v43 = vpack.c.bf16 %v24034_v45, %v24033_v20  ;;  %v24036_v9 = vld [vmem:[#allocation79_spill] sm:$0xff]  ;;  %24041 = vst [vmem:[#allocation73_spill] sm:$0xff] %v21161_v23  ;;  %24052 = vst [vmem:[#allocation77_spill] sm:$0xff] %v21183_v0 }
 0x11c   :  { %24032 = vst [vmem:[#allocation65_spill] sm:$0xff] %v21143_v39  ;;  %2211 = vmatmul.mubr.f32.vlgmr.msra.gmra.mrb[0].mxu0 %v23680_v15  ;;  %v21155_v56 = vpack.c.bf16 %v24037_v38, %v24036_v9 }
 0x11d   :  { %3053 = vmatmul.mubr.f32.vlgmr.msra.gmra.mrb[0].mxu1 %v23680_v15  ;;  %15962 = vmatpush1.bf16.msra.mxu0 %v21129_v46  ;;  %24035 = vst [vmem:[#allocation67_spill] sm:$0xff] %v21151_v43  ;;  %v24042_v46 = vld [vmem:[#allocation87_spill] sm:$0xff] }
 0x11e   :  { %16154 = vmatpush1.bf16.msra.mxu1 %v21133_v3  ;;  %24038 = vst [vmem:[#allocation68_spill] sm:$0xff] %v21155_v56  ;;  %15964 = vmatprep.subr.bf16.mxu0 %v21139_v63  ;;  %v21165_v8 = vpack.c.bf16 %v24042_v46, %v20483_v40  ;;  %v24044_v3 = vld [vmem:[#allocation88_spill] sm:$0xff]  ;;  %v24045_v63 = vld [vmem:[#allocation89_spill] sm:$0xff] }
 0x11f   :  { %16156 = vmatprep.subr.bf16.mxu1 %v21143_v39  ;;  %2345 = vmatprep.mubr.f32.mxu0 %v23680_v15  ;;  %v21173_v7 = vpack.c.bf16 %v24045_v63, %v24044_v3  ;;  %v24047_v39 = vld [vmem:[#allocation8_spill] sm:$0xff] }
 0x120   :  { %24043 = vst [vmem:[#allocation74_spill] sm:$0xff] %v21165_v8  ;;  %3187 = vmatprep.mubr.f32.mxu1 %v23680_v15  ;;  %v21177_v4 = vpack.c.bf16 %v24048_v13, %v24047_v39 }
 0x121   :  { %15966 = vmatpush1.bf16.msra.mxu0 %v21151_v43  ;;  %24046 = vst [vmem:[#allocation75_spill] sm:$0xff] %v21173_v7  ;;  %v24054_v43 = vld [vmem:[#allocation14_spill] sm:$0xff] }
 0x122   :  { %16158 = vmatpush1.bf16.msra.mxu1 %v21155_v56  ;;  %24049 = vst [vmem:[#allocation76_spill] sm:$0xff] %v21177_v4  ;;  %15968 = vmatprep.subr.bf16.mxu0 %v21161_v23  ;;  %v21187_v2 = vpack.c.bf16 %v24054_v43, %v24053_v41  ;;  %v24056_v56 = vld [vmem:[#allocation15_spill] sm:$0xff]  ;;  %v21197_v23 = vpack.c.bf16 %v20605_v24, %v20592_v12 }
 0x123   :  { %16160 = vmatprep.subr.bf16.mxu1 %v21165_v8  ;;  %v21193_v61 = vpack.c.bf16 %v24056_v56, %v20568_v59  ;;  %v21203_v8 = vpack.c.bf16 %v20643_v44, %v20617_v16 }
 0x124   :  { %24055 = vst [vmem:[#allocation78_spill] sm:$0xff] %v21187_v2  ;;  %24058 = vst [vmem:[#allocation80_spill] sm:$0xff] %v21197_v23 }
 0x125   :  { %15970 = vmatpush1.bf16.msra.mxu0 %v21173_v7  ;;  %24057 = vst [vmem:[#allocation79_spill] sm:$0xff] %v21193_v61  ;;  %24059 = vst [vmem:[#allocation81_spill] sm:$0xff] %v21203_v8  ;;  %v21207_v7 = vpack.c.bf16 %v20717_v30, %v20660_v50 }
 0x126   :  { %16162 = vmatpush1.bf16.msra.mxu1 %v21177_v4  ;;  %15972 = vmatprep.subr.bf16.mxu0 %v21183_v0  ;;  %v24061_v4 = vld [vmem:[#allocation26_spill] sm:$0xff]  ;;  %v21217_v0 = vpack.c.bf16 %v20848_v21, %v20832_v53  ;;  %v24070_v53 = vld [vmem:[#allocation39_spill] sm:$0xff] }
 0x127   :  { %16164 = vmatprep.subr.bf16.mxu1 %v21187_v2  ;;  %24060 = vst [vmem:[#allocation82_spill] sm:$0xff] %v21207_v7  ;;  %v21213_v24 = vpack.c.bf16 %v20802_v54, %v24061_v4  ;;  %v24064_v2 = vld [vmem:[#allocation34_spill] sm:$0xff] }
 0x128   :  { %24063 = vst [vmem:[#allocation88_spill] sm:$0xff] %v21217_v0  ;;  %v21223_v30 = vpack.c.bf16 %v20892_v57, %v24064_v2  ;;  %v24074_v57 = vld [vmem:[#allocation43_spill] sm:$0xff] }
 0x129   :  { %15974 = vmatpush1.bf16.msra.mxu0 %v21193_v61  ;;  %24062 = vst [vmem:[#allocation87_spill] sm:$0xff] %v21213_v24  ;;  %v24066_v61 = vld [vmem:[#allocation37_spill] sm:$0xff] }
 0x12a   :  { %16166 = vmatpush1.bf16.msra.mxu1 %v21197_v23  ;;  %15976 = vmatprep.subr.bf16.mxu0 %v21203_v8  ;;  %24065 = vst [vmem:[#allocation89_spill] sm:$0xff] %v21223_v30  ;;  %v21227_v50 = vpack.c.bf16 %v24066_v61, %v20897_v28  ;;  %v24068_v23 = vld [vmem:[#allocation38_spill] sm:$0xff]  ;;  %v24071_v8 = vld [vmem:[#allocation41_spill] sm:$0xff] }
 0x12b   :  { %16168 = vmatprep.subr.bf16.mxu1 %v21207_v7  ;;  %v21233_v21 = vpack.c.bf16 %v20915_v5, %v24068_v23  ;;  %v21237_v54 = vpack.c.bf16 %v24071_v8, %v24070_v53  ;;  %v24073_v7 = vld [vmem:[#allocation42_spill] sm:$0xff] }
 0x12c   :  { %24067 = vst [vmem:[#allocation8_spill] sm:$0xff] %v21227_v50  ;;  %v21243_v61 = vpack.c.bf16 %v24074_v57, %v24073_v7 }
 0x12d   :  { %15978 = vmatpush1.bf16.msra.mxu0 %v21213_v24  ;;  %24069 = vst [vmem:[#allocation10_spill] sm:$0xff] %v21233_v21  ;;  %24072 = vst [vmem:[#allocation11_spill] sm:$0xff] %v21237_v54  ;;  %v21247_v24 = vpack.c.bf16 %v20951_v36, %v20946_v49 }
 0x12e   :  { %16170 = vmatpush1.bf16.msra.mxu1 %v21217_v0  ;;  %15980 = vmatprep.subr.bf16.mxu0 %v21223_v30  ;;  %24075 = vst [vmem:[#allocation12_spill] sm:$0xff] %v21243_v61  ;;  %v21253_v0 = vpack.c.bf16 %v20710_v32, %v20696_v27  ;;  %v21257_v30 = vpack.c.bf16 %v20727_v48, %v20722_v10  ;;  %v24083_v10 = vld [vmem:[#allocation9_spill] sm:$0xff] }
 0x12f   :  { %16172 = vmatprep.subr.bf16.mxu1 %v21227_v50  ;;  %24076 = vst [vmem:[#allocation13_spill] sm:$0xff] %v21247_v24  ;;  %v21263_v50 = vpack.c.bf16 %v20755_v18, %v20750_v58  ;;  %v21273_v27 = vpack.c.bf16 %v20778_v17, %v20773_v60  ;;  %v21277_v32 = vpack.c.bf16 %v20792_v33, %v20787_v31  ;;  %v24084_v48 = vld [vmem:[#allocation17_spill] sm:$0xff]  ;;  %v24085_v58 = vld [vmem:[#allocation18_spill] sm:$0xff]  ;;  %v24086_v18 = vld [vmem:[#allocation19_spill] sm:$0xff] }
 0x130   :  { %24077 = vst [vmem:[#allocation14_spill] sm:$0xff] %v21253_v0  ;;  %24078 = vst [vmem:[#allocation15_spill] sm:$0xff] %v21257_v30  ;;  %v24089_v60 = vld [vmem:[#allocation23_spill] sm:$0xff]  ;;  %v24090_v17 = vld [vmem:[#allocation24_spill] sm:$0xff] }
 0x131   :  { %15982 = vmatpush1.bf16.msra.mxu0 %v21233_v21  ;;  %24079 = vst [vmem:[#allocation26_spill] sm:$0xff] %v21263_v50  ;;  %v21267_v21 = vpack.c.bf16 %v20768_v37, %v20760_v6  ;;  %24081 = vst [vmem:[#allocation38_spill] sm:$0xff] %v21273_v27  ;;  %v24087_v6 = vld [vmem:[#allocation20_spill] sm:$0xff]  ;;  %v24088_v37 = vld [vmem:[#allocation22_spill] sm:$0xff] }
 0x132   :  { %16174 = vmatpush1.bf16.msra.mxu1 %v21237_v54  ;;  %15984 = vmatprep.subr.bf16.mxu0 %v21243_v61  ;;  %24082 = vst [vmem:[#allocation39_spill] sm:$0xff] %v21277_v32  ;;  %v24091_v31 = vld [vmem:[#allocation25_spill] sm:$0xff]  ;;  %v24100_v61 = vld [vmem:[#allocation48_spill] sm:$0xff]  ;;  %v24101_v54 = vld [vmem:[#allocation50_spill] sm:$0xff] }
 0x133   :  { %16176 = vmatprep.subr.bf16.mxu1 %v21247_v24  ;;  %24080 = vst [vmem:[#allocation34_spill] sm:$0xff] %v21267_v21  ;;  %v24092_v33 = vld [vmem:[#allocation29_spill] sm:$0xff]  ;;  %v24099_v24 = vld [vmem:[#allocation47_spill] sm:$0xff] }
 0x135   :  { %15986 = vmatpush1.bf16.msra.mxu0 %v21253_v0  ;;  %v24098_v0 = vld [vmem:[#allocation46_spill] sm:$0xff] }
 0x136   :  { %16178 = vmatpush1.bf16.msra.mxu1 %v21257_v30  ;;  %15988 = vmatprep.subr.bf16.mxu0 %v21263_v50  ;;  %v24096_v50 = vld [vmem:[#allocation36_spill] sm:$0xff] }
 0x137   :  { %16180 = vmatprep.subr.bf16.mxu1 %v21267_v21  ;;  %v24095_v21 = vld [vmem:[#allocation32_spill] sm:$0xff] }
 0x138   :  { %v24097_v30 = vld [vmem:[#allocation40_spill] sm:$0xff] }
 0x139   :  { %15990 = vmatpush1.bf16.msra.mxu0 %v21273_v27  ;;  %v24094_v27 = vld [vmem:[#allocation31_spill] sm:$0xff] }
 0x13a   :  { %16182 = vmatpush1.bf16.msra.mxu1 %v21277_v32  ;;  %15992 = vmatprep.subr.bf16.mxu0 %v24083_v10  ;;  %v24093_v32 = vld [vmem:[#allocation30_spill] sm:$0xff] }
 0x13b   :  { %16184 = vmatprep.subr.bf16.mxu1 %v24084_v48 }
 0x13c   :  { %2346 = vmatmul.mubr.f32.vlgmr.msra.gmra.mrb[0].mxu0 %v23680_v15 }
 0x13d   :  { %3188 = vmatmul.mubr.f32.vlgmr.msra.gmra.mrb[0].mxu1 %v23680_v15  ;;  %15994 = vmatpush1.bf16.msra.mxu0 %v24085_v58 }
 0x13e   :  { %16186 = vmatpush1.bf16.msra.mxu1 %v24086_v18  ;;  %15996 = vmatprep.subr.bf16.mxu0 %v24087_v6 }
 0x13f   :  { %16188 = vmatprep.subr.bf16.mxu1 %v24088_v37  ;;  %2448 = vmatprep.mubr.f32.mxu0 %v23680_v15 }
 0x140   :  { %3290 = vmatprep.mubr.f32.mxu1 %v23680_v15 }
 0x141   :  { %15998 = vmatpush1.bf16.msra.mxu0 %v24089_v60 }
 0x142   :  { %16190 = vmatpush1.bf16.msra.mxu1 %v24090_v17  ;;  %16000 = vmatprep.subr.bf16.mxu0 %v24091_v31  ;;  %v24102_v31 = vld [vmem:[#allocation53_spill] sm:$0xff] }
 0x143   :  { %16192 = vmatprep.subr.bf16.mxu1 %v24092_v33  ;;  %v24103_v33 = vld [vmem:[#allocation54_spill] sm:$0xff] }
 0x145   :  { %16002 = vmatpush1.bf16.msra.mxu0 %v24093_v32  ;;  %v24104_v32 = vld [vmem:[#allocation55_spill] sm:$0xff] }
 0x146   :  { %16194 = vmatpush1.bf16.msra.mxu1 %v24094_v27  ;;  %16004 = vmatprep.subr.bf16.mxu0 %v24095_v21  ;;  %v24105_v27 = vld [vmem:[#allocation56_spill] sm:$0xff]  ;;  %v24106_v21 = vld [vmem:[#allocation57_spill] sm:$0xff] }
 0x147   :  { %16196 = vmatprep.subr.bf16.mxu1 %v24096_v50  ;;  %v24107_v50 = vld [vmem:[#allocation60_spill] sm:$0xff] }
 0x149   :  { %16006 = vmatpush1.bf16.msra.mxu0 %v24097_v30  ;;  %v24108_v30 = vld [vmem:[#allocation63_spill] sm:$0xff] }
 0x14a   :  { %16198 = vmatpush1.bf16.msra.mxu1 %v24098_v0  ;;  %16008 = vmatprep.subr.bf16.mxu0 %v24099_v24  ;;  %v24109_v0 = vld [vmem:[#allocation64_spill] sm:$0xff]  ;;  %v24110_v24 = vld [vmem:[#allocation66_spill] sm:$0xff] }
 0x14b   :  { %16200 = vmatprep.subr.bf16.mxu1 %v24100_v61  ;;  %v24111_v61 = vld [vmem:[#allocation69_spill] sm:$0xff] }
 0x14d   :  { %16010 = vmatpush1.bf16.msra.mxu0 %v24101_v54  ;;  %v24112_v54 = vld [vmem:[#allocation70_spill] sm:$0xff] }
 0x14e   :  { %16202 = vmatpush1.bf16.msra.mxu1 %v24102_v31  ;;  %16012 = vmatprep.subr.bf16.mxu0 %v24103_v33  ;;  %v24113_v33 = vand.u32 4294901760, %v24015_v52  ;;  %v24124_v52 = vand.u32 4294901760, %v24024_v22 }
 0x14f   :  { %16204 = vmatprep.subr.bf16.mxu1 %v24104_v32  ;;  %v24114_v32 = vand.u32 4294901760, %v24016_v29  ;;  %v24125_v29 = vand.u32 4294901760, %v24025_v34  ;;  %v24136_v34 = vand.u32 4294901760, %v24036_v9  ;;  %v24149_v9 = vand.u32 4294901760, %v24048_v13 }
 0x150   :  { %v24157_v13 = vand.u32 4294901760, %v20568_v59  ;;  %v24167_v59 = vld [vmem:[#allocation94_spill] sm:$0xff] }
 0x151   :  { %16014 = vmatpush1.bf16.msra.mxu0 %v24105_v27  ;;  %v21321_v31 = vpack.c.bf16 %v24114_v32, %v24113_v33  ;;  %v21341_v32 = vpack.c.bf16 %v24125_v29, %v24124_v52  ;;  %v24151_v29 = vand.u32 4294901760, %v24050_v35  ;;  %v24161_v35 = vld [vmem:[#allocation93_spill] sm:$0xff] }
 0x152   :  { %16206 = vmatpush1.bf16.msra.mxu1 %v24106_v21  ;;  %16016 = vmatprep.subr.bf16.mxu0 %v24107_v50  ;;  %v24116_v21 = vand.u32 4294901760, %v24018_v1  ;;  %v24117_v50 = vand.u32 4294901760, %v24019_v14  ;;  %v24130_v14 = vand.u32 4294901760, %v24030_v62  ;;  %v24140_v62 = vand.u32 4294901760, %v24040_v51 }
 0x153   :  { %16208 = vmatprep.subr.bf16.mxu1 %v24108_v30  ;;  %24115 = vst [vmem:[#allocation41_spill] sm:$0xff] %v21321_v31  ;;  %v24119_v30 = vld [vmem:[#allocation71_spill] sm:$0xff]  ;;  %24126 = vst [vmem:[#allocation9_spill] sm:$0xff] %v21341_v32  ;;  %v24146_v51 = vand.u32 4294901760, %v24045_v63  ;;  %v24155_v63 = vand.u32 4294901760, %v24054_v43  ;;  %v24165_v43 = vand.u32 4294901760, %v20643_v44 }
 0x154   :  { %v21327_v27 = vpack.c.bf16 %v24117_v50, %v24116_v21  ;;  %v24127_v50 = vand.u32 4294901760, %v24027_v19  ;;  %v24128_v21 = vand.u32 4294901760, %v24028_v47  ;;  %v24139_v47 = vand.u32 4294901760, %v24039_v55 }
 0x155   :  { %16018 = vmatpush1.bf16.msra.mxu0 %v24109_v0  ;;  %v24120_v0 = vld [vmem:[#allocation72_spill] sm:$0xff]  ;;  %v24145_v55 = vand.u32 4294901760, %v24044_v3  ;;  %v24154_v3 = vand.u32 4294901760, %v24053_v41  ;;  %v24164_v41 = vand.u32 4294901760, %v20617_v16 }
 0x156   :  { %16210 = vmatpush1.bf16.msra.mxu1 %v24110_v24  ;;  %16020 = vmatprep.subr.bf16.mxu0 %v24111_v61  ;;  %24118 = vst [vmem:[#allocation42_spill] sm:$0xff] %v21327_v27  ;;  %v24121_v61 = vand.u32 4294901760, %v24021_v26  ;;  %v21349_v1 = vpack.c.bf16 %v24128_v21, %v24127_v50  ;;  %v24133_v26 = vand.u32 4294901760, %v24033_v20  ;;  %v21379_v33 = vpack.c.bf16 %v24140_v62, %v24139_v47  ;;  %v24176_v16 = vld [vmem:[#allocation28_spill] sm:$0xff] }
 0x157   :  { %16212 = vmatprep.subr.bf16.mxu1 %v24112_v54  ;;  %v24122_v54 = vand.u32 4294901760, %v24022_v11  ;;  %v24134_v11 = vand.u32 4294901760, %v24034_v45  ;;  %v24142_v20 = vand.u32 4294901760, %v20483_v40  ;;  %v24143_v45 = vand.u32 4294901760, %v24042_v46 }
 0x158   :  { %24129 = vst [vmem:[#allocation17_spill] sm:$0xff] %v21349_v1  ;;  %24141 = vst [vmem:[#allocation22_spill] sm:$0xff] %v21379_v33  ;;  %v24148_v40 = vand.u32 4294901760, %v24047_v39  ;;  %v24152_v50 = vand.u32 4294901760, %v24051_v42  ;;  %v24158_v39 = vand.u32 4294901760, %v24056_v56  ;;  %v24160_v42 = vand.u32 4294901760, %v20592_v12 }
 0x159   :  { %16022 = vmatpush1.bf16.msra.mxu0 %v24119_v30  ;;  %v21335_v24 = vpack.c.bf16 %v24122_v54, %v24121_v61  ;;  %v24131_v61 = vand.u32 4294901760, %v24031_v25  ;;  %v21365_v22 = vpack.c.bf16 %v24134_v11, %v24133_v26  ;;  %v24137_v25 = vand.u32 4294901760, %v24037_v38 }
 0x15a   :  { %16214 = vmatpush1.bf16.msra.mxu1 %v24120_v0  ;;  %16024 = vmatprep.subr.bf16.mxu0 %v21321_v31  ;;  %v21385_v52 = vpack.c.bf16 %v24143_v45, %v24142_v20  ;;  %v21395_v38 = vpack.c.bf16 %v24146_v51, %v24145_v55  ;;  %v21401_v46 = vpack.c.bf16 %v24149_v9, %v24148_v40  ;;  %v24162_v26 = vand.u32 4294901760, %v24161_v35  ;;  %v24173_v20 = vld [vmem:[#allocation27_spill] sm:$0xff]  ;;  %v24178_v51 = vld [vmem:[#allocation33_spill] sm:$0xff] }
 0x15b   :  { %24123 = vst [vmem:[#allocation43_spill] sm:$0xff] %v21335_v24  ;;  %16216 = vmatprep.subr.bf16.mxu1 %v21327_v27  ;;  %v21355_v54 = vpack.c.bf16 %v24131_v61, %v24130_v14  ;;  %24135 = vst [vmem:[#allocation19_spill] sm:$0xff] %v21365_v22  ;;  %v21371_v19 = vpack.c.bf16 %v24137_v25, %v24136_v34  ;;  %v21409_v21 = vpack.c.bf16 %v24152_v50, %v24151_v29  ;;  %v24169_v25 = vld [vmem:[#allocation21_spill] sm:$0xff]  ;;  %v24182_v50 = vld [vmem:[#allocation35_spill] sm:$0xff] }
 0x15c   :  { %2449 = vmatmul.mubr.f32.vlgmr.msra.gmra.mrb[0].mxu0 %v23680_v15  ;;  %24144 = vst [vmem:[#allocation23_spill] sm:$0xff] %v21385_v52  ;;  %24147 = vst [vmem:[#allocation24_spill] sm:$0xff] %v21395_v38  ;;  %v21415_v14 = vpack.c.bf16 %v24155_v63, %v24154_v3  ;;  %v21423_v61 = vpack.c.bf16 %v24158_v39, %v24157_v13  ;;  %v21429_v11 = vpack.c.bf16 %v24162_v26, %v24160_v42  ;;  %v24186_v13 = vld [vmem:[#allocation37_spill] sm:$0xff] }
 0x15d   :  { %24132 = vst [vmem:[#allocation18_spill] sm:$0xff] %v21355_v54  ;;  %3291 = vmatmul.mubr.f32.vlgmr.msra.gmra.mrb[0].mxu1 %v23680_v15  ;;  %16026 = vmatpush1.bf16.msra.mxu0 %v21335_v24  ;;  %24138 = vst [vmem:[#allocation20_spill] sm:$0xff] %v21371_v19  ;;  %v21437_v34 = vpack.c.bf16 %v24165_v43, %v24164_v41  ;;  %v24168_v56 = vand.u32 4294901760, %v24167_v59  ;;  %v24170_v47 = vand.u32 4294901760, %v24169_v25  ;;  %v24172_v12 = vand.u32 4294901760, %v24061_v4 }
 0x15e   :  { %16218 = vmatpush1.bf16.msra.mxu1 %v21341_v32  ;;  %16028 = vmatprep.subr.bf16.mxu0 %v21349_v1  ;;  %24150 = vst [vmem:[#allocation120_spill] sm:$0xff] %v21401_v46  ;;  %24153 = vst [vmem:[#allocation121_spill] sm:$0xff] %v21409_v21  ;;  %v24174_v45 = vand.u32 4294901760, %v24173_v20  ;;  %v24177_v44 = vand.u32 4294901760, %v24176_v16  ;;  %v24179_v40 = vand.u32 4294901760, %v24178_v51  ;;  %v24181_v29 = vand.u32 4294901760, %v24064_v2 }
 0x15f   :  { %16220 = vmatprep.subr.bf16.mxu1 %v21355_v54  ;;  %2615 = vmatprep.mubr.f32.mxu0 %v23680_v15  ;;  %24156 = vst [vmem:[#allocation122_spill] sm:$0xff] %v21415_v14  ;;  %24159 = vst [vmem:[#allocation123_spill] sm:$0xff] %v21423_v61  ;;  %v21443_v62 = vpack.c.bf16 %v24170_v47, %v24168_v56  ;;  %v24183_v3 = vand.u32 4294901760, %v24182_v50  ;;  %v24185_v4 = vand.u32 4294901760, %v20897_v28  ;;  %v24187_v39 = vand.u32 4294901760, %v24186_v13  ;;  %v24208_v20 = vld [vmem:[#allocation29_spill] sm:$0xff] }
 0x160   :  { %3457 = vmatprep.mubr.f32.mxu1 %v23680_v15  ;;  %24163 = vst [vmem:[#allocation93_spill] sm:$0xff] %v21429_v11  ;;  %24166 = vst [vmem:[#allocation124_spill] sm:$0xff] %v21437_v34  ;;  %v21451_v55 = vpack.c.bf16 %v24174_v45, %v24172_v12  ;;  %v21457_v9 = vpack.c.bf16 %v24179_v40, %v24177_v44  ;;  %v24189_v35 = vand.u32 4294901760, %v24068_v23  ;;  %v24190_v26 = vand.u32 4294901760, %v20915_v5  ;;  %v24207_v12 = vld [vmem:[#allocation25_spill] sm:$0xff]  ;;  %v24209_v45 = vld [vmem:[#allocation30_spill] sm:$0xff] }
 0x161   :  { %16030 = vmatpush1.bf16.msra.mxu0 %v21365_v22  ;;  %24171 = vst [vmem:[#allocation94_spill] sm:$0xff] %v21443_v62  ;;  %v21465_v63 = vpack.c.bf16 %v24183_v3, %v24181_v29  ;;  %v21471_v42 = vpack.c.bf16 %v24187_v39, %v24185_v4  ;;  %v24192_v2 = vand.u32 4294901760, %v24070_v53  ;;  %v24193_v43 = vand.u32 4294901760, %v24071_v8  ;;  %v24201_v53 = vld [vmem:[#allocation102_spill] sm:$0xff]  ;;  %v24204_v8 = vld [vmem:[#allocation105_spill] sm:$0xff]  ;;  %v24210_v16 = vld [vmem:[#allocation31_spill] sm:$0xff] }
 0x162   :  { %16222 = vmatpush1.bf16.msra.mxu1 %v21371_v19  ;;  %16032 = vmatprep.subr.bf16.mxu0 %v21379_v33  ;;  %24175 = vst [vmem:[#allocation21_spill] sm:$0xff] %v21451_v55  ;;  %24180 = vst [vmem:[#allocation27_spill] sm:$0xff] %v21457_v9  ;;  %v21479_v41 = vpack.c.bf16 %v24190_v26, %v24189_v35  ;;  %v24195_v28 = vand.u32 4294901760, %v24073_v7  ;;  %v24196_v56 = vand.u32 4294901760, %v24074_v57  ;;  %v24198_v5 = vand.u32 4294901760, %v20946_v49  ;;  %v24202_v7 = vld [vmem:[#allocation103_spill] sm:$0xff] }
 0x163   :  { %16224 = vmatprep.subr.bf16.mxu1 %v21385_v52  ;;  %24184 = vst [vmem:[#allocation28_spill] sm:$0xff] %v21465_v63  ;;  %24188 = vst [vmem:[#allocation33_spill] sm:$0xff] %v21471_v42  ;;  %v21485_v59 = vpack.c.bf16 %v24193_v43, %v24192_v2  ;;  %v24199_v23 = vand.u32 4294901760, %v20951_v36  ;;  %v24203_v57 = vld [vmem:[#allocation104_spill] sm:$0xff]  ;;  %v24205_v49 = vld [vmem:[#allocation106_spill] sm:$0xff] }
 0x164   :  { %24191 = vst [vmem:[#allocation35_spill] sm:$0xff] %v21479_v41  ;;  %v21493_v25 = vpack.c.bf16 %v24196_v56, %v24195_v28  ;;  %v24206_v36 = vld [vmem:[#allocation107_spill] sm:$0xff]  ;;  %v24211_v44 = vld [vmem:[#allocation32_spill] sm:$0xff]  ;;  %v24214_v29 = vld [vmem:[#allocation46_spill] sm:$0xff] }
 0x165   :  { %16034 = vmatpush1.bf16.msra.mxu0 %v21395_v38  ;;  %24194 = vst [vmem:[#allocation37_spill] sm:$0xff] %v21485_v59  ;;  %v21499_v47 = vpack.c.bf16 %v24199_v23, %v24198_v5  ;;  %v24212_v51 = vld [vmem:[#allocation36_spill] sm:$0xff]  ;;  %v24215_v50 = vld [vmem:[#allocation47_spill] sm:$0xff]  ;;  %v24217_v4 = vld [vmem:[#allocation50_spill] sm:$0xff] }
 0x166   :  { %16226 = vmatpush1.bf16.msra.mxu1 %v21401_v46  ;;  %16036 = vmatprep.subr.bf16.mxu0 %v21409_v21  ;;  %24197 = vst [vmem:[#allocation125_spill] sm:$0xff] %v21493_v25  ;;  %v24213_v40 = vld [vmem:[#allocation40_spill] sm:$0xff]  ;;  %v24218_v13 = vld [vmem:[#allocation53_spill] sm:$0xff]  ;;  %v24219_v39 = vld [vmem:[#allocation54_spill] sm:$0xff] }
 0x167   :  { %16228 = vmatprep.subr.bf16.mxu1 %v21415_v14  ;;  %24200 = vst [vmem:[#allocation126_spill] sm:$0xff] %v21499_v47  ;;  %v24216_v3 = vld [vmem:[#allocation48_spill] sm:$0xff]  ;;  %v24220_v35 = vld [vmem:[#allocation55_spill] sm:$0xff]  ;;  %v24222_v2 = vld [vmem:[#allocation57_spill] sm:$0xff] }
 0x168   :  { %v24221_v26 = vld [vmem:[#allocation56_spill] sm:$0xff]  ;;  %v24224_v28 = vld [vmem:[#allocation63_spill] sm:$0xff]  ;;  %v24226_v5 = vld [vmem:[#allocation66_spill] sm:$0xff] }
 0x169   :  { %16038 = vmatpush1.bf16.msra.mxu0 %v21423_v61  ;;  %v24223_v43 = vld [vmem:[#allocation60_spill] sm:$0xff]  ;;  %v24227_v23 = vld [vmem:[#allocation69_spill] sm:$0xff] }
 0x16a   :  { %16230 = vmatpush1.bf16.msra.mxu1 %v21429_v11  ;;  %16040 = vmatprep.subr.bf16.mxu0 %v21437_v34  ;;  %v24225_v56 = vld [vmem:[#allocation64_spill] sm:$0xff] }
 0x16b   :  { %16232 = vmatprep.subr.bf16.mxu1 %v21443_v62 }
 0x16d   :  { %16042 = vmatpush1.bf16.msra.mxu0 %v21451_v55 }
 0x16e   :  { %16234 = vmatpush1.bf16.msra.mxu1 %v21457_v9  ;;  %16044 = vmatprep.subr.bf16.mxu0 %v21465_v63 }
 0x16f   :  { %16236 = vmatprep.subr.bf16.mxu1 %v21471_v42 }
 0x171   :  { %16046 = vmatpush1.bf16.msra.mxu0 %v21479_v41 }
 0x172   :  { %16238 = vmatpush1.bf16.msra.mxu1 %v21485_v59  ;;  %16048 = vmatprep.subr.bf16.mxu0 %v21493_v25 }
 0x173   :  { %16240 = vmatprep.subr.bf16.mxu1 %v21499_v47  ;;  %v55_v47 = vld [vmem:[%s23197_s3] sm:$0xf] }
 0x175   :  { %16050 = vmatpush1.bf16.msra.mxu0 %v24201_v53 }
 0x176   :  { %16242 = vmatpush1.bf16.msra.mxu1 %v24202_v7  ;;  %16052 = vmatprep.subr.bf16.mxu0 %v24203_v57  ;;  %v57_v57 = vlaneseq }
 0x177   :  { %16244 = vmatprep.subr.bf16.mxu1 %v24204_v8  ;;  %v24230_v8 = vld [vmem:[#allocation84_spill] sm:$0xff] }
 0x178   :  { %v58_v7 = vshrl.u32 %v57_v57, 7 }
 0x179   :  { %16054 = vmatpush1.bf16.msra.mxu0 %v24205_v49  ;;  %v24229_v49 = vld [vmem:[#allocation83_spill] sm:$0xff] }
 0x17a   :  { %16246 = vmatpush1.bf16.msra.mxu1 %v24206_v36  ;;  %16056 = vmatprep.subr.bf16.mxu0 %v24083_v10  ;;  %v24228_v36 = vld [vmem:[#allocation70_spill] sm:$0xff]  ;;  %v59_v53 = vsub.s32 0, %v58_v7  ;;  %v63_v25 = vsub.s32 1, %v58_v7  ;;  %v71_v9 = vsub.s32 3, %v58_v7  ;;  %v67_v61 = vsub.s32 2, %v58_v7 }
 0x17b   :  { %16248 = vmatprep.subr.bf16.mxu1 %v24084_v48 }
 0x17c   :  { %2616 = vmatmul.mubr.f32.vlgmr.msra.gmra.mrb[0].mxu0 %v23680_v15  ;;  %v21588_v59 = vrot.slane %v55_v47, %v59_v53  ;;  %v21590_v41 = vrot.slane %v55_v47, %v63_v25  ;;  %v21594_v11 = vrot.slane %v55_v47, %v71_v9  ;;  %v21597_v25 = vrot.slane %v55_v47, %v67_v61 }
 0x17d   :  { %3458 = vmatmul.mubr.f32.vlgmr.msra.gmra.mrb[0].mxu1 %v23680_v15  ;;  %16058 = vmatpush1.bf16.msra.mxu0 %v24085_v58 }
 0x17e   :  { %16250 = vmatpush1.bf16.msra.mxu1 %v24086_v18  ;;  %16060 = vmatprep.subr.bf16.mxu0 %v24087_v6  ;;  %24231 = vst [vmem:[#allocation25_spill] sm:$0xff] %v21588_v59 }
 0x17f   :  { %16252 = vmatprep.subr.bf16.mxu1 %v24088_v37  ;;  %2718 = vmatprep.mubr.f32.mxu0 %v23680_v15 }
 0x180   :  { %3560 = vmatprep.mubr.f32.mxu1 %v23680_v15 }
 0x181   :  { %16062 = vmatpush1.bf16.msra.mxu0 %v24089_v60 }
 0x182   :  { %16254 = vmatpush1.bf16.msra.mxu1 %v24090_v17  ;;  %16064 = vmatprep.subr.bf16.mxu0 %v24207_v12 }
 0x183   :  { %16256 = vmatprep.subr.bf16.mxu1 %v24208_v20 }
 0x185   :  { %16066 = vmatpush1.bf16.msra.mxu0 %v24209_v45 }
 0x186   :  { %16258 = vmatpush1.bf16.msra.mxu1 %v24210_v16  ;;  %16068 = vmatprep.subr.bf16.mxu0 %v24211_v44 }
 0x187   :  { %16260 = vmatprep.subr.bf16.mxu1 %v24212_v51 }
 0x189   :  { %16070 = vmatpush1.bf16.msra.mxu0 %v24213_v40 }
 0x18a   :  { %16262 = vmatpush1.bf16.msra.mxu1 %v24214_v29  ;;  %16072 = vmatprep.subr.bf16.mxu0 %v24215_v50 }
 0x18b   :  { %16264 = vmatprep.subr.bf16.mxu1 %v24216_v3 }
 0x18d   :  { %16074 = vmatpush1.bf16.msra.mxu0 %v24217_v4 }
 0x18e   :  { %16266 = vmatpush1.bf16.msra.mxu1 %v24218_v13  ;;  %16076 = vmatprep.subr.bf16.mxu0 %v24219_v39 }
 0x18f   :  { %16268 = vmatprep.subr.bf16.mxu1 %v24220_v35 }
 0x191   :  { %16078 = vmatpush1.bf16.msra.mxu0 %v24221_v26 }
 0x192   :  { %16270 = vmatpush1.bf16.msra.mxu1 %v24222_v2  ;;  %16080 = vmatprep.subr.bf16.mxu0 %v24223_v43 }
 0x193   :  { %16272 = vmatprep.subr.bf16.mxu1 %v24224_v28 }
 0x195   :  { %16082 = vmatpush1.bf16.msra.mxu0 %v24225_v56 }
 0x196   :  { %16274 = vmatpush1.bf16.msra.mxu1 %v24226_v5  ;;  %16084 = vmatprep.subr.bf16.mxu0 %v24227_v23 }
 0x197   :  { %16276 = vmatprep.subr.bf16.mxu1 %v24228_v36 }
 0x199   :  { %16086 = vmatpush1.bf16.msra.mxu0 %v24119_v30 }
 0x19a   :  { %16278 = vmatpush1.bf16.msra.mxu1 %v24120_v0  ;;  %16280 = vmatprep.subr.bf16.mxu0 %v24083_v10 }
 0x19b   :  { %16472 = vmatprep.subr.bf16.mxu1 %v24084_v48 }
 0x19c   :  { %2719 = vmatmul.mubr.f32.vlgmr.msra.gmra.mrb[0].mxu0 %v23680_v15 }
 0x19d   :  { %3561 = vmatmul.mubr.f32.vlgmr.msra.gmra.mrb[0].mxu1 %v23680_v15  ;;  %16282 = vmatpush1.bf16.msra.mxu0 %v24085_v58 }
 0x19e   :  { %16474 = vmatpush1.bf16.msra.mxu1 %v24086_v18  ;;  %16284 = vmatprep.subr.bf16.mxu0 %v24087_v6 }
 0x19f   :  { %16476 = vmatprep.subr.bf16.mxu1 %v24088_v37  ;;  %3696 = vmatprep.mubr.f32.mxu0 %v23680_v15 }
 0x1a0   :  { %4551 = vmatprep.mubr.f32.mxu1 %v23680_v15 }
 0x1a1   :  { %16286 = vmatpush1.bf16.msra.mxu0 %v24089_v60 }
 0x1a2   :  { %16478 = vmatpush1.bf16.msra.mxu1 %v24090_v17  ;;  %16288 = vmatprep.subr.bf16.mxu0 %v24207_v12 }
 0x1a3   :  { %16480 = vmatprep.subr.bf16.mxu1 %v24208_v20 }
 0x1a5   :  { %16290 = vmatpush1.bf16.msra.mxu0 %v24209_v45 }
 0x1a6   :  { %16482 = vmatpush1.bf16.msra.mxu1 %v24210_v16  ;;  %16292 = vmatprep.subr.bf16.mxu0 %v24211_v44 }
 0x1a7   :  { %16484 = vmatprep.subr.bf16.mxu1 %v24212_v51 }
 0x1a9   :  { %16294 = vmatpush1.bf16.msra.mxu0 %v24213_v40 }
 0x1aa   :  { %16486 = vmatpush1.bf16.msra.mxu1 %v24214_v29  ;;  %16296 = vmatprep.subr.bf16.mxu0 %v24215_v50 }
 0x1ab   :  { %16488 = vmatprep.subr.bf16.mxu1 %v24216_v3 }
 0x1ad   :  { %16298 = vmatpush1.bf16.msra.mxu0 %v24217_v4 }
 0x1ae   :  { %16490 = vmatpush1.bf16.msra.mxu1 %v24218_v13  ;;  %16300 = vmatprep.subr.bf16.mxu0 %v24219_v39 }
 0x1af   :  { %16492 = vmatprep.subr.bf16.mxu1 %v24220_v35 }
 0x1b1   :  { %16302 = vmatpush1.bf16.msra.mxu0 %v24221_v26 }
 0x1b2   :  { %16494 = vmatpush1.bf16.msra.mxu1 %v24222_v2  ;;  %16304 = vmatprep.subr.bf16.mxu0 %v24223_v43 }
 0x1b3   :  { %16496 = vmatprep.subr.bf16.mxu1 %v24224_v28 }
 0x1b5   :  { %16306 = vmatpush1.bf16.msra.mxu0 %v24225_v56 }
 0x1b6   :  { %16498 = vmatpush1.bf16.msra.mxu1 %v24226_v5  ;;  %16308 = vmatprep.subr.bf16.mxu0 %v24227_v23 }
 0x1b7   :  { %16500 = vmatprep.subr.bf16.mxu1 %v24228_v36 }
 0x1b9   :  { %16310 = vmatpush1.bf16.msra.mxu0 %v24119_v30 }
 0x1ba   :  { %16502 = vmatpush1.bf16.msra.mxu1 %v24120_v0  ;;  %16312 = vmatprep.subr.bf16.mxu0 %v24229_v49 }
 0x1bb   :  { %16504 = vmatprep.subr.bf16.mxu1 %v24230_v8 }
 0x26f   :  { %v2720_v42 = vpop.f32.mrb[0].mxu0 }
 0x270   :  { %v3562_v63 = vpop.f32.mrb[0].mxu1  ;;  %v18967_v55 = vadd.f32 %v2720_v42, %v21588_v59  ;;  %v2722_v49 = vpop.f32.mrb[1].mxu0 }
 0x271   :  { %v3564_v62 = vpop.f32.mrb[1].mxu1  ;;  %v18968_v8 = vadd.f32 %v2722_v49, %v21590_v41  ;;  %v18983_v21 = vadd.f32 %v3562_v63, %v21597_v25 }
 0x272   :  { %v15821_v57 = vmul.f32 -1.442695, %v18967_v55  ;;  %v18984_v53 = vadd.f32 %v3564_v62, %v21594_v11 }
 0x273   :  { %v15822_v34 = vmul.f32 -1.442695, %v18968_v8 }
 0x274   :  { %19355 = vpow2.f32 %v15821_v57  ;;  %v15823_v14 = vmul.f32 -1.442695, %v18984_v53 }
 0x275   :  { %19357 = vpow2.f32 %v15822_v34 }
 0x276   :  { %19359 = vpow2.f32 %v15823_v14 }
 0x277   :  { %19361 = vtanh.f32 %v18983_v21 }
 0x27e   :  { %v19356_v46 = vpop.eup %19355 }
 0x27f   :  { %v19358_v42 = vpop.eup %19357  ;;  %v3580_v59 = vadd.f32 1.0, %v19356_v46 }
 0x280   :  { %v3581_v49 = vadd.f32 1.0, %v19358_v42  ;;  %v19360_v55 = vpop.eup %19359 }
 0x281   :  { %19363 = vrcp.f32 %v3580_v59  ;;  %v19362_v9 = vpop.eup %19361  ;;  %v3582_v57 = vadd.f32 1.0, %v19360_v55  ;;  %v24233_v55 = vld [vmem:[#allocation86_spill] sm:$0xff] }
 0x282   :  { %19365 = vrcp.f32 %v3581_v49  ;;  %v24232_v49 = vld [vmem:[#allocation85_spill] sm:$0xff] }
 0x283   :  { %19367 = vrcp.f32 %v3582_v57  ;;  %v24238_v57 = vld [vmem:[#allocation16_spill] sm:$0xff] }
 0x28b   :  { %v19364_v8 = vpop.eup %19363 }
 0x28c   :  { %v19366_v7 = vpop.eup %19365  ;;  %v3591_v34 = vmul.f32 %v19364_v8, %v19362_v9  ;;  %v24234_v9 = vld [vmem:[#allocation90_spill] sm:$0xff]  ;;  %v24235_v8 = vld [vmem:[#allocation7_spill] sm:$0xff] }
 0x28d   :  { %v3590_v62 = vmul.f32 0.0, %v19366_v7  ;;  %v19368_v63 = vpop.eup %19367  ;;  %v24236_v7 = vld [vmem:[#allocation91_spill] sm:$0xff] }
 0x28f   :  { %v21600_v61 = vadd.f32 %v3591_v34, %v3590_v62  ;;  %v24237_v34 = vld [vmem:[#allocation92_spill] sm:$0xff]  ;;  %v24239_v62 = vld [vmem:[#allocation95_spill] sm:$0xff] }
 0x291   :  { %19369 = vtanh.f32 %v21600_v61 }
 0x29b   :  { %v19370_v47 = vpop.eup %19369 }
 0x29c   :  { %v3594_v46 = vmul.f32 %v19370_v47, %v19368_v63  ;;  %v24240_v63 = vld [vmem:[#allocation96_spill] sm:$0xff]  ;;  %v24241_v47 = vld [vmem:[#allocation97_spill] sm:$0xff] }
 0x29e   :  { %v21603_v14 = vand.u32 4294901760, %v3594_v46 }
 0x2a0   :  { %v21606_v21 = vsub.f32 %v3594_v46, %v21603_v14  ;;  %v24242_v46 = vld [vmem:[#allocation98_spill] sm:$0xff] }
 0x2a2   :  { %v21609_v59 = vand.u32 4294901760, %v21606_v21 }
 0x2a4   :  { %v3700_v53 = vsub.f32 %v21606_v21, %v21609_v59 }
 0x2a6   :  { %v3701_v42 = vand.u32 4294901760, %v3700_v53  ;;  %v24243_v53 = vld [vmem:[#allocation99_spill] sm:$0xff] }
 0x2a8   :  { %3702 = vmatmul.mubr.f32.vlgmr.msra.gmra.mrb[2].mxu0 %v3701_v42  ;;  %4557 = vmatmul.mubr.f32.vlgmr.msra.gmra.mrb[2].mxu1 %v3701_v42  ;;  %v24244_v42 = vld [vmem:[#allocation100_spill] sm:$0xff] }
 0x2a9   :  { %16314 = vmatpush1.bf16.msra.mxu0 %v24232_v49  ;;  %16506 = vmatpush1.bf16.msra.mxu1 %v24233_v55 }
 0x2aa   :  { %16316 = vmatprep.subr.bf16.mxu0 %v24234_v9  ;;  %16508 = vmatprep.subr.bf16.mxu1 %v24235_v8  ;;  %v24245_v8 = vld [vmem:[#allocation101_spill] sm:$0xff]  ;;  %v24246_v9 = vld [vmem:[#allocation44_spill] sm:$0xff] }
 0x2ab   :  { %3932 = vmatprep.mubr.f32.mxu0 %v23680_v15  ;;  %4787 = vmatprep.mubr.f32.mxu1 %v23680_v15 }
 0x2ad   :  { %16318 = vmatpush1.bf16.msra.mxu0 %v24236_v7  ;;  %16510 = vmatpush1.bf16.msra.mxu1 %v24237_v34  ;;  %v24247_v7 = vld [vmem:[#allocation45_spill] sm:$0xff] }
 0x2ae   :  { %16320 = vmatprep.subr.bf16.mxu0 %v24238_v57  ;;  %16512 = vmatprep.subr.bf16.mxu1 %v24239_v62  ;;  %v24248_v34 = vld [vmem:[#allocation49_spill] sm:$0xff]  ;;  %v24249_v57 = vld [vmem:[#allocation51_spill] sm:$0xff]  ;;  %v24250_v62 = vld [vmem:[#allocation108_spill] sm:$0xff] }
 0x2b1   :  { %16322 = vmatpush1.bf16.msra.mxu0 %v24240_v63  ;;  %16514 = vmatpush1.bf16.msra.mxu1 %v24241_v47  ;;  %v24251_v63 = vld [vmem:[#allocation109_spill] sm:$0xff]  ;;  %v24252_v47 = vld [vmem:[#allocation110_spill] sm:$0xff] }
 0x2b2   :  { %16324 = vmatprep.subr.bf16.mxu0 %v24242_v46  ;;  %16516 = vmatprep.subr.bf16.mxu1 %v24243_v53  ;;  %v24253_v46 = vld [vmem:[#allocation111_spill] sm:$0xff]  ;;  %v24254_v53 = vld [vmem:[#allocation112_spill] sm:$0xff] }
 0x2b5   :  { %16326 = vmatpush1.bf16.msra.mxu0 %v24244_v42  ;;  %16518 = vmatpush1.bf16.msra.mxu1 %v24245_v8  ;;  %v24255_v42 = vld [vmem:[#allocation113_spill] sm:$0xff]  ;;  %v24256_v8 = vld [vmem:[#allocation114_spill] sm:$0xff] }
 0x2b6   :  { %16328 = vmatprep.subr.bf16.mxu0 %v24246_v9  ;;  %16520 = vmatprep.subr.bf16.mxu1 %v24247_v7  ;;  %v24257_v9 = vld [vmem:[#allocation115_spill] sm:$0xff]  ;;  %v24258_v7 = vld [vmem:[#allocation116_spill] sm:$0xff] }
 0x2b9   :  { %16330 = vmatpush1.bf16.msra.mxu0 %v24248_v34  ;;  %16522 = vmatpush1.bf16.msra.mxu1 %v24249_v57  ;;  %v24259_v34 = vld [vmem:[#allocation117_spill] sm:$0xff]  ;;  %v24260_v57 = vld [vmem:[#allocation118_spill] sm:$0xff] }
 0x2ba   :  { %16332 = vmatprep.subr.bf16.mxu0 %v24250_v62  ;;  %16524 = vmatprep.subr.bf16.mxu1 %v24251_v63  ;;  %v24261_v62 = vld [vmem:[#allocation119_spill] sm:$0xff]  ;;  %v24262_v63 = vld [vmem:[#allocation52_spill] sm:$0xff] }
 0x2bd   :  { %16334 = vmatpush1.bf16.msra.mxu0 %v24252_v47  ;;  %16526 = vmatpush1.bf16.msra.mxu1 %v24253_v46  ;;  %v24263_v47 = vld [vmem:[#allocation58_spill] sm:$0xff]  ;;  %v24278_v46 = vld [vmem:[#allocation81_spill] sm:$0xff] }
 0x2be   :  { %16336 = vmatprep.subr.bf16.mxu0 %v24254_v53  ;;  %16528 = vmatprep.subr.bf16.mxu1 %v24255_v42  ;;  %v24264_v42 = vld [vmem:[#allocation59_spill] sm:$0xff]  ;;  %v24277_v53 = vld [vmem:[#allocation80_spill] sm:$0xff] }
 0x2c1   :  { %16338 = vmatpush1.bf16.msra.mxu0 %v24256_v8  ;;  %16530 = vmatpush1.bf16.msra.mxu1 %v24257_v9  ;;  %v24265_v8 = vld [vmem:[#allocation61_spill] sm:$0xff]  ;;  %v24266_v9 = vld [vmem:[#allocation62_spill] sm:$0xff] }
 0x2c2   :  { %16340 = vmatprep.subr.bf16.mxu0 %v24258_v7  ;;  %16532 = vmatprep.subr.bf16.mxu1 %v24259_v34  ;;  %v24267_v7 = vld [vmem:[#allocation65_spill] sm:$0xff]  ;;  %v24272_v34 = vld [vmem:[#allocation75_spill] sm:$0xff] }
 0x2c5   :  { %16342 = vmatpush1.bf16.msra.mxu0 %v24260_v57  ;;  %16534 = vmatpush1.bf16.msra.mxu1 %v24261_v62  ;;  %v24268_v62 = vld [vmem:[#allocation67_spill] sm:$0xff]  ;;  %v24271_v57 = vld [vmem:[#allocation74_spill] sm:$0xff] }
 0x2c6   :  { %16344 = vmatprep.subr.bf16.mxu0 %v24262_v63  ;;  %16536 = vmatprep.subr.bf16.mxu1 %v24263_v47  ;;  %v24269_v63 = vld [vmem:[#allocation68_spill] sm:$0xff]  ;;  %v24270_v47 = vld [vmem:[#allocation73_spill] sm:$0xff] }
 0x2c8   :  { %3934 = vmatmul.mubr.f32.vlgmr.msra.gmra.mrb[2].mxu0 %v21603_v14  ;;  %4789 = vmatmul.mubr.f32.vlgmr.msra.gmra.mrb[2].mxu1 %v21603_v14 }
 0x2c9   :  { %16346 = vmatpush1.bf16.msra.mxu0 %v24264_v42  ;;  %16538 = vmatpush1.bf16.msra.mxu1 %v24265_v8  ;;  %v24273_v42 = vld [vmem:[#allocation76_spill] sm:$0xff]  ;;  %v24274_v8 = vld [vmem:[#allocation77_spill] sm:$0xff] }
 0x2ca   :  { %16348 = vmatprep.subr.bf16.mxu0 %v24266_v9  ;;  %16540 = vmatprep.subr.bf16.mxu1 %v24267_v7  ;;  %v24275_v9 = vld [vmem:[#allocation78_spill] sm:$0xff]  ;;  %v24276_v7 = vld [vmem:[#allocation79_spill] sm:$0xff] }
 0x2cb   :  { %4068 = vmatprep.mubr.f32.mxu0 %v23680_v15  ;;  %4923 = vmatprep.mubr.f32.mxu1 %v23680_v15 }
 0x2cd   :  { %16350 = vmatpush1.bf16.msra.mxu0 %v24268_v62  ;;  %16542 = vmatpush1.bf16.msra.mxu1 %v24269_v63  ;;  %v24279_v62 = vld [vmem:[#allocation82_spill] sm:$0xff]  ;;  %v24280_v63 = vld [vmem:[#allocation87_spill] sm:$0xff] }
 0x2ce   :  { %16352 = vmatprep.subr.bf16.mxu0 %v24270_v47  ;;  %16544 = vmatprep.subr.bf16.mxu1 %v24271_v57  ;;  %v24281_v47 = vld [vmem:[#allocation88_spill] sm:$0xff]  ;;  %v24282_v57 = vld [vmem:[#allocation89_spill] sm:$0xff] }
 0x2d1   :  { %16354 = vmatpush1.bf16.msra.mxu0 %v24272_v34  ;;  %16546 = vmatpush1.bf16.msra.mxu1 %v24273_v42  ;;  %v24283_v34 = vld [vmem:[#allocation8_spill] sm:$0xff]  ;;  %v24284_v42 = vld [vmem:[#allocation10_spill] sm:$0xff] }
 0x2d2   :  { %16356 = vmatprep.subr.bf16.mxu0 %v24274_v8  ;;  %16548 = vmatprep.subr.bf16.mxu1 %v24275_v9  ;;  %v24285_v8 = vld [vmem:[#allocation11_spill] sm:$0xff]  ;;  %v24286_v9 = vld [vmem:[#allocation12_spill] sm:$0xff] }
 0x2d5   :  { %16358 = vmatpush1.bf16.msra.mxu0 %v24276_v7  ;;  %16550 = vmatpush1.bf16.msra.mxu1 %v24277_v53  ;;  %v24287_v7 = vld [vmem:[#allocation13_spill] sm:$0xff]  ;;  %v24288_v53 = vld [vmem:[#allocation14_spill] sm:$0xff] }
 0x2d6   :  { %16360 = vmatprep.subr.bf16.mxu0 %v24278_v46  ;;  %16552 = vmatprep.subr.bf16.mxu1 %v24279_v62  ;;  %v24289_v46 = vld [vmem:[#allocation15_spill] sm:$0xff]  ;;  %v24290_v62 = vld [vmem:[#allocation26_spill] sm:$0xff] }
 0x2d9   :  { %16362 = vmatpush1.bf16.msra.mxu0 %v24280_v63  ;;  %16554 = vmatpush1.bf16.msra.mxu1 %v24281_v47  ;;  %v24291_v63 = vld [vmem:[#allocation34_spill] sm:$0xff] }
 0x2da   :  { %16364 = vmatprep.subr.bf16.mxu0 %v24282_v57  ;;  %16556 = vmatprep.subr.bf16.mxu1 %v24283_v34  ;;  %v24292_v47 = vld [vmem:[#allocation38_spill] sm:$0xff]  ;;  %v24293_v57 = vld [vmem:[#allocation39_spill] sm:$0xff] }
 0x2dd   :  { %16366 = vmatpush1.bf16.msra.mxu0 %v24284_v42  ;;  %16558 = vmatpush1.bf16.msra.mxu1 %v24285_v8 }
 0x2de   :  { %16368 = vmatprep.subr.bf16.mxu0 %v24286_v9  ;;  %16560 = vmatprep.subr.bf16.mxu1 %v24287_v7 }
 0x2e1   :  { %16370 = vmatpush1.bf16.msra.mxu0 %v24288_v53  ;;  %16562 = vmatpush1.bf16.msra.mxu1 %v24289_v46 }
 0x2e2   :  { %16372 = vmatprep.subr.bf16.mxu0 %v24290_v62  ;;  %16564 = vmatprep.subr.bf16.mxu1 %v24291_v63 }
 0x2e5   :  { %16374 = vmatpush1.bf16.msra.mxu0 %v24292_v47  ;;  %16566 = vmatpush1.bf16.msra.mxu1 %v24293_v57 }
 0x2e6   :  { %16376 = vmatprep.subr.bf16.mxu0 %v24083_v10  ;;  %16568 = vmatprep.subr.bf16.mxu1 %v24084_v48 }
 0x2e8   :  { %4071 = vmatmul.mubr.f32.vlgmr.msra.gmra.mrb[2].mxu0 %v21606_v21  ;;  %4926 = vmatmul.mubr.f32.vlgmr.msra.gmra.mrb[2].mxu1 %v21606_v21  ;;  %v24294_v21 = vld [vmem:[#allocation120_spill] sm:$0xff] }
 0x2e9   :  { %16378 = vmatpush1.bf16.msra.mxu0 %v24085_v58  ;;  %16570 = vmatpush1.bf16.msra.mxu1 %v24086_v18 }
 0x2ea   :  { %16380 = vmatprep.subr.bf16.mxu0 %v24087_v6  ;;  %16572 = vmatprep.subr.bf16.mxu1 %v24088_v37 }
 0x2eb   :  { %4173 = vmatprep.mubr.f32.mxu0 %v23680_v15  ;;  %5028 = vmatprep.mubr.f32.mxu1 %v23680_v15 }
 0x2ed   :  { %16382 = vmatpush1.bf16.msra.mxu0 %v24089_v60  ;;  %16574 = vmatpush1.bf16.msra.mxu1 %v24090_v17 }
 0x2ee   :  { %16384 = vmatprep.subr.bf16.mxu0 %v24207_v12  ;;  %16576 = vmatprep.subr.bf16.mxu1 %v24208_v20 }
 0x2f1   :  { %16386 = vmatpush1.bf16.msra.mxu0 %v24209_v45  ;;  %16578 = vmatpush1.bf16.msra.mxu1 %v24210_v16 }
 0x2f2   :  { %16388 = vmatprep.subr.bf16.mxu0 %v24211_v44  ;;  %16580 = vmatprep.subr.bf16.mxu1 %v24212_v51 }
 0x2f5   :  { %16390 = vmatpush1.bf16.msra.mxu0 %v24213_v40  ;;  %16582 = vmatpush1.bf16.msra.mxu1 %v24214_v29 }
 0x2f6   :  { %16392 = vmatprep.subr.bf16.mxu0 %v24215_v50  ;;  %16584 = vmatprep.subr.bf16.mxu1 %v24216_v3 }
 0x2f9   :  { %16394 = vmatpush1.bf16.msra.mxu0 %v24217_v4  ;;  %16586 = vmatpush1.bf16.msra.mxu1 %v24218_v13 }
 0x2fa   :  { %16396 = vmatprep.subr.bf16.mxu0 %v24219_v39  ;;  %16588 = vmatprep.subr.bf16.mxu1 %v24220_v35 }
 0x2fd   :  { %16398 = vmatpush1.bf16.msra.mxu0 %v24221_v26  ;;  %16590 = vmatpush1.bf16.msra.mxu1 %v24222_v2 }
 0x2fe   :  { %16400 = vmatprep.subr.bf16.mxu0 %v24223_v43  ;;  %16592 = vmatprep.subr.bf16.mxu1 %v24224_v28 }
 0x301   :  { %16402 = vmatpush1.bf16.msra.mxu0 %v24225_v56  ;;  %16594 = vmatpush1.bf16.msra.mxu1 %v24226_v5 }
 0x302   :  { %16404 = vmatprep.subr.bf16.mxu0 %v24227_v23  ;;  %16596 = vmatprep.subr.bf16.mxu1 %v24228_v36 }
 0x305   :  { %16406 = vmatpush1.bf16.msra.mxu0 %v24119_v30  ;;  %16598 = vmatpush1.bf16.msra.mxu1 %v24120_v0 }
 0x306   :  { %16408 = vmatprep.subr.bf16.mxu0 %v21321_v31  ;;  %16600 = vmatprep.subr.bf16.mxu1 %v21327_v27 }
 0x308   :  { %4177 = vmatmul.mubr.f32.vlgmr.msra.gmra.mrb[2].mxu0 %v21609_v59  ;;  %5032 = vmatmul.mubr.f32.vlgmr.msra.gmra.mrb[2].mxu1 %v21609_v59  ;;  %v24295_v59 = vld [vmem:[#allocation121_spill] sm:$0xff] }
 0x309   :  { %16410 = vmatpush1.bf16.msra.mxu0 %v21335_v24  ;;  %16602 = vmatpush1.bf16.msra.mxu1 %v21341_v32  ;;  %v24298_v32 = vld [vmem:[#allocation93_spill] sm:$0xff]  ;;  %v24299_v24 = vld [vmem:[#allocation124_spill] sm:$0xff] }
 0x30a   :  { %16412 = vmatprep.subr.bf16.mxu0 %v21349_v1  ;;  %16604 = vmatprep.subr.bf16.mxu1 %v21355_v54  ;;  %v24296_v1 = vld [vmem:[#allocation122_spill] sm:$0xff]  ;;  %v24297_v54 = vld [vmem:[#allocation123_spill] sm:$0xff] }
 0x30b   :  { %4343 = vmatprep.mubr.f32.mxu0 %v23680_v15  ;;  %5198 = vmatprep.mubr.f32.mxu1 %v23680_v15 }
 0x30d   :  { %16414 = vmatpush1.bf16.msra.mxu0 %v21365_v22  ;;  %16606 = vmatpush1.bf16.msra.mxu1 %v21371_v19  ;;  %v24300_v22 = vld [vmem:[#allocation94_spill] sm:$0xff]  ;;  %v24301_v19 = vld [vmem:[#allocation21_spill] sm:$0xff] }
 0x30e   :  { %16416 = vmatprep.subr.bf16.mxu0 %v21379_v33  ;;  %16608 = vmatprep.subr.bf16.mxu1 %v21385_v52  ;;  %v24302_v33 = vld [vmem:[#allocation27_spill] sm:$0xff]  ;;  %v24303_v52 = vld [vmem:[#allocation28_spill] sm:$0xff] }
 0x311   :  { %16418 = vmatpush1.bf16.msra.mxu0 %v21395_v38  ;;  %16610 = vmatpush1.bf16.msra.mxu1 %v24294_v21  ;;  %v24304_v38 = vld [vmem:[#allocation33_spill] sm:$0xff]  ;;  %v24305_v21 = vld [vmem:[#allocation35_spill] sm:$0xff] }
 0x312   :  { %16420 = vmatprep.subr.bf16.mxu0 %v24295_v59  ;;  %16612 = vmatprep.subr.bf16.mxu1 %v24296_v1  ;;  %v24306_v59 = vld [vmem:[#allocation37_spill] sm:$0xff] }
 0x313   :  { %v24307_v1 = vld [vmem:[#allocation125_spill] sm:$0xff] }
 0x315   :  { %16422 = vmatpush1.bf16.msra.mxu0 %v24297_v54  ;;  %16614 = vmatpush1.bf16.msra.mxu1 %v24298_v32  ;;  %v24308_v54 = vld [vmem:[#allocation126_spill] sm:$0xff] }
 0x316   :  { %16424 = vmatprep.subr.bf16.mxu0 %v24299_v24  ;;  %16616 = vmatprep.subr.bf16.mxu1 %v24300_v22  ;;  %v24309_v32 = vld [vmem:[#allocation102_spill] sm:$0xff]  ;;  %v24310_v24 = vld [vmem:[#allocation103_spill] sm:$0xff]  ;;  %v24311_v22 = vld [vmem:[#allocation104_spill] sm:$0xff] }
 0x319   :  { %16426 = vmatpush1.bf16.msra.mxu0 %v24301_v19  ;;  %16618 = vmatpush1.bf16.msra.mxu1 %v24302_v33  ;;  %v24312_v19 = vld [vmem:[#allocation105_spill] sm:$0xff]  ;;  %v24313_v33 = vld [vmem:[#allocation106_spill] sm:$0xff] }
 0x31a   :  { %16428 = vmatprep.subr.bf16.mxu0 %v24303_v52  ;;  %16620 = vmatprep.subr.bf16.mxu1 %v24304_v38  ;;  %v24314_v52 = vld [vmem:[#allocation107_spill] sm:$0xff] }
 0x31d   :  { %16430 = vmatpush1.bf16.msra.mxu0 %v24305_v21  ;;  %16622 = vmatpush1.bf16.msra.mxu1 %v24306_v59 }
 0x31e   :  { %16432 = vmatprep.subr.bf16.mxu0 %v24307_v1  ;;  %16624 = vmatprep.subr.bf16.mxu1 %v24308_v54 }
 0x321   :  { %16434 = vmatpush1.bf16.msra.mxu0 %v24309_v32  ;;  %16626 = vmatpush1.bf16.msra.mxu1 %v24310_v24 }
 0x322   :  { %16436 = vmatprep.subr.bf16.mxu0 %v24311_v22  ;;  %16628 = vmatprep.subr.bf16.mxu1 %v24312_v19  ;;  %v24317_v22 = vld [vmem:[#allocation25_spill] sm:$0xff] }
 0x325   :  { %16438 = vmatpush1.bf16.msra.mxu0 %v24313_v33  ;;  %16630 = vmatpush1.bf16.msra.mxu1 %v24314_v52  ;;  %v24316_v52 = vld [vmem:[#allocation84_spill] sm:$0xff] }
 0x326   :  { %16440 = vmatprep.subr.bf16.mxu0 %v24083_v10  ;;  %16632 = vmatprep.subr.bf16.mxu1 %v24084_v48 }
 0x328   :  { %4345 = vmatmul.mubr.f32.vlgmr.msra.gmra.mrb[2].mxu0 %v21603_v14  ;;  %5200 = vmatmul.mubr.f32.vlgmr.msra.gmra.mrb[2].mxu1 %v21603_v14 }
 0x329   :  { %16442 = vmatpush1.bf16.msra.mxu0 %v24085_v58  ;;  %16634 = vmatpush1.bf16.msra.mxu1 %v24086_v18 }
 0x32a   :  { %16444 = vmatprep.subr.bf16.mxu0 %v24087_v6  ;;  %16636 = vmatprep.subr.bf16.mxu1 %v24088_v37 }
 0x32b   :  { %4447 = vmatprep.mubr.f32.mxu0 %v23680_v15  ;;  %5302 = vmatprep.mubr.f32.mxu1 %v23680_v15 }
 0x32d   :  { %16446 = vmatpush1.bf16.msra.mxu0 %v24089_v60  ;;  %16638 = vmatpush1.bf16.msra.mxu1 %v24090_v17 }
 0x32e   :  { %16448 = vmatprep.subr.bf16.mxu0 %v24207_v12  ;;  %16640 = vmatprep.subr.bf16.mxu1 %v24208_v20 }
 0x331   :  { %16450 = vmatpush1.bf16.msra.mxu0 %v24209_v45  ;;  %16642 = vmatpush1.bf16.msra.mxu1 %v24210_v16 }
 0x332   :  { %16452 = vmatprep.subr.bf16.mxu0 %v24211_v44  ;;  %16644 = vmatprep.subr.bf16.mxu1 %v24212_v51 }
 0x335   :  { %16454 = vmatpush1.bf16.msra.mxu0 %v24213_v40  ;;  %16646 = vmatpush1.bf16.msra.mxu1 %v24214_v29 }
 0x336   :  { %16456 = vmatprep.subr.bf16.mxu0 %v24215_v50  ;;  %16648 = vmatprep.subr.bf16.mxu1 %v24216_v3 }
 0x339   :  { %16458 = vmatpush1.bf16.msra.mxu0 %v24217_v4  ;;  %16650 = vmatpush1.bf16.msra.mxu1 %v24218_v13 }
 0x33a   :  { %16460 = vmatprep.subr.bf16.mxu0 %v24219_v39  ;;  %16652 = vmatprep.subr.bf16.mxu1 %v24220_v35 }
 0x33d   :  { %16462 = vmatpush1.bf16.msra.mxu0 %v24221_v26  ;;  %16654 = vmatpush1.bf16.msra.mxu1 %v24222_v2 }
 0x33e   :  { %16464 = vmatprep.subr.bf16.mxu0 %v24223_v43  ;;  %16656 = vmatprep.subr.bf16.mxu1 %v24224_v28 }
 0x341   :  { %16466 = vmatpush1.bf16.msra.mxu0 %v24225_v56  ;;  %16658 = vmatpush1.bf16.msra.mxu1 %v24226_v5 }
 0x342   :  { %16468 = vmatprep.subr.bf16.mxu0 %v24227_v23  ;;  %16660 = vmatprep.subr.bf16.mxu1 %v24228_v36 }
 0x345   :  { %16470 = vmatpush1.bf16.msra.mxu0 %v24119_v30  ;;  %16662 = vmatpush1.bf16.msra.mxu1 %v24120_v0 }
 0x346   :  { %16664 = vmatprep.subr.bf16.mxu0 %v24083_v10  ;;  %16856 = vmatprep.subr.bf16.mxu1 %v24084_v48 }
 0x348   :  { %4449 = vmatmul.mubr.f32.vlgmr.msra.gmra.mrb[2].mxu0 %v21603_v14  ;;  %5304 = vmatmul.mubr.f32.vlgmr.msra.gmra.mrb[2].mxu1 %v21603_v14  ;;  %v24315_v14 = vld [vmem:[#allocation83_spill] sm:$0xff] }
 0x349   :  { %16666 = vmatpush1.bf16.msra.mxu0 %v24085_v58  ;;  %16858 = vmatpush1.bf16.msra.mxu1 %v24086_v18 }
 0x34a   :  { %16668 = vmatprep.subr.bf16.mxu0 %v24087_v6  ;;  %16860 = vmatprep.subr.bf16.mxu1 %v24088_v37 }
 0x34b   :  { %5439 = vmatprep.mubr.f32.mxu0 %v23680_v15  ;;  %6294 = vmatprep.mubr.f32.mxu1 %v23680_v15 }
 0x34d   :  { %16670 = vmatpush1.bf16.msra.mxu0 %v24089_v60  ;;  %16862 = vmatpush1.bf16.msra.mxu1 %v24090_v17 }
 0x34e   :  { %16672 = vmatprep.subr.bf16.mxu0 %v24207_v12  ;;  %16864 = vmatprep.subr.bf16.mxu1 %v24208_v20 }
 0x351   :  { %16674 = vmatpush1.bf16.msra.mxu0 %v24209_v45  ;;  %16866 = vmatpush1.bf16.msra.mxu1 %v24210_v16 }
 0x352   :  { %16676 = vmatprep.subr.bf16.mxu0 %v24211_v44  ;;  %16868 = vmatprep.subr.bf16.mxu1 %v24212_v51 }
 0x355   :  { %16678 = vmatpush1.bf16.msra.mxu0 %v24213_v40  ;;  %16870 = vmatpush1.bf16.msra.mxu1 %v24214_v29 }
 0x356   :  { %16680 = vmatprep.subr.bf16.mxu0 %v24215_v50  ;;  %16872 = vmatprep.subr.bf16.mxu1 %v24216_v3 }
 0x359   :  { %16682 = vmatpush1.bf16.msra.mxu0 %v24217_v4  ;;  %16874 = vmatpush1.bf16.msra.mxu1 %v24218_v13 }
 0x35a   :  { %16684 = vmatprep.subr.bf16.mxu0 %v24219_v39  ;;  %16876 = vmatprep.subr.bf16.mxu1 %v24220_v35 }
 0x35d   :  { %16686 = vmatpush1.bf16.msra.mxu0 %v24221_v26  ;;  %16878 = vmatpush1.bf16.msra.mxu1 %v24222_v2 }
 0x35e   :  { %16688 = vmatprep.subr.bf16.mxu0 %v24223_v43  ;;  %16880 = vmatprep.subr.bf16.mxu1 %v24224_v28 }
 0x361   :  { %16690 = vmatpush1.bf16.msra.mxu0 %v24225_v56  ;;  %16882 = vmatpush1.bf16.msra.mxu1 %v24226_v5 }
 0x362   :  { %16692 = vmatprep.subr.bf16.mxu0 %v24227_v23  ;;  %16884 = vmatprep.subr.bf16.mxu1 %v24228_v36 }
 0x365   :  { %16694 = vmatpush1.bf16.msra.mxu0 %v24119_v30  ;;  %16886 = vmatpush1.bf16.msra.mxu1 %v24120_v0 }
 0x366   :  { %16696 = vmatprep.subr.bf16.mxu0 %v24315_v14  ;;  %16888 = vmatprep.subr.bf16.mxu1 %v24316_v52 }
 0x41b   :  { %v4450_v33 = vpop.f32.mrb[2].mxu0  ;;  %v5305_v19 = vpop.f32.mrb[2].mxu1 }
 0x41c   :  { %v18969_v24 = vadd.f32 %v4450_v33, %v24317_v22  ;;  %v4452_v32 = vpop.f32.mrb[3].mxu0  ;;  %v5307_v54 = vpop.f32.mrb[3].mxu1  ;;  %v18985_v31 = vadd.f32 %v5305_v19, %v21597_v25 }
 0x41d   :  { %v18970_v1 = vadd.f32 %v4452_v32, %v21590_v41  ;;  %v18986_v38 = vadd.f32 %v5307_v54, %v21594_v11 }
 0x41e   :  { %v15824_v59 = vmul.f32 -1.442695, %v18969_v24 }
 0x41f   :  { %v15825_v21 = vmul.f32 -1.442695, %v18970_v1  ;;  %v15826_v27 = vmul.f32 -1.442695, %v18986_v38 }
 0x420   :  { %19371 = vpow2.f32 %v15824_v59 }
 0x421   :  { %19373 = vpow2.f32 %v15825_v21 }
 0x422   :  { %19375 = vpow2.f32 %v15826_v27 }
 0x423   :  { %19377 = vtanh.f32 %v18985_v31 }
 0x42a   :  { %v19372_v14 = vpop.eup %19371 }
 0x42b   :  { %v19374_v0 = vpop.eup %19373  ;;  %v5323_v52 = vadd.f32 1.0, %v19372_v14  ;;  %v24319_v14 = vld [vmem:[#allocation7_spill] sm:$0xff] }
 0x42c   :  { %v5324_v30 = vadd.f32 1.0, %v19374_v0  ;;  %v19376_v33 = vpop.eup %19375 }
 0x42d   :  { %19379 = vrcp.f32 %v5323_v52  ;;  %v19378_v22 = vpop.eup %19377  ;;  %v5325_v59 = vadd.f32 1.0, %v19376_v33  ;;  %v24320_v33 = vld [vmem:[#allocation91_spill] sm:$0xff] }
 0x42e   :  { %19381 = vrcp.f32 %v5324_v30 }
 0x42f   :  { %19383 = vrcp.f32 %v5325_v59  ;;  %v24324_v59 = vld [vmem:[#allocation96_spill] sm:$0xff] }
 0x437   :  { %v19380_v32 = vpop.eup %19379 }
 0x438   :  { %v19382_v24 = vpop.eup %19381  ;;  %v5334_v1 = vmul.f32 %v19380_v32, %v19378_v22  ;;  %v24321_v32 = vld [vmem:[#allocation92_spill] sm:$0xff] }
 0x439   :  { %v5333_v21 = vmul.f32 %v19382_v24, %v21600_v61  ;;  %v19384_v19 = vpop.eup %19383  ;;  %v24318_v61 = vld [vmem:[#allocation90_spill] sm:$0xff]  ;;  %v24322_v24 = vld [vmem:[#allocation16_spill] sm:$0xff] }
 0x43b   :  { %v21832_v54 = vadd.f32 %v5334_v1, %v5333_v21  ;;  %v24323_v1 = vld [vmem:[#allocation95_spill] sm:$0xff]  ;;  %v24325_v21 = vld [vmem:[#allocation97_spill] sm:$0xff] }
 0x43d   :  { %19385 = vtanh.f32 %v21832_v54 }
 0x447   :  { %v19386_v38 = vpop.eup %19385 }
 0x448   :  { %v5337_v27 = vmul.f32 %v19386_v38, %v19384_v19  ;;  %v24326_v19 = vld [vmem:[#allocation98_spill] sm:$0xff]  ;;  %v24327_v38 = vld [vmem:[#allocation99_spill] sm:$0xff] }
 0x44a   :  { %v21835_v31 = vand.u32 4294901760, %v5337_v27 }
 0x44c   :  { %v21838_v30 = vsub.f32 %v5337_v27, %v21835_v31  ;;  %v24328_v27 = vld [vmem:[#allocation100_spill] sm:$0xff] }
 0x44e   :  { %v21841_v0 = vand.u32 4294901760, %v21838_v30 }
 0x450   :  { %v5443_v22 = vsub.f32 %v21838_v30, %v21841_v0 }
 0x452   :  { %v5444_v52 = vand.u32 4294901760, %v5443_v22  ;;  %v24329_v22 = vld [vmem:[#allocation101_spill] sm:$0xff] }
 0x454   :  { %5445 = vmatmul.mubr.f32.vlgmr.msra.gmra.mrb[4].mxu0 %v5444_v52  ;;  %6300 = vmatmul.mubr.f32.vlgmr.msra.gmra.mrb[4].mxu1 %v5444_v52  ;;  %v24330_v52 = vld [vmem:[#allocation44_spill] sm:$0xff] }
 0x455   :  { %16698 = vmatpush1.bf16.msra.mxu0 %v24232_v49  ;;  %16890 = vmatpush1.bf16.msra.mxu1 %v24233_v55 }
 0x456   :  { %16700 = vmatprep.subr.bf16.mxu0 %v24318_v61  ;;  %16892 = vmatprep.subr.bf16.mxu1 %v24319_v14 }
 0x457   :  { %5675 = vmatprep.mubr.f32.mxu0 %v23680_v15  ;;  %6530 = vmatprep.mubr.f32.mxu1 %v23680_v15 }
 0x459   :  { %16702 = vmatpush1.bf16.msra.mxu0 %v24320_v33  ;;  %16894 = vmatpush1.bf16.msra.mxu1 %v24321_v32  ;;  %v24331_v33 = vld [vmem:[#allocation45_spill] sm:$0xff] }
 0x45a   :  { %16704 = vmatprep.subr.bf16.mxu0 %v24322_v24  ;;  %16896 = vmatprep.subr.bf16.mxu1 %v24323_v1  ;;  %v24332_v32 = vld [vmem:[#allocation49_spill] sm:$0xff]  ;;  %v24333_v24 = vld [vmem:[#allocation51_spill] sm:$0xff]  ;;  %v24334_v1 = vld [vmem:[#allocation108_spill] sm:$0xff] }
 0x45d   :  { %16706 = vmatpush1.bf16.msra.mxu0 %v24324_v59  ;;  %16898 = vmatpush1.bf16.msra.mxu1 %v24325_v21  ;;  %v24335_v59 = vld [vmem:[#allocation109_spill] sm:$0xff]  ;;  %v24336_v21 = vld [vmem:[#allocation110_spill] sm:$0xff] }
 0x45e   :  { %16708 = vmatprep.subr.bf16.mxu0 %v24326_v19  ;;  %16900 = vmatprep.subr.bf16.mxu1 %v24327_v38  ;;  %v24337_v19 = vld [vmem:[#allocation111_spill] sm:$0xff]  ;;  %v24338_v38 = vld [vmem:[#allocation112_spill] sm:$0xff] }
 0x461   :  { %16710 = vmatpush1.bf16.msra.mxu0 %v24328_v27  ;;  %16902 = vmatpush1.bf16.msra.mxu1 %v24329_v22  ;;  %v24339_v27 = vld [vmem:[#allocation113_spill] sm:$0xff]  ;;  %v24340_v22 = vld [vmem:[#allocation114_spill] sm:$0xff] }
 0x462   :  { %16712 = vmatprep.subr.bf16.mxu0 %v24330_v52  ;;  %16904 = vmatprep.subr.bf16.mxu1 %v24331_v33  ;;  %v24341_v52 = vld [vmem:[#allocation115_spill] sm:$0xff]  ;;  %v24342_v33 = vld [vmem:[#allocation116_spill] sm:$0xff] }
 0x465   :  { %16714 = vmatpush1.bf16.msra.mxu0 %v24332_v32  ;;  %16906 = vmatpush1.bf16.msra.mxu1 %v24333_v24  ;;  %v24343_v32 = vld [vmem:[#allocation117_spill] sm:$0xff]  ;;  %v24344_v24 = vld [vmem:[#allocation118_spill] sm:$0xff] }
 0x466   :  { %16716 = vmatprep.subr.bf16.mxu0 %v24334_v1  ;;  %16908 = vmatprep.subr.bf16.mxu1 %v24335_v59  ;;  %v24345_v1 = vld [vmem:[#allocation119_spill] sm:$0xff]  ;;  %v24346_v59 = vld [vmem:[#allocation52_spill] sm:$0xff] }
 0x469   :  { %16718 = vmatpush1.bf16.msra.mxu0 %v24336_v21  ;;  %16910 = vmatpush1.bf16.msra.mxu1 %v24337_v19  ;;  %v24347_v21 = vld [vmem:[#allocation58_spill] sm:$0xff]  ;;  %v24362_v19 = vld [vmem:[#allocation81_spill] sm:$0xff] }
 0x46a   :  { %16720 = vmatprep.subr.bf16.mxu0 %v24338_v38  ;;  %16912 = vmatprep.subr.bf16.mxu1 %v24339_v27  ;;  %v24348_v27 = vld [vmem:[#allocation59_spill] sm:$0xff]  ;;  %v24361_v38 = vld [vmem:[#allocation80_spill] sm:$0xff] }
 0x46d   :  { %16722 = vmatpush1.bf16.msra.mxu0 %v24340_v22  ;;  %16914 = vmatpush1.bf16.msra.mxu1 %v24341_v52  ;;  %v24349_v22 = vld [vmem:[#allocation61_spill] sm:$0xff]  ;;  %v24350_v52 = vld [vmem:[#allocation62_spill] sm:$0xff] }
 0x46e   :  { %16724 = vmatprep.subr.bf16.mxu0 %v24342_v33  ;;  %16916 = vmatprep.subr.bf16.mxu1 %v24343_v32  ;;  %v24351_v33 = vld [vmem:[#allocation65_spill] sm:$0xff]  ;;  %v24356_v32 = vld [vmem:[#allocation75_spill] sm:$0xff] }
 0x471   :  { %16726 = vmatpush1.bf16.msra.mxu0 %v24344_v24  ;;  %16918 = vmatpush1.bf16.msra.mxu1 %v24345_v1  ;;  %v24352_v1 = vld [vmem:[#allocation67_spill] sm:$0xff]  ;;  %v24355_v24 = vld [vmem:[#allocation74_spill] sm:$0xff] }
 0x472   :  { %16728 = vmatprep.subr.bf16.mxu0 %v24346_v59  ;;  %16920 = vmatprep.subr.bf16.mxu1 %v24347_v21  ;;  %v24353_v59 = vld [vmem:[#allocation68_spill] sm:$0xff]  ;;  %v24354_v21 = vld [vmem:[#allocation73_spill] sm:$0xff] }
 0x474   :  { %5677 = vmatmul.mubr.f32.vlgmr.msra.gmra.mrb[4].mxu0 %v21835_v31  ;;  %6532 = vmatmul.mubr.f32.vlgmr.msra.gmra.mrb[4].mxu1 %v21835_v31 }
 0x475   :  { %16730 = vmatpush1.bf16.msra.mxu0 %v24348_v27  ;;  %16922 = vmatpush1.bf16.msra.mxu1 %v24349_v22  ;;  %v24357_v27 = vld [vmem:[#allocation76_spill] sm:$0xff]  ;;  %v24358_v22 = vld [vmem:[#allocation77_spill] sm:$0xff] }
 0x476   :  { %16732 = vmatprep.subr.bf16.mxu0 %v24350_v52  ;;  %16924 = vmatprep.subr.bf16.mxu1 %v24351_v33  ;;  %v24359_v52 = vld [vmem:[#allocation78_spill] sm:$0xff]  ;;  %v24360_v33 = vld [vmem:[#allocation79_spill] sm:$0xff] }
 0x477   :  { %5811 = vmatprep.mubr.f32.mxu0 %v23680_v15  ;;  %6666 = vmatprep.mubr.f32.mxu1 %v23680_v15 }
 0x479   :  { %16734 = vmatpush1.bf16.msra.mxu0 %v24352_v1  ;;  %16926 = vmatpush1.bf16.msra.mxu1 %v24353_v59  ;;  %v24363_v1 = vld [vmem:[#allocation82_spill] sm:$0xff]  ;;  %v24364_v59 = vld [vmem:[#allocation87_spill] sm:$0xff] }
 0x47a   :  { %16736 = vmatprep.subr.bf16.mxu0 %v24354_v21  ;;  %16928 = vmatprep.subr.bf16.mxu1 %v24355_v24  ;;  %v24365_v21 = vld [vmem:[#allocation88_spill] sm:$0xff]  ;;  %v24366_v24 = vld [vmem:[#allocation89_spill] sm:$0xff] }
 0x47d   :  { %16738 = vmatpush1.bf16.msra.mxu0 %v24356_v32  ;;  %16930 = vmatpush1.bf16.msra.mxu1 %v24357_v27 }
 0x47e   :  { %16740 = vmatprep.subr.bf16.mxu0 %v24358_v22  ;;  %16932 = vmatprep.subr.bf16.mxu1 %v24359_v52 }
 0x481   :  { %16742 = vmatpush1.bf16.msra.mxu0 %v24360_v33  ;;  %16934 = vmatpush1.bf16.msra.mxu1 %v24361_v38 }
 0x482   :  { %16744 = vmatprep.subr.bf16.mxu0 %v24362_v19  ;;  %16936 = vmatprep.subr.bf16.mxu1 %v24363_v1 }
 0x485   :  { %16746 = vmatpush1.bf16.msra.mxu0 %v24364_v59  ;;  %16938 = vmatpush1.bf16.msra.mxu1 %v24365_v21 }
 0x486   :  { %16748 = vmatprep.subr.bf16.mxu0 %v24366_v24  ;;  %16940 = vmatprep.subr.bf16.mxu1 %v24283_v34  ;;  %v24385_v34 = vld [vmem:[#allocation124_spill] sm:$0xff] }
 0x489   :  { %16750 = vmatpush1.bf16.msra.mxu0 %v24284_v42  ;;  %16942 = vmatpush1.bf16.msra.mxu1 %v24285_v8  ;;  %v24378_v8 = vld [vmem:[#allocation23_spill] sm:$0xff]  ;;  %v24384_v42 = vld [vmem:[#allocation93_spill] sm:$0xff] }
 0x48a   :  { %16752 = vmatprep.subr.bf16.mxu0 %v24286_v9  ;;  %16944 = vmatprep.subr.bf16.mxu1 %v24287_v7  ;;  %v24374_v7 = vld [vmem:[#allocation18_spill] sm:$0xff]  ;;  %v24375_v9 = vld [vmem:[#allocation19_spill] sm:$0xff] }
 0x48d   :  { %16754 = vmatpush1.bf16.msra.mxu0 %v24288_v53  ;;  %16946 = vmatpush1.bf16.msra.mxu1 %v24289_v46  ;;  %v24372_v46 = vld [vmem:[#allocation9_spill] sm:$0xff] }
 0x48e   :  { %16756 = vmatprep.subr.bf16.mxu0 %v24290_v62  ;;  %16948 = vmatprep.subr.bf16.mxu1 %v24291_v63  ;;  %v24370_v63 = vld [vmem:[#allocation42_spill] sm:$0xff]  ;;  %v24371_v62 = vld [vmem:[#allocation43_spill] sm:$0xff]  ;;  %v24373_v53 = vld [vmem:[#allocation17_spill] sm:$0xff] }
 0x491   :  { %16758 = vmatpush1.bf16.msra.mxu0 %v24292_v47  ;;  %16950 = vmatpush1.bf16.msra.mxu1 %v24293_v57  ;;  %v24368_v57 = vld [vmem:[#allocation72_spill] sm:$0xff]  ;;  %v24369_v47 = vld [vmem:[#allocation41_spill] sm:$0xff] }
 0x492   :  { %16760 = vmatprep.subr.bf16.mxu0 %v24083_v10  ;;  %16952 = vmatprep.subr.bf16.mxu1 %v24084_v48 }
 0x494   :  { %5814 = vmatmul.mubr.f32.vlgmr.msra.gmra.mrb[4].mxu0 %v21838_v30  ;;  %6669 = vmatmul.mubr.f32.vlgmr.msra.gmra.mrb[4].mxu1 %v21838_v30  ;;  %v24367_v30 = vld [vmem:[#allocation71_spill] sm:$0xff] }
 0x495   :  { %16762 = vmatpush1.bf16.msra.mxu0 %v24085_v58  ;;  %16954 = vmatpush1.bf16.msra.mxu1 %v24086_v18 }
 0x496   :  { %16764 = vmatprep.subr.bf16.mxu0 %v24087_v6  ;;  %16956 = vmatprep.subr.bf16.mxu1 %v24088_v37 }
 0x497   :  { %5916 = vmatprep.mubr.f32.mxu0 %v23680_v15  ;;  %6771 = vmatprep.mubr.f32.mxu1 %v23680_v15 }
 0x499   :  { %16766 = vmatpush1.bf16.msra.mxu0 %v24089_v60  ;;  %16958 = vmatpush1.bf16.msra.mxu1 %v24090_v17 }
 0x49a   :  { %16768 = vmatprep.subr.bf16.mxu0 %v24207_v12  ;;  %16960 = vmatprep.subr.bf16.mxu1 %v24208_v20 }
 0x49d   :  { %16770 = vmatpush1.bf16.msra.mxu0 %v24209_v45  ;;  %16962 = vmatpush1.bf16.msra.mxu1 %v24210_v16 }
 0x49e   :  { %16772 = vmatprep.subr.bf16.mxu0 %v24211_v44  ;;  %16964 = vmatprep.subr.bf16.mxu1 %v24212_v51 }
 0x4a1   :  { %16774 = vmatpush1.bf16.msra.mxu0 %v24213_v40  ;;  %16966 = vmatpush1.bf16.msra.mxu1 %v24214_v29 }
 0x4a2   :  { %16776 = vmatprep.subr.bf16.mxu0 %v24215_v50  ;;  %16968 = vmatprep.subr.bf16.mxu1 %v24216_v3 }
 0x4a5   :  { %16778 = vmatpush1.bf16.msra.mxu0 %v24217_v4  ;;  %16970 = vmatpush1.bf16.msra.mxu1 %v24218_v13 }
 0x4a6   :  { %16780 = vmatprep.subr.bf16.mxu0 %v24219_v39  ;;  %16972 = vmatprep.subr.bf16.mxu1 %v24220_v35 }
 0x4a9   :  { %16782 = vmatpush1.bf16.msra.mxu0 %v24221_v26  ;;  %16974 = vmatpush1.bf16.msra.mxu1 %v24222_v2 }
 0x4aa   :  { %16784 = vmatprep.subr.bf16.mxu0 %v24223_v43  ;;  %16976 = vmatprep.subr.bf16.mxu1 %v24224_v28 }
 0x4ad   :  { %16786 = vmatpush1.bf16.msra.mxu0 %v24225_v56  ;;  %16978 = vmatpush1.bf16.msra.mxu1 %v24226_v5 }
 0x4ae   :  { %16788 = vmatprep.subr.bf16.mxu0 %v24227_v23  ;;  %16980 = vmatprep.subr.bf16.mxu1 %v24228_v36 }
 0x4b1   :  { %16790 = vmatpush1.bf16.msra.mxu0 %v24367_v30  ;;  %16982 = vmatpush1.bf16.msra.mxu1 %v24368_v57 }
 0x4b2   :  { %16792 = vmatprep.subr.bf16.mxu0 %v24369_v47  ;;  %16984 = vmatprep.subr.bf16.mxu1 %v24370_v63  ;;  %v24376_v47 = vld [vmem:[#allocation20_spill] sm:$0xff]  ;;  %v24377_v63 = vld [vmem:[#allocation22_spill] sm:$0xff] }
 0x4b4   :  { %5920 = vmatmul.mubr.f32.vlgmr.msra.gmra.mrb[4].mxu0 %v21841_v0  ;;  %6775 = vmatmul.mubr.f32.vlgmr.msra.gmra.mrb[4].mxu1 %v21841_v0  ;;  %v24379_v0 = vld [vmem:[#allocation24_spill] sm:$0xff] }
 0x4b5   :  { %16794 = vmatpush1.bf16.msra.mxu0 %v24371_v62  ;;  %16986 = vmatpush1.bf16.msra.mxu1 %v24372_v46  ;;  %v24380_v62 = vld [vmem:[#allocation120_spill] sm:$0xff]  ;;  %v24381_v46 = vld [vmem:[#allocation121_spill] sm:$0xff] }
 0x4b6   :  { %16796 = vmatprep.subr.bf16.mxu0 %v24373_v53  ;;  %16988 = vmatprep.subr.bf16.mxu1 %v24374_v7  ;;  %v24382_v53 = vld [vmem:[#allocation122_spill] sm:$0xff]  ;;  %v24383_v7 = vld [vmem:[#allocation123_spill] sm:$0xff] }
 0x4b7   :  { %6086 = vmatprep.mubr.f32.mxu0 %v23680_v15  ;;  %6941 = vmatprep.mubr.f32.mxu1 %v23680_v15 }
 0x4b9   :  { %16798 = vmatpush1.bf16.msra.mxu0 %v24375_v9  ;;  %16990 = vmatpush1.bf16.msra.mxu1 %v24376_v47  ;;  %v24386_v9 = vld [vmem:[#allocation94_spill] sm:$0xff]  ;;  %v24387_v47 = vld [vmem:[#allocation21_spill] sm:$0xff] }
 0x4ba   :  { %16800 = vmatprep.subr.bf16.mxu0 %v24377_v63  ;;  %16992 = vmatprep.subr.bf16.mxu1 %v24378_v8  ;;  %v24388_v63 = vld [vmem:[#allocation27_spill] sm:$0xff]  ;;  %v24389_v8 = vld [vmem:[#allocation28_spill] sm:$0xff] }
 0x4bd   :  { %16802 = vmatpush1.bf16.msra.mxu0 %v24379_v0  ;;  %16994 = vmatpush1.bf16.msra.mxu1 %v24380_v62  ;;  %v24390_v0 = vld [vmem:[#allocation33_spill] sm:$0xff]  ;;  %v24391_v62 = vld [vmem:[#allocation35_spill] sm:$0xff] }
 0x4be   :  { %16804 = vmatprep.subr.bf16.mxu0 %v24381_v46  ;;  %16996 = vmatprep.subr.bf16.mxu1 %v24382_v53  ;;  %v24392_v46 = vld [vmem:[#allocation37_spill] sm:$0xff] }
 0x4bf   :  { %v24393_v53 = vld [vmem:[#allocation125_spill] sm:$0xff] }
 0x4c1   :  { %16806 = vmatpush1.bf16.msra.mxu0 %v24383_v7  ;;  %16998 = vmatpush1.bf16.msra.mxu1 %v24384_v42  ;;  %v24394_v7 = vld [vmem:[#allocation126_spill] sm:$0xff] }
 0x4c2   :  { %16808 = vmatprep.subr.bf16.mxu0 %v24385_v34  ;;  %17000 = vmatprep.subr.bf16.mxu1 %v24386_v9  ;;  %v24395_v42 = vld [vmem:[#allocation102_spill] sm:$0xff]  ;;  %v24396_v34 = vld [vmem:[#allocation103_spill] sm:$0xff]  ;;  %v24397_v9 = vld [vmem:[#allocation104_spill] sm:$0xff] }
 0x4c5   :  { %16810 = vmatpush1.bf16.msra.mxu0 %v24387_v47  ;;  %17002 = vmatpush1.bf16.msra.mxu1 %v24388_v63  ;;  %v24398_v47 = vld [vmem:[#allocation105_spill] sm:$0xff]  ;;  %v24399_v63 = vld [vmem:[#allocation106_spill] sm:$0xff] }
 0x4c6   :  { %16812 = vmatprep.subr.bf16.mxu0 %v24389_v8  ;;  %17004 = vmatprep.subr.bf16.mxu1 %v24390_v0  ;;  %v24400_v8 = vld [vmem:[#allocation107_spill] sm:$0xff] }
 0x4c9   :  { %16814 = vmatpush1.bf16.msra.mxu0 %v24391_v62  ;;  %17006 = vmatpush1.bf16.msra.mxu1 %v24392_v46 }
 0x4ca   :  { %16816 = vmatprep.subr.bf16.mxu0 %v24393_v53  ;;  %17008 = vmatprep.subr.bf16.mxu1 %v24394_v7 }
 0x4cd   :  { %16818 = vmatpush1.bf16.msra.mxu0 %v24395_v42  ;;  %17010 = vmatpush1.bf16.msra.mxu1 %v24396_v34 }
 0x4ce   :  { %16820 = vmatprep.subr.bf16.mxu0 %v24397_v9  ;;  %17012 = vmatprep.subr.bf16.mxu1 %v24398_v47  ;;  %v24403_v9 = vld [vmem:[#allocation25_spill] sm:$0xff] }
 0x4d1   :  { %16822 = vmatpush1.bf16.msra.mxu0 %v24399_v63  ;;  %17014 = vmatpush1.bf16.msra.mxu1 %v24400_v8  ;;  %v24402_v8 = vld [vmem:[#allocation84_spill] sm:$0xff] }
 0x4d2   :  { %16824 = vmatprep.subr.bf16.mxu0 %v24083_v10  ;;  %17016 = vmatprep.subr.bf16.mxu1 %v24084_v48 }
 0x4d4   :  { %6088 = vmatmul.mubr.f32.vlgmr.msra.gmra.mrb[4].mxu0 %v21835_v31  ;;  %6943 = vmatmul.mubr.f32.vlgmr.msra.gmra.mrb[4].mxu1 %v21835_v31 }
 0x4d5   :  { %16826 = vmatpush1.bf16.msra.mxu0 %v24085_v58  ;;  %17018 = vmatpush1.bf16.msra.mxu1 %v24086_v18 }
 0x4d6   :  { %16828 = vmatprep.subr.bf16.mxu0 %v24087_v6  ;;  %17020 = vmatprep.subr.bf16.mxu1 %v24088_v37 }
 0x4d7   :  { %6190 = vmatprep.mubr.f32.mxu0 %v23680_v15  ;;  %7045 = vmatprep.mubr.f32.mxu1 %v23680_v15 }
 0x4d9   :  { %16830 = vmatpush1.bf16.msra.mxu0 %v24089_v60  ;;  %17022 = vmatpush1.bf16.msra.mxu1 %v24090_v17 }
 0x4da   :  { %16832 = vmatprep.subr.bf16.mxu0 %v24207_v12  ;;  %17024 = vmatprep.subr.bf16.mxu1 %v24208_v20 }
 0x4dd   :  { %16834 = vmatpush1.bf16.msra.mxu0 %v24209_v45  ;;  %17026 = vmatpush1.bf16.msra.mxu1 %v24210_v16 }
 0x4de   :  { %16836 = vmatprep.subr.bf16.mxu0 %v24211_v44  ;;  %17028 = vmatprep.subr.bf16.mxu1 %v24212_v51 }
 0x4e1   :  { %16838 = vmatpush1.bf16.msra.mxu0 %v24213_v40  ;;  %17030 = vmatpush1.bf16.msra.mxu1 %v24214_v29 }
 0x4e2   :  { %16840 = vmatprep.subr.bf16.mxu0 %v24215_v50  ;;  %17032 = vmatprep.subr.bf16.mxu1 %v24216_v3 }
 0x4e5   :  { %16842 = vmatpush1.bf16.msra.mxu0 %v24217_v4  ;;  %17034 = vmatpush1.bf16.msra.mxu1 %v24218_v13 }
 0x4e6   :  { %16844 = vmatprep.subr.bf16.mxu0 %v24219_v39  ;;  %17036 = vmatprep.subr.bf16.mxu1 %v24220_v35 }
 0x4e9   :  { %16846 = vmatpush1.bf16.msra.mxu0 %v24221_v26  ;;  %17038 = vmatpush1.bf16.msra.mxu1 %v24222_v2 }
 0x4ea   :  { %16848 = vmatprep.subr.bf16.mxu0 %v24223_v43  ;;  %17040 = vmatprep.subr.bf16.mxu1 %v24224_v28 }
 0x4ed   :  { %16850 = vmatpush1.bf16.msra.mxu0 %v24225_v56  ;;  %17042 = vmatpush1.bf16.msra.mxu1 %v24226_v5 }
 0x4ee   :  { %16852 = vmatprep.subr.bf16.mxu0 %v24227_v23  ;;  %17044 = vmatprep.subr.bf16.mxu1 %v24228_v36 }
 0x4f1   :  { %16854 = vmatpush1.bf16.msra.mxu0 %v24367_v30  ;;  %17046 = vmatpush1.bf16.msra.mxu1 %v24368_v57 }
 0x4f2   :  { %17048 = vmatprep.subr.bf16.mxu0 %v24083_v10  ;;  %17240 = vmatprep.subr.bf16.mxu1 %v24084_v48 }
 0x4f4   :  { %6192 = vmatmul.mubr.f32.vlgmr.msra.gmra.mrb[4].mxu0 %v21835_v31  ;;  %7047 = vmatmul.mubr.f32.vlgmr.msra.gmra.mrb[4].mxu1 %v21835_v31  ;;  %v24401_v31 = vld [vmem:[#allocation83_spill] sm:$0xff] }
 0x4f5   :  { %17050 = vmatpush1.bf16.msra.mxu0 %v24085_v58  ;;  %17242 = vmatpush1.bf16.msra.mxu1 %v24086_v18 }
 0x4f6   :  { %17052 = vmatprep.subr.bf16.mxu0 %v24087_v6  ;;  %17244 = vmatprep.subr.bf16.mxu1 %v24088_v37 }
 0x4f7   :  { %7182 = vmatprep.mubr.f32.mxu0 %v23680_v15  ;;  %8037 = vmatprep.mubr.f32.mxu1 %v23680_v15 }
 0x4f9   :  { %17054 = vmatpush1.bf16.msra.mxu0 %v24089_v60  ;;  %17246 = vmatpush1.bf16.msra.mxu1 %v24090_v17 }
 0x4fa   :  { %17056 = vmatprep.subr.bf16.mxu0 %v24207_v12  ;;  %17248 = vmatprep.subr.bf16.mxu1 %v24208_v20 }
 0x4fd   :  { %17058 = vmatpush1.bf16.msra.mxu0 %v24209_v45  ;;  %17250 = vmatpush1.bf16.msra.mxu1 %v24210_v16 }
 0x4fe   :  { %17060 = vmatprep.subr.bf16.mxu0 %v24211_v44  ;;  %17252 = vmatprep.subr.bf16.mxu1 %v24212_v51 }
 0x501   :  { %17062 = vmatpush1.bf16.msra.mxu0 %v24213_v40  ;;  %17254 = vmatpush1.bf16.msra.mxu1 %v24214_v29 }
 0x502   :  { %17064 = vmatprep.subr.bf16.mxu0 %v24215_v50  ;;  %17256 = vmatprep.subr.bf16.mxu1 %v24216_v3 }
 0x505   :  { %17066 = vmatpush1.bf16.msra.mxu0 %v24217_v4  ;;  %17258 = vmatpush1.bf16.msra.mxu1 %v24218_v13 }
 0x506   :  { %17068 = vmatprep.subr.bf16.mxu0 %v24219_v39  ;;  %17260 = vmatprep.subr.bf16.mxu1 %v24220_v35 }
 0x509   :  { %17070 = vmatpush1.bf16.msra.mxu0 %v24221_v26  ;;  %17262 = vmatpush1.bf16.msra.mxu1 %v24222_v2 }
 0x50a   :  { %17072 = vmatprep.subr.bf16.mxu0 %v24223_v43  ;;  %17264 = vmatprep.subr.bf16.mxu1 %v24224_v28 }
 0x50d   :  { %17074 = vmatpush1.bf16.msra.mxu0 %v24225_v56  ;;  %17266 = vmatpush1.bf16.msra.mxu1 %v24226_v5 }
 0x50e   :  { %17076 = vmatprep.subr.bf16.mxu0 %v24227_v23  ;;  %17268 = vmatprep.subr.bf16.mxu1 %v24228_v36 }
 0x511   :  { %17078 = vmatpush1.bf16.msra.mxu0 %v24367_v30  ;;  %17270 = vmatpush1.bf16.msra.mxu1 %v24368_v57 }
 0x512   :  { %17080 = vmatprep.subr.bf16.mxu0 %v24401_v31  ;;  %17272 = vmatprep.subr.bf16.mxu1 %v24402_v8 }
 0x5c7   :  { %v6193_v63 = vpop.f32.mrb[4].mxu0  ;;  %v7048_v47 = vpop.f32.mrb[4].mxu1 }
 0x5c8   :  { %v18971_v34 = vadd.f32 %v6193_v63, %v24403_v9  ;;  %v6195_v42 = vpop.f32.mrb[5].mxu0  ;;  %v7050_v7 = vpop.f32.mrb[5].mxu1  ;;  %v18987_v57 = vadd.f32 %v7048_v47, %v21597_v25 }
 0x5c9   :  { %v18972_v53 = vadd.f32 %v6195_v42, %v21590_v41  ;;  %v18988_v0 = vadd.f32 %v7050_v7, %v21594_v11 }
 0x5ca   :  { %v15827_v46 = vmul.f32 -1.442695, %v18971_v34 }
 0x5cb   :  { %v15828_v62 = vmul.f32 -1.442695, %v18972_v53  ;;  %v15829_v30 = vmul.f32 -1.442695, %v18988_v0 }
 0x5cc   :  { %19387 = vpow2.f32 %v15827_v46 }
 0x5cd   :  { %19389 = vpow2.f32 %v15828_v62 }
 0x5ce   :  { %19391 = vpow2.f32 %v15829_v30 }
 0x5cf   :  { %19393 = vtanh.f32 %v18987_v57 }
 0x5d6   :  { %v19388_v31 = vpop.eup %19387 }
 0x5d7   :  { %v19390_v36 = vpop.eup %19389  ;;  %v7066_v8 = vadd.f32 1.0, %v19388_v31  ;;  %v24405_v31 = vld [vmem:[#allocation92_spill] sm:$0xff] }
 0x5d8   :  { %v7067_v23 = vadd.f32 1.0, %v19390_v36  ;;  %v19392_v63 = vpop.eup %19391 }
 0x5d9   :  { %19395 = vrcp.f32 %v7066_v8  ;;  %v19394_v9 = vpop.eup %19393  ;;  %v7068_v46 = vadd.f32 1.0, %v19392_v63  ;;  %v24406_v63 = vld [vmem:[#allocation16_spill] sm:$0xff] }
 0x5da   :  { %19397 = vrcp.f32 %v7067_v23 }
 0x5db   :  { %19399 = vrcp.f32 %v7068_v46  ;;  %v24410_v46 = vld [vmem:[#allocation98_spill] sm:$0xff] }
 0x5e3   :  { %v19396_v42 = vpop.eup %19395 }
 0x5e4   :  { %v19398_v34 = vpop.eup %19397  ;;  %v7077_v53 = vmul.f32 %v19396_v42, %v19394_v9  ;;  %v24407_v42 = vld [vmem:[#allocation95_spill] sm:$0xff] }
 0x5e5   :  { %v7076_v62 = vmul.f32 %v19398_v34, %v21832_v54  ;;  %v19400_v47 = vpop.eup %19399  ;;  %v24404_v54 = vld [vmem:[#allocation91_spill] sm:$0xff]  ;;  %v24408_v34 = vld [vmem:[#allocation96_spill] sm:$0xff] }
 0x5e7   :  { %v22064_v7 = vadd.f32 %v7077_v53, %v7076_v62  ;;  %v24409_v53 = vld [vmem:[#allocation97_spill] sm:$0xff]  ;;  %v24411_v62 = vld [vmem:[#allocation99_spill] sm:$0xff] }
 0x5e9   :  { %19401 = vtanh.f32 %v22064_v7 }
 0x5f3   :  { %v19402_v0 = vpop.eup %19401 }
 0x5f4   :  { %v7080_v30 = vmul.f32 %v19402_v0, %v19400_v47  ;;  %v24412_v47 = vld [vmem:[#allocation100_spill] sm:$0xff]  ;;  %v24413_v0 = vld [vmem:[#allocation101_spill] sm:$0xff] }
 0x5f6   :  { %v22067_v57 = vand.u32 4294901760, %v7080_v30 }
 0x5f8   :  { %v22070_v36 = vsub.f32 %v7080_v30, %v22067_v57  ;;  %v24414_v30 = vld [vmem:[#allocation44_spill] sm:$0xff] }
 0x5fa   :  { %v22073_v23 = vand.u32 4294901760, %v22070_v36 }
 0x5fc   :  { %v7186_v9 = vsub.f32 %v22070_v36, %v22073_v23 }
 0x5fe   :  { %v7187_v8 = vand.u32 4294901760, %v7186_v9  ;;  %v24415_v9 = vld [vmem:[#allocation45_spill] sm:$0xff] }
 0x600   :  { %7188 = vmatmul.mubr.f32.vlgmr.msra.gmra.mrb[6].mxu0 %v7187_v8  ;;  %8043 = vmatmul.mubr.f32.vlgmr.msra.gmra.mrb[6].mxu1 %v7187_v8  ;;  %v24416_v8 = vld [vmem:[#allocation49_spill] sm:$0xff] }
 0x601   :  { %17082 = vmatpush1.bf16.msra.mxu0 %v24232_v49  ;;  %17274 = vmatpush1.bf16.msra.mxu1 %v24233_v55 }
 0x602   :  { %17084 = vmatprep.subr.bf16.mxu0 %v24318_v61  ;;  %17276 = vmatprep.subr.bf16.mxu1 %v24319_v14 }
 0x603   :  { %7418 = vmatprep.mubr.f32.mxu0 %v23680_v15  ;;  %8273 = vmatprep.mubr.f32.mxu1 %v23680_v15 }
 0x605   :  { %17086 = vmatpush1.bf16.msra.mxu0 %v24404_v54  ;;  %17278 = vmatpush1.bf16.msra.mxu1 %v24405_v31 }
 0x606   :  { %17088 = vmatprep.subr.bf16.mxu0 %v24406_v63  ;;  %17280 = vmatprep.subr.bf16.mxu1 %v24407_v42  ;;  %v24417_v63 = vld [vmem:[#allocation51_spill] sm:$0xff]  ;;  %v24418_v42 = vld [vmem:[#allocation108_spill] sm:$0xff] }
 0x609   :  { %17090 = vmatpush1.bf16.msra.mxu0 %v24408_v34  ;;  %17282 = vmatpush1.bf16.msra.mxu1 %v24409_v53  ;;  %v24419_v34 = vld [vmem:[#allocation109_spill] sm:$0xff]  ;;  %v24420_v53 = vld [vmem:[#allocation110_spill] sm:$0xff] }
 0x60a   :  { %17092 = vmatprep.subr.bf16.mxu0 %v24410_v46  ;;  %17284 = vmatprep.subr.bf16.mxu1 %v24411_v62  ;;  %v24421_v46 = vld [vmem:[#allocation111_spill] sm:$0xff]  ;;  %v24422_v62 = vld [vmem:[#allocation112_spill] sm:$0xff] }
 0x60d   :  { %17094 = vmatpush1.bf16.msra.mxu0 %v24412_v47  ;;  %17286 = vmatpush1.bf16.msra.mxu1 %v24413_v0  ;;  %v24423_v47 = vld [vmem:[#allocation113_spill] sm:$0xff]  ;;  %v24424_v0 = vld [vmem:[#allocation114_spill] sm:$0xff] }
 0x60e   :  { %17096 = vmatprep.subr.bf16.mxu0 %v24414_v30  ;;  %17288 = vmatprep.subr.bf16.mxu1 %v24415_v9  ;;  %v24425_v30 = vld [vmem:[#allocation115_spill] sm:$0xff]  ;;  %v24426_v9 = vld [vmem:[#allocation116_spill] sm:$0xff] }
 0x611   :  { %17098 = vmatpush1.bf16.msra.mxu0 %v24416_v8  ;;  %17290 = vmatpush1.bf16.msra.mxu1 %v24417_v63  ;;  %v24427_v8 = vld [vmem:[#allocation117_spill] sm:$0xff]  ;;  %v24428_v63 = vld [vmem:[#allocation118_spill] sm:$0xff] }
 0x612   :  { %17100 = vmatprep.subr.bf16.mxu0 %v24418_v42  ;;  %17292 = vmatprep.subr.bf16.mxu1 %v24419_v34  ;;  %v24429_v42 = vld [vmem:[#allocation119_spill] sm:$0xff]  ;;  %v24430_v34 = vld [vmem:[#allocation52_spill] sm:$0xff] }
 0x615   :  { %17102 = vmatpush1.bf16.msra.mxu0 %v24420_v53  ;;  %17294 = vmatpush1.bf16.msra.mxu1 %v24421_v46  ;;  %v24431_v53 = vld [vmem:[#allocation58_spill] sm:$0xff] }
 0x616   :  { %17104 = vmatprep.subr.bf16.mxu0 %v24422_v62  ;;  %17296 = vmatprep.subr.bf16.mxu1 %v24423_v47  ;;  %v24432_v47 = vld [vmem:[#allocation59_spill] sm:$0xff] }
 0x619   :  { %17106 = vmatpush1.bf16.msra.mxu0 %v24424_v0  ;;  %17298 = vmatpush1.bf16.msra.mxu1 %v24425_v30  ;;  %v24433_v0 = vld [vmem:[#allocation61_spill] sm:$0xff]  ;;  %v24434_v30 = vld [vmem:[#allocation62_spill] sm:$0xff] }
 0x61a   :  { %17108 = vmatprep.subr.bf16.mxu0 %v24426_v9  ;;  %17300 = vmatprep.subr.bf16.mxu1 %v24427_v8  ;;  %v24435_v9 = vld [vmem:[#allocation65_spill] sm:$0xff] }
 0x61d   :  { %17110 = vmatpush1.bf16.msra.mxu0 %v24428_v63  ;;  %17302 = vmatpush1.bf16.msra.mxu1 %v24429_v42  ;;  %v24436_v42 = vld [vmem:[#allocation67_spill] sm:$0xff]  ;;  %v24439_v63 = vld [vmem:[#allocation74_spill] sm:$0xff] }
 0x61e   :  { %17112 = vmatprep.subr.bf16.mxu0 %v24430_v34  ;;  %17304 = vmatprep.subr.bf16.mxu1 %v24431_v53  ;;  %v24437_v34 = vld [vmem:[#allocation68_spill] sm:$0xff]  ;;  %v24438_v53 = vld [vmem:[#allocation73_spill] sm:$0xff] }
 0x620   :  { %7420 = vmatmul.mubr.f32.vlgmr.msra.gmra.mrb[6].mxu0 %v22067_v57  ;;  %8275 = vmatmul.mubr.f32.vlgmr.msra.gmra.mrb[6].mxu1 %v22067_v57 }
 0x621   :  { %17114 = vmatpush1.bf16.msra.mxu0 %v24432_v47  ;;  %17306 = vmatpush1.bf16.msra.mxu1 %v24433_v0 }
 0x622   :  { %17116 = vmatprep.subr.bf16.mxu0 %v24434_v30  ;;  %17308 = vmatprep.subr.bf16.mxu1 %v24435_v9 }
 0x623   :  { %7554 = vmatprep.mubr.f32.mxu0 %v23680_v15  ;;  %8409 = vmatprep.mubr.f32.mxu1 %v23680_v15 }
 0x625   :  { %17118 = vmatpush1.bf16.msra.mxu0 %v24436_v42  ;;  %17310 = vmatpush1.bf16.msra.mxu1 %v24437_v34 }
 0x626   :  { %17120 = vmatprep.subr.bf16.mxu0 %v24438_v53  ;;  %17312 = vmatprep.subr.bf16.mxu1 %v24439_v63  ;;  %v24470_v63 = vld [vmem:[#allocation93_spill] sm:$0xff]  ;;  %v24471_v53 = vld [vmem:[#allocation124_spill] sm:$0xff] }
 0x629   :  { %17122 = vmatpush1.bf16.msra.mxu0 %v24356_v32  ;;  %17314 = vmatpush1.bf16.msra.mxu1 %v24357_v27  ;;  %v24440_v32 = vld [vmem:[#allocation8_spill] sm:$0xff]  ;;  %v24441_v27 = vld [vmem:[#allocation10_spill] sm:$0xff] }
 0x62a   :  { %17124 = vmatprep.subr.bf16.mxu0 %v24358_v22  ;;  %17316 = vmatprep.subr.bf16.mxu1 %v24359_v52  ;;  %v24442_v22 = vld [vmem:[#allocation11_spill] sm:$0xff]  ;;  %v24443_v52 = vld [vmem:[#allocation12_spill] sm:$0xff] }
 0x62d   :  { %17126 = vmatpush1.bf16.msra.mxu0 %v24360_v33  ;;  %17318 = vmatpush1.bf16.msra.mxu1 %v24361_v38  ;;  %v24444_v33 = vld [vmem:[#allocation13_spill] sm:$0xff]  ;;  %v24445_v38 = vld [vmem:[#allocation14_spill] sm:$0xff] }
 0x62e   :  { %17128 = vmatprep.subr.bf16.mxu0 %v24362_v19  ;;  %17320 = vmatprep.subr.bf16.mxu1 %v24363_v1  ;;  %v24446_v19 = vld [vmem:[#allocation15_spill] sm:$0xff]  ;;  %v24447_v1 = vld [vmem:[#allocation26_spill] sm:$0xff] }
 0x631   :  { %17130 = vmatpush1.bf16.msra.mxu0 %v24364_v59  ;;  %17322 = vmatpush1.bf16.msra.mxu1 %v24365_v21  ;;  %v24448_v59 = vld [vmem:[#allocation34_spill] sm:$0xff] }
 0x632   :  { %17132 = vmatprep.subr.bf16.mxu0 %v24366_v24  ;;  %17324 = vmatprep.subr.bf16.mxu1 %v24440_v32  ;;  %v24449_v21 = vld [vmem:[#allocation38_spill] sm:$0xff]  ;;  %v24450_v24 = vld [vmem:[#allocation39_spill] sm:$0xff] }
 0x633   :  { %v24464_v32 = vld [vmem:[#allocation23_spill] sm:$0xff] }
 0x635   :  { %17134 = vmatpush1.bf16.msra.mxu0 %v24441_v27  ;;  %17326 = vmatpush1.bf16.msra.mxu1 %v24442_v22  ;;  %v24460_v22 = vld [vmem:[#allocation18_spill] sm:$0xff]  ;;  %v24461_v27 = vld [vmem:[#allocation19_spill] sm:$0xff] }
 0x636   :  { %17136 = vmatprep.subr.bf16.mxu0 %v24443_v52  ;;  %17328 = vmatprep.subr.bf16.mxu1 %v24444_v33  ;;  %v24458_v33 = vld [vmem:[#allocation9_spill] sm:$0xff] }
 0x637   :  { %v24459_v52 = vld [vmem:[#allocation17_spill] sm:$0xff] }
 0x639   :  { %17138 = vmatpush1.bf16.msra.mxu0 %v24445_v38  ;;  %17330 = vmatpush1.bf16.msra.mxu1 %v24446_v19  ;;  %v24456_v19 = vld [vmem:[#allocation42_spill] sm:$0xff]  ;;  %v24457_v38 = vld [vmem:[#allocation43_spill] sm:$0xff] }
 0x63a   :  { %17140 = vmatprep.subr.bf16.mxu0 %v24447_v1  ;;  %17332 = vmatprep.subr.bf16.mxu1 %v24448_v59  ;;  %v24454_v59 = vld [vmem:[#allocation72_spill] sm:$0xff]  ;;  %v24455_v1 = vld [vmem:[#allocation41_spill] sm:$0xff] }
 0x63d   :  { %17142 = vmatpush1.bf16.msra.mxu0 %v24449_v21  ;;  %17334 = vmatpush1.bf16.msra.mxu1 %v24450_v24  ;;  %v24452_v24 = vld [vmem:[#allocation70_spill] sm:$0xff]  ;;  %v24453_v21 = vld [vmem:[#allocation71_spill] sm:$0xff] }
 0x63e   :  { %17144 = vmatprep.subr.bf16.mxu0 %v24083_v10  ;;  %17336 = vmatprep.subr.bf16.mxu1 %v24084_v48 }
 0x640   :  { %7557 = vmatmul.mubr.f32.vlgmr.msra.gmra.mrb[6].mxu0 %v22070_v36  ;;  %8412 = vmatmul.mubr.f32.vlgmr.msra.gmra.mrb[6].mxu1 %v22070_v36  ;;  %v24451_v36 = vld [vmem:[#allocation69_spill] sm:$0xff] }
 0x641   :  { %17146 = vmatpush1.bf16.msra.mxu0 %v24085_v58  ;;  %17338 = vmatpush1.bf16.msra.mxu1 %v24086_v18 }
 0x642   :  { %17148 = vmatprep.subr.bf16.mxu0 %v24087_v6  ;;  %17340 = vmatprep.subr.bf16.mxu1 %v24088_v37 }
 0x643   :  { %7659 = vmatprep.mubr.f32.mxu0 %v23680_v15  ;;  %8514 = vmatprep.mubr.f32.mxu1 %v23680_v15 }
 0x645   :  { %17150 = vmatpush1.bf16.msra.mxu0 %v24089_v60  ;;  %17342 = vmatpush1.bf16.msra.mxu1 %v24090_v17 }
 0x646   :  { %17152 = vmatprep.subr.bf16.mxu0 %v24207_v12  ;;  %17344 = vmatprep.subr.bf16.mxu1 %v24208_v20 }
 0x649   :  { %17154 = vmatpush1.bf16.msra.mxu0 %v24209_v45  ;;  %17346 = vmatpush1.bf16.msra.mxu1 %v24210_v16 }
 0x64a   :  { %17156 = vmatprep.subr.bf16.mxu0 %v24211_v44  ;;  %17348 = vmatprep.subr.bf16.mxu1 %v24212_v51 }
 0x64d   :  { %17158 = vmatpush1.bf16.msra.mxu0 %v24213_v40  ;;  %17350 = vmatpush1.bf16.msra.mxu1 %v24214_v29 }
 0x64e   :  { %17160 = vmatprep.subr.bf16.mxu0 %v24215_v50  ;;  %17352 = vmatprep.subr.bf16.mxu1 %v24216_v3 }
 0x651   :  { %17162 = vmatpush1.bf16.msra.mxu0 %v24217_v4  ;;  %17354 = vmatpush1.bf16.msra.mxu1 %v24218_v13 }
 0x652   :  { %17164 = vmatprep.subr.bf16.mxu0 %v24219_v39  ;;  %17356 = vmatprep.subr.bf16.mxu1 %v24220_v35 }
 0x655   :  { %17166 = vmatpush1.bf16.msra.mxu0 %v24221_v26  ;;  %17358 = vmatpush1.bf16.msra.mxu1 %v24222_v2 }
 0x656   :  { %17168 = vmatprep.subr.bf16.mxu0 %v24223_v43  ;;  %17360 = vmatprep.subr.bf16.mxu1 %v24224_v28 }
 0x659   :  { %17170 = vmatpush1.bf16.msra.mxu0 %v24225_v56  ;;  %17362 = vmatpush1.bf16.msra.mxu1 %v24226_v5 }
 0x65a   :  { %17172 = vmatprep.subr.bf16.mxu0 %v24451_v36  ;;  %17364 = vmatprep.subr.bf16.mxu1 %v24452_v24 }
 0x65d   :  { %17174 = vmatpush1.bf16.msra.mxu0 %v24453_v21  ;;  %17366 = vmatpush1.bf16.msra.mxu1 %v24454_v59 }
 0x65e   :  { %17176 = vmatprep.subr.bf16.mxu0 %v24455_v1  ;;  %17368 = vmatprep.subr.bf16.mxu1 %v24456_v19  ;;  %v24462_v1 = vld [vmem:[#allocation20_spill] sm:$0xff]  ;;  %v24463_v19 = vld [vmem:[#allocation22_spill] sm:$0xff] }
 0x660   :  { %7663 = vmatmul.mubr.f32.vlgmr.msra.gmra.mrb[6].mxu0 %v22073_v23  ;;  %8518 = vmatmul.mubr.f32.vlgmr.msra.gmra.mrb[6].mxu1 %v22073_v23  ;;  %v24465_v23 = vld [vmem:[#allocation24_spill] sm:$0xff] }
 0x661   :  { %17178 = vmatpush1.bf16.msra.mxu0 %v24457_v38  ;;  %17370 = vmatpush1.bf16.msra.mxu1 %v24458_v33  ;;  %v24466_v38 = vld [vmem:[#allocation120_spill] sm:$0xff]  ;;  %v24467_v33 = vld [vmem:[#allocation121_spill] sm:$0xff] }
 0x662   :  { %17180 = vmatprep.subr.bf16.mxu0 %v24459_v52  ;;  %17372 = vmatprep.subr.bf16.mxu1 %v24460_v22  ;;  %v24468_v52 = vld [vmem:[#allocation122_spill] sm:$0xff]  ;;  %v24469_v22 = vld [vmem:[#allocation123_spill] sm:$0xff] }
 0x663   :  { %7829 = vmatprep.mubr.f32.mxu0 %v23680_v15  ;;  %8684 = vmatprep.mubr.f32.mxu1 %v23680_v15 }
 0x665   :  { %17182 = vmatpush1.bf16.msra.mxu0 %v24461_v27  ;;  %17374 = vmatpush1.bf16.msra.mxu1 %v24462_v1  ;;  %v24472_v27 = vld [vmem:[#allocation94_spill] sm:$0xff]  ;;  %v24473_v1 = vld [vmem:[#allocation21_spill] sm:$0xff] }
 0x666   :  { %17184 = vmatprep.subr.bf16.mxu0 %v24463_v19  ;;  %17376 = vmatprep.subr.bf16.mxu1 %v24464_v32  ;;  %v24474_v19 = vld [vmem:[#allocation27_spill] sm:$0xff]  ;;  %v24475_v32 = vld [vmem:[#allocation28_spill] sm:$0xff] }
 0x669   :  { %17186 = vmatpush1.bf16.msra.mxu0 %v24465_v23  ;;  %17378 = vmatpush1.bf16.msra.mxu1 %v24466_v38  ;;  %v24476_v23 = vld [vmem:[#allocation33_spill] sm:$0xff]  ;;  %v24477_v38 = vld [vmem:[#allocation35_spill] sm:$0xff] }
 0x66a   :  { %17188 = vmatprep.subr.bf16.mxu0 %v24467_v33  ;;  %17380 = vmatprep.subr.bf16.mxu1 %v24468_v52  ;;  %v24478_v33 = vld [vmem:[#allocation37_spill] sm:$0xff] }
 0x66b   :  { %v24479_v52 = vld [vmem:[#allocation125_spill] sm:$0xff] }
 0x66d   :  { %17190 = vmatpush1.bf16.msra.mxu0 %v24469_v22  ;;  %17382 = vmatpush1.bf16.msra.mxu1 %v24470_v63  ;;  %v24480_v22 = vld [vmem:[#allocation126_spill] sm:$0xff] }
 0x66e   :  { %17192 = vmatprep.subr.bf16.mxu0 %v24471_v53  ;;  %17384 = vmatprep.subr.bf16.mxu1 %v24472_v27  ;;  %v24481_v63 = vld [vmem:[#allocation102_spill] sm:$0xff]  ;;  %v24482_v53 = vld [vmem:[#allocation103_spill] sm:$0xff]  ;;  %v24483_v27 = vld [vmem:[#allocation104_spill] sm:$0xff] }
 0x671   :  { %17194 = vmatpush1.bf16.msra.mxu0 %v24473_v1  ;;  %17386 = vmatpush1.bf16.msra.mxu1 %v24474_v19  ;;  %v24484_v1 = vld [vmem:[#allocation105_spill] sm:$0xff]  ;;  %v24485_v19 = vld [vmem:[#allocation106_spill] sm:$0xff] }
 0x672   :  { %17196 = vmatprep.subr.bf16.mxu0 %v24475_v32  ;;  %17388 = vmatprep.subr.bf16.mxu1 %v24476_v23  ;;  %v24486_v32 = vld [vmem:[#allocation107_spill] sm:$0xff] }
 0x675   :  { %17198 = vmatpush1.bf16.msra.mxu0 %v24477_v38  ;;  %17390 = vmatpush1.bf16.msra.mxu1 %v24478_v33 }
 0x676   :  { %17200 = vmatprep.subr.bf16.mxu0 %v24479_v52  ;;  %17392 = vmatprep.subr.bf16.mxu1 %v24480_v22 }
 0x679   :  { %17202 = vmatpush1.bf16.msra.mxu0 %v24481_v63  ;;  %17394 = vmatpush1.bf16.msra.mxu1 %v24482_v53 }
 0x67a   :  { %17204 = vmatprep.subr.bf16.mxu0 %v24483_v27  ;;  %17396 = vmatprep.subr.bf16.mxu1 %v24484_v1  ;;  %v24489_v27 = vld [vmem:[#allocation25_spill] sm:$0xff] }
 0x67d   :  { %17206 = vmatpush1.bf16.msra.mxu0 %v24485_v19  ;;  %17398 = vmatpush1.bf16.msra.mxu1 %v24486_v32  ;;  %v24488_v32 = vld [vmem:[#allocation84_spill] sm:$0xff] }
 0x67e   :  { %17208 = vmatprep.subr.bf16.mxu0 %v24083_v10  ;;  %17400 = vmatprep.subr.bf16.mxu1 %v24084_v48 }
 0x680   :  { %7831 = vmatmul.mubr.f32.vlgmr.msra.gmra.mrb[6].mxu0 %v22067_v57  ;;  %8686 = vmatmul.mubr.f32.vlgmr.msra.gmra.mrb[6].mxu1 %v22067_v57 }
 0x681   :  { %17210 = vmatpush1.bf16.msra.mxu0 %v24085_v58  ;;  %17402 = vmatpush1.bf16.msra.mxu1 %v24086_v18 }
 0x682   :  { %17212 = vmatprep.subr.bf16.mxu0 %v24087_v6  ;;  %17404 = vmatprep.subr.bf16.mxu1 %v24088_v37 }
 0x683   :  { %7933 = vmatprep.mubr.f32.mxu0 %v23680_v15  ;;  %8788 = vmatprep.mubr.f32.mxu1 %v23680_v15 }
 0x685   :  { %17214 = vmatpush1.bf16.msra.mxu0 %v24089_v60  ;;  %17406 = vmatpush1.bf16.msra.mxu1 %v24090_v17 }
 0x686   :  { %17216 = vmatprep.subr.bf16.mxu0 %v24207_v12  ;;  %17408 = vmatprep.subr.bf16.mxu1 %v24208_v20 }
 0x689   :  { %17218 = vmatpush1.bf16.msra.mxu0 %v24209_v45  ;;  %17410 = vmatpush1.bf16.msra.mxu1 %v24210_v16 }
 0x68a   :  { %17220 = vmatprep.subr.bf16.mxu0 %v24211_v44  ;;  %17412 = vmatprep.subr.bf16.mxu1 %v24212_v51 }
 0x68d   :  { %17222 = vmatpush1.bf16.msra.mxu0 %v24213_v40  ;;  %17414 = vmatpush1.bf16.msra.mxu1 %v24214_v29 }
 0x68e   :  { %17224 = vmatprep.subr.bf16.mxu0 %v24215_v50  ;;  %17416 = vmatprep.subr.bf16.mxu1 %v24216_v3 }
 0x691   :  { %17226 = vmatpush1.bf16.msra.mxu0 %v24217_v4  ;;  %17418 = vmatpush1.bf16.msra.mxu1 %v24218_v13 }
 0x692   :  { %17228 = vmatprep.subr.bf16.mxu0 %v24219_v39  ;;  %17420 = vmatprep.subr.bf16.mxu1 %v24220_v35 }
 0x695   :  { %17230 = vmatpush1.bf16.msra.mxu0 %v24221_v26  ;;  %17422 = vmatpush1.bf16.msra.mxu1 %v24222_v2 }
 0x696   :  { %17232 = vmatprep.subr.bf16.mxu0 %v24223_v43  ;;  %17424 = vmatprep.subr.bf16.mxu1 %v24224_v28 }
 0x699   :  { %17234 = vmatpush1.bf16.msra.mxu0 %v24225_v56  ;;  %17426 = vmatpush1.bf16.msra.mxu1 %v24226_v5 }
 0x69a   :  { %17236 = vmatprep.subr.bf16.mxu0 %v24451_v36  ;;  %17428 = vmatprep.subr.bf16.mxu1 %v24452_v24 }
 0x69d   :  { %17238 = vmatpush1.bf16.msra.mxu0 %v24453_v21  ;;  %17430 = vmatpush1.bf16.msra.mxu1 %v24454_v59 }
 0x69e   :  { %17432 = vmatprep.subr.bf16.mxu0 %v24083_v10  ;;  %17624 = vmatprep.subr.bf16.mxu1 %v24084_v48 }
 0x6a0   :  { %7935 = vmatmul.mubr.f32.vlgmr.msra.gmra.mrb[6].mxu0 %v22067_v57  ;;  %8790 = vmatmul.mubr.f32.vlgmr.msra.gmra.mrb[6].mxu1 %v22067_v57  ;;  %v24487_v57 = vld [vmem:[#allocation83_spill] sm:$0xff] }
 0x6a1   :  { %17434 = vmatpush1.bf16.msra.mxu0 %v24085_v58  ;;  %17626 = vmatpush1.bf16.msra.mxu1 %v24086_v18 }
 0x6a2   :  { %17436 = vmatprep.subr.bf16.mxu0 %v24087_v6  ;;  %17628 = vmatprep.subr.bf16.mxu1 %v24088_v37 }
 0x6a3   :  { %8925 = vmatprep.mubr.f32.mxu0 %v23680_v15  ;;  %9780 = vmatprep.mubr.f32.mxu1 %v23680_v15 }
 0x6a5   :  { %17438 = vmatpush1.bf16.msra.mxu0 %v24089_v60  ;;  %17630 = vmatpush1.bf16.msra.mxu1 %v24090_v17 }
 0x6a6   :  { %17440 = vmatprep.subr.bf16.mxu0 %v24207_v12  ;;  %17632 = vmatprep.subr.bf16.mxu1 %v24208_v20 }
 0x6a9   :  { %17442 = vmatpush1.bf16.msra.mxu0 %v24209_v45  ;;  %17634 = vmatpush1.bf16.msra.mxu1 %v24210_v16 }
 0x6aa   :  { %17444 = vmatprep.subr.bf16.mxu0 %v24211_v44  ;;  %17636 = vmatprep.subr.bf16.mxu1 %v24212_v51 }
 0x6ad   :  { %17446 = vmatpush1.bf16.msra.mxu0 %v24213_v40  ;;  %17638 = vmatpush1.bf16.msra.mxu1 %v24214_v29 }
 0x6ae   :  { %17448 = vmatprep.subr.bf16.mxu0 %v24215_v50  ;;  %17640 = vmatprep.subr.bf16.mxu1 %v24216_v3 }
 0x6b1   :  { %17450 = vmatpush1.bf16.msra.mxu0 %v24217_v4  ;;  %17642 = vmatpush1.bf16.msra.mxu1 %v24218_v13 }
 0x6b2   :  { %17452 = vmatprep.subr.bf16.mxu0 %v24219_v39  ;;  %17644 = vmatprep.subr.bf16.mxu1 %v24220_v35 }
 0x6b5   :  { %17454 = vmatpush1.bf16.msra.mxu0 %v24221_v26  ;;  %17646 = vmatpush1.bf16.msra.mxu1 %v24222_v2 }
 0x6b6   :  { %17456 = vmatprep.subr.bf16.mxu0 %v24223_v43  ;;  %17648 = vmatprep.subr.bf16.mxu1 %v24224_v28 }
 0x6b9   :  { %17458 = vmatpush1.bf16.msra.mxu0 %v24225_v56  ;;  %17650 = vmatpush1.bf16.msra.mxu1 %v24226_v5 }
 0x6ba   :  { %17460 = vmatprep.subr.bf16.mxu0 %v24451_v36  ;;  %17652 = vmatprep.subr.bf16.mxu1 %v24452_v24 }
 0x6bd   :  { %17462 = vmatpush1.bf16.msra.mxu0 %v24453_v21  ;;  %17654 = vmatpush1.bf16.msra.mxu1 %v24454_v59 }
 0x6be   :  { %17464 = vmatprep.subr.bf16.mxu0 %v24487_v57  ;;  %17656 = vmatprep.subr.bf16.mxu1 %v24488_v32 }
 0x773   :  { %v7936_v19 = vpop.f32.mrb[6].mxu0  ;;  %v8791_v1 = vpop.f32.mrb[6].mxu1 }
 0x774   :  { %v18973_v53 = vadd.f32 %v7936_v19, %v24489_v27  ;;  %v7938_v63 = vpop.f32.mrb[7].mxu0  ;;  %v8793_v22 = vpop.f32.mrb[7].mxu1  ;;  %v18989_v59 = vadd.f32 %v8791_v1, %v21597_v25 }
 0x775   :  { %v18974_v52 = vadd.f32 %v7938_v63, %v21590_v41  ;;  %v18990_v23 = vadd.f32 %v8793_v22, %v21594_v11 }
 0x776   :  { %v15830_v33 = vmul.f32 -1.442695, %v18973_v53 }
 0x777   :  { %v15831_v38 = vmul.f32 -1.442695, %v18974_v52  ;;  %v15832_v21 = vmul.f32 -1.442695, %v18990_v23 }
 0x778   :  { %19403 = vpow2.f32 %v15830_v33 }
 0x779   :  { %19405 = vpow2.f32 %v15831_v38 }
 0x77a   :  { %19407 = vpow2.f32 %v15832_v21 }
 0x77b   :  { %19409 = vtanh.f32 %v18989_v59 }
 0x782   :  { %v19404_v57 = vpop.eup %19403 }
 0x783   :  { %v19406_v24 = vpop.eup %19405  ;;  %v8809_v32 = vadd.f32 1.0, %v19404_v57  ;;  %v24491_v57 = vld [vmem:[#allocation95_spill] sm:$0xff] }
 0x784   :  { %v8810_v36 = vadd.f32 1.0, %v19406_v24  ;;  %v19408_v19 = vpop.eup %19407 }
 0x785   :  { %19411 = vrcp.f32 %v8809_v32  ;;  %v19410_v27 = vpop.eup %19409  ;;  %v8811_v33 = vadd.f32 1.0, %v19408_v19  ;;  %v24492_v19 = vld [vmem:[#allocation96_spill] sm:$0xff] }
 0x786   :  { %19413 = vrcp.f32 %v8810_v36  ;;  %v24490_v36 = vld [vmem:[#allocation16_spill] sm:$0xff] }
 0x787   :  { %19415 = vrcp.f32 %v8811_v33  ;;  %v24496_v33 = vld [vmem:[#allocation100_spill] sm:$0xff] }
 0x78f   :  { %v19412_v63 = vpop.eup %19411 }
 0x790   :  { %v19414_v53 = vpop.eup %19413  ;;  %v8820_v52 = vmul.f32 %v19412_v63, %v19410_v27  ;;  %v24493_v63 = vld [vmem:[#allocation97_spill] sm:$0xff] }
 0x791   :  { %v8819_v38 = vmul.f32 %v19414_v53, %v22064_v7  ;;  %v19416_v1 = vpop.eup %19415  ;;  %v24494_v53 = vld [vmem:[#allocation98_spill] sm:$0xff] }
 0x793   :  { %v22296_v22 = vadd.f32 %v8820_v52, %v8819_v38  ;;  %v24495_v52 = vld [vmem:[#allocation99_spill] sm:$0xff]  ;;  %v24497_v38 = vld [vmem:[#allocation101_spill] sm:$0xff] }
 0x795   :  { %19417 = vtanh.f32 %v22296_v22 }
 0x79f   :  { %v19418_v23 = vpop.eup %19417 }
 0x7a0   :  { %v8823_v21 = vmul.f32 %v19418_v23, %v19416_v1  ;;  %v24498_v1 = vld [vmem:[#allocation44_spill] sm:$0xff]  ;;  %v24499_v23 = vld [vmem:[#allocation45_spill] sm:$0xff] }
 0x7a2   :  { %v22299_v59 = vand.u32 4294901760, %v8823_v21 }
 0x7a4   :  { %v22302_v32 = vsub.f32 %v8823_v21, %v22299_v59  ;;  %v24500_v21 = vld [vmem:[#allocation49_spill] sm:$0xff] }
 0x7a6   :  { %v22305_v24 = vand.u32 4294901760, %v22302_v32 }
 0x7a8   :  { %v8929_v27 = vsub.f32 %v22302_v32, %v22305_v24 }
 0x7aa   :  { %v8930_v7 = vand.u32 4294901760, %v8929_v27  ;;  %v24501_v27 = vld [vmem:[#allocation51_spill] sm:$0xff] }
 0x7ac   :  { %8931 = vmatmul.mubr.f32.vlgmr.msra.gmra.mrb[8].mxu0 %v8930_v7  ;;  %9786 = vmatmul.mubr.f32.vlgmr.msra.gmra.mrb[8].mxu1 %v8930_v7  ;;  %v24502_v7 = vld [vmem:[#allocation108_spill] sm:$0xff] }
 0x7ad   :  { %17466 = vmatpush1.bf16.msra.mxu0 %v24232_v49  ;;  %17658 = vmatpush1.bf16.msra.mxu1 %v24233_v55 }
 0x7ae   :  { %17468 = vmatprep.subr.bf16.mxu0 %v24318_v61  ;;  %17660 = vmatprep.subr.bf16.mxu1 %v24319_v14 }
 0x7af   :  { %9161 = vmatprep.mubr.f32.mxu0 %v23680_v15  ;;  %10016 = vmatprep.mubr.f32.mxu1 %v23680_v15 }
 0x7b1   :  { %17470 = vmatpush1.bf16.msra.mxu0 %v24404_v54  ;;  %17662 = vmatpush1.bf16.msra.mxu1 %v24405_v31 }
 0x7b2   :  { %17472 = vmatprep.subr.bf16.mxu0 %v24490_v36  ;;  %17664 = vmatprep.subr.bf16.mxu1 %v24491_v57 }
 0x7b5   :  { %17474 = vmatpush1.bf16.msra.mxu0 %v24492_v19  ;;  %17666 = vmatpush1.bf16.msra.mxu1 %v24493_v63  ;;  %v24503_v19 = vld [vmem:[#allocation109_spill] sm:$0xff]  ;;  %v24504_v63 = vld [vmem:[#allocation110_spill] sm:$0xff] }
 0x7b6   :  { %17476 = vmatprep.subr.bf16.mxu0 %v24494_v53  ;;  %17668 = vmatprep.subr.bf16.mxu1 %v24495_v52 }
 0x7b9   :  { %17478 = vmatpush1.bf16.msra.mxu0 %v24496_v33  ;;  %17670 = vmatpush1.bf16.msra.mxu1 %v24497_v38  ;;  %v24505_v33 = vld [vmem:[#allocation113_spill] sm:$0xff]  ;;  %v24506_v38 = vld [vmem:[#allocation114_spill] sm:$0xff] }
 0x7ba   :  { %17480 = vmatprep.subr.bf16.mxu0 %v24498_v1  ;;  %17672 = vmatprep.subr.bf16.mxu1 %v24499_v23  ;;  %v24507_v1 = vld [vmem:[#allocation115_spill] sm:$0xff]  ;;  %v24508_v23 = vld [vmem:[#allocation116_spill] sm:$0xff] }
 0x7bd   :  { %17482 = vmatpush1.bf16.msra.mxu0 %v24500_v21  ;;  %17674 = vmatpush1.bf16.msra.mxu1 %v24501_v27  ;;  %v24509_v27 = vld [vmem:[#allocation118_spill] sm:$0xff] }
 0x7be   :  { %17484 = vmatprep.subr.bf16.mxu0 %v24502_v7  ;;  %17676 = vmatprep.subr.bf16.mxu1 %v24503_v19  ;;  %v24510_v7 = vld [vmem:[#allocation119_spill] sm:$0xff]  ;;  %v24511_v19 = vld [vmem:[#allocation52_spill] sm:$0xff] }
 0x7c1   :  { %17486 = vmatpush1.bf16.msra.mxu0 %v24504_v63  ;;  %17678 = vmatpush1.bf16.msra.mxu1 %v24421_v46  ;;  %v24512_v63 = vld [vmem:[#allocation58_spill] sm:$0xff] }
 0x7c2   :  { %17488 = vmatprep.subr.bf16.mxu0 %v24422_v62  ;;  %17680 = vmatprep.subr.bf16.mxu1 %v24505_v33 }
 0x7c5   :  { %17490 = vmatpush1.bf16.msra.mxu0 %v24506_v38  ;;  %17682 = vmatpush1.bf16.msra.mxu1 %v24507_v1  ;;  %v24557_v1 = vld [vmem:[#allocation124_spill] sm:$0xff] }
 0x7c6   :  { %17492 = vmatprep.subr.bf16.mxu0 %v24508_v23  ;;  %17684 = vmatprep.subr.bf16.mxu1 %v24427_v8  ;;  %v24521_v8 = vld [vmem:[#allocation81_spill] sm:$0xff] }
 0x7c7   :  { %v24556_v23 = vld [vmem:[#allocation93_spill] sm:$0xff] }
 0x7c9   :  { %17494 = vmatpush1.bf16.msra.mxu0 %v24509_v27  ;;  %17686 = vmatpush1.bf16.msra.mxu1 %v24510_v7  ;;  %v24515_v7 = vld [vmem:[#allocation75_spill] sm:$0xff]  ;;  %v24520_v27 = vld [vmem:[#allocation80_spill] sm:$0xff] }
 0x7ca   :  { %17496 = vmatprep.subr.bf16.mxu0 %v24511_v19  ;;  %17688 = vmatprep.subr.bf16.mxu1 %v24512_v63  ;;  %v24513_v63 = vld [vmem:[#allocation73_spill] sm:$0xff]  ;;  %v24514_v19 = vld [vmem:[#allocation74_spill] sm:$0xff] }
 0x7cc   :  { %9163 = vmatmul.mubr.f32.vlgmr.msra.gmra.mrb[8].mxu0 %v22299_v59  ;;  %10018 = vmatmul.mubr.f32.vlgmr.msra.gmra.mrb[8].mxu1 %v22299_v59 }
 0x7cd   :  { %17498 = vmatpush1.bf16.msra.mxu0 %v24432_v47  ;;  %17690 = vmatpush1.bf16.msra.mxu1 %v24433_v0  ;;  %v24516_v47 = vld [vmem:[#allocation76_spill] sm:$0xff]  ;;  %v24517_v0 = vld [vmem:[#allocation77_spill] sm:$0xff] }
 0x7ce   :  { %17500 = vmatprep.subr.bf16.mxu0 %v24434_v30  ;;  %17692 = vmatprep.subr.bf16.mxu1 %v24435_v9  ;;  %v24518_v30 = vld [vmem:[#allocation78_spill] sm:$0xff]  ;;  %v24519_v9 = vld [vmem:[#allocation79_spill] sm:$0xff] }
 0x7cf   :  { %9297 = vmatprep.mubr.f32.mxu0 %v23680_v15  ;;  %10152 = vmatprep.mubr.f32.mxu1 %v23680_v15 }
 0x7d1   :  { %17502 = vmatpush1.bf16.msra.mxu0 %v24436_v42  ;;  %17694 = vmatpush1.bf16.msra.mxu1 %v24437_v34  ;;  %v24522_v42 = vld [vmem:[#allocation82_spill] sm:$0xff]  ;;  %v24523_v34 = vld [vmem:[#allocation87_spill] sm:$0xff] }
 0x7d2   :  { %17504 = vmatprep.subr.bf16.mxu0 %v24513_v63  ;;  %17696 = vmatprep.subr.bf16.mxu1 %v24514_v19  ;;  %v24524_v63 = vld [vmem:[#allocation88_spill] sm:$0xff]  ;;  %v24525_v19 = vld [vmem:[#allocation89_spill] sm:$0xff] }
 0x7d5   :  { %17506 = vmatpush1.bf16.msra.mxu0 %v24515_v7  ;;  %17698 = vmatpush1.bf16.msra.mxu1 %v24516_v47  ;;  %v24526_v7 = vld [vmem:[#allocation8_spill] sm:$0xff]  ;;  %v24527_v47 = vld [vmem:[#allocation10_spill] sm:$0xff] }
 0x7d6   :  { %17508 = vmatprep.subr.bf16.mxu0 %v24517_v0  ;;  %17700 = vmatprep.subr.bf16.mxu1 %v24518_v30  ;;  %v24528_v0 = vld [vmem:[#allocation11_spill] sm:$0xff]  ;;  %v24529_v30 = vld [vmem:[#allocation12_spill] sm:$0xff] }
 0x7d9   :  { %17510 = vmatpush1.bf16.msra.mxu0 %v24519_v9  ;;  %17702 = vmatpush1.bf16.msra.mxu1 %v24520_v27  ;;  %v24530_v9 = vld [vmem:[#allocation13_spill] sm:$0xff]  ;;  %v24531_v27 = vld [vmem:[#allocation14_spill] sm:$0xff] }
 0x7da   :  { %17512 = vmatprep.subr.bf16.mxu0 %v24521_v8  ;;  %17704 = vmatprep.subr.bf16.mxu1 %v24522_v42  ;;  %v24532_v8 = vld [vmem:[#allocation15_spill] sm:$0xff]  ;;  %v24533_v42 = vld [vmem:[#allocation26_spill] sm:$0xff] }
 0x7dd   :  { %17514 = vmatpush1.bf16.msra.mxu0 %v24523_v34  ;;  %17706 = vmatpush1.bf16.msra.mxu1 %v24524_v63  ;;  %v24534_v34 = vld [vmem:[#allocation34_spill] sm:$0xff] }
 0x7de   :  { %17516 = vmatprep.subr.bf16.mxu0 %v24525_v19  ;;  %17708 = vmatprep.subr.bf16.mxu1 %v24526_v7  ;;  %v24535_v63 = vld [vmem:[#allocation38_spill] sm:$0xff]  ;;  %v24536_v19 = vld [vmem:[#allocation39_spill] sm:$0xff] }
 0x7df   :  { %v24550_v7 = vld [vmem:[#allocation23_spill] sm:$0xff] }
 0x7e1   :  { %17518 = vmatpush1.bf16.msra.mxu0 %v24527_v47  ;;  %17710 = vmatpush1.bf16.msra.mxu1 %v24528_v0  ;;  %v24546_v0 = vld [vmem:[#allocation18_spill] sm:$0xff]  ;;  %v24547_v47 = vld [vmem:[#allocation19_spill] sm:$0xff] }
 0x7e2   :  { %17520 = vmatprep.subr.bf16.mxu0 %v24529_v30  ;;  %17712 = vmatprep.subr.bf16.mxu1 %v24530_v9  ;;  %v24544_v9 = vld [vmem:[#allocation9_spill] sm:$0xff] }
 0x7e3   :  { %v24545_v30 = vld [vmem:[#allocation17_spill] sm:$0xff] }
 0x7e5   :  { %17522 = vmatpush1.bf16.msra.mxu0 %v24531_v27  ;;  %17714 = vmatpush1.bf16.msra.mxu1 %v24532_v8  ;;  %v24542_v8 = vld [vmem:[#allocation42_spill] sm:$0xff]  ;;  %v24543_v27 = vld [vmem:[#allocation43_spill] sm:$0xff] }
 0x7e6   :  { %17524 = vmatprep.subr.bf16.mxu0 %v24533_v42  ;;  %17716 = vmatprep.subr.bf16.mxu1 %v24534_v34  ;;  %v24540_v34 = vld [vmem:[#allocation72_spill] sm:$0xff]  ;;  %v24541_v42 = vld [vmem:[#allocation41_spill] sm:$0xff] }
 0x7e9   :  { %17526 = vmatpush1.bf16.msra.mxu0 %v24535_v63  ;;  %17718 = vmatpush1.bf16.msra.mxu1 %v24536_v19  ;;  %v24538_v19 = vld [vmem:[#allocation70_spill] sm:$0xff]  ;;  %v24539_v63 = vld [vmem:[#allocation71_spill] sm:$0xff] }
 0x7ea   :  { %17528 = vmatprep.subr.bf16.mxu0 %v24083_v10  ;;  %17720 = vmatprep.subr.bf16.mxu1 %v24084_v48 }
 0x7ec   :  { %9300 = vmatmul.mubr.f32.vlgmr.msra.gmra.mrb[8].mxu0 %v22302_v32  ;;  %10155 = vmatmul.mubr.f32.vlgmr.msra.gmra.mrb[8].mxu1 %v22302_v32  ;;  %v24537_v32 = vld [vmem:[#allocation69_spill] sm:$0xff] }
 0x7ed   :  { %17530 = vmatpush1.bf16.msra.mxu0 %v24085_v58  ;;  %17722 = vmatpush1.bf16.msra.mxu1 %v24086_v18 }
 0x7ee   :  { %17532 = vmatprep.subr.bf16.mxu0 %v24087_v6  ;;  %17724 = vmatprep.subr.bf16.mxu1 %v24088_v37 }
 0x7ef   :  { %9402 = vmatprep.mubr.f32.mxu0 %v23680_v15  ;;  %10257 = vmatprep.mubr.f32.mxu1 %v23680_v15 }
 0x7f1   :  { %17534 = vmatpush1.bf16.msra.mxu0 %v24089_v60  ;;  %17726 = vmatpush1.bf16.msra.mxu1 %v24090_v17 }
 0x7f2   :  { %17536 = vmatprep.subr.bf16.mxu0 %v24207_v12  ;;  %17728 = vmatprep.subr.bf16.mxu1 %v24208_v20 }
 0x7f5   :  { %17538 = vmatpush1.bf16.msra.mxu0 %v24209_v45  ;;  %17730 = vmatpush1.bf16.msra.mxu1 %v24210_v16 }
 0x7f6   :  { %17540 = vmatprep.subr.bf16.mxu0 %v24211_v44  ;;  %17732 = vmatprep.subr.bf16.mxu1 %v24212_v51 }
 0x7f9   :  { %17542 = vmatpush1.bf16.msra.mxu0 %v24213_v40  ;;  %17734 = vmatpush1.bf16.msra.mxu1 %v24214_v29 }
 0x7fa   :  { %17544 = vmatprep.subr.bf16.mxu0 %v24215_v50  ;;  %17736 = vmatprep.subr.bf16.mxu1 %v24216_v3 }
 0x7fd   :  { %17546 = vmatpush1.bf16.msra.mxu0 %v24217_v4  ;;  %17738 = vmatpush1.bf16.msra.mxu1 %v24218_v13 }
 0x7fe   :  { %17548 = vmatprep.subr.bf16.mxu0 %v24219_v39  ;;  %17740 = vmatprep.subr.bf16.mxu1 %v24220_v35 }
 0x801   :  { %17550 = vmatpush1.bf16.msra.mxu0 %v24221_v26  ;;  %17742 = vmatpush1.bf16.msra.mxu1 %v24222_v2 }
 0x802   :  { %17552 = vmatprep.subr.bf16.mxu0 %v24223_v43  ;;  %17744 = vmatprep.subr.bf16.mxu1 %v24224_v28 }
 0x805   :  { %17554 = vmatpush1.bf16.msra.mxu0 %v24225_v56  ;;  %17746 = vmatpush1.bf16.msra.mxu1 %v24226_v5 }
 0x806   :  { %17556 = vmatprep.subr.bf16.mxu0 %v24537_v32  ;;  %17748 = vmatprep.subr.bf16.mxu1 %v24538_v19 }
 0x809   :  { %17558 = vmatpush1.bf16.msra.mxu0 %v24539_v63  ;;  %17750 = vmatpush1.bf16.msra.mxu1 %v24540_v34 }
 0x80a   :  { %17560 = vmatprep.subr.bf16.mxu0 %v24541_v42  ;;  %17752 = vmatprep.subr.bf16.mxu1 %v24542_v8  ;;  %v24548_v42 = vld [vmem:[#allocation20_spill] sm:$0xff]  ;;  %v24549_v8 = vld [vmem:[#allocation22_spill] sm:$0xff] }
 0x80c   :  { %9406 = vmatmul.mubr.f32.vlgmr.msra.gmra.mrb[8].mxu0 %v22305_v24  ;;  %10261 = vmatmul.mubr.f32.vlgmr.msra.gmra.mrb[8].mxu1 %v22305_v24  ;;  %v24551_v24 = vld [vmem:[#allocation24_spill] sm:$0xff] }
 0x80d   :  { %17562 = vmatpush1.bf16.msra.mxu0 %v24543_v27  ;;  %17754 = vmatpush1.bf16.msra.mxu1 %v24544_v9  ;;  %v24552_v27 = vld [vmem:[#allocation120_spill] sm:$0xff]  ;;  %v24553_v9 = vld [vmem:[#allocation121_spill] sm:$0xff] }
 0x80e   :  { %17564 = vmatprep.subr.bf16.mxu0 %v24545_v30  ;;  %17756 = vmatprep.subr.bf16.mxu1 %v24546_v0  ;;  %v24554_v30 = vld [vmem:[#allocation122_spill] sm:$0xff]  ;;  %v24555_v0 = vld [vmem:[#allocation123_spill] sm:$0xff] }
 0x80f   :  { %9572 = vmatprep.mubr.f32.mxu0 %v23680_v15  ;;  %10427 = vmatprep.mubr.f32.mxu1 %v23680_v15 }
 0x811   :  { %17566 = vmatpush1.bf16.msra.mxu0 %v24547_v47  ;;  %17758 = vmatpush1.bf16.msra.mxu1 %v24548_v42  ;;  %v24558_v47 = vld [vmem:[#allocation94_spill] sm:$0xff]  ;;  %v24559_v42 = vld [vmem:[#allocation21_spill] sm:$0xff] }
 0x812   :  { %17568 = vmatprep.subr.bf16.mxu0 %v24549_v8  ;;  %17760 = vmatprep.subr.bf16.mxu1 %v24550_v7  ;;  %v24560_v8 = vld [vmem:[#allocation27_spill] sm:$0xff]  ;;  %v24561_v7 = vld [vmem:[#allocation28_spill] sm:$0xff] }
 0x815   :  { %17570 = vmatpush1.bf16.msra.mxu0 %v24551_v24  ;;  %17762 = vmatpush1.bf16.msra.mxu1 %v24552_v27  ;;  %v24562_v24 = vld [vmem:[#allocation33_spill] sm:$0xff]  ;;  %v24563_v27 = vld [vmem:[#allocation35_spill] sm:$0xff] }
 0x816   :  { %17572 = vmatprep.subr.bf16.mxu0 %v24553_v9  ;;  %17764 = vmatprep.subr.bf16.mxu1 %v24554_v30  ;;  %v24564_v9 = vld [vmem:[#allocation37_spill] sm:$0xff] }
 0x817   :  { %v24565_v30 = vld [vmem:[#allocation125_spill] sm:$0xff] }
 0x819   :  { %17574 = vmatpush1.bf16.msra.mxu0 %v24555_v0  ;;  %17766 = vmatpush1.bf16.msra.mxu1 %v24556_v23  ;;  %v24566_v0 = vld [vmem:[#allocation126_spill] sm:$0xff] }
 0x81a   :  { %17576 = vmatprep.subr.bf16.mxu0 %v24557_v1  ;;  %17768 = vmatprep.subr.bf16.mxu1 %v24558_v47  ;;  %v24567_v23 = vld [vmem:[#allocation102_spill] sm:$0xff]  ;;  %v24568_v1 = vld [vmem:[#allocation103_spill] sm:$0xff]  ;;  %v24569_v47 = vld [vmem:[#allocation104_spill] sm:$0xff] }
 0x81d   :  { %17578 = vmatpush1.bf16.msra.mxu0 %v24559_v42  ;;  %17770 = vmatpush1.bf16.msra.mxu1 %v24560_v8  ;;  %v24570_v42 = vld [vmem:[#allocation105_spill] sm:$0xff]  ;;  %v24571_v8 = vld [vmem:[#allocation106_spill] sm:$0xff] }
 0x81e   :  { %17580 = vmatprep.subr.bf16.mxu0 %v24561_v7  ;;  %17772 = vmatprep.subr.bf16.mxu1 %v24562_v24  ;;  %v24572_v7 = vld [vmem:[#allocation107_spill] sm:$0xff] }
 0x821   :  { %17582 = vmatpush1.bf16.msra.mxu0 %v24563_v27  ;;  %17774 = vmatpush1.bf16.msra.mxu1 %v24564_v9 }
 0x822   :  { %17584 = vmatprep.subr.bf16.mxu0 %v24565_v30  ;;  %17776 = vmatprep.subr.bf16.mxu1 %v24566_v0 }
 0x825   :  { %17586 = vmatpush1.bf16.msra.mxu0 %v24567_v23  ;;  %17778 = vmatpush1.bf16.msra.mxu1 %v24568_v1 }
 0x826   :  { %17588 = vmatprep.subr.bf16.mxu0 %v24569_v47  ;;  %17780 = vmatprep.subr.bf16.mxu1 %v24570_v42  ;;  %v24575_v47 = vld [vmem:[#allocation25_spill] sm:$0xff] }
 0x829   :  { %17590 = vmatpush1.bf16.msra.mxu0 %v24571_v8  ;;  %17782 = vmatpush1.bf16.msra.mxu1 %v24572_v7  ;;  %v24574_v7 = vld [vmem:[#allocation84_spill] sm:$0xff] }
 0x82a   :  { %17592 = vmatprep.subr.bf16.mxu0 %v24083_v10  ;;  %17784 = vmatprep.subr.bf16.mxu1 %v24084_v48 }
 0x82c   :  { %9574 = vmatmul.mubr.f32.vlgmr.msra.gmra.mrb[8].mxu0 %v22299_v59  ;;  %10429 = vmatmul.mubr.f32.vlgmr.msra.gmra.mrb[8].mxu1 %v22299_v59 }
 0x82d   :  { %17594 = vmatpush1.bf16.msra.mxu0 %v24085_v58  ;;  %17786 = vmatpush1.bf16.msra.mxu1 %v24086_v18 }
 0x82e   :  { %17596 = vmatprep.subr.bf16.mxu0 %v24087_v6  ;;  %17788 = vmatprep.subr.bf16.mxu1 %v24088_v37 }
 0x82f   :  { %9676 = vmatprep.mubr.f32.mxu0 %v23680_v15  ;;  %10531 = vmatprep.mubr.f32.mxu1 %v23680_v15 }
 0x831   :  { %17598 = vmatpush1.bf16.msra.mxu0 %v24089_v60  ;;  %17790 = vmatpush1.bf16.msra.mxu1 %v24090_v17 }
 0x832   :  { %17600 = vmatprep.subr.bf16.mxu0 %v24207_v12  ;;  %17792 = vmatprep.subr.bf16.mxu1 %v24208_v20 }
 0x835   :  { %17602 = vmatpush1.bf16.msra.mxu0 %v24209_v45  ;;  %17794 = vmatpush1.bf16.msra.mxu1 %v24210_v16 }
 0x836   :  { %17604 = vmatprep.subr.bf16.mxu0 %v24211_v44  ;;  %17796 = vmatprep.subr.bf16.mxu1 %v24212_v51 }
 0x839   :  { %17606 = vmatpush1.bf16.msra.mxu0 %v24213_v40  ;;  %17798 = vmatpush1.bf16.msra.mxu1 %v24214_v29 }
 0x83a   :  { %17608 = vmatprep.subr.bf16.mxu0 %v24215_v50  ;;  %17800 = vmatprep.subr.bf16.mxu1 %v24216_v3 }
 0x83d   :  { %17610 = vmatpush1.bf16.msra.mxu0 %v24217_v4  ;;  %17802 = vmatpush1.bf16.msra.mxu1 %v24218_v13 }
 0x83e   :  { %17612 = vmatprep.subr.bf16.mxu0 %v24219_v39  ;;  %17804 = vmatprep.subr.bf16.mxu1 %v24220_v35 }
 0x841   :  { %17614 = vmatpush1.bf16.msra.mxu0 %v24221_v26  ;;  %17806 = vmatpush1.bf16.msra.mxu1 %v24222_v2 }
 0x842   :  { %17616 = vmatprep.subr.bf16.mxu0 %v24223_v43  ;;  %17808 = vmatprep.subr.bf16.mxu1 %v24224_v28 }
 0x845   :  { %17618 = vmatpush1.bf16.msra.mxu0 %v24225_v56  ;;  %17810 = vmatpush1.bf16.msra.mxu1 %v24226_v5 }
 0x846   :  { %17620 = vmatprep.subr.bf16.mxu0 %v24537_v32  ;;  %17812 = vmatprep.subr.bf16.mxu1 %v24538_v19 }
 0x849   :  { %17622 = vmatpush1.bf16.msra.mxu0 %v24539_v63  ;;  %17814 = vmatpush1.bf16.msra.mxu1 %v24540_v34 }
 0x84a   :  { %17816 = vmatprep.subr.bf16.mxu0 %v24083_v10  ;;  %18008 = vmatprep.subr.bf16.mxu1 %v24084_v48 }
 0x84c   :  { %9678 = vmatmul.mubr.f32.vlgmr.msra.gmra.mrb[8].mxu0 %v22299_v59  ;;  %10533 = vmatmul.mubr.f32.vlgmr.msra.gmra.mrb[8].mxu1 %v22299_v59  ;;  %v24573_v59 = vld [vmem:[#allocation83_spill] sm:$0xff] }
 0x84d   :  { %17818 = vmatpush1.bf16.msra.mxu0 %v24085_v58  ;;  %18010 = vmatpush1.bf16.msra.mxu1 %v24086_v18 }
 0x84e   :  { %17820 = vmatprep.subr.bf16.mxu0 %v24087_v6  ;;  %18012 = vmatprep.subr.bf16.mxu1 %v24088_v37 }
 0x84f   :  { %10668 = vmatprep.mubr.f32.mxu0 %v23680_v15  ;;  %11523 = vmatprep.mubr.f32.mxu1 %v23680_v15 }
 0x851   :  { %17822 = vmatpush1.bf16.msra.mxu0 %v24089_v60  ;;  %18014 = vmatpush1.bf16.msra.mxu1 %v24090_v17 }
 0x852   :  { %17824 = vmatprep.subr.bf16.mxu0 %v24207_v12  ;;  %18016 = vmatprep.subr.bf16.mxu1 %v24208_v20 }
 0x855   :  { %17826 = vmatpush1.bf16.msra.mxu0 %v24209_v45  ;;  %18018 = vmatpush1.bf16.msra.mxu1 %v24210_v16 }
 0x856   :  { %17828 = vmatprep.subr.bf16.mxu0 %v24211_v44  ;;  %18020 = vmatprep.subr.bf16.mxu1 %v24212_v51 }
 0x859   :  { %17830 = vmatpush1.bf16.msra.mxu0 %v24213_v40  ;;  %18022 = vmatpush1.bf16.msra.mxu1 %v24214_v29 }
 0x85a   :  { %17832 = vmatprep.subr.bf16.mxu0 %v24215_v50  ;;  %18024 = vmatprep.subr.bf16.mxu1 %v24216_v3 }
 0x85d   :  { %17834 = vmatpush1.bf16.msra.mxu0 %v24217_v4  ;;  %18026 = vmatpush1.bf16.msra.mxu1 %v24218_v13 }
 0x85e   :  { %17836 = vmatprep.subr.bf16.mxu0 %v24219_v39  ;;  %18028 = vmatprep.subr.bf16.mxu1 %v24220_v35 }
 0x861   :  { %17838 = vmatpush1.bf16.msra.mxu0 %v24221_v26  ;;  %18030 = vmatpush1.bf16.msra.mxu1 %v24222_v2 }
 0x862   :  { %17840 = vmatprep.subr.bf16.mxu0 %v24223_v43  ;;  %18032 = vmatprep.subr.bf16.mxu1 %v24224_v28 }
 0x865   :  { %17842 = vmatpush1.bf16.msra.mxu0 %v24225_v56  ;;  %18034 = vmatpush1.bf16.msra.mxu1 %v24226_v5 }
 0x866   :  { %17844 = vmatprep.subr.bf16.mxu0 %v24537_v32  ;;  %18036 = vmatprep.subr.bf16.mxu1 %v24538_v19 }
 0x869   :  { %17846 = vmatpush1.bf16.msra.mxu0 %v24539_v63  ;;  %18038 = vmatpush1.bf16.msra.mxu1 %v24540_v34 }
 0x86a   :  { %17848 = vmatprep.subr.bf16.mxu0 %v24573_v59  ;;  %18040 = vmatprep.subr.bf16.mxu1 %v24574_v7 }
 0x91f   :  { %v9679_v8 = vpop.f32.mrb[8].mxu0  ;;  %v10534_v42 = vpop.f32.mrb[8].mxu1 }
 0x920   :  { %v18975_v1 = vadd.f32 %v9679_v8, %v24575_v47  ;;  %v9681_v23 = vpop.f32.mrb[9].mxu0  ;;  %v10536_v0 = vpop.f32.mrb[9].mxu1  ;;  %v18991_v34 = vadd.f32 %v10534_v42, %v21597_v25 }
 0x921   :  { %v18976_v30 = vadd.f32 %v9681_v23, %v21590_v41  ;;  %v18992_v24 = vadd.f32 %v10536_v0, %v21594_v11 }
 0x922   :  { %v15833_v9 = vmul.f32 -1.442695, %v18975_v1 }
 0x923   :  { %v15834_v27 = vmul.f32 -1.442695, %v18976_v30  ;;  %v15835_v63 = vmul.f32 -1.442695, %v18992_v24 }
 0x924   :  { %19419 = vpow2.f32 %v15833_v9 }
 0x925   :  { %19421 = vpow2.f32 %v15834_v27 }
 0x926   :  { %19423 = vpow2.f32 %v15835_v63 }
 0x927   :  { %19425 = vtanh.f32 %v18991_v34 }
 0x92e   :  { %v19420_v59 = vpop.eup %19419 }
 0x92f   :  { %v19422_v19 = vpop.eup %19421  ;;  %v10552_v7 = vadd.f32 1.0, %v19420_v59  ;;  %v24577_v59 = vld [vmem:[#allocation97_spill] sm:$0xff] }
 0x930   :  { %v10553_v32 = vadd.f32 1.0, %v19422_v19  ;;  %v19424_v8 = vpop.eup %19423 }
 0x931   :  { %19427 = vrcp.f32 %v10552_v7  ;;  %v19426_v47 = vpop.eup %19425  ;;  %v10554_v9 = vadd.f32 1.0, %v19424_v8  ;;  %v24578_v8 = vld [vmem:[#allocation100_spill] sm:$0xff] }
 0x932   :  { %19429 = vrcp.f32 %v10553_v32  ;;  %v24576_v32 = vld [vmem:[#allocation96_spill] sm:$0xff] }
 0x933   :  { %19431 = vrcp.f32 %v10554_v9  ;;  %v24582_v9 = vld [vmem:[#allocation51_spill] sm:$0xff] }
 0x93b   :  { %v19428_v23 = vpop.eup %19427 }
 0x93c   :  { %v19430_v1 = vpop.eup %19429  ;;  %v10563_v30 = vmul.f32 %v19428_v23, %v19426_v47  ;;  %v24579_v23 = vld [vmem:[#allocation101_spill] sm:$0xff] }
 0x93d   :  { %v10562_v27 = vmul.f32 %v19430_v1, %v22296_v22  ;;  %v19432_v42 = vpop.eup %19431  ;;  %v24580_v1 = vld [vmem:[#allocation44_spill] sm:$0xff] }
 0x93f   :  { %v22528_v0 = vadd.f32 %v10563_v30, %v10562_v27  ;;  %v24581_v30 = vld [vmem:[#allocation45_spill] sm:$0xff]  ;;  %v24583_v27 = vld [vmem:[#allocation108_spill] sm:$0xff] }
 0x941   :  { %19433 = vtanh.f32 %v22528_v0 }
 0x94b   :  { %v19434_v24 = vpop.eup %19433 }
 0x94c   :  { %v10566_v63 = vmul.f32 %v19434_v24, %v19432_v42  ;;  %v24584_v42 = vld [vmem:[#allocation109_spill] sm:$0xff]  ;;  %v24585_v24 = vld [vmem:[#allocation110_spill] sm:$0xff] }
 0x94e   :  { %v22531_v34 = vand.u32 4294901760, %v10566_v63 }
 0x950   :  { %v22534_v19 = vsub.f32 %v10566_v63, %v22531_v34  ;;  %v24586_v63 = vld [vmem:[#allocation115_spill] sm:$0xff] }
 0x952   :  { %v22537_v7 = vand.u32 4294901760, %v22534_v19 }
 0x954   :  { %v10672_v47 = vsub.f32 %v22534_v19, %v22537_v7 }
 0x956   :  { %v10673_v22 = vand.u32 4294901760, %v10672_v47  ;;  %v24587_v47 = vld [vmem:[#allocation116_spill] sm:$0xff] }
 0x958   :  { %10674 = vmatmul.mubr.f32.vlgmr.msra.gmra.mrb[10].mxu0 %v10673_v22  ;;  %11529 = vmatmul.mubr.f32.vlgmr.msra.gmra.mrb[10].mxu1 %v10673_v22  ;;  %v24588_v22 = vld [vmem:[#allocation117_spill] sm:$0xff] }
 0x959   :  { %17850 = vmatpush1.bf16.msra.mxu0 %v24232_v49  ;;  %18042 = vmatpush1.bf16.msra.mxu1 %v24233_v55 }
 0x95a   :  { %17852 = vmatprep.subr.bf16.mxu0 %v24318_v61  ;;  %18044 = vmatprep.subr.bf16.mxu1 %v24319_v14 }
 0x95b   :  { %10904 = vmatprep.mubr.f32.mxu0 %v23680_v15  ;;  %11759 = vmatprep.mubr.f32.mxu1 %v23680_v15 }
 0x95d   :  { %17854 = vmatpush1.bf16.msra.mxu0 %v24404_v54  ;;  %18046 = vmatpush1.bf16.msra.mxu1 %v24405_v31 }
 0x95e   :  { %17856 = vmatprep.subr.bf16.mxu0 %v24490_v36  ;;  %18048 = vmatprep.subr.bf16.mxu1 %v24491_v57 }
 0x961   :  { %17858 = vmatpush1.bf16.msra.mxu0 %v24576_v32  ;;  %18050 = vmatpush1.bf16.msra.mxu1 %v24577_v59 }
 0x962   :  { %17860 = vmatprep.subr.bf16.mxu0 %v24494_v53  ;;  %18052 = vmatprep.subr.bf16.mxu1 %v24495_v52 }
 0x965   :  { %17862 = vmatpush1.bf16.msra.mxu0 %v24578_v8  ;;  %18054 = vmatpush1.bf16.msra.mxu1 %v24579_v23 }
 0x966   :  { %17864 = vmatprep.subr.bf16.mxu0 %v24580_v1  ;;  %18056 = vmatprep.subr.bf16.mxu1 %v24581_v30  ;;  %v24643_v30 = vld [vmem:[#allocation124_spill] sm:$0xff] }
 0x969   :  { %17866 = vmatpush1.bf16.msra.mxu0 %v24500_v21  ;;  %18058 = vmatpush1.bf16.msra.mxu1 %v24582_v9  ;;  %v24589_v9 = vld [vmem:[#allocation118_spill] sm:$0xff]  ;;  %v24642_v21 = vld [vmem:[#allocation93_spill] sm:$0xff] }
 0x96a   :  { %17868 = vmatprep.subr.bf16.mxu0 %v24583_v27  ;;  %18060 = vmatprep.subr.bf16.mxu1 %v24584_v42  ;;  %v24590_v27 = vld [vmem:[#allocation119_spill] sm:$0xff]  ;;  %v24591_v42 = vld [vmem:[#allocation52_spill] sm:$0xff] }
 0x96d   :  { %17870 = vmatpush1.bf16.msra.mxu0 %v24585_v24  ;;  %18062 = vmatpush1.bf16.msra.mxu1 %v24421_v46  ;;  %v24592_v24 = vld [vmem:[#allocation58_spill] sm:$0xff]  ;;  %v24607_v46 = vld [vmem:[#allocation81_spill] sm:$0xff] }
 0x96e   :  { %17872 = vmatprep.subr.bf16.mxu0 %v24422_v62  ;;  %18064 = vmatprep.subr.bf16.mxu1 %v24505_v33  ;;  %v24593_v33 = vld [vmem:[#allocation59_spill] sm:$0xff]  ;;  %v24606_v62 = vld [vmem:[#allocation80_spill] sm:$0xff] }
 0x971   :  { %17874 = vmatpush1.bf16.msra.mxu0 %v24506_v38  ;;  %18066 = vmatpush1.bf16.msra.mxu1 %v24586_v63  ;;  %v24594_v38 = vld [vmem:[#allocation61_spill] sm:$0xff]  ;;  %v24595_v63 = vld [vmem:[#allocation62_spill] sm:$0xff] }
 0x972   :  { %17876 = vmatprep.subr.bf16.mxu0 %v24587_v47  ;;  %18068 = vmatprep.subr.bf16.mxu1 %v24588_v22  ;;  %v24596_v47 = vld [vmem:[#allocation65_spill] sm:$0xff]  ;;  %v24601_v22 = vld [vmem:[#allocation75_spill] sm:$0xff] }
 0x975   :  { %17878 = vmatpush1.bf16.msra.mxu0 %v24589_v9  ;;  %18070 = vmatpush1.bf16.msra.mxu1 %v24590_v27  ;;  %v24597_v27 = vld [vmem:[#allocation67_spill] sm:$0xff]  ;;  %v24600_v9 = vld [vmem:[#allocation74_spill] sm:$0xff] }
 0x976   :  { %17880 = vmatprep.subr.bf16.mxu0 %v24591_v42  ;;  %18072 = vmatprep.subr.bf16.mxu1 %v24592_v24  ;;  %v24598_v42 = vld [vmem:[#allocation68_spill] sm:$0xff]  ;;  %v24599_v24 = vld [vmem:[#allocation73_spill] sm:$0xff] }
 0x978   :  { %10906 = vmatmul.mubr.f32.vlgmr.msra.gmra.mrb[10].mxu0 %v22531_v34  ;;  %11761 = vmatmul.mubr.f32.vlgmr.msra.gmra.mrb[10].mxu1 %v22531_v34 }
 0x979   :  { %17882 = vmatpush1.bf16.msra.mxu0 %v24593_v33  ;;  %18074 = vmatpush1.bf16.msra.mxu1 %v24594_v38  ;;  %v24602_v33 = vld [vmem:[#allocation76_spill] sm:$0xff]  ;;  %v24603_v38 = vld [vmem:[#allocation77_spill] sm:$0xff] }
 0x97a   :  { %17884 = vmatprep.subr.bf16.mxu0 %v24595_v63  ;;  %18076 = vmatprep.subr.bf16.mxu1 %v24596_v47  ;;  %v24604_v63 = vld [vmem:[#allocation78_spill] sm:$0xff]  ;;  %v24605_v47 = vld [vmem:[#allocation79_spill] sm:$0xff] }
 0x97b   :  { %11040 = vmatprep.mubr.f32.mxu0 %v23680_v15  ;;  %11895 = vmatprep.mubr.f32.mxu1 %v23680_v15 }
 0x97d   :  { %17886 = vmatpush1.bf16.msra.mxu0 %v24597_v27  ;;  %18078 = vmatpush1.bf16.msra.mxu1 %v24598_v42  ;;  %v24608_v27 = vld [vmem:[#allocation82_spill] sm:$0xff]  ;;  %v24609_v42 = vld [vmem:[#allocation87_spill] sm:$0xff] }
 0x97e   :  { %17888 = vmatprep.subr.bf16.mxu0 %v24599_v24  ;;  %18080 = vmatprep.subr.bf16.mxu1 %v24600_v9  ;;  %v24610_v24 = vld [vmem:[#allocation88_spill] sm:$0xff]  ;;  %v24611_v9 = vld [vmem:[#allocation89_spill] sm:$0xff] }
 0x981   :  { %17890 = vmatpush1.bf16.msra.mxu0 %v24601_v22  ;;  %18082 = vmatpush1.bf16.msra.mxu1 %v24602_v33  ;;  %v24612_v22 = vld [vmem:[#allocation8_spill] sm:$0xff]  ;;  %v24613_v33 = vld [vmem:[#allocation10_spill] sm:$0xff] }
 0x982   :  { %17892 = vmatprep.subr.bf16.mxu0 %v24603_v38  ;;  %18084 = vmatprep.subr.bf16.mxu1 %v24604_v63  ;;  %v24614_v38 = vld [vmem:[#allocation11_spill] sm:$0xff]  ;;  %v24615_v63 = vld [vmem:[#allocation12_spill] sm:$0xff] }
 0x985   :  { %17894 = vmatpush1.bf16.msra.mxu0 %v24605_v47  ;;  %18086 = vmatpush1.bf16.msra.mxu1 %v24606_v62  ;;  %v24616_v47 = vld [vmem:[#allocation13_spill] sm:$0xff]  ;;  %v24617_v62 = vld [vmem:[#allocation14_spill] sm:$0xff] }
 0x986   :  { %17896 = vmatprep.subr.bf16.mxu0 %v24607_v46  ;;  %18088 = vmatprep.subr.bf16.mxu1 %v24608_v27  ;;  %v24618_v46 = vld [vmem:[#allocation15_spill] sm:$0xff]  ;;  %v24619_v27 = vld [vmem:[#allocation26_spill] sm:$0xff] }
 0x989   :  { %17898 = vmatpush1.bf16.msra.mxu0 %v24609_v42  ;;  %18090 = vmatpush1.bf16.msra.mxu1 %v24610_v24  ;;  %v24620_v42 = vld [vmem:[#allocation34_spill] sm:$0xff] }
 0x98a   :  { %17900 = vmatprep.subr.bf16.mxu0 %v24611_v9  ;;  %18092 = vmatprep.subr.bf16.mxu1 %v24612_v22  ;;  %v24621_v24 = vld [vmem:[#allocation38_spill] sm:$0xff]  ;;  %v24622_v9 = vld [vmem:[#allocation39_spill] sm:$0xff] }
 0x98b   :  { %v24636_v22 = vld [vmem:[#allocation23_spill] sm:$0xff] }
 0x98d   :  { %17902 = vmatpush1.bf16.msra.mxu0 %v24613_v33  ;;  %18094 = vmatpush1.bf16.msra.mxu1 %v24614_v38  ;;  %v24632_v38 = vld [vmem:[#allocation18_spill] sm:$0xff]  ;;  %v24633_v33 = vld [vmem:[#allocation19_spill] sm:$0xff] }
 0x98e   :  { %17904 = vmatprep.subr.bf16.mxu0 %v24615_v63  ;;  %18096 = vmatprep.subr.bf16.mxu1 %v24616_v47  ;;  %v24630_v47 = vld [vmem:[#allocation9_spill] sm:$0xff] }
 0x98f   :  { %v24631_v63 = vld [vmem:[#allocation17_spill] sm:$0xff] }
 0x991   :  { %17906 = vmatpush1.bf16.msra.mxu0 %v24617_v62  ;;  %18098 = vmatpush1.bf16.msra.mxu1 %v24618_v46  ;;  %v24628_v46 = vld [vmem:[#allocation42_spill] sm:$0xff]  ;;  %v24629_v62 = vld [vmem:[#allocation43_spill] sm:$0xff] }
 0x992   :  { %17908 = vmatprep.subr.bf16.mxu0 %v24619_v27  ;;  %18100 = vmatprep.subr.bf16.mxu1 %v24620_v42  ;;  %v24626_v42 = vld [vmem:[#allocation72_spill] sm:$0xff]  ;;  %v24627_v27 = vld [vmem:[#allocation41_spill] sm:$0xff] }
 0x995   :  { %17910 = vmatpush1.bf16.msra.mxu0 %v24621_v24  ;;  %18102 = vmatpush1.bf16.msra.mxu1 %v24622_v9  ;;  %v24624_v9 = vld [vmem:[#allocation70_spill] sm:$0xff]  ;;  %v24625_v24 = vld [vmem:[#allocation71_spill] sm:$0xff] }
 0x996   :  { %17912 = vmatprep.subr.bf16.mxu0 %v24083_v10  ;;  %18104 = vmatprep.subr.bf16.mxu1 %v24084_v48 }
 0x998   :  { %11043 = vmatmul.mubr.f32.vlgmr.msra.gmra.mrb[10].mxu0 %v22534_v19  ;;  %11898 = vmatmul.mubr.f32.vlgmr.msra.gmra.mrb[10].mxu1 %v22534_v19  ;;  %v24623_v19 = vld [vmem:[#allocation69_spill] sm:$0xff] }
 0x999   :  { %17914 = vmatpush1.bf16.msra.mxu0 %v24085_v58  ;;  %18106 = vmatpush1.bf16.msra.mxu1 %v24086_v18 }
 0x99a   :  { %17916 = vmatprep.subr.bf16.mxu0 %v24087_v6  ;;  %18108 = vmatprep.subr.bf16.mxu1 %v24088_v37 }
 0x99b   :  { %11145 = vmatprep.mubr.f32.mxu0 %v23680_v15  ;;  %12000 = vmatprep.mubr.f32.mxu1 %v23680_v15 }
 0x99d   :  { %17918 = vmatpush1.bf16.msra.mxu0 %v24089_v60  ;;  %18110 = vmatpush1.bf16.msra.mxu1 %v24090_v17 }
 0x99e   :  { %17920 = vmatprep.subr.bf16.mxu0 %v24207_v12  ;;  %18112 = vmatprep.subr.bf16.mxu1 %v24208_v20 }
 0x9a1   :  { %17922 = vmatpush1.bf16.msra.mxu0 %v24209_v45  ;;  %18114 = vmatpush1.bf16.msra.mxu1 %v24210_v16 }
 0x9a2   :  { %17924 = vmatprep.subr.bf16.mxu0 %v24211_v44  ;;  %18116 = vmatprep.subr.bf16.mxu1 %v24212_v51 }
 0x9a5   :  { %17926 = vmatpush1.bf16.msra.mxu0 %v24213_v40  ;;  %18118 = vmatpush1.bf16.msra.mxu1 %v24214_v29 }
 0x9a6   :  { %17928 = vmatprep.subr.bf16.mxu0 %v24215_v50  ;;  %18120 = vmatprep.subr.bf16.mxu1 %v24216_v3 }
 0x9a9   :  { %17930 = vmatpush1.bf16.msra.mxu0 %v24217_v4  ;;  %18122 = vmatpush1.bf16.msra.mxu1 %v24218_v13 }
 0x9aa   :  { %17932 = vmatprep.subr.bf16.mxu0 %v24219_v39  ;;  %18124 = vmatprep.subr.bf16.mxu1 %v24220_v35 }
 0x9ad   :  { %17934 = vmatpush1.bf16.msra.mxu0 %v24221_v26  ;;  %18126 = vmatpush1.bf16.msra.mxu1 %v24222_v2 }
 0x9ae   :  { %17936 = vmatprep.subr.bf16.mxu0 %v24223_v43  ;;  %18128 = vmatprep.subr.bf16.mxu1 %v24224_v28 }
 0x9b1   :  { %17938 = vmatpush1.bf16.msra.mxu0 %v24225_v56  ;;  %18130 = vmatpush1.bf16.msra.mxu1 %v24226_v5 }
 0x9b2   :  { %17940 = vmatprep.subr.bf16.mxu0 %v24623_v19  ;;  %18132 = vmatprep.subr.bf16.mxu1 %v24624_v9 }
 0x9b5   :  { %17942 = vmatpush1.bf16.msra.mxu0 %v24625_v24  ;;  %18134 = vmatpush1.bf16.msra.mxu1 %v24626_v42 }
 0x9b6   :  { %17944 = vmatprep.subr.bf16.mxu0 %v24627_v27  ;;  %18136 = vmatprep.subr.bf16.mxu1 %v24628_v46  ;;  %v24634_v27 = vld [vmem:[#allocation20_spill] sm:$0xff]  ;;  %v24635_v46 = vld [vmem:[#allocation22_spill] sm:$0xff] }
 0x9b8   :  { %11149 = vmatmul.mubr.f32.vlgmr.msra.gmra.mrb[10].mxu0 %v22537_v7  ;;  %12004 = vmatmul.mubr.f32.vlgmr.msra.gmra.mrb[10].mxu1 %v22537_v7  ;;  %v24637_v7 = vld [vmem:[#allocation24_spill] sm:$0xff] }
 0x9b9   :  { %17946 = vmatpush1.bf16.msra.mxu0 %v24629_v62  ;;  %18138 = vmatpush1.bf16.msra.mxu1 %v24630_v47  ;;  %v24638_v62 = vld [vmem:[#allocation120_spill] sm:$0xff]  ;;  %v24639_v47 = vld [vmem:[#allocation121_spill] sm:$0xff] }
 0x9ba   :  { %17948 = vmatprep.subr.bf16.mxu0 %v24631_v63  ;;  %18140 = vmatprep.subr.bf16.mxu1 %v24632_v38  ;;  %v24640_v63 = vld [vmem:[#allocation122_spill] sm:$0xff]  ;;  %v24641_v38 = vld [vmem:[#allocation123_spill] sm:$0xff] }
 0x9bb   :  { %11315 = vmatprep.mubr.f32.mxu0 %v23680_v15  ;;  %12170 = vmatprep.mubr.f32.mxu1 %v23680_v15 }
 0x9bd   :  { %17950 = vmatpush1.bf16.msra.mxu0 %v24633_v33  ;;  %18142 = vmatpush1.bf16.msra.mxu1 %v24634_v27  ;;  %v24644_v33 = vld [vmem:[#allocation94_spill] sm:$0xff]  ;;  %v24645_v27 = vld [vmem:[#allocation21_spill] sm:$0xff] }
 0x9be   :  { %17952 = vmatprep.subr.bf16.mxu0 %v24635_v46  ;;  %18144 = vmatprep.subr.bf16.mxu1 %v24636_v22  ;;  %v24646_v46 = vld [vmem:[#allocation27_spill] sm:$0xff]  ;;  %v24647_v22 = vld [vmem:[#allocation28_spill] sm:$0xff] }
 0x9c1   :  { %17954 = vmatpush1.bf16.msra.mxu0 %v24637_v7  ;;  %18146 = vmatpush1.bf16.msra.mxu1 %v24638_v62  ;;  %v24648_v7 = vld [vmem:[#allocation33_spill] sm:$0xff]  ;;  %v24649_v62 = vld [vmem:[#allocation35_spill] sm:$0xff] }
 0x9c2   :  { %17956 = vmatprep.subr.bf16.mxu0 %v24639_v47  ;;  %18148 = vmatprep.subr.bf16.mxu1 %v24640_v63  ;;  %v24650_v47 = vld [vmem:[#allocation37_spill] sm:$0xff] }
 0x9c3   :  { %v24651_v63 = vld [vmem:[#allocation125_spill] sm:$0xff] }
 0x9c5   :  { %17958 = vmatpush1.bf16.msra.mxu0 %v24641_v38  ;;  %18150 = vmatpush1.bf16.msra.mxu1 %v24642_v21  ;;  %v24652_v38 = vld [vmem:[#allocation126_spill] sm:$0xff] }
 0x9c6   :  { %17960 = vmatprep.subr.bf16.mxu0 %v24643_v30  ;;  %18152 = vmatprep.subr.bf16.mxu1 %v24644_v33  ;;  %v24653_v21 = vld [vmem:[#allocation102_spill] sm:$0xff]  ;;  %v24654_v30 = vld [vmem:[#allocation103_spill] sm:$0xff]  ;;  %v24655_v33 = vld [vmem:[#allocation104_spill] sm:$0xff] }
 0x9c9   :  { %17962 = vmatpush1.bf16.msra.mxu0 %v24645_v27  ;;  %18154 = vmatpush1.bf16.msra.mxu1 %v24646_v46  ;;  %v24656_v27 = vld [vmem:[#allocation105_spill] sm:$0xff]  ;;  %v24657_v46 = vld [vmem:[#allocation106_spill] sm:$0xff] }
 0x9ca   :  { %17964 = vmatprep.subr.bf16.mxu0 %v24647_v22  ;;  %18156 = vmatprep.subr.bf16.mxu1 %v24648_v7  ;;  %v24658_v22 = vld [vmem:[#allocation107_spill] sm:$0xff] }
 0x9cd   :  { %17966 = vmatpush1.bf16.msra.mxu0 %v24649_v62  ;;  %18158 = vmatpush1.bf16.msra.mxu1 %v24650_v47 }
 0x9ce   :  { %17968 = vmatprep.subr.bf16.mxu0 %v24651_v63  ;;  %18160 = vmatprep.subr.bf16.mxu1 %v24652_v38 }
 0x9d1   :  { %17970 = vmatpush1.bf16.msra.mxu0 %v24653_v21  ;;  %18162 = vmatpush1.bf16.msra.mxu1 %v24654_v30 }
 0x9d2   :  { %17972 = vmatprep.subr.bf16.mxu0 %v24655_v33  ;;  %18164 = vmatprep.subr.bf16.mxu1 %v24656_v27  ;;  %v24661_v33 = vld [vmem:[#allocation25_spill] sm:$0xff] }
 0x9d5   :  { %17974 = vmatpush1.bf16.msra.mxu0 %v24657_v46  ;;  %18166 = vmatpush1.bf16.msra.mxu1 %v24658_v22  ;;  %v24660_v22 = vld [vmem:[#allocation84_spill] sm:$0xff] }
 0x9d6   :  { %17976 = vmatprep.subr.bf16.mxu0 %v24083_v10  ;;  %18168 = vmatprep.subr.bf16.mxu1 %v24084_v48 }
 0x9d8   :  { %11317 = vmatmul.mubr.f32.vlgmr.msra.gmra.mrb[10].mxu0 %v22531_v34  ;;  %12172 = vmatmul.mubr.f32.vlgmr.msra.gmra.mrb[10].mxu1 %v22531_v34 }
 0x9d9   :  { %17978 = vmatpush1.bf16.msra.mxu0 %v24085_v58  ;;  %18170 = vmatpush1.bf16.msra.mxu1 %v24086_v18 }
 0x9da   :  { %17980 = vmatprep.subr.bf16.mxu0 %v24087_v6  ;;  %18172 = vmatprep.subr.bf16.mxu1 %v24088_v37 }
 0x9db   :  { %11419 = vmatprep.mubr.f32.mxu0 %v23680_v15  ;;  %12274 = vmatprep.mubr.f32.mxu1 %v23680_v15 }
 0x9dd   :  { %17982 = vmatpush1.bf16.msra.mxu0 %v24089_v60  ;;  %18174 = vmatpush1.bf16.msra.mxu1 %v24090_v17 }
 0x9de   :  { %17984 = vmatprep.subr.bf16.mxu0 %v24207_v12  ;;  %18176 = vmatprep.subr.bf16.mxu1 %v24208_v20 }
 0x9e1   :  { %17986 = vmatpush1.bf16.msra.mxu0 %v24209_v45  ;;  %18178 = vmatpush1.bf16.msra.mxu1 %v24210_v16 }
 0x9e2   :  { %17988 = vmatprep.subr.bf16.mxu0 %v24211_v44  ;;  %18180 = vmatprep.subr.bf16.mxu1 %v24212_v51 }
 0x9e5   :  { %17990 = vmatpush1.bf16.msra.mxu0 %v24213_v40  ;;  %18182 = vmatpush1.bf16.msra.mxu1 %v24214_v29 }
 0x9e6   :  { %17992 = vmatprep.subr.bf16.mxu0 %v24215_v50  ;;  %18184 = vmatprep.subr.bf16.mxu1 %v24216_v3 }
 0x9e9   :  { %17994 = vmatpush1.bf16.msra.mxu0 %v24217_v4  ;;  %18186 = vmatpush1.bf16.msra.mxu1 %v24218_v13 }
 0x9ea   :  { %17996 = vmatprep.subr.bf16.mxu0 %v24219_v39  ;;  %18188 = vmatprep.subr.bf16.mxu1 %v24220_v35 }
 0x9ed   :  { %17998 = vmatpush1.bf16.msra.mxu0 %v24221_v26  ;;  %18190 = vmatpush1.bf16.msra.mxu1 %v24222_v2 }
 0x9ee   :  { %18000 = vmatprep.subr.bf16.mxu0 %v24223_v43  ;;  %18192 = vmatprep.subr.bf16.mxu1 %v24224_v28 }
 0x9f1   :  { %18002 = vmatpush1.bf16.msra.mxu0 %v24225_v56  ;;  %18194 = vmatpush1.bf16.msra.mxu1 %v24226_v5 }
 0x9f2   :  { %18004 = vmatprep.subr.bf16.mxu0 %v24623_v19  ;;  %18196 = vmatprep.subr.bf16.mxu1 %v24624_v9 }
 0x9f5   :  { %18006 = vmatpush1.bf16.msra.mxu0 %v24625_v24  ;;  %18198 = vmatpush1.bf16.msra.mxu1 %v24626_v42 }
 0x9f6   :  { %18200 = vmatprep.subr.bf16.mxu0 %v24083_v10  ;;  %18392 = vmatprep.subr.bf16.mxu1 %v24084_v48 }
 0x9f8   :  { %11421 = vmatmul.mubr.f32.vlgmr.msra.gmra.mrb[10].mxu0 %v22531_v34  ;;  %12276 = vmatmul.mubr.f32.vlgmr.msra.gmra.mrb[10].mxu1 %v22531_v34  ;;  %v24659_v34 = vld [vmem:[#allocation83_spill] sm:$0xff] }
 0x9f9   :  { %18202 = vmatpush1.bf16.msra.mxu0 %v24085_v58  ;;  %18394 = vmatpush1.bf16.msra.mxu1 %v24086_v18 }
 0x9fa   :  { %18204 = vmatprep.subr.bf16.mxu0 %v24087_v6  ;;  %18396 = vmatprep.subr.bf16.mxu1 %v24088_v37 }
 0x9fb   :  { %12411 = vmatprep.mubr.f32.mxu0 %v23680_v15  ;;  %13266 = vmatprep.mubr.f32.mxu1 %v23680_v15 }
 0x9fd   :  { %18206 = vmatpush1.bf16.msra.mxu0 %v24089_v60  ;;  %18398 = vmatpush1.bf16.msra.mxu1 %v24090_v17 }
 0x9fe   :  { %18208 = vmatprep.subr.bf16.mxu0 %v24207_v12  ;;  %18400 = vmatprep.subr.bf16.mxu1 %v24208_v20 }
 0xa01   :  { %18210 = vmatpush1.bf16.msra.mxu0 %v24209_v45  ;;  %18402 = vmatpush1.bf16.msra.mxu1 %v24210_v16 }
 0xa02   :  { %18212 = vmatprep.subr.bf16.mxu0 %v24211_v44  ;;  %18404 = vmatprep.subr.bf16.mxu1 %v24212_v51 }
 0xa05   :  { %18214 = vmatpush1.bf16.msra.mxu0 %v24213_v40  ;;  %18406 = vmatpush1.bf16.msra.mxu1 %v24214_v29 }
 0xa06   :  { %18216 = vmatprep.subr.bf16.mxu0 %v24215_v50  ;;  %18408 = vmatprep.subr.bf16.mxu1 %v24216_v3 }
 0xa09   :  { %18218 = vmatpush1.bf16.msra.mxu0 %v24217_v4  ;;  %18410 = vmatpush1.bf16.msra.mxu1 %v24218_v13 }
 0xa0a   :  { %18220 = vmatprep.subr.bf16.mxu0 %v24219_v39  ;;  %18412 = vmatprep.subr.bf16.mxu1 %v24220_v35 }
 0xa0d   :  { %18222 = vmatpush1.bf16.msra.mxu0 %v24221_v26  ;;  %18414 = vmatpush1.bf16.msra.mxu1 %v24222_v2 }
 0xa0e   :  { %18224 = vmatprep.subr.bf16.mxu0 %v24223_v43  ;;  %18416 = vmatprep.subr.bf16.mxu1 %v24224_v28 }
 0xa11   :  { %18226 = vmatpush1.bf16.msra.mxu0 %v24225_v56  ;;  %18418 = vmatpush1.bf16.msra.mxu1 %v24226_v5 }
 0xa12   :  { %18228 = vmatprep.subr.bf16.mxu0 %v24623_v19  ;;  %18420 = vmatprep.subr.bf16.mxu1 %v24624_v9 }
 0xa15   :  { %18230 = vmatpush1.bf16.msra.mxu0 %v24625_v24  ;;  %18422 = vmatpush1.bf16.msra.mxu1 %v24626_v42 }
 0xa16   :  { %18232 = vmatprep.subr.bf16.mxu0 %v24659_v34  ;;  %18424 = vmatprep.subr.bf16.mxu1 %v24660_v22 }
 0xacb   :  { %v11422_v46 = vpop.f32.mrb[10].mxu0  ;;  %v12277_v27 = vpop.f32.mrb[10].mxu1 }
 0xacc   :  { %v18977_v30 = vadd.f32 %v11422_v46, %v24661_v33  ;;  %v11424_v21 = vpop.f32.mrb[11].mxu0  ;;  %v12279_v38 = vpop.f32.mrb[11].mxu1  ;;  %v18993_v42 = vadd.f32 %v12277_v27, %v21597_v25 }
 0xacd   :  { %v18978_v63 = vadd.f32 %v11424_v21, %v21590_v41  ;;  %v18994_v7 = vadd.f32 %v12279_v38, %v21594_v11 }
 0xace   :  { %v15836_v47 = vmul.f32 -1.442695, %v18977_v30 }
 0xacf   :  { %v15837_v62 = vmul.f32 -1.442695, %v18978_v63  ;;  %v15838_v24 = vmul.f32 -1.442695, %v18994_v7 }
 0xad0   :  { %19435 = vpow2.f32 %v15836_v47 }
 0xad1   :  { %19437 = vpow2.f32 %v15837_v62 }
 0xad2   :  { %19439 = vpow2.f32 %v15838_v24 }
 0xad3   :  { %19441 = vtanh.f32 %v18993_v42 }
 0xada   :  { %v19436_v34 = vpop.eup %19435 }
 0xadb   :  { %v19438_v9 = vpop.eup %19437  ;;  %v12295_v22 = vadd.f32 1.0, %v19436_v34  ;;  %v24663_v34 = vld [vmem:[#allocation49_spill] sm:$0xff] }
 0xadc   :  { %v12296_v19 = vadd.f32 1.0, %v19438_v9  ;;  %v19440_v46 = vpop.eup %19439 }
 0xadd   :  { %19443 = vrcp.f32 %v12295_v22  ;;  %v19442_v33 = vpop.eup %19441  ;;  %v12297_v47 = vadd.f32 1.0, %v19440_v46  ;;  %v24664_v46 = vld [vmem:[#allocation51_spill] sm:$0xff] }
 0xade   :  { %19445 = vrcp.f32 %v12296_v19  ;;  %v24662_v19 = vld [vmem:[#allocation45_spill] sm:$0xff] }
 0xadf   :  { %19447 = vrcp.f32 %v12297_v47  ;;  %v24668_v47 = vld [vmem:[#allocation111_spill] sm:$0xff] }
 0xae7   :  { %v19444_v21 = vpop.eup %19443 }
 0xae8   :  { %v19446_v30 = vpop.eup %19445  ;;  %v12306_v63 = vmul.f32 %v19444_v21, %v19442_v33  ;;  %v24665_v21 = vld [vmem:[#allocation108_spill] sm:$0xff] }
 0xae9   :  { %v12305_v62 = vmul.f32 %v19446_v30, %v22528_v0  ;;  %v19448_v27 = vpop.eup %19447  ;;  %v24666_v30 = vld [vmem:[#allocation109_spill] sm:$0xff] }
 0xaeb   :  { %v22760_v38 = vadd.f32 %v12306_v63, %v12305_v62  ;;  %v24667_v63 = vld [vmem:[#allocation110_spill] sm:$0xff]  ;;  %v24669_v62 = vld [vmem:[#allocation112_spill] sm:$0xff] }
 0xaed   :  { %19449 = vtanh.f32 %v22760_v38 }
 0xaf7   :  { %v19450_v7 = vpop.eup %19449 }
 0xaf8   :  { %v12309_v24 = vmul.f32 %v19450_v7, %v19448_v27  ;;  %v24670_v27 = vld [vmem:[#allocation113_spill] sm:$0xff]  ;;  %v24671_v7 = vld [vmem:[#allocation114_spill] sm:$0xff] }
 0xafa   :  { %v22763_v42 = vand.u32 4294901760, %v12309_v24 }
 0xafc   :  { %v22766_v9 = vsub.f32 %v12309_v24, %v22763_v42  ;;  %v24672_v24 = vld [vmem:[#allocation115_spill] sm:$0xff] }
 0xafe   :  { %v22769_v22 = vand.u32 4294901760, %v22766_v9 }
 0xb00   :  { %v12415_v33 = vsub.f32 %v22766_v9, %v22769_v22 }
 0xb02   :  { %v12416_v0 = vand.u32 4294901760, %v12415_v33  ;;  %v24673_v33 = vld [vmem:[#allocation116_spill] sm:$0xff] }
 0xb04   :  { %12417 = vmatmul.mubr.f32.vlgmr.msra.gmra.mrb[12].mxu0 %v12416_v0  ;;  %13272 = vmatmul.mubr.f32.vlgmr.msra.gmra.mrb[12].mxu1 %v12416_v0  ;;  %v24674_v0 = vld [vmem:[#allocation117_spill] sm:$0xff] }
 0xb05   :  { %18234 = vmatpush1.bf16.msra.mxu0 %v24232_v49  ;;  %18426 = vmatpush1.bf16.msra.mxu1 %v24233_v55 }
 0xb06   :  { %18236 = vmatprep.subr.bf16.mxu0 %v24318_v61  ;;  %18428 = vmatprep.subr.bf16.mxu1 %v24319_v14 }
 0xb07   :  { %12647 = vmatprep.mubr.f32.mxu0 %v23680_v15  ;;  %13502 = vmatprep.mubr.f32.mxu1 %v23680_v15 }
 0xb09   :  { %18238 = vmatpush1.bf16.msra.mxu0 %v24404_v54  ;;  %18430 = vmatpush1.bf16.msra.mxu1 %v24405_v31 }
 0xb0a   :  { %18240 = vmatprep.subr.bf16.mxu0 %v24490_v36  ;;  %18432 = vmatprep.subr.bf16.mxu1 %v24491_v57 }
 0xb0d   :  { %18242 = vmatpush1.bf16.msra.mxu0 %v24576_v32  ;;  %18434 = vmatpush1.bf16.msra.mxu1 %v24577_v59 }
 0xb0e   :  { %18244 = vmatprep.subr.bf16.mxu0 %v24494_v53  ;;  %18436 = vmatprep.subr.bf16.mxu1 %v24495_v52 }
 0xb11   :  { %18246 = vmatpush1.bf16.msra.mxu0 %v24578_v8  ;;  %18438 = vmatpush1.bf16.msra.mxu1 %v24579_v23 }
 0xb12   :  { %18248 = vmatprep.subr.bf16.mxu0 %v24580_v1  ;;  %18440 = vmatprep.subr.bf16.mxu1 %v24662_v19  ;;  %v24729_v19 = vld [vmem:[#allocation124_spill] sm:$0xff] }
 0xb15   :  { %18250 = vmatpush1.bf16.msra.mxu0 %v24663_v34  ;;  %18442 = vmatpush1.bf16.msra.mxu1 %v24664_v46  ;;  %v24675_v46 = vld [vmem:[#allocation118_spill] sm:$0xff]  ;;  %v24728_v34 = vld [vmem:[#allocation93_spill] sm:$0xff] }
 0xb16   :  { %18252 = vmatprep.subr.bf16.mxu0 %v24665_v21  ;;  %18444 = vmatprep.subr.bf16.mxu1 %v24666_v30  ;;  %v24676_v21 = vld [vmem:[#allocation119_spill] sm:$0xff]  ;;  %v24677_v30 = vld [vmem:[#allocation52_spill] sm:$0xff] }
 0xb19   :  { %18254 = vmatpush1.bf16.msra.mxu0 %v24667_v63  ;;  %18446 = vmatpush1.bf16.msra.mxu1 %v24668_v47  ;;  %v24678_v63 = vld [vmem:[#allocation58_spill] sm:$0xff]  ;;  %v24693_v47 = vld [vmem:[#allocation81_spill] sm:$0xff] }
 0xb1a   :  { %18256 = vmatprep.subr.bf16.mxu0 %v24669_v62  ;;  %18448 = vmatprep.subr.bf16.mxu1 %v24670_v27  ;;  %v24679_v27 = vld [vmem:[#allocation59_spill] sm:$0xff]  ;;  %v24692_v62 = vld [vmem:[#allocation80_spill] sm:$0xff] }
 0xb1d   :  { %18258 = vmatpush1.bf16.msra.mxu0 %v24671_v7  ;;  %18450 = vmatpush1.bf16.msra.mxu1 %v24672_v24  ;;  %v24680_v7 = vld [vmem:[#allocation61_spill] sm:$0xff]  ;;  %v24681_v24 = vld [vmem:[#allocation62_spill] sm:$0xff] }
 0xb1e   :  { %18260 = vmatprep.subr.bf16.mxu0 %v24673_v33  ;;  %18452 = vmatprep.subr.bf16.mxu1 %v24674_v0  ;;  %v24682_v33 = vld [vmem:[#allocation65_spill] sm:$0xff]  ;;  %v24687_v0 = vld [vmem:[#allocation75_spill] sm:$0xff] }
 0xb21   :  { %18262 = vmatpush1.bf16.msra.mxu0 %v24675_v46  ;;  %18454 = vmatpush1.bf16.msra.mxu1 %v24676_v21  ;;  %v24683_v21 = vld [vmem:[#allocation67_spill] sm:$0xff]  ;;  %v24686_v46 = vld [vmem:[#allocation74_spill] sm:$0xff] }
 0xb22   :  { %18264 = vmatprep.subr.bf16.mxu0 %v24677_v30  ;;  %18456 = vmatprep.subr.bf16.mxu1 %v24678_v63  ;;  %v24684_v30 = vld [vmem:[#allocation68_spill] sm:$0xff]  ;;  %v24685_v63 = vld [vmem:[#allocation73_spill] sm:$0xff] }
 0xb24   :  { %12649 = vmatmul.mubr.f32.vlgmr.msra.gmra.mrb[12].mxu0 %v22763_v42  ;;  %13504 = vmatmul.mubr.f32.vlgmr.msra.gmra.mrb[12].mxu1 %v22763_v42 }
 0xb25   :  { %18266 = vmatpush1.bf16.msra.mxu0 %v24679_v27  ;;  %18458 = vmatpush1.bf16.msra.mxu1 %v24680_v7  ;;  %v24688_v27 = vld [vmem:[#allocation76_spill] sm:$0xff]  ;;  %v24689_v7 = vld [vmem:[#allocation77_spill] sm:$0xff] }
 0xb26   :  { %18268 = vmatprep.subr.bf16.mxu0 %v24681_v24  ;;  %18460 = vmatprep.subr.bf16.mxu1 %v24682_v33  ;;  %v24690_v24 = vld [vmem:[#allocation78_spill] sm:$0xff]  ;;  %v24691_v33 = vld [vmem:[#allocation79_spill] sm:$0xff] }
 0xb27   :  { %12783 = vmatprep.mubr.f32.mxu0 %v23680_v15  ;;  %13638 = vmatprep.mubr.f32.mxu1 %v23680_v15 }
 0xb29   :  { %18270 = vmatpush1.bf16.msra.mxu0 %v24683_v21  ;;  %18462 = vmatpush1.bf16.msra.mxu1 %v24684_v30  ;;  %v24694_v21 = vld [vmem:[#allocation82_spill] sm:$0xff]  ;;  %v24695_v30 = vld [vmem:[#allocation87_spill] sm:$0xff] }
 0xb2a   :  { %18272 = vmatprep.subr.bf16.mxu0 %v24685_v63  ;;  %18464 = vmatprep.subr.bf16.mxu1 %v24686_v46  ;;  %v24696_v63 = vld [vmem:[#allocation88_spill] sm:$0xff]  ;;  %v24697_v46 = vld [vmem:[#allocation89_spill] sm:$0xff] }
 0xb2d   :  { %18274 = vmatpush1.bf16.msra.mxu0 %v24687_v0  ;;  %18466 = vmatpush1.bf16.msra.mxu1 %v24688_v27  ;;  %v24698_v0 = vld [vmem:[#allocation8_spill] sm:$0xff]  ;;  %v24699_v27 = vld [vmem:[#allocation10_spill] sm:$0xff] }
 0xb2e   :  { %18276 = vmatprep.subr.bf16.mxu0 %v24689_v7  ;;  %18468 = vmatprep.subr.bf16.mxu1 %v24690_v24  ;;  %v24700_v7 = vld [vmem:[#allocation11_spill] sm:$0xff]  ;;  %v24701_v24 = vld [vmem:[#allocation12_spill] sm:$0xff] }
 0xb31   :  { %18278 = vmatpush1.bf16.msra.mxu0 %v24691_v33  ;;  %18470 = vmatpush1.bf16.msra.mxu1 %v24692_v62  ;;  %v24702_v33 = vld [vmem:[#allocation13_spill] sm:$0xff]  ;;  %v24703_v62 = vld [vmem:[#allocation14_spill] sm:$0xff] }
 0xb32   :  { %18280 = vmatprep.subr.bf16.mxu0 %v24693_v47  ;;  %18472 = vmatprep.subr.bf16.mxu1 %v24694_v21  ;;  %v24704_v47 = vld [vmem:[#allocation15_spill] sm:$0xff]  ;;  %v24705_v21 = vld [vmem:[#allocation26_spill] sm:$0xff] }
 0xb35   :  { %18282 = vmatpush1.bf16.msra.mxu0 %v24695_v30  ;;  %18474 = vmatpush1.bf16.msra.mxu1 %v24696_v63  ;;  %v24706_v30 = vld [vmem:[#allocation34_spill] sm:$0xff] }
 0xb36   :  { %18284 = vmatprep.subr.bf16.mxu0 %v24697_v46  ;;  %18476 = vmatprep.subr.bf16.mxu1 %v24698_v0  ;;  %v24707_v63 = vld [vmem:[#allocation38_spill] sm:$0xff]  ;;  %v24708_v46 = vld [vmem:[#allocation39_spill] sm:$0xff] }
 0xb37   :  { %v24722_v0 = vld [vmem:[#allocation23_spill] sm:$0xff] }
 0xb39   :  { %18286 = vmatpush1.bf16.msra.mxu0 %v24699_v27  ;;  %18478 = vmatpush1.bf16.msra.mxu1 %v24700_v7  ;;  %v24718_v7 = vld [vmem:[#allocation18_spill] sm:$0xff]  ;;  %v24719_v27 = vld [vmem:[#allocation19_spill] sm:$0xff] }
 0xb3a   :  { %18288 = vmatprep.subr.bf16.mxu0 %v24701_v24  ;;  %18480 = vmatprep.subr.bf16.mxu1 %v24702_v33  ;;  %v24716_v33 = vld [vmem:[#allocation9_spill] sm:$0xff] }
 0xb3b   :  { %v24717_v24 = vld [vmem:[#allocation17_spill] sm:$0xff] }
 0xb3d   :  { %18290 = vmatpush1.bf16.msra.mxu0 %v24703_v62  ;;  %18482 = vmatpush1.bf16.msra.mxu1 %v24704_v47  ;;  %v24714_v47 = vld [vmem:[#allocation42_spill] sm:$0xff]  ;;  %v24715_v62 = vld [vmem:[#allocation43_spill] sm:$0xff] }
 0xb3e   :  { %18292 = vmatprep.subr.bf16.mxu0 %v24705_v21  ;;  %18484 = vmatprep.subr.bf16.mxu1 %v24706_v30  ;;  %v24712_v30 = vld [vmem:[#allocation72_spill] sm:$0xff]  ;;  %v24713_v21 = vld [vmem:[#allocation41_spill] sm:$0xff] }
 0xb41   :  { %18294 = vmatpush1.bf16.msra.mxu0 %v24707_v63  ;;  %18486 = vmatpush1.bf16.msra.mxu1 %v24708_v46  ;;  %v24710_v46 = vld [vmem:[#allocation70_spill] sm:$0xff]  ;;  %v24711_v63 = vld [vmem:[#allocation71_spill] sm:$0xff] }
 0xb42   :  { %18296 = vmatprep.subr.bf16.mxu0 %v24083_v10  ;;  %18488 = vmatprep.subr.bf16.mxu1 %v24084_v48 }
 0xb44   :  { %12786 = vmatmul.mubr.f32.vlgmr.msra.gmra.mrb[12].mxu0 %v22766_v9  ;;  %13641 = vmatmul.mubr.f32.vlgmr.msra.gmra.mrb[12].mxu1 %v22766_v9  ;;  %v24709_v9 = vld [vmem:[#allocation69_spill] sm:$0xff] }
 0xb45   :  { %18298 = vmatpush1.bf16.msra.mxu0 %v24085_v58  ;;  %18490 = vmatpush1.bf16.msra.mxu1 %v24086_v18 }
 0xb46   :  { %18300 = vmatprep.subr.bf16.mxu0 %v24087_v6  ;;  %18492 = vmatprep.subr.bf16.mxu1 %v24088_v37 }
 0xb47   :  { %12888 = vmatprep.mubr.f32.mxu0 %v23680_v15  ;;  %13743 = vmatprep.mubr.f32.mxu1 %v23680_v15 }
 0xb49   :  { %18302 = vmatpush1.bf16.msra.mxu0 %v24089_v60  ;;  %18494 = vmatpush1.bf16.msra.mxu1 %v24090_v17 }
 0xb4a   :  { %18304 = vmatprep.subr.bf16.mxu0 %v24207_v12  ;;  %18496 = vmatprep.subr.bf16.mxu1 %v24208_v20 }
 0xb4d   :  { %18306 = vmatpush1.bf16.msra.mxu0 %v24209_v45  ;;  %18498 = vmatpush1.bf16.msra.mxu1 %v24210_v16 }
 0xb4e   :  { %18308 = vmatprep.subr.bf16.mxu0 %v24211_v44  ;;  %18500 = vmatprep.subr.bf16.mxu1 %v24212_v51 }
 0xb51   :  { %18310 = vmatpush1.bf16.msra.mxu0 %v24213_v40  ;;  %18502 = vmatpush1.bf16.msra.mxu1 %v24214_v29 }
 0xb52   :  { %18312 = vmatprep.subr.bf16.mxu0 %v24215_v50  ;;  %18504 = vmatprep.subr.bf16.mxu1 %v24216_v3 }
 0xb55   :  { %18314 = vmatpush1.bf16.msra.mxu0 %v24217_v4  ;;  %18506 = vmatpush1.bf16.msra.mxu1 %v24218_v13 }
 0xb56   :  { %18316 = vmatprep.subr.bf16.mxu0 %v24219_v39  ;;  %18508 = vmatprep.subr.bf16.mxu1 %v24220_v35 }
 0xb59   :  { %18318 = vmatpush1.bf16.msra.mxu0 %v24221_v26  ;;  %18510 = vmatpush1.bf16.msra.mxu1 %v24222_v2 }
 0xb5a   :  { %18320 = vmatprep.subr.bf16.mxu0 %v24223_v43  ;;  %18512 = vmatprep.subr.bf16.mxu1 %v24224_v28 }
 0xb5d   :  { %18322 = vmatpush1.bf16.msra.mxu0 %v24225_v56  ;;  %18514 = vmatpush1.bf16.msra.mxu1 %v24226_v5 }
 0xb5e   :  { %18324 = vmatprep.subr.bf16.mxu0 %v24709_v9  ;;  %18516 = vmatprep.subr.bf16.mxu1 %v24710_v46 }
 0xb61   :  { %18326 = vmatpush1.bf16.msra.mxu0 %v24711_v63  ;;  %18518 = vmatpush1.bf16.msra.mxu1 %v24712_v30 }
 0xb62   :  { %18328 = vmatprep.subr.bf16.mxu0 %v24713_v21  ;;  %18520 = vmatprep.subr.bf16.mxu1 %v24714_v47  ;;  %v24720_v21 = vld [vmem:[#allocation20_spill] sm:$0xff]  ;;  %v24721_v47 = vld [vmem:[#allocation22_spill] sm:$0xff] }
 0xb64   :  { %12892 = vmatmul.mubr.f32.vlgmr.msra.gmra.mrb[12].mxu0 %v22769_v22  ;;  %13747 = vmatmul.mubr.f32.vlgmr.msra.gmra.mrb[12].mxu1 %v22769_v22  ;;  %v24723_v22 = vld [vmem:[#allocation24_spill] sm:$0xff] }
 0xb65   :  { %18330 = vmatpush1.bf16.msra.mxu0 %v24715_v62  ;;  %18522 = vmatpush1.bf16.msra.mxu1 %v24716_v33  ;;  %v24724_v62 = vld [vmem:[#allocation120_spill] sm:$0xff]  ;;  %v24725_v33 = vld [vmem:[#allocation121_spill] sm:$0xff] }
 0xb66   :  { %18332 = vmatprep.subr.bf16.mxu0 %v24717_v24  ;;  %18524 = vmatprep.subr.bf16.mxu1 %v24718_v7  ;;  %v24726_v24 = vld [vmem:[#allocation122_spill] sm:$0xff]  ;;  %v24727_v7 = vld [vmem:[#allocation123_spill] sm:$0xff] }
 0xb67   :  { %13058 = vmatprep.mubr.f32.mxu0 %v23680_v15  ;;  %13913 = vmatprep.mubr.f32.mxu1 %v23680_v15 }
 0xb69   :  { %18334 = vmatpush1.bf16.msra.mxu0 %v24719_v27  ;;  %18526 = vmatpush1.bf16.msra.mxu1 %v24720_v21  ;;  %v24730_v27 = vld [vmem:[#allocation94_spill] sm:$0xff]  ;;  %v24731_v21 = vld [vmem:[#allocation21_spill] sm:$0xff] }
 0xb6a   :  { %18336 = vmatprep.subr.bf16.mxu0 %v24721_v47  ;;  %18528 = vmatprep.subr.bf16.mxu1 %v24722_v0  ;;  %v24732_v47 = vld [vmem:[#allocation27_spill] sm:$0xff]  ;;  %v24733_v0 = vld [vmem:[#allocation28_spill] sm:$0xff] }
 0xb6d   :  { %18338 = vmatpush1.bf16.msra.mxu0 %v24723_v22  ;;  %18530 = vmatpush1.bf16.msra.mxu1 %v24724_v62  ;;  %v24734_v22 = vld [vmem:[#allocation33_spill] sm:$0xff]  ;;  %v24735_v62 = vld [vmem:[#allocation35_spill] sm:$0xff] }
 0xb6e   :  { %18340 = vmatprep.subr.bf16.mxu0 %v24725_v33  ;;  %18532 = vmatprep.subr.bf16.mxu1 %v24726_v24  ;;  %v24736_v33 = vld [vmem:[#allocation37_spill] sm:$0xff] }
 0xb6f   :  { %v24737_v24 = vld [vmem:[#allocation125_spill] sm:$0xff] }
 0xb71   :  { %18342 = vmatpush1.bf16.msra.mxu0 %v24727_v7  ;;  %18534 = vmatpush1.bf16.msra.mxu1 %v24728_v34  ;;  %v24738_v7 = vld [vmem:[#allocation126_spill] sm:$0xff] }
 0xb72   :  { %18344 = vmatprep.subr.bf16.mxu0 %v24729_v19  ;;  %18536 = vmatprep.subr.bf16.mxu1 %v24730_v27  ;;  %v24739_v34 = vld [vmem:[#allocation102_spill] sm:$0xff]  ;;  %v24740_v19 = vld [vmem:[#allocation103_spill] sm:$0xff]  ;;  %v24741_v27 = vld [vmem:[#allocation104_spill] sm:$0xff] }
 0xb75   :  { %18346 = vmatpush1.bf16.msra.mxu0 %v24731_v21  ;;  %18538 = vmatpush1.bf16.msra.mxu1 %v24732_v47  ;;  %v24742_v21 = vld [vmem:[#allocation105_spill] sm:$0xff]  ;;  %v24743_v47 = vld [vmem:[#allocation106_spill] sm:$0xff] }
 0xb76   :  { %18348 = vmatprep.subr.bf16.mxu0 %v24733_v0  ;;  %18540 = vmatprep.subr.bf16.mxu1 %v24734_v22  ;;  %v24744_v0 = vld [vmem:[#allocation107_spill] sm:$0xff] }
 0xb79   :  { %18350 = vmatpush1.bf16.msra.mxu0 %v24735_v62  ;;  %18542 = vmatpush1.bf16.msra.mxu1 %v24736_v33 }
 0xb7a   :  { %18352 = vmatprep.subr.bf16.mxu0 %v24737_v24  ;;  %18544 = vmatprep.subr.bf16.mxu1 %v24738_v7 }
 0xb7d   :  { %18354 = vmatpush1.bf16.msra.mxu0 %v24739_v34  ;;  %18546 = vmatpush1.bf16.msra.mxu1 %v24740_v19 }
 0xb7e   :  { %18356 = vmatprep.subr.bf16.mxu0 %v24741_v27  ;;  %18548 = vmatprep.subr.bf16.mxu1 %v24742_v21  ;;  %v24747_v27 = vld [vmem:[#allocation25_spill] sm:$0xff] }
 0xb81   :  { %18358 = vmatpush1.bf16.msra.mxu0 %v24743_v47  ;;  %18550 = vmatpush1.bf16.msra.mxu1 %v24744_v0  ;;  %v24746_v0 = vld [vmem:[#allocation84_spill] sm:$0xff] }
 0xb82   :  { %18360 = vmatprep.subr.bf16.mxu0 %v24083_v10  ;;  %18552 = vmatprep.subr.bf16.mxu1 %v24084_v48 }
 0xb84   :  { %13060 = vmatmul.mubr.f32.vlgmr.msra.gmra.mrb[12].mxu0 %v22763_v42  ;;  %13915 = vmatmul.mubr.f32.vlgmr.msra.gmra.mrb[12].mxu1 %v22763_v42 }
 0xb85   :  { %18362 = vmatpush1.bf16.msra.mxu0 %v24085_v58  ;;  %18554 = vmatpush1.bf16.msra.mxu1 %v24086_v18 }
 0xb86   :  { %18364 = vmatprep.subr.bf16.mxu0 %v24087_v6  ;;  %18556 = vmatprep.subr.bf16.mxu1 %v24088_v37 }
 0xb87   :  { %13162 = vmatprep.mubr.f32.mxu0 %v23680_v15  ;;  %14017 = vmatprep.mubr.f32.mxu1 %v23680_v15 }
 0xb89   :  { %18366 = vmatpush1.bf16.msra.mxu0 %v24089_v60  ;;  %18558 = vmatpush1.bf16.msra.mxu1 %v24090_v17 }
 0xb8a   :  { %18368 = vmatprep.subr.bf16.mxu0 %v24207_v12  ;;  %18560 = vmatprep.subr.bf16.mxu1 %v24208_v20 }
 0xb8d   :  { %18370 = vmatpush1.bf16.msra.mxu0 %v24209_v45  ;;  %18562 = vmatpush1.bf16.msra.mxu1 %v24210_v16 }
 0xb8e   :  { %18372 = vmatprep.subr.bf16.mxu0 %v24211_v44  ;;  %18564 = vmatprep.subr.bf16.mxu1 %v24212_v51 }
 0xb91   :  { %18374 = vmatpush1.bf16.msra.mxu0 %v24213_v40  ;;  %18566 = vmatpush1.bf16.msra.mxu1 %v24214_v29 }
 0xb92   :  { %18376 = vmatprep.subr.bf16.mxu0 %v24215_v50  ;;  %18568 = vmatprep.subr.bf16.mxu1 %v24216_v3 }
 0xb95   :  { %18378 = vmatpush1.bf16.msra.mxu0 %v24217_v4  ;;  %18570 = vmatpush1.bf16.msra.mxu1 %v24218_v13 }
 0xb96   :  { %18380 = vmatprep.subr.bf16.mxu0 %v24219_v39  ;;  %18572 = vmatprep.subr.bf16.mxu1 %v24220_v35 }
 0xb99   :  { %18382 = vmatpush1.bf16.msra.mxu0 %v24221_v26  ;;  %18574 = vmatpush1.bf16.msra.mxu1 %v24222_v2 }
 0xb9a   :  { %18384 = vmatprep.subr.bf16.mxu0 %v24223_v43  ;;  %18576 = vmatprep.subr.bf16.mxu1 %v24224_v28 }
 0xb9d   :  { %18386 = vmatpush1.bf16.msra.mxu0 %v24225_v56  ;;  %18578 = vmatpush1.bf16.msra.mxu1 %v24226_v5 }
 0xb9e   :  { %18388 = vmatprep.subr.bf16.mxu0 %v24709_v9  ;;  %18580 = vmatprep.subr.bf16.mxu1 %v24710_v46 }
 0xba1   :  { %18390 = vmatpush1.bf16.msra.mxu0 %v24711_v63  ;;  %18582 = vmatpush1.bf16.msra.mxu1 %v24712_v30 }
 0xba2   :  { %18584 = vmatprep.subr.bf16.mxu0 %v24083_v10  ;;  %18776 = vmatprep.subr.bf16.mxu1 %v24084_v48 }
 0xba4   :  { %13164 = vmatmul.mubr.f32.vlgmr.msra.gmra.mrb[12].mxu0 %v22763_v42  ;;  %14019 = vmatmul.mubr.f32.vlgmr.msra.gmra.mrb[12].mxu1 %v22763_v42  ;;  %v24745_v42 = vld [vmem:[#allocation83_spill] sm:$0xff] }
 0xba5   :  { %18586 = vmatpush1.bf16.msra.mxu0 %v24085_v58  ;;  %18778 = vmatpush1.bf16.msra.mxu1 %v24086_v18 }
 0xba6   :  { %18588 = vmatprep.subr.bf16.mxu0 %v24087_v6  ;;  %18780 = vmatprep.subr.bf16.mxu1 %v24088_v37 }
 0xba7   :  { %14154 = vmatprep.mubr.f32.mxu0 %v23680_v15  ;;  %15009 = vmatprep.mubr.f32.mxu1 %v23680_v15 }
 0xba9   :  { %18590 = vmatpush1.bf16.msra.mxu0 %v24089_v60  ;;  %18782 = vmatpush1.bf16.msra.mxu1 %v24090_v17 }
 0xbaa   :  { %18592 = vmatprep.subr.bf16.mxu0 %v24207_v12  ;;  %18784 = vmatprep.subr.bf16.mxu1 %v24208_v20 }
 0xbad   :  { %18594 = vmatpush1.bf16.msra.mxu0 %v24209_v45  ;;  %18786 = vmatpush1.bf16.msra.mxu1 %v24210_v16 }
 0xbae   :  { %18596 = vmatprep.subr.bf16.mxu0 %v24211_v44  ;;  %18788 = vmatprep.subr.bf16.mxu1 %v24212_v51 }
 0xbb1   :  { %18598 = vmatpush1.bf16.msra.mxu0 %v24213_v40  ;;  %18790 = vmatpush1.bf16.msra.mxu1 %v24214_v29 }
 0xbb2   :  { %18600 = vmatprep.subr.bf16.mxu0 %v24215_v50  ;;  %18792 = vmatprep.subr.bf16.mxu1 %v24216_v3 }
 0xbb5   :  { %18602 = vmatpush1.bf16.msra.mxu0 %v24217_v4  ;;  %18794 = vmatpush1.bf16.msra.mxu1 %v24218_v13 }
 0xbb6   :  { %18604 = vmatprep.subr.bf16.mxu0 %v24219_v39  ;;  %18796 = vmatprep.subr.bf16.mxu1 %v24220_v35 }
 0xbb9   :  { %18606 = vmatpush1.bf16.msra.mxu0 %v24221_v26  ;;  %18798 = vmatpush1.bf16.msra.mxu1 %v24222_v2 }
 0xbba   :  { %18608 = vmatprep.subr.bf16.mxu0 %v24223_v43  ;;  %18800 = vmatprep.subr.bf16.mxu1 %v24224_v28 }
 0xbbd   :  { %18610 = vmatpush1.bf16.msra.mxu0 %v24225_v56  ;;  %18802 = vmatpush1.bf16.msra.mxu1 %v24226_v5 }
 0xbbe   :  { %18612 = vmatprep.subr.bf16.mxu0 %v24709_v9  ;;  %18804 = vmatprep.subr.bf16.mxu1 %v24710_v46 }
 0xbc1   :  { %18614 = vmatpush1.bf16.msra.mxu0 %v24711_v63  ;;  %18806 = vmatpush1.bf16.msra.mxu1 %v24712_v30 }
 0xbc2   :  { %18616 = vmatprep.subr.bf16.mxu0 %v24745_v42  ;;  %18808 = vmatprep.subr.bf16.mxu1 %v24746_v0 }
 0xc77   :  { %v13165_v47 = vpop.f32.mrb[12].mxu0  ;;  %v14020_v21 = vpop.f32.mrb[12].mxu1 }
 0xc78   :  { %v18979_v19 = vadd.f32 %v13165_v47, %v24747_v27  ;;  %v13167_v34 = vpop.f32.mrb[13].mxu0  ;;  %v14022_v7 = vpop.f32.mrb[13].mxu1  ;;  %v18995_v30 = vadd.f32 %v14020_v21, %v21597_v25 }
 0xc79   :  { %v18980_v24 = vadd.f32 %v13167_v34, %v21590_v41  ;;  %v18996_v22 = vadd.f32 %v14022_v7, %v21594_v11 }
 0xc7a   :  { %v15839_v33 = vmul.f32 -1.442695, %v18979_v19 }
 0xc7b   :  { %v15840_v62 = vmul.f32 -1.442695, %v18980_v24  ;;  %v15841_v63 = vmul.f32 -1.442695, %v18996_v22 }
 0xc7c   :  { %19451 = vpow2.f32 %v15839_v33 }
 0xc7d   :  { %19453 = vpow2.f32 %v15840_v62 }
 0xc7e   :  { %19455 = vpow2.f32 %v15841_v63 }
 0xc7f   :  { %19457 = vtanh.f32 %v18995_v30 }
 0xc86   :  { %v19452_v42 = vpop.eup %19451 }
 0xc87   :  { %v19454_v46 = vpop.eup %19453  ;;  %v14038_v0 = vadd.f32 1.0, %v19452_v42  ;;  %v24763_v42 = vld [vmem:[#allocation52_spill] sm:$0xff] }
 0xc88   :  { %v14039_v9 = vadd.f32 1.0, %v19454_v46  ;;  %v19456_v47 = vpop.eup %19455 }
 0xc89   :  { %19459 = vrcp.f32 %v14038_v0  ;;  %v19458_v27 = vpop.eup %19457  ;;  %v14040_v33 = vadd.f32 1.0, %v19456_v47  ;;  %v24764_v0 = vld [vmem:[#allocation58_spill] sm:$0xff]  ;;  %v24765_v47 = vld [vmem:[#allocation59_spill] sm:$0xff] }
 0xc8a   :  { %19461 = vrcp.f32 %v14039_v9 }
 0xc8b   :  { %19463 = vrcp.f32 %v14040_v33  ;;  %v24769_v33 = vld [vmem:[#allocation67_spill] sm:$0xff] }
 0xc93   :  { %v19460_v34 = vpop.eup %19459 }
 0xc94   :  { %v19462_v19 = vpop.eup %19461  ;;  %v14049_v24 = vmul.f32 %v19460_v34, %v19458_v27  ;;  %v24766_v34 = vld [vmem:[#allocation61_spill] sm:$0xff] }
 0xc95   :  { %v14048_v62 = vmul.f32 %v19462_v19, %v22760_v38  ;;  %v19464_v21 = vpop.eup %19463  ;;  %v24767_v19 = vld [vmem:[#allocation62_spill] sm:$0xff] }
 0xc97   :  { %v22992_v7 = vadd.f32 %v14049_v24, %v14048_v62  ;;  %v24768_v24 = vld [vmem:[#allocation65_spill] sm:$0xff]  ;;  %v24770_v62 = vld [vmem:[#allocation68_spill] sm:$0xff] }
 0xc99   :  { %19465 = vtanh.f32 %v22992_v7 }
 0xca3   :  { %v19466_v22 = vpop.eup %19465 }
 0xca4   :  { %v14052_v63 = vmul.f32 %v19466_v22, %v19464_v21  ;;  %v24771_v21 = vld [vmem:[#allocation73_spill] sm:$0xff]  ;;  %v24772_v22 = vld [vmem:[#allocation74_spill] sm:$0xff] }
 0xca6   :  { %v22995_v30 = vand.u32 4294901760, %v14052_v63 }
 0xca8   :  { %v22998_v46 = vsub.f32 %v14052_v63, %v22995_v30  ;;  %v24773_v63 = vld [vmem:[#allocation75_spill] sm:$0xff] }
 0xcaa   :  { %v23001_v9 = vand.u32 4294901760, %v22998_v46 }
 0xcac   :  { %v14158_v27 = vsub.f32 %v22998_v46, %v23001_v9 }
 0xcae   :  { %v14159_v38 = vand.u32 4294901760, %v14158_v27  ;;  %v24774_v27 = vld [vmem:[#allocation76_spill] sm:$0xff] }
 0xcb0   :  { %14160 = vmatmul.mubr.f32.vlgmr.msra.gmra.mrb[14].mxu0 %v14159_v38  ;;  %15015 = vmatmul.mubr.f32.vlgmr.msra.gmra.mrb[14].mxu1 %v14159_v38  ;;  %v24775_v38 = vld [vmem:[#allocation77_spill] sm:$0xff] }
 0xcb1   :  { %18618 = vmatpush1.bf16.msra.mxu0 %v24232_v49  ;;  %18810 = vmatpush1.bf16.msra.mxu1 %v24233_v55  ;;  %v24748_v49 = vld [vmem:[#allocation45_spill] sm:$0xff] }
 0xcb2   :  { %18620 = vmatprep.subr.bf16.mxu0 %v24318_v61  ;;  %18812 = vmatprep.subr.bf16.mxu1 %v24319_v14  ;;  %v24749_v55 = vld [vmem:[#allocation49_spill] sm:$0xff]  ;;  %v24750_v61 = vld [vmem:[#allocation51_spill] sm:$0xff]  ;;  %v24751_v14 = vld [vmem:[#allocation108_spill] sm:$0xff] }
 0xcb3   :  { %14390 = vmatprep.mubr.f32.mxu0 %v23680_v15  ;;  %15245 = vmatprep.mubr.f32.mxu1 %v23680_v15 }
 0xcb5   :  { %18622 = vmatpush1.bf16.msra.mxu0 %v24404_v54  ;;  %18814 = vmatpush1.bf16.msra.mxu1 %v24405_v31  ;;  %v24752_v54 = vld [vmem:[#allocation109_spill] sm:$0xff]  ;;  %v24753_v31 = vld [vmem:[#allocation110_spill] sm:$0xff] }
 0xcb6   :  { %18624 = vmatprep.subr.bf16.mxu0 %v24490_v36  ;;  %18816 = vmatprep.subr.bf16.mxu1 %v24491_v57  ;;  %v24754_v36 = vld [vmem:[#allocation111_spill] sm:$0xff]  ;;  %v24755_v57 = vld [vmem:[#allocation112_spill] sm:$0xff] }
 0xcb9   :  { %18626 = vmatpush1.bf16.msra.mxu0 %v24576_v32  ;;  %18818 = vmatpush1.bf16.msra.mxu1 %v24577_v59  ;;  %v24758_v32 = vld [vmem:[#allocation115_spill] sm:$0xff]  ;;  %v24759_v59 = vld [vmem:[#allocation116_spill] sm:$0xff] }
 0xcba   :  { %18628 = vmatprep.subr.bf16.mxu0 %v24494_v53  ;;  %18820 = vmatprep.subr.bf16.mxu1 %v24495_v52  ;;  %v24756_v53 = vld [vmem:[#allocation113_spill] sm:$0xff]  ;;  %v24757_v52 = vld [vmem:[#allocation114_spill] sm:$0xff] }
 0xcbd   :  { %18630 = vmatpush1.bf16.msra.mxu0 %v24578_v8  ;;  %18822 = vmatpush1.bf16.msra.mxu1 %v24579_v23  ;;  %v24760_v8 = vld [vmem:[#allocation117_spill] sm:$0xff]  ;;  %v24761_v23 = vld [vmem:[#allocation118_spill] sm:$0xff] }
 0xcbe   :  { %18632 = vmatprep.subr.bf16.mxu0 %v24580_v1  ;;  %18824 = vmatprep.subr.bf16.mxu1 %v24748_v49  ;;  %v24762_v1 = vld [vmem:[#allocation119_spill] sm:$0xff]  ;;  %v24776_v49 = vld [vmem:[#allocation78_spill] sm:$0xff] }
 0xcc1   :  { %18634 = vmatpush1.bf16.msra.mxu0 %v24749_v55  ;;  %18826 = vmatpush1.bf16.msra.mxu1 %v24750_v61  ;;  %v24777_v55 = vld [vmem:[#allocation79_spill] sm:$0xff]  ;;  %v24778_v61 = vld [vmem:[#allocation80_spill] sm:$0xff] }
 0xcc2   :  { %18636 = vmatprep.subr.bf16.mxu0 %v24751_v14  ;;  %18828 = vmatprep.subr.bf16.mxu1 %v24752_v54  ;;  %v24779_v14 = vld [vmem:[#allocation81_spill] sm:$0xff]  ;;  %v24780_v54 = vld [vmem:[#allocation82_spill] sm:$0xff] }
 0xcc5   :  { %18638 = vmatpush1.bf16.msra.mxu0 %v24753_v31  ;;  %18830 = vmatpush1.bf16.msra.mxu1 %v24754_v36  ;;  %v24781_v31 = vld [vmem:[#allocation87_spill] sm:$0xff]  ;;  %v24782_v36 = vld [vmem:[#allocation88_spill] sm:$0xff] }
 0xcc6   :  { %18640 = vmatprep.subr.bf16.mxu0 %v24755_v57  ;;  %18832 = vmatprep.subr.bf16.mxu1 %v24756_v53  ;;  %v24783_v57 = vld [vmem:[#allocation89_spill] sm:$0xff]  ;;  %v24784_v53 = vld [vmem:[#allocation8_spill] sm:$0xff] }
 0xcc9   :  { %18642 = vmatpush1.bf16.msra.mxu0 %v24757_v52  ;;  %18834 = vmatpush1.bf16.msra.mxu1 %v24758_v32  ;;  %v24785_v52 = vld [vmem:[#allocation10_spill] sm:$0xff]  ;;  %v24786_v32 = vld [vmem:[#allocation11_spill] sm:$0xff] }
 0xcca   :  { %18644 = vmatprep.subr.bf16.mxu0 %v24759_v59  ;;  %18836 = vmatprep.subr.bf16.mxu1 %v24760_v8  ;;  %v24787_v59 = vld [vmem:[#allocation12_spill] sm:$0xff]  ;;  %v24788_v8 = vld [vmem:[#allocation13_spill] sm:$0xff] }
 0xccd   :  { %18646 = vmatpush1.bf16.msra.mxu0 %v24761_v23  ;;  %18838 = vmatpush1.bf16.msra.mxu1 %v24762_v1  ;;  %v24789_v23 = vld [vmem:[#allocation14_spill] sm:$0xff]  ;;  %v24790_v1 = vld [vmem:[#allocation15_spill] sm:$0xff] }
 0xcce   :  { %18648 = vmatprep.subr.bf16.mxu0 %v24763_v42  ;;  %18840 = vmatprep.subr.bf16.mxu1 %v24764_v0  ;;  %v24791_v42 = vld [vmem:[#allocation26_spill] sm:$0xff] }
 0xccf   :  { %v24792_v0 = vld [vmem:[#allocation34_spill] sm:$0xff] }
 0xcd0   :  { %14392 = vmatmul.mubr.f32.vlgmr.msra.gmra.mrb[14].mxu0 %v22995_v30  ;;  %15247 = vmatmul.mubr.f32.vlgmr.msra.gmra.mrb[14].mxu1 %v22995_v30 }
 0xcd1   :  { %18650 = vmatpush1.bf16.msra.mxu0 %v24765_v47  ;;  %18842 = vmatpush1.bf16.msra.mxu1 %v24766_v34  ;;  %v24793_v47 = vld [vmem:[#allocation38_spill] sm:$0xff]  ;;  %v24794_v34 = vld [vmem:[#allocation39_spill] sm:$0xff] }
 0xcd2   :  { %18652 = vmatprep.subr.bf16.mxu0 %v24767_v19  ;;  %18844 = vmatprep.subr.bf16.mxu1 %v24768_v24  ;;  %v24796_v19 = vld [vmem:[#allocation70_spill] sm:$0xff]  ;;  %v24797_v24 = vld [vmem:[#allocation71_spill] sm:$0xff] }
 0xcd3   :  { %14526 = vmatprep.mubr.f32.mxu0 %v23680_v15  ;;  %15381 = vmatprep.mubr.f32.mxu1 %v23680_v15 }
 0xcd5   :  { %18654 = vmatpush1.bf16.msra.mxu0 %v24769_v33  ;;  %18846 = vmatpush1.bf16.msra.mxu1 %v24770_v62  ;;  %v24798_v33 = vld [vmem:[#allocation72_spill] sm:$0xff]  ;;  %v24799_v62 = vld [vmem:[#allocation41_spill] sm:$0xff] }
 0xcd6   :  { %18656 = vmatprep.subr.bf16.mxu0 %v24771_v21  ;;  %18848 = vmatprep.subr.bf16.mxu1 %v24772_v22  ;;  %v24800_v21 = vld [vmem:[#allocation42_spill] sm:$0xff]  ;;  %v24801_v22 = vld [vmem:[#allocation43_spill] sm:$0xff] }
 0xcd9   :  { %18658 = vmatpush1.bf16.msra.mxu0 %v24773_v63  ;;  %18850 = vmatpush1.bf16.msra.mxu1 %v24774_v27  ;;  %v24802_v63 = vld [vmem:[#allocation9_spill] sm:$0xff] }
 0xcda   :  { %18660 = vmatprep.subr.bf16.mxu0 %v24775_v38  ;;  %18852 = vmatprep.subr.bf16.mxu1 %v24776_v49  ;;  %v24803_v27 = vld [vmem:[#allocation17_spill] sm:$0xff]  ;;  %v24804_v38 = vld [vmem:[#allocation18_spill] sm:$0xff]  ;;  %v24805_v49 = vld [vmem:[#allocation19_spill] sm:$0xff] }
 0xcdd   :  { %18662 = vmatpush1.bf16.msra.mxu0 %v24777_v55  ;;  %18854 = vmatpush1.bf16.msra.mxu1 %v24778_v61  ;;  %v24806_v55 = vld [vmem:[#allocation20_spill] sm:$0xff]  ;;  %v24807_v61 = vld [vmem:[#allocation22_spill] sm:$0xff] }
 0xcde   :  { %18664 = vmatprep.subr.bf16.mxu0 %v24779_v14  ;;  %18856 = vmatprep.subr.bf16.mxu1 %v24780_v54  ;;  %v24808_v14 = vld [vmem:[#allocation23_spill] sm:$0xff]  ;;  %v24810_v54 = vld [vmem:[#allocation120_spill] sm:$0xff] }
 0xce1   :  { %18666 = vmatpush1.bf16.msra.mxu0 %v24781_v31  ;;  %18858 = vmatpush1.bf16.msra.mxu1 %v24782_v36  ;;  %v24811_v31 = vld [vmem:[#allocation121_spill] sm:$0xff]  ;;  %v24812_v36 = vld [vmem:[#allocation122_spill] sm:$0xff] }
 0xce2   :  { %18668 = vmatprep.subr.bf16.mxu0 %v24783_v57  ;;  %18860 = vmatprep.subr.bf16.mxu1 %v24784_v53  ;;  %v24813_v57 = vld [vmem:[#allocation123_spill] sm:$0xff]  ;;  %v24814_v53 = vld [vmem:[#allocation93_spill] sm:$0xff] }
 0xce5   :  { %18670 = vmatpush1.bf16.msra.mxu0 %v24785_v52  ;;  %18862 = vmatpush1.bf16.msra.mxu1 %v24786_v32  ;;  %v24815_v52 = vld [vmem:[#allocation124_spill] sm:$0xff]  ;;  %v24816_v32 = vld [vmem:[#allocation94_spill] sm:$0xff] }
 0xce6   :  { %18672 = vmatprep.subr.bf16.mxu0 %v24787_v59  ;;  %18864 = vmatprep.subr.bf16.mxu1 %v24788_v8  ;;  %v24817_v59 = vld [vmem:[#allocation21_spill] sm:$0xff]  ;;  %v24818_v8 = vld [vmem:[#allocation27_spill] sm:$0xff] }
 0xce9   :  { %18674 = vmatpush1.bf16.msra.mxu0 %v24789_v23  ;;  %18866 = vmatpush1.bf16.msra.mxu1 %v24790_v1  ;;  %v24819_v23 = vld [vmem:[#allocation28_spill] sm:$0xff]  ;;  %v24820_v1 = vld [vmem:[#allocation33_spill] sm:$0xff] }
 0xcea   :  { %18676 = vmatprep.subr.bf16.mxu0 %v24791_v42  ;;  %18868 = vmatprep.subr.bf16.mxu1 %v24792_v0  ;;  %v24821_v42 = vld [vmem:[#allocation35_spill] sm:$0xff]  ;;  %v24822_v0 = vld [vmem:[#allocation37_spill] sm:$0xff] }
 0xced   :  { %18678 = vmatpush1.bf16.msra.mxu0 %v24793_v47  ;;  %18870 = vmatpush1.bf16.msra.mxu1 %v24794_v34  ;;  %v24823_v47 = vld [vmem:[#allocation125_spill] sm:$0xff]  ;;  %v24824_v34 = vld [vmem:[#allocation126_spill] sm:$0xff] }
 0xcee   :  { %18680 = vmatprep.subr.bf16.mxu0 %v24083_v10  ;;  %18872 = vmatprep.subr.bf16.mxu1 %v24084_v48 }
 0xcf0   :  { %14529 = vmatmul.mubr.f32.vlgmr.msra.gmra.mrb[14].mxu0 %v22998_v46  ;;  %15384 = vmatmul.mubr.f32.vlgmr.msra.gmra.mrb[14].mxu1 %v22998_v46  ;;  %v24795_v46 = vld [vmem:[#allocation69_spill] sm:$0xff] }
 0xcf1   :  { %18682 = vmatpush1.bf16.msra.mxu0 %v24085_v58  ;;  %18874 = vmatpush1.bf16.msra.mxu1 %v24086_v18 }
 0xcf2   :  { %18684 = vmatprep.subr.bf16.mxu0 %v24087_v6  ;;  %18876 = vmatprep.subr.bf16.mxu1 %v24088_v37 }
 0xcf3   :  { %14631 = vmatprep.mubr.f32.mxu0 %v23680_v15  ;;  %15486 = vmatprep.mubr.f32.mxu1 %v23680_v15 }
 0xcf5   :  { %18686 = vmatpush1.bf16.msra.mxu0 %v24089_v60  ;;  %18878 = vmatpush1.bf16.msra.mxu1 %v24090_v17 }
 0xcf6   :  { %18688 = vmatprep.subr.bf16.mxu0 %v24207_v12  ;;  %18880 = vmatprep.subr.bf16.mxu1 %v24208_v20 }
 0xcf9   :  { %18690 = vmatpush1.bf16.msra.mxu0 %v24209_v45  ;;  %18882 = vmatpush1.bf16.msra.mxu1 %v24210_v16 }
 0xcfa   :  { %18692 = vmatprep.subr.bf16.mxu0 %v24211_v44  ;;  %18884 = vmatprep.subr.bf16.mxu1 %v24212_v51 }
 0xcfd   :  { %18694 = vmatpush1.bf16.msra.mxu0 %v24213_v40  ;;  %18886 = vmatpush1.bf16.msra.mxu1 %v24214_v29 }
 0xcfe   :  { %18696 = vmatprep.subr.bf16.mxu0 %v24215_v50  ;;  %18888 = vmatprep.subr.bf16.mxu1 %v24216_v3 }
 0xd01   :  { %18698 = vmatpush1.bf16.msra.mxu0 %v24217_v4  ;;  %18890 = vmatpush1.bf16.msra.mxu1 %v24218_v13 }
 0xd02   :  { %18700 = vmatprep.subr.bf16.mxu0 %v24219_v39  ;;  %18892 = vmatprep.subr.bf16.mxu1 %v24220_v35 }
 0xd05   :  { %18702 = vmatpush1.bf16.msra.mxu0 %v24221_v26  ;;  %18894 = vmatpush1.bf16.msra.mxu1 %v24222_v2 }
 0xd06   :  { %18704 = vmatprep.subr.bf16.mxu0 %v24223_v43  ;;  %18896 = vmatprep.subr.bf16.mxu1 %v24224_v28 }
 0xd09   :  { %18706 = vmatpush1.bf16.msra.mxu0 %v24225_v56  ;;  %18898 = vmatpush1.bf16.msra.mxu1 %v24226_v5 }
 0xd0a   :  { %18708 = vmatprep.subr.bf16.mxu0 %v24795_v46  ;;  %18900 = vmatprep.subr.bf16.mxu1 %v24796_v19 }
 0xd0d   :  { %18710 = vmatpush1.bf16.msra.mxu0 %v24797_v24  ;;  %18902 = vmatpush1.bf16.msra.mxu1 %v24798_v33 }
 0xd0e   :  { %18712 = vmatprep.subr.bf16.mxu0 %v24799_v62  ;;  %18904 = vmatprep.subr.bf16.mxu1 %v24800_v21  ;;  %v24825_v62 = vld [vmem:[#allocation102_spill] sm:$0xff]  ;;  %v24826_v21 = vld [vmem:[#allocation103_spill] sm:$0xff] }
 0xd10   :  { %14635 = vmatmul.mubr.f32.vlgmr.msra.gmra.mrb[14].mxu0 %v23001_v9  ;;  %15490 = vmatmul.mubr.f32.vlgmr.msra.gmra.mrb[14].mxu1 %v23001_v9  ;;  %v24809_v9 = vld [vmem:[#allocation24_spill] sm:$0xff] }
 0xd11   :  { %18714 = vmatpush1.bf16.msra.mxu0 %v24801_v22  ;;  %18906 = vmatpush1.bf16.msra.mxu1 %v24802_v63  ;;  %v24827_v22 = vld [vmem:[#allocation104_spill] sm:$0xff]  ;;  %v24828_v63 = vld [vmem:[#allocation105_spill] sm:$0xff] }
 0xd12   :  { %18716 = vmatprep.subr.bf16.mxu0 %v24803_v27  ;;  %18908 = vmatprep.subr.bf16.mxu1 %v24804_v38  ;;  %v24829_v27 = vld [vmem:[#allocation106_spill] sm:$0xff]  ;;  %v24830_v38 = vld [vmem:[#allocation107_spill] sm:$0xff] }
 0xd13   :  { %14801 = vmatprep.mubr.f32.mxu0 %v23680_v15  ;;  %15656 = vmatprep.mubr.f32.mxu1 %v23680_v15 }
 0xd15   :  { %18718 = vmatpush1.bf16.msra.mxu0 %v24805_v49  ;;  %18910 = vmatpush1.bf16.msra.mxu1 %v24806_v55 }
 0xd16   :  { %18720 = vmatprep.subr.bf16.mxu0 %v24807_v61  ;;  %18912 = vmatprep.subr.bf16.mxu1 %v24808_v14 }
 0xd19   :  { %18722 = vmatpush1.bf16.msra.mxu0 %v24809_v9  ;;  %18914 = vmatpush1.bf16.msra.mxu1 %v24810_v54 }
 0xd1a   :  { %18724 = vmatprep.subr.bf16.mxu0 %v24811_v31  ;;  %18916 = vmatprep.subr.bf16.mxu1 %v24812_v36 }
 0xd1d   :  { %18726 = vmatpush1.bf16.msra.mxu0 %v24813_v57  ;;  %18918 = vmatpush1.bf16.msra.mxu1 %v24814_v53 }
 0xd1e   :  { %18728 = vmatprep.subr.bf16.mxu0 %v24815_v52  ;;  %18920 = vmatprep.subr.bf16.mxu1 %v24816_v32 }
 0xd21   :  { %18730 = vmatpush1.bf16.msra.mxu0 %v24817_v59  ;;  %18922 = vmatpush1.bf16.msra.mxu1 %v24818_v8 }
 0xd22   :  { %18732 = vmatprep.subr.bf16.mxu0 %v24819_v23  ;;  %18924 = vmatprep.subr.bf16.mxu1 %v24820_v1 }
 0xd25   :  { %18734 = vmatpush1.bf16.msra.mxu0 %v24821_v42  ;;  %18926 = vmatpush1.bf16.msra.mxu1 %v24822_v0 }
 0xd26   :  { %18736 = vmatprep.subr.bf16.mxu0 %v24823_v47  ;;  %18928 = vmatprep.subr.bf16.mxu1 %v24824_v34 }
 0xd29   :  { %18738 = vmatpush1.bf16.msra.mxu0 %v24825_v62  ;;  %18930 = vmatpush1.bf16.msra.mxu1 %v24826_v21 }
 0xd2a   :  { %18740 = vmatprep.subr.bf16.mxu0 %v24827_v22  ;;  %18932 = vmatprep.subr.bf16.mxu1 %v24828_v63 }
 0xd2d   :  { %18742 = vmatpush1.bf16.msra.mxu0 %v24829_v27  ;;  %18934 = vmatpush1.bf16.msra.mxu1 %v24830_v38 }
 0xd2e   :  { %18744 = vmatprep.subr.bf16.mxu0 %v24083_v10  ;;  %18936 = vmatprep.subr.bf16.mxu1 %v24084_v48  ;;  %v24831_v48 = vld [vmem:[#allocation25_spill] sm:$0xff] }
 0xd30   :  { %14803 = vmatmul.mubr.f32.vlgmr.msra.gmra.mrb[14].mxu0 %v22995_v30  ;;  %15658 = vmatmul.mubr.f32.vlgmr.msra.gmra.mrb[14].mxu1 %v22995_v30 }
 0xd31   :  { %18746 = vmatpush1.bf16.msra.mxu0 %v24085_v58  ;;  %18938 = vmatpush1.bf16.msra.mxu1 %v24086_v18 }
 0xd32   :  { %18748 = vmatprep.subr.bf16.mxu0 %v24087_v6  ;;  %18940 = vmatprep.subr.bf16.mxu1 %v24088_v37 }
 0xd33   :  { %14905 = vmatprep.mubr.f32.mxu0 %v23680_v15  ;;  %15760 = vmatprep.mubr.f32.mxu1 %v23680_v15 }
 0xd35   :  { %18750 = vmatpush1.bf16.msra.mxu0 %v24089_v60  ;;  %18942 = vmatpush1.bf16.msra.mxu1 %v24090_v17 }
 0xd36   :  { %18752 = vmatprep.subr.bf16.mxu0 %v24207_v12  ;;  %18944 = vmatprep.subr.bf16.mxu1 %v24208_v20 }
 0xd39   :  { %18754 = vmatpush1.bf16.msra.mxu0 %v24209_v45  ;;  %18946 = vmatpush1.bf16.msra.mxu1 %v24210_v16 }
 0xd3a   :  { %18756 = vmatprep.subr.bf16.mxu0 %v24211_v44  ;;  %18948 = vmatprep.subr.bf16.mxu1 %v24212_v51 }
 0xd3d   :  { %18758 = vmatpush1.bf16.msra.mxu0 %v24213_v40  ;;  %18950 = vmatpush1.bf16.msra.mxu1 %v24214_v29 }
 0xd3e   :  { %18760 = vmatprep.subr.bf16.mxu0 %v24215_v50  ;;  %18952 = vmatprep.subr.bf16.mxu1 %v24216_v3 }
 0xd41   :  { %18762 = vmatpush1.bf16.msra.mxu0 %v24217_v4  ;;  %18954 = vmatpush1.bf16.msra.mxu1 %v24218_v13 }
 0xd42   :  { %18764 = vmatprep.subr.bf16.mxu0 %v24219_v39  ;;  %18956 = vmatprep.subr.bf16.mxu1 %v24220_v35 }
 0xd45   :  { %18766 = vmatpush1.bf16.msra.mxu0 %v24221_v26  ;;  %18958 = vmatpush1.bf16.msra.mxu1 %v24222_v2  ;;  %v15845_v2 = vld [vmem:[%s23198_s4] ss:$0 sm:$0xff] }
 0xd46   :  { %18768 = vmatprep.subr.bf16.mxu0 %v24223_v43  ;;  %18960 = vmatprep.subr.bf16.mxu1 %v24224_v28 }
 0xd49   :  { %18770 = vmatpush1.bf16.msra.mxu0 %v24225_v56  ;;  %18962 = vmatpush1.bf16.msra.mxu1 %v24226_v5  ;;  %v15846_v56 = vld [vmem:[#allocation3] ss:$0 sm:$0xff] }
 0xd4a   :  { %18772 = vmatprep.subr.bf16.mxu0 %v24795_v46  ;;  %18964 = vmatprep.subr.bf16.mxu1 %v24796_v19 }
 0xd4d   :  { %18774 = vmatpush1.bf16.msra.mxu0 %v24797_v24  ;;  %18966 = vmatpush1.bf16.msra.mxu1 %v24798_v33 }
 0xd50   :  { %14907 = vmatmul.mubr.f32.vlgmr.msra.gmra.mrb[14].mxu0 %v22995_v30  ;;  %15762 = vmatmul.mubr.f32.vlgmr.msra.gmra.mrb[14].mxu1 %v22995_v30 }
 0xe23   :  { %v14908_v15 = vpop.f32.mrb[14].mxu0  ;;  %v15763_v10 = vpop.f32.mrb[14].mxu1 }
 0xe24   :  { %v18981_v58 = vadd.f32 %v14908_v15, %v24831_v48  ;;  %v14910_v18 = vpop.f32.mrb[15].mxu0  ;;  %v15765_v6 = vpop.f32.mrb[15].mxu1  ;;  %v18997_v45 = vadd.f32 %v15763_v10, %v21597_v25 }
 0xe25   :  { %v18982_v37 = vadd.f32 %v14910_v18, %v21590_v41  ;;  %v18998_v12 = vadd.f32 %v15765_v6, %v21594_v11 }
 0xe26   :  { %v15842_v60 = vmul.f32 -1.442695, %v18981_v58 }
 0xe27   :  { %v15843_v17 = vmul.f32 -1.442695, %v18982_v37  ;;  %v15844_v20 = vmul.f32 -1.442695, %v18998_v12 }
 0xe28   :  { %19467 = vpow2.f32 %v15842_v60 }
 0xe29   :  { %19469 = vpow2.f32 %v15843_v17 }
 0xe2a   :  { %19471 = vpow2.f32 %v15844_v20 }
 0xe2b   :  { %19473 = vtanh.f32 %v18997_v45 }
 0xe32   :  { %v19468_v16 = vpop.eup %19467 }
 0xe33   :  { %v19470_v44 = vpop.eup %19469  ;;  %v15781_v51 = vadd.f32 1.0, %v19468_v16 }
 0xe34   :  { %v15782_v40 = vadd.f32 1.0, %v19470_v44  ;;  %v19472_v29 = vpop.eup %19471 }
 0xe35   :  { %19475 = vrcp.f32 %v15781_v51  ;;  %v19474_v50 = vpop.eup %19473  ;;  %v15783_v13 = vadd.f32 1.0, %v19472_v29 }
 0xe36   :  { %19477 = vrcp.f32 %v15782_v40 }
 0xe37   :  { %19479 = vrcp.f32 %v15783_v13 }
 0xe3f   :  { %v19476_v41 = vpop.eup %19475 }
 0xe40   :  { %v19478_v3 = vpop.eup %19477  ;;  %v15792_v4 = vmul.f32 %v19476_v41, %v19474_v50 }
 0xe41   :  { %v15791_v39 = vmul.f32 %v19478_v3, %v22992_v7  ;;  %v19480_v35 = vpop.eup %19479 }
 0xe43   :  { %v15793_v11 = vadd.f32 %v15792_v4, %v15791_v39 }
 0xe45   :  { %19481 = vtanh.f32 %v15793_v11 }
 0xe4f   :  { %v19482_v26 = vpop.eup %19481 }
 0xe50   :  { %v15795_v43 = vmul.f32 %v19482_v26, %v19480_v35 }
 0xe52   :  { %v15803_v28 = vmul.f32 %v15845_v2, %v15795_v43 }
 0xe54   :  { %15804 = vadd.xlane.f32.xlu0 %v15803_v28 }
 0xee1   :  { %v15805_v5 = vpop.xlane.xlu0 %15804 }
 0xee2   :  { %v15813_v25 = vadd.f32 %v15846_v56, %v15805_v5 }
 0xee4   :  { %15815 = vst.msk [vmem:[%s23200_s6] sm:$0xff] %vm15814_vm2, %v15813_v25 }
 0xee5   :  { %15820 = vsyncpa [#allocation5], 1 }

</bundles_post_ra>
